<compile_context>
chip_gen: v5e
topology: v5e:2x2
jax: 0.10.0
libtpu: 0.0.40
codegen_flags: <defaults>
</compile_context>

<pallas_src>
import math

import jax
import jax.numpy as jnp
from jax.experimental import pallas as pl
from jax.experimental.pallas import tpu as pltpu

D_MODEL = 32
NHEAD = 8                    # nn.Transformer default
HEAD_DIM = D_MODEL // NHEAD
DFF = 2048                   # nn.Transformer default dim_feedforward
NUM_ENC = 6
NUM_DEC = 6
EPS = 1e-5
NEG_INF = -1e9
VMEM_LIMIT = 32 * 1024 * 1024


# ------------------------- in-kernel building blocks -------------------------

def _ln(x, g, b):
    mean = jnp.mean(x, axis=-1, keepdims=True)
    xc = x - mean
    var = jnp.mean(xc * xc, axis=-1, keepdims=True)
    return xc * jax.lax.rsqrt(var + EPS) * g + b


def _mha_all_heads(q, k, v, hmask, attn_mask):
    # q: (Sq, D), k/v: (Sk, D), hmask: (NHEAD, D) one-hot lane masks per head,
    # attn_mask: (Sq, Sk) additive or None.  All heads computed in one statically
    # unrolled loop; heads occupy disjoint lanes so summing merges them lane-dense.
    scale = 1.0 / math.sqrt(HEAD_DIM)
    kt = k.T                                       # (D, Sk), hoisted out of the loop
    out = None
    for h in range(NHEAD):
        mh = hmask[h:h + 1, :]                     # (1, D): 1.0 on this head's lanes
        s = jnp.dot(q * mh, kt, preferred_element_type=jnp.float32) * scale
        if attn_mask is not None:
            s = s + attn_mask
        s = s - jnp.max(s, axis=-1, keepdims=True)
        p = jnp.exp(s)
        p = p * pl.reciprocal(jnp.sum(p, axis=-1, keepdims=True), approx=True)
        o_h = jnp.dot(p, v * mh, preferred_element_type=jnp.float32)   # (Sq, D)
        out = o_h if out is None else out + o_h
    return out


def _encoder_layer(x, attn_mask, hmask, wqkv, bqkv, wo, bo, ln1g, ln1b,
                   w1, b1, w2, b2, ln2g, ln2b):
    qkv = jnp.dot(x, wqkv, preferred_element_type=jnp.float32) + bqkv
    q, k, v = qkv[:, :D_MODEL], qkv[:, D_MODEL:2 * D_MODEL], qkv[:, 2 * D_MODEL:]
    sa = _mha_all_heads(q, k, v, hmask, attn_mask)
    sa = jnp.dot(sa, wo, preferred_element_type=jnp.float32) + bo
    x = _ln(x + sa, ln1g, ln1b)                    # fused residual + LN
    h = jnp.maximum(jnp.dot(x, w1, preferred_element_type=jnp.float32) + b1, 0.0)
    ff = jnp.dot(h, w2, preferred_element_type=jnp.float32) + b2
    return _ln(x + ff, ln2g, ln2b)                 # fused residual + LN


# ----------------------------- fused stack kernels ----------------------------

def _encoder_stack_kernel(x_ref, mask_ref, hmask_ref,
                          wqkv_ref, bqkv_ref, wo_ref, bo_ref,
                          ln1g_ref, ln1b_ref,
                          w1_ref, b1_ref, w2_ref, b2_ref,
                          ln2g_ref, ln2b_ref,
                          fng_ref, fnb_ref,
                          o_ref):
    l = pl.program_id(1)

    # Activation is carried in the resident output block across the layer axis.
    @pl.when(l == 0)
    def _():
        o_ref[0] = x_ref[0]

    x = o_ref[0]                                   # (S, D)
    x = _encoder_layer(x, mask_ref[...], hmask_ref[...],
                       wqkv_ref[0], bqkv_ref[0], wo_ref[0], bo_ref[0],
                       ln1g_ref[0], ln1b_ref[0],
                       w1_ref[0], b1_ref[0], w2_ref[0], b2_ref[0],
                       ln2g_ref[0], ln2b_ref[0])

    # Final encoder LayerNorm fused into the last layer step.
    is_last = l == pl.num_programs(1) - 1
    x = jnp.where(is_last, _ln(x, fng_ref[...], fnb_ref[...]), x)
    o_ref[0] = x.astype(o_ref.dtype)


def _decoder_stack_kernel(y_ref, mem_ref, mask_ref, hmask_ref,
                          swqkv_ref, sbqkv_ref, swo_ref, sbo_ref,
                          ln1g_ref, ln1b_ref,
                          cwq_ref, cbq_ref, cwkv_ref, cbkv_ref, cwo_ref, cbo_ref,
                          ln2g_ref, ln2b_ref,
                          w1_ref, b1_ref, w2_ref, b2_ref,
                          ln3g_ref, ln3b_ref,
                          o_ref):
    l = pl.program_id(1)

    @pl.when(l == 0)
    def _():
        o_ref[0] = y_ref[0]

    y = o_ref[0]                                   # (T, D)
    mem = mem_ref[0]                               # (S, D)
    attn_mask = mask_ref[...]                      # (T, T)
    hmask = hmask_ref[...]                         # (NHEAD, D)

    # --- masked self-attention ---
    qkv = jnp.dot(y, swqkv_ref[0], preferred_element_type=jnp.float32) + sbqkv_ref[0]
    q, k, v = qkv[:, :D_MODEL], qkv[:, D_MODEL:2 * D_MODEL], qkv[:, 2 * D_MODEL:]
    sa = _mha_all_heads(q, k, v, hmask, attn_mask)
    sa = jnp.dot(sa, swo_ref[0], preferred_element_type=jnp.float32) + sbo_ref[0]
    y = _ln(y + sa, ln1g_ref[0], ln1b_ref[0])

    # --- cross-attention over encoder memory (no mask) ---
    q = jnp.dot(y, cwq_ref[0], preferred_element_type=jnp.float32) + cbq_ref[0]
    kv = jnp.dot(mem, cwkv_ref[0], preferred_element_type=jnp.float32) + cbkv_ref[0]
    k, v = kv[:, :D_MODEL], kv[:, D_MODEL:]
    ca = _mha_all_heads(q, k, v, hmask, None)
    ca = jnp.dot(ca, cwo_ref[0], preferred_element_type=jnp.float32) + cbo_ref[0]
    y = _ln(y + ca, ln2g_ref[0], ln2b_ref[0])

    # --- feed-forward (the (T, 2048) intermediate never leaves VMEM) ---
    h = jnp.maximum(jnp.dot(y, w1_ref[0], preferred_element_type=jnp.float32)
                    + b1_ref[0], 0.0)
    ff = jnp.dot(h, w2_ref[0], preferred_element_type=jnp.float32) + b2_ref[0]
    y = _ln(y + ff, ln3g_ref[0], ln3b_ref[0])

    o_ref[0] = y.astype(o_ref.dtype)


def _norm_head_kernel(x_ref, g_ref, b_ref, w_ref, pb_ref, o_ref):
    y = _ln(x_ref[...], g_ref[...], b_ref[...])
    o_ref[...] = (jnp.dot(y, w_ref[...], preferred_element_type=jnp.float32)
                  + pb_ref[...]).astype(o_ref.dtype)


# ------------------------------ kernel wrappers -------------------------------

ENC_W_KEYS = ("wqkv", "bqkv", "wo", "bo", "ln1_g", "ln1_b",
              "w1", "b1", "w2", "b2", "ln2_g", "ln2_b")

DEC_W_KEYS = ("s_wqkv", "s_bqkv", "s_wo", "s_bo", "ln1_g", "ln1_b",
              "c_wq", "c_bq", "c_wkv", "c_bkv", "c_wo", "c_bo", "ln2_g", "ln2_b",
              "w1", "b1", "w2", "b2", "ln3_g", "ln3_b")


def _mosaic_params(semantics):
    # batch axis parallel -> both TensorCores get work on v7x megacore;
    # modest explicit scoped-VMEM limit, valid on v5e / v6e / v7x.
    return pltpu.CompilerParams(dimension_semantics=semantics,
                                vmem_limit_bytes=VMEM_LIMIT)


def _stacked_spec(w):
    # Stream layer l's weight slab per grid step (double-buffered by the pipeline).
    return pl.BlockSpec((1,) + w.shape[1:], lambda b, l: (l, 0, 0))


def encoder_stack(x, src_mask, hmask, enc_p, fng, fnb):
    B, S, D = x.shape
    ws = [enc_p[k] for k in ENC_W_KEYS]            # each (NUM_ENC, ...)
    in_specs = ([pl.BlockSpec((1, S, D), lambda b, l: (b, 0, 0)),
                 pl.BlockSpec((S, S), lambda b, l: (0, 0)),
                 pl.BlockSpec((NHEAD, D), lambda b, l: (0, 0))]
                + [_stacked_spec(w) for w in ws]
                + [pl.BlockSpec((1, D), lambda b, l: (0, 0)),
                   pl.BlockSpec((1, D), lambda b, l: (0, 0))])
    return pl.pallas_call(
        _encoder_stack_kernel,
        out_shape=jax.ShapeDtypeStruct((B, S, D), jnp.float32),
        grid=(B, NUM_ENC),
        in_specs=in_specs,
        out_specs=pl.BlockSpec((1, S, D), lambda b, l: (b, 0, 0)),
        compiler_params=_mosaic_params(("parallel", "arbitrary")),
    )(x, src_mask, hmask, *ws, fng, fnb)


def decoder_stack(y, memory, tgt_mask, hmask, dec_p):
    B, T, D = y.shape
    S = memory.shape[1]
    ws = [dec_p[k] for k in DEC_W_KEYS]            # each (NUM_DEC, ...)
    in_specs = ([pl.BlockSpec((1, T, D), lambda b, l: (b, 0, 0)),
                 pl.BlockSpec((1, S, D), lambda b, l: (b, 0, 0)),
                 pl.BlockSpec((T, T), lambda b, l: (0, 0)),
                 pl.BlockSpec((NHEAD, D), lambda b, l: (0, 0))]
                + [_stacked_spec(w) for w in ws])
    return pl.pallas_call(
        _decoder_stack_kernel,
        out_shape=jax.ShapeDtypeStruct((B, T, D), jnp.float32),
        grid=(B, NUM_DEC),
        in_specs=in_specs,
        out_specs=pl.BlockSpec((1, T, D), lambda b, l: (b, 0, 0)),
        compiler_params=_mosaic_params(("parallel", "arbitrary")),
    )(y, memory, tgt_mask, hmask, *ws)


def norm_and_predict(x2d, g, b, w, pb, tile_n=512):
    # Final decoder LayerNorm fused with the prediction linear.  Vocab is lane-padded
    # to a multiple of 128 (unmasked stores) and tiled over N so a realistic vocab
    # also stays within the scoped-VMEM budget.
    M, D = x2d.shape
    Np = w.shape[1]
    tn = min(tile_n, Np)
    return pl.pallas_call(
        _norm_head_kernel,
        out_shape=jax.ShapeDtypeStruct((M, Np), jnp.float32),
        grid=(pl.cdiv(Np, tn),),
        in_specs=[pl.BlockSpec((M, D), lambda j: (0, 0)),
                  pl.BlockSpec((1, D), lambda j: (0, 0)),
                  pl.BlockSpec((1, D), lambda j: (0, 0)),
                  pl.BlockSpec((D, tn), lambda j: (0, j)),
                  pl.BlockSpec((1, tn), lambda j: (0, j))],
        out_specs=pl.BlockSpec((M, tn), lambda j: (0, j)),
        compiler_params=_mosaic_params(("parallel",)),
    )(x2d, g, b, w, pb)


# --------------------------- model composition (JAX glue) ---------------------

def make_pos_embedding(max_length, emb_size):
    den = jnp.exp(-jnp.arange(0, emb_size, 2, dtype=jnp.float32)
                  * math.log(10000.0) / emb_size)
    pos = jnp.arange(0, max_length, dtype=jnp.float32).reshape(max_length, 1)
    pe = jnp.zeros((max_length, emb_size), jnp.float32)
    pe = pe.at[:, 0::2].set(jnp.sin(pos * den))
    pe = pe.at[:, 1::2].set(jnp.cos(pos * den))
    return pe


def causal_mask(S):
    # torch.triu(ones, diagonal=1) == True positions receive a large negative bias.
    return jnp.triu(jnp.full((S, S), NEG_INF, jnp.float32), k=1)


def head_lane_mask():
    lane_head = jnp.arange(D_MODEL, dtype=jnp.int32) // HEAD_DIM            # (D,)
    return (lane_head[None, :] ==
            jnp.arange(NHEAD, dtype=jnp.int32)[:, None]).astype(jnp.float32)  # (NHEAD, D)


def seq2seq_forward(params, src_idxs, trg_idxs, dec_vocab):
    pe = params["pos_embedding"]
    B, S = src_idxs.shape
    T = trg_idxs.shape[1]

    # TODO(synk): dropout (PositionalEncoding / transformer layers) treated as identity (eval mode).
    src = jnp.take(params["src_emb"], src_idxs, axis=0) + pe[:S][None]
    trg = jnp.take(params["tgt_emb"], trg_idxs, axis=0) + pe[:T][None]

    # The reference module builds a causal (triu) mask for BOTH src and tgt.
    src_mask = causal_mask(S)
    tgt_mask = causal_mask(T)
    hmask = head_lane_mask()

    memory = encoder_stack(src, src_mask, hmask, params["enc"],
                           params["enc_norm_g"], params["enc_norm_b"])
    y = decoder_stack(trg, memory, tgt_mask, hmask, params["dec"])

    logits_p = norm_and_predict(y.reshape(B * T, D_MODEL),
                                params["dec_norm_g"], params["dec_norm_b"],
                                params["pred_w"], params["pred_b"])
    return logits_p[:, :dec_vocab].reshape(B, T, dec_vocab)


# --------------------------------- init / main --------------------------------

def init_params(key, enc_vocab, dec_vocab):
    kiter = iter(jax.random.split(key, 64))

    def nrm(shape, scale=0.02):
        return scale * jax.random.normal(next(kiter), shape, dtype=jnp.float32)

    def zeros(shape):
        return jnp.zeros(shape, jnp.float32)

    def ones(shape):
        return jnp.ones(shape, jnp.float32)

    Le, Ld = NUM_ENC, NUM_DEC
    enc = dict(
        wqkv=nrm((Le, D_MODEL, 3 * D_MODEL)), bqkv=zeros((Le, 1, 3 * D_MODEL)),
        wo=nrm((Le, D_MODEL, D_MODEL)), bo=zeros((Le, 1, D_MODEL)),
        ln1_g=ones((Le, 1, D_MODEL)), ln1_b=zeros((Le, 1, D_MODEL)),
        w1=nrm((Le, D_MODEL, DFF)), b1=zeros((Le, 1, DFF)),
        w2=nrm((Le, DFF, D_MODEL)), b2=zeros((Le, 1, D_MODEL)),
        ln2_g=ones((Le, 1, D_MODEL)), ln2_b=zeros((Le, 1, D_MODEL)),
    )
    dec = dict(
        s_wqkv=nrm((Ld, D_MODEL, 3 * D_MODEL)), s_bqkv=zeros((Ld, 1, 3 * D_MODEL)),
        s_wo=nrm((Ld, D_MODEL, D_MODEL)), s_bo=zeros((Ld, 1, D_MODEL)),
        ln1_g=ones((Ld, 1, D_MODEL)), ln1_b=zeros((Ld, 1, D_MODEL)),
        c_wq=nrm((Ld, D_MODEL, D_MODEL)), c_bq=zeros((Ld, 1, D_MODEL)),
        c_wkv=nrm((Ld, D_MODEL, 2 * D_MODEL)), c_bkv=zeros((Ld, 1, 2 * D_MODEL)),
        c_wo=nrm((Ld, D_MODEL, D_MODEL)), c_bo=zeros((Ld, 1, D_MODEL)),
        ln2_g=ones((Ld, 1, D_MODEL)), ln2_b=zeros((Ld, 1, D_MODEL)),
        w1=nrm((Ld, D_MODEL, DFF)), b1=zeros((Ld, 1, DFF)),
        w2=nrm((Ld, DFF, D_MODEL)), b2=zeros((Ld, 1, D_MODEL)),
        ln3_g=ones((Ld, 1, D_MODEL)), ln3_b=zeros((Ld, 1, D_MODEL)),
    )

    vocab_pad = ((dec_vocab + 127) // 128) * 128      # lane-dense head output
    pred_w = jnp.zeros((D_MODEL, vocab_pad), jnp.float32)
    pred_w = pred_w.at[:, :dec_vocab].set(nrm((D_MODEL, dec_vocab)))

    return dict(
        src_emb=nrm((enc_vocab, D_MODEL), 1.0),
        tgt_emb=nrm((dec_vocab, D_MODEL), 1.0),
        pos_embedding=make_pos_embedding(5000, D_MODEL),
        enc=enc, dec=dec,
        enc_norm_g=ones((1, D_MODEL)), enc_norm_b=zeros((1, D_MODEL)),
        dec_norm_g=ones((1, D_MODEL)), dec_norm_b=zeros((1, D_MODEL)),
        pred_w=pred_w, pred_b=zeros((1, vocab_pad)),
    )


if __name__ == "__main__":
    ENC_VOCAB, DEC_VOCAB = 40, 48
    B, SRC_LEN, TGT_LEN = 2, 8, 6

    root = jax.random.PRNGKey(0)
    k_params, k_src, k_trg = jax.random.split(root, 3)

    params = init_params(k_params, ENC_VOCAB, DEC_VOCAB)
    src_idxs = jax.random.randint(k_src, (B, SRC_LEN), 0, ENC_VOCAB, dtype=jnp.int32)
    trg_idxs = jax.random.randint(k_trg, (B, TGT_LEN), 0, DEC_VOCAB, dtype=jnp.int32)

    fwd = jax.jit(seq2seq_forward, static_argnums=3)
    logits = jax.block_until_ready(fwd(params, src_idxs, trg_idxs, DEC_VOCAB))

    assert logits.shape == (B, TGT_LEN, DEC_VOCAB), logits.shape
    assert bool(jnp.all(jnp.isfinite(logits)))
    print("KERNEL_OK")
</pallas_src>

<mosaic_0001>
module attributes {stable_mosaic.version = 11 : i64} {
  func.func @_encoder_stack_kernel(%arg0: i32, %arg1: i32, %arg2: memref<1x8x32xf32, #tpu.memory_space<vmem>>, %arg3: memref<8x8xf32, #tpu.memory_space<vmem>>, %arg4: memref<8x32xf32, #tpu.memory_space<vmem>>, %arg5: memref<1x32x96xf32, #tpu.memory_space<vmem>>, %arg6: memref<1x1x96xf32, #tpu.memory_space<vmem>>, %arg7: memref<1x32x32xf32, #tpu.memory_space<vmem>>, %arg8: memref<1x1x32xf32, #tpu.memory_space<vmem>>, %arg9: memref<1x1x32xf32, #tpu.memory_space<vmem>>, %arg10: memref<1x1x32xf32, #tpu.memory_space<vmem>>, %arg11: memref<1x32x2048xf32, #tpu.memory_space<vmem>>, %arg12: memref<1x1x2048xf32, #tpu.memory_space<vmem>>, %arg13: memref<1x2048x32xf32, #tpu.memory_space<vmem>>, %arg14: memref<1x1x32xf32, #tpu.memory_space<vmem>>, %arg15: memref<1x1x32xf32, #tpu.memory_space<vmem>>, %arg16: memref<1x1x32xf32, #tpu.memory_space<vmem>>, %arg17: memref<1x32xf32, #tpu.memory_space<vmem>>, %arg18: memref<1x32xf32, #tpu.memory_space<vmem>>, %arg19: memref<1x8x32xf32, #tpu.memory_space<vmem>>) attributes {dimension_semantics = [#tpu.dimension_semantics<parallel>, #tpu.dimension_semantics<arbitrary>], iteration_bounds = array<i64: 2, 6>, scalar_prefetch = 0 : i64, scratch_operands = 0 : i64, tpu.core_type = #tpu.core_type<tc>, window_params = [{transform_indices = @transform_0, window_bounds = array<i64: 1, 8, 32>}, {pipeline_mode = #tpu.pipeline_mode<synchronous>, transform_indices = @transform_1, window_bounds = array<i64: 8, 8>}, {pipeline_mode = #tpu.pipeline_mode<synchronous>, transform_indices = @transform_2, window_bounds = array<i64: 8, 32>}, {transform_indices = @transform_3, window_bounds = array<i64: 1, 32, 96>}, {transform_indices = @transform_4, window_bounds = array<i64: 1, 1, 96>}, {transform_indices = @transform_5, window_bounds = array<i64: 1, 32, 32>}, {transform_indices = @transform_6, window_bounds = array<i64: 1, 1, 32>}, {transform_indices = @transform_7, window_bounds = array<i64: 1, 1, 32>}, {transform_indices = @transform_8, window_bounds = array<i64: 1, 1, 32>}, {transform_indices = @transform_9, window_bounds = array<i64: 1, 32, 2048>}, {transform_indices = @transform_10, window_bounds = array<i64: 1, 1, 2048>}, {transform_indices = @transform_11, window_bounds = array<i64: 1, 2048, 32>}, {transform_indices = @transform_12, window_bounds = array<i64: 1, 1, 32>}, {transform_indices = @transform_13, window_bounds = array<i64: 1, 1, 32>}, {transform_indices = @transform_14, window_bounds = array<i64: 1, 1, 32>}, {pipeline_mode = #tpu.pipeline_mode<synchronous>, transform_indices = @transform_15, window_bounds = array<i64: 1, 32>}, {pipeline_mode = #tpu.pipeline_mode<synchronous>, transform_indices = @transform_16, window_bounds = array<i64: 1, 32>}, {transform_indices = @transform_17, window_bounds = array<i64: 1, 8, 32>}]} {
    %c0_i32 = arith.constant 0 : i32
    %0 = arith.cmpi eq, %arg1, %c0_i32 : i32
    %1 = arith.extui %0 : i1 to i32
    %c0_i32_0 = arith.constant 0 : i32
    %2 = arith.cmpi ne, %1, %c0_i32_0 : i32
    scf.if %2 {
      %c0_109 = arith.constant 0 : index
      %c0_110 = arith.constant 0 : index
      %c0_111 = arith.constant 0 : index
      %285 = vector.load %arg2[%c0_109, %c0_110, %c0_111] : memref<1x8x32xf32, #tpu.memory_space<vmem>>, vector<1x8x32xf32>
      %286 = vector.shape_cast %285 : vector<1x8x32xf32> to vector<8x32xf32>
      %c0_112 = arith.constant 0 : index
      %c0_113 = arith.constant 0 : index
      %c0_114 = arith.constant 0 : index
      %287 = vector.load %arg19[%c0_112, %c0_113, %c0_114] : memref<1x8x32xf32, #tpu.memory_space<vmem>>, vector<1x8x32xf32>
      %288 = vector.shape_cast %287 : vector<1x8x32xf32> to vector<8x32xf32>
      %289 = vector.shape_cast %286 : vector<8x32xf32> to vector<1x8x32xf32>
      tpu.vector_store %arg19[%c0_112, %c0_113, %c0_114], %289 {strides = array<i32>} : memref<1x8x32xf32, #tpu.memory_space<vmem>>, vector<1x8x32xf32>,
    } else {
    }
    %c0 = arith.constant 0 : index
    %c0_1 = arith.constant 0 : index
    %c0_2 = arith.constant 0 : index
    %3 = vector.load %arg19[%c0, %c0_1, %c0_2] : memref<1x8x32xf32, #tpu.memory_space<vmem>>, vector<1x8x32xf32>
    %4 = vector.shape_cast %3 : vector<1x8x32xf32> to vector<8x32xf32>
    %c0_3 = arith.constant 0 : index
    %c0_4 = arith.constant 0 : index
    %5 = vector.load %arg3[%c0_3, %c0_4] : memref<8x8xf32, #tpu.memory_space<vmem>>, vector<8x8xf32>
    %c0_5 = arith.constant 0 : index
    %c0_6 = arith.constant 0 : index
    %6 = vector.load %arg4[%c0_5, %c0_6] : memref<8x32xf32, #tpu.memory_space<vmem>>, vector<8x32xf32>
    %c0_7 = arith.constant 0 : index
    %c0_8 = arith.constant 0 : index
    %c0_9 = arith.constant 0 : index
    %7 = vector.load %arg5[%c0_7, %c0_8, %c0_9] : memref<1x32x96xf32, #tpu.memory_space<vmem>>, vector<1x32x96xf32>
    %8 = vector.shape_cast %7 : vector<1x32x96xf32> to vector<32x96xf32>
    %c0_10 = arith.constant 0 : index
    %c0_11 = arith.constant 0 : index
    %c0_12 = arith.constant 0 : index
    %9 = vector.load %arg6[%c0_10, %c0_11, %c0_12] : memref<1x1x96xf32, #tpu.memory_space<vmem>>, vector<1x1x96xf32>
    %10 = vector.shape_cast %9 : vector<1x1x96xf32> to vector<1x96xf32>
    %c0_13 = arith.constant 0 : index
    %c0_14 = arith.constant 0 : index
    %c0_15 = arith.constant 0 : index
    %11 = vector.load %arg7[%c0_13, %c0_14, %c0_15] : memref<1x32x32xf32, #tpu.memory_space<vmem>>, vector<1x32x32xf32>
    %12 = vector.shape_cast %11 : vector<1x32x32xf32> to vector<32x32xf32>
    %c0_16 = arith.constant 0 : index
    %c0_17 = arith.constant 0 : index
    %c0_18 = arith.constant 0 : index
    %13 = vector.load %arg8[%c0_16, %c0_17, %c0_18] : memref<1x1x32xf32, #tpu.memory_space<vmem>>, vector<1x1x32xf32>
    %14 = vector.shape_cast %13 : vector<1x1x32xf32> to vector<1x32xf32>
    %c0_19 = arith.constant 0 : index
    %c0_20 = arith.constant 0 : index
    %c0_21 = arith.constant 0 : index
    %15 = vector.load %arg9[%c0_19, %c0_20, %c0_21] : memref<1x1x32xf32, #tpu.memory_space<vmem>>, vector<1x1x32xf32>
    %16 = vector.shape_cast %15 : vector<1x1x32xf32> to vector<1x32xf32>
    %c0_22 = arith.constant 0 : index
    %c0_23 = arith.constant 0 : index
    %c0_24 = arith.constant 0 : index
    %17 = vector.load %arg10[%c0_22, %c0_23, %c0_24] : memref<1x1x32xf32, #tpu.memory_space<vmem>>, vector<1x1x32xf32>
    %18 = vector.shape_cast %17 : vector<1x1x32xf32> to vector<1x32xf32>
    %c0_25 = arith.constant 0 : index
    %c0_26 = arith.constant 0 : index
    %c0_27 = arith.constant 0 : index
    %19 = vector.load %arg11[%c0_25, %c0_26, %c0_27] : memref<1x32x2048xf32, #tpu.memory_space<vmem>>, vector<1x32x2048xf32>
    %20 = vector.shape_cast %19 : vector<1x32x2048xf32> to vector<32x2048xf32>
    %c0_28 = arith.constant 0 : index
    %c0_29 = arith.constant 0 : index
    %c0_30 = arith.constant 0 : index
    %21 = vector.load %arg12[%c0_28, %c0_29, %c0_30] : memref<1x1x2048xf32, #tpu.memory_space<vmem>>, vector<1x1x2048xf32>
    %22 = vector.shape_cast %21 : vector<1x1x2048xf32> to vector<1x2048xf32>
    %c0_31 = arith.constant 0 : index
    %c0_32 = arith.constant 0 : index
    %c0_33 = arith.constant 0 : index
    %23 = vector.load %arg13[%c0_31, %c0_32, %c0_33] : memref<1x2048x32xf32, #tpu.memory_space<vmem>>, vector<1x2048x32xf32>
    %24 = vector.shape_cast %23 : vector<1x2048x32xf32> to vector<2048x32xf32>
    %c0_34 = arith.constant 0 : index
    %c0_35 = arith.constant 0 : index
    %c0_36 = arith.constant 0 : index
    %25 = vector.load %arg14[%c0_34, %c0_35, %c0_36] : memref<1x1x32xf32, #tpu.memory_space<vmem>>, vector<1x1x32xf32>
    %26 = vector.shape_cast %25 : vector<1x1x32xf32> to vector<1x32xf32>
    %c0_37 = arith.constant 0 : index
    %c0_38 = arith.constant 0 : index
    %c0_39 = arith.constant 0 : index
    %27 = vector.load %arg15[%c0_37, %c0_38, %c0_39] : memref<1x1x32xf32, #tpu.memory_space<vmem>>, vector<1x1x32xf32>
    %28 = vector.shape_cast %27 : vector<1x1x32xf32> to vector<1x32xf32>
    %c0_40 = arith.constant 0 : index
    %c0_41 = arith.constant 0 : index
    %c0_42 = arith.constant 0 : index
    %29 = vector.load %arg16[%c0_40, %c0_41, %c0_42] : memref<1x1x32xf32, #tpu.memory_space<vmem>>, vector<1x1x32xf32>
    %30 = vector.shape_cast %29 : vector<1x1x32xf32> to vector<1x32xf32>
    %cst = arith.constant dense<0.000000e+00> : vector<8x96xf32>
    %31 = tpu.matmul %4, %8, %cst {dimension_numbers = #tpu.dot_dimension_numbers<[1], [0], [0], [1], [0, 0, 1, 1], [], []>} : vector<8x32xf32>, vector<32x96xf32>, vector<8x96xf32> -> vector<8x96xf32>
    %32 = vector.broadcast %10 : vector<1x96xf32> to vector<8x96xf32>
    %33 = arith.addf %31, %32 : vector<8x96xf32>
    %34 = vector.extract_strided_slice %33 {offsets = [0, 0], sizes = [8, 32], strides = [1, 1]} : vector<8x96xf32> to vector<8x32xf32>
    %35 = vector.extract_strided_slice %33 {offsets = [0, 32], sizes = [8, 32], strides = [1, 1]} : vector<8x96xf32> to vector<8x32xf32>
    %36 = vector.extract_strided_slice %33 {offsets = [0, 64], sizes = [8, 32], strides = [1, 1]} : vector<8x96xf32> to vector<8x32xf32>
    %37 = tpu.transpose %35, [1, 0] : vector<8x32xf32> -> vector<32x8xf32>
    %38 = vector.extract_strided_slice %6 {offsets = [0, 0], sizes = [1, 32], strides = [1, 1]} : vector<8x32xf32> to vector<1x32xf32>
    %39 = vector.broadcast %38 : vector<1x32xf32> to vector<8x32xf32>
    %40 = arith.mulf %34, %39 : vector<8x32xf32>
    %cst_43 = arith.constant dense<0.000000e+00> : vector<8x8xf32>
    %41 = tpu.matmul %40, %37, %cst_43 {dimension_numbers = #tpu.dot_dimension_numbers<[1], [0], [0], [1], [0, 0, 1, 1], [], []>} : vector<8x32xf32>, vector<32x8xf32>, vector<8x8xf32> -> vector<8x8xf32>
    %cst_44 = arith.constant 5.000000e-01 : f32
    %42 = vector.broadcast %cst_44 : f32 to vector<8x8xf32>
    %43 = arith.mulf %41, %42 : vector<8x8xf32>
    %44 = arith.addf %43, %5 : vector<8x8xf32>
    %cst_45 = arith.constant dense<0xFF800000> : vector<8xf32>
    %45 = vector.multi_reduction <maximumf>, %44, %cst_45 [1] : vector<8x8xf32> to vector<8xf32>
    %46 = vector.shape_cast %45 : vector<8xf32> to vector<8x1xf32>
    %47 = vector.broadcast %46 : vector<8x1xf32> to vector<8x8xf32>
    %48 = arith.subf %44, %47 : vector<8x8xf32>
    %49 = math.exp %48 : vector<8x8xf32>
    %cst_46 = arith.constant dense<0.000000e+00> : vector<8xf32>
    %50 = vector.multi_reduction <add>, %49, %cst_46 [1] : vector<8x8xf32> to vector<8xf32>
    %51 = vector.shape_cast %50 : vector<8xf32> to vector<8x1xf32>
    %52 = tpu.reciprocal %51 {approx = true} : vector<8x1xf32> -> vector<8x1xf32>
    %53 = vector.broadcast %52 : vector<8x1xf32> to vector<8x8xf32>
    %54 = arith.mulf %49, %53 : vector<8x8xf32>
    %55 = vector.broadcast %38 : vector<1x32xf32> to vector<8x32xf32>
    %56 = arith.mulf %36, %55 : vector<8x32xf32>
    %cst_47 = arith.constant dense<0.000000e+00> : vector<8x32xf32>
    %57 = tpu.matmul %54, %56, %cst_47 {dimension_numbers = #tpu.dot_dimension_numbers<[1], [0], [0], [1], [0, 0, 1, 1], [], []>} : vector<8x8xf32>, vector<8x32xf32>, vector<8x32xf32> -> vector<8x32xf32>
    %58 = vector.extract_strided_slice %6 {offsets = [1, 0], sizes = [1, 32], strides = [1, 1]} : vector<8x32xf32> to vector<1x32xf32>
    %59 = vector.broadcast %58 : vector<1x32xf32> to vector<8x32xf32>
    %60 = arith.mulf %34, %59 : vector<8x32xf32>
    %cst_48 = arith.constant dense<0.000000e+00> : vector<8x8xf32>
    %61 = tpu.matmul %60, %37, %cst_48 {dimension_numbers = #tpu.dot_dimension_numbers<[1], [0], [0], [1], [0, 0, 1, 1], [], []>} : vector<8x32xf32>, vector<32x8xf32>, vector<8x8xf32> -> vector<8x8xf32>
    %cst_49 = arith.constant 5.000000e-01 : f32
    %62 = vector.broadcast %cst_49 : f32 to vector<8x8xf32>
    %63 = arith.mulf %61, %62 : vector<8x8xf32>
    %64 = arith.addf %63, %5 : vector<8x8xf32>
    %cst_50 = arith.constant dense<0xFF800000> : vector<8xf32>
    %65 = vector.multi_reduction <maximumf>, %64, %cst_50 [1] : vector<8x8xf32> to vector<8xf32>
    %66 = vector.shape_cast %65 : vector<8xf32> to vector<8x1xf32>
    %67 = vector.broadcast %66 : vector<8x1xf32> to vector<8x8xf32>
    %68 = arith.subf %64, %67 : vector<8x8xf32>
    %69 = math.exp %68 : vector<8x8xf32>
    %cst_51 = arith.constant dense<0.000000e+00> : vector<8xf32>
    %70 = vector.multi_reduction <add>, %69, %cst_51 [1] : vector<8x8xf32> to vector<8xf32>
    %71 = vector.shape_cast %70 : vector<8xf32> to vector<8x1xf32>
    %72 = tpu.reciprocal %71 {approx = true} : vector<8x1xf32> -> vector<8x1xf32>
    %73 = vector.broadcast %72 : vector<8x1xf32> to vector<8x8xf32>
    %74 = arith.mulf %69, %73 : vector<8x8xf32>
    %75 = vector.broadcast %58 : vector<1x32xf32> to vector<8x32xf32>
    %76 = arith.mulf %36, %75 : vector<8x32xf32>
    %cst_52 = arith.constant dense<0.000000e+00> : vector<8x32xf32>
    %77 = tpu.matmul %74, %76, %cst_52 {dimension_numbers = #tpu.dot_dimension_numbers<[1], [0], [0], [1], [0, 0, 1, 1], [], []>} : vector<8x8xf32>, vector<8x32xf32>, vector<8x32xf32> -> vector<8x32xf32>
    %78 = arith.addf %57, %77 : vector<8x32xf32>
    %79 = vector.extract_strided_slice %6 {offsets = [2, 0], sizes = [1, 32], strides = [1, 1]} : vector<8x32xf32> to vector<1x32xf32>
    %80 = vector.broadcast %79 : vector<1x32xf32> to vector<8x32xf32>
    %81 = arith.mulf %34, %80 : vector<8x32xf32>
    %cst_53 = arith.constant dense<0.000000e+00> : vector<8x8xf32>
    %82 = tpu.matmul %81, %37, %cst_53 {dimension_numbers = #tpu.dot_dimension_numbers<[1], [0], [0], [1], [0, 0, 1, 1], [], []>} : vector<8x32xf32>, vector<32x8xf32>, vector<8x8xf32> -> vector<8x8xf32>
    %cst_54 = arith.constant 5.000000e-01 : f32
    %83 = vector.broadcast %cst_54 : f32 to vector<8x8xf32>
    %84 = arith.mulf %82, %83 : vector<8x8xf32>
    %85 = arith.addf %84, %5 : vector<8x8xf32>
    %cst_55 = arith.constant dense<0xFF800000> : vector<8xf32>
    %86 = vector.multi_reduction <maximumf>, %85, %cst_55 [1] : vector<8x8xf32> to vector<8xf32>
    %87 = vector.shape_cast %86 : vector<8xf32> to vector<8x1xf32>
    %88 = vector.broadcast %87 : vector<8x1xf32> to vector<8x8xf32>
    %89 = arith.subf %85, %88 : vector<8x8xf32>
    %90 = math.exp %89 : vector<8x8xf32>
    %cst_56 = arith.constant dense<0.000000e+00> : vector<8xf32>
    %91 = vector.multi_reduction <add>, %90, %cst_56 [1] : vector<8x8xf32> to vector<8xf32>
    %92 = vector.shape_cast %91 : vector<8xf32> to vector<8x1xf32>
    %93 = tpu.reciprocal %92 {approx = true} : vector<8x1xf32> -> vector<8x1xf32>
    %94 = vector.broadcast %93 : vector<8x1xf32> to vector<8x8xf32>
    %95 = arith.mulf %90, %94 : vector<8x8xf32>
    %96 = vector.broadcast %79 : vector<1x32xf32> to vector<8x32xf32>
    %97 = arith.mulf %36, %96 : vector<8x32xf32>
    %cst_57 = arith.constant dense<0.000000e+00> : vector<8x32xf32>
    %98 = tpu.matmul %95, %97, %cst_57 {dimension_numbers = #tpu.dot_dimension_numbers<[1], [0], [0], [1], [0, 0, 1, 1], [], []>} : vector<8x8xf32>, vector<8x32xf32>, vector<8x32xf32> -> vector<8x32xf32>
    %99 = arith.addf %78, %98 : vector<8x32xf32>
    %100 = vector.extract_strided_slice %6 {offsets = [3, 0], sizes = [1, 32], strides = [1, 1]} : vector<8x32xf32> to vector<1x32xf32>
    %101 = vector.broadcast %100 : vector<1x32xf32> to vector<8x32xf32>
    %102 = arith.mulf %34, %101 : vector<8x32xf32>
    %cst_58 = arith.constant dense<0.000000e+00> : vector<8x8xf32>
    %103 = tpu.matmul %102, %37, %cst_58 {dimension_numbers = #tpu.dot_dimension_numbers<[1], [0], [0], [1], [0, 0, 1, 1], [], []>} : vector<8x32xf32>, vector<32x8xf32>, vector<8x8xf32> -> vector<8x8xf32>
    %cst_59 = arith.constant 5.000000e-01 : f32
    %104 = vector.broadcast %cst_59 : f32 to vector<8x8xf32>
    %105 = arith.mulf %103, %104 : vector<8x8xf32>
    %106 = arith.addf %105, %5 : vector<8x8xf32>
    %cst_60 = arith.constant dense<0xFF800000> : vector<8xf32>
    %107 = vector.multi_reduction <maximumf>, %106, %cst_60 [1] : vector<8x8xf32> to vector<8xf32>
    %108 = vector.shape_cast %107 : vector<8xf32> to vector<8x1xf32>
    %109 = vector.broadcast %108 : vector<8x1xf32> to vector<8x8xf32>
    %110 = arith.subf %106, %109 : vector<8x8xf32>
    %111 = math.exp %110 : vector<8x8xf32>
    %cst_61 = arith.constant dense<0.000000e+00> : vector<8xf32>
    %112 = vector.multi_reduction <add>, %111, %cst_61 [1] : vector<8x8xf32> to vector<8xf32>
    %113 = vector.shape_cast %112 : vector<8xf32> to vector<8x1xf32>
    %114 = tpu.reciprocal %113 {approx = true} : vector<8x1xf32> -> vector<8x1xf32>
    %115 = vector.broadcast %114 : vector<8x1xf32> to vector<8x8xf32>
    %116 = arith.mulf %111, %115 : vector<8x8xf32>
    %117 = vector.broadcast %100 : vector<1x32xf32> to vector<8x32xf32>
    %118 = arith.mulf %36, %117 : vector<8x32xf32>
    %cst_62 = arith.constant dense<0.000000e+00> : vector<8x32xf32>
    %119 = tpu.matmul %116, %118, %cst_62 {dimension_numbers = #tpu.dot_dimension_numbers<[1], [0], [0], [1], [0, 0, 1, 1], [], []>} : vector<8x8xf32>, vector<8x32xf32>, vector<8x32xf32> -> vector<8x32xf32>
    %120 = arith.addf %99, %119 : vector<8x32xf32>
    %121 = vector.extract_strided_slice %6 {offsets = [4, 0], sizes = [1, 32], strides = [1, 1]} : vector<8x32xf32> to vector<1x32xf32>
    %122 = vector.broadcast %121 : vector<1x32xf32> to vector<8x32xf32>
    %123 = arith.mulf %34, %122 : vector<8x32xf32>
    %cst_63 = arith.constant dense<0.000000e+00> : vector<8x8xf32>
    %124 = tpu.matmul %123, %37, %cst_63 {dimension_numbers = #tpu.dot_dimension_numbers<[1], [0], [0], [1], [0, 0, 1, 1], [], []>} : vector<8x32xf32>, vector<32x8xf32>, vector<8x8xf32> -> vector<8x8xf32>
    %cst_64 = arith.constant 5.000000e-01 : f32
    %125 = vector.broadcast %cst_64 : f32 to vector<8x8xf32>
    %126 = arith.mulf %124, %125 : vector<8x8xf32>
    %127 = arith.addf %126, %5 : vector<8x8xf32>
    %cst_65 = arith.constant dense<0xFF800000> : vector<8xf32>
    %128 = vector.multi_reduction <maximumf>, %127, %cst_65 [1] : vector<8x8xf32> to vector<8xf32>
    %129 = vector.shape_cast %128 : vector<8xf32> to vector<8x1xf32>
    %130 = vector.broadcast %129 : vector<8x1xf32> to vector<8x8xf32>
    %131 = arith.subf %127, %130 : vector<8x8xf32>
    %132 = math.exp %131 : vector<8x8xf32>
    %cst_66 = arith.constant dense<0.000000e+00> : vector<8xf32>
    %133 = vector.multi_reduction <add>, %132, %cst_66 [1] : vector<8x8xf32> to vector<8xf32>
    %134 = vector.shape_cast %133 : vector<8xf32> to vector<8x1xf32>
    %135 = tpu.reciprocal %134 {approx = true} : vector<8x1xf32> -> vector<8x1xf32>
    %136 = vector.broadcast %135 : vector<8x1xf32> to vector<8x8xf32>
    %137 = arith.mulf %132, %136 : vector<8x8xf32>
    %138 = vector.broadcast %121 : vector<1x32xf32> to vector<8x32xf32>
    %139 = arith.mulf %36, %138 : vector<8x32xf32>
    %cst_67 = arith.constant dense<0.000000e+00> : vector<8x32xf32>
    %140 = tpu.matmul %137, %139, %cst_67 {dimension_numbers = #tpu.dot_dimension_numbers<[1], [0], [0], [1], [0, 0, 1, 1], [], []>} : vector<8x8xf32>, vector<8x32xf32>, vector<8x32xf32> -> vector<8x32xf32>
    %141 = arith.addf %120, %140 : vector<8x32xf32>
    %142 = vector.extract_strided_slice %6 {offsets = [5, 0], sizes = [1, 32], strides = [1, 1]} : vector<8x32xf32> to vector<1x32xf32>
    %143 = vector.broadcast %142 : vector<1x32xf32> to vector<8x32xf32>
    %144 = arith.mulf %34, %143 : vector<8x32xf32>
    %cst_68 = arith.constant dense<0.000000e+00> : vector<8x8xf32>
    %145 = tpu.matmul %144, %37, %cst_68 {dimension_numbers = #tpu.dot_dimension_numbers<[1], [0], [0], [1], [0, 0, 1, 1], [], []>} : vector<8x32xf32>, vector<32x8xf32>, vector<8x8xf32> -> vector<8x8xf32>
    %cst_69 = arith.constant 5.000000e-01 : f32
    %146 = vector.broadcast %cst_69 : f32 to vector<8x8xf32>
    %147 = arith.mulf %145, %146 : vector<8x8xf32>
    %148 = arith.addf %147, %5 : vector<8x8xf32>
    %cst_70 = arith.constant dense<0xFF800000> : vector<8xf32>
    %149 = vector.multi_reduction <maximumf>, %148, %cst_70 [1] : vector<8x8xf32> to vector<8xf32>
    %150 = vector.shape_cast %149 : vector<8xf32> to vector<8x1xf32>
    %151 = vector.broadcast %150 : vector<8x1xf32> to vector<8x8xf32>
    %152 = arith.subf %148, %151 : vector<8x8xf32>
    %153 = math.exp %152 : vector<8x8xf32>
    %cst_71 = arith.constant dense<0.000000e+00> : vector<8xf32>
    %154 = vector.multi_reduction <add>, %153, %cst_71 [1] : vector<8x8xf32> to vector<8xf32>
    %155 = vector.shape_cast %154 : vector<8xf32> to vector<8x1xf32>
    %156 = tpu.reciprocal %155 {approx = true} : vector<8x1xf32> -> vector<8x1xf32>
    %157 = vector.broadcast %156 : vector<8x1xf32> to vector<8x8xf32>
    %158 = arith.mulf %153, %157 : vector<8x8xf32>
    %159 = vector.broadcast %142 : vector<1x32xf32> to vector<8x32xf32>
    %160 = arith.mulf %36, %159 : vector<8x32xf32>
    %cst_72 = arith.constant dense<0.000000e+00> : vector<8x32xf32>
    %161 = tpu.matmul %158, %160, %cst_72 {dimension_numbers = #tpu.dot_dimension_numbers<[1], [0], [0], [1], [0, 0, 1, 1], [], []>} : vector<8x8xf32>, vector<8x32xf32>, vector<8x32xf32> -> vector<8x32xf32>
    %162 = arith.addf %141, %161 : vector<8x32xf32>
    %163 = vector.extract_strided_slice %6 {offsets = [6, 0], sizes = [1, 32], strides = [1, 1]} : vector<8x32xf32> to vector<1x32xf32>
    %164 = vector.broadcast %163 : vector<1x32xf32> to vector<8x32xf32>
    %165 = arith.mulf %34, %164 : vector<8x32xf32>
    %cst_73 = arith.constant dense<0.000000e+00> : vector<8x8xf32>
    %166 = tpu.matmul %165, %37, %cst_73 {dimension_numbers = #tpu.dot_dimension_numbers<[1], [0], [0], [1], [0, 0, 1, 1], [], []>} : vector<8x32xf32>, vector<32x8xf32>, vector<8x8xf32> -> vector<8x8xf32>
    %cst_74 = arith.constant 5.000000e-01 : f32
    %167 = vector.broadcast %cst_74 : f32 to vector<8x8xf32>
    %168 = arith.mulf %166, %167 : vector<8x8xf32>
    %169 = arith.addf %168, %5 : vector<8x8xf32>
    %cst_75 = arith.constant dense<0xFF800000> : vector<8xf32>
    %170 = vector.multi_reduction <maximumf>, %169, %cst_75 [1] : vector<8x8xf32> to vector<8xf32>
    %171 = vector.shape_cast %170 : vector<8xf32> to vector<8x1xf32>
    %172 = vector.broadcast %171 : vector<8x1xf32> to vector<8x8xf32>
    %173 = arith.subf %169, %172 : vector<8x8xf32>
    %174 = math.exp %173 : vector<8x8xf32>
    %cst_76 = arith.constant dense<0.000000e+00> : vector<8xf32>
    %175 = vector.multi_reduction <add>, %174, %cst_76 [1] : vector<8x8xf32> to vector<8xf32>
    %176 = vector.shape_cast %175 : vector<8xf32> to vector<8x1xf32>
    %177 = tpu.reciprocal %176 {approx = true} : vector<8x1xf32> -> vector<8x1xf32>
    %178 = vector.broadcast %177 : vector<8x1xf32> to vector<8x8xf32>
    %179 = arith.mulf %174, %178 : vector<8x8xf32>
    %180 = vector.broadcast %163 : vector<1x32xf32> to vector<8x32xf32>
    %181 = arith.mulf %36, %180 : vector<8x32xf32>
    %cst_77 = arith.constant dense<0.000000e+00> : vector<8x32xf32>
    %182 = tpu.matmul %179, %181, %cst_77 {dimension_numbers = #tpu.dot_dimension_numbers<[1], [0], [0], [1], [0, 0, 1, 1], [], []>} : vector<8x8xf32>, vector<8x32xf32>, vector<8x32xf32> -> vector<8x32xf32>
    %183 = arith.addf %162, %182 : vector<8x32xf32>
    %184 = vector.extract_strided_slice %6 {offsets = [7, 0], sizes = [1, 32], strides = [1, 1]} : vector<8x32xf32> to vector<1x32xf32>
    %185 = vector.broadcast %184 : vector<1x32xf32> to vector<8x32xf32>
    %186 = arith.mulf %34, %185 : vector<8x32xf32>
    %cst_78 = arith.constant dense<0.000000e+00> : vector<8x8xf32>
    %187 = tpu.matmul %186, %37, %cst_78 {dimension_numbers = #tpu.dot_dimension_numbers<[1], [0], [0], [1], [0, 0, 1, 1], [], []>} : vector<8x32xf32>, vector<32x8xf32>, vector<8x8xf32> -> vector<8x8xf32>
    %cst_79 = arith.constant 5.000000e-01 : f32
    %188 = vector.broadcast %cst_79 : f32 to vector<8x8xf32>
    %189 = arith.mulf %187, %188 : vector<8x8xf32>
    %190 = arith.addf %189, %5 : vector<8x8xf32>
    %cst_80 = arith.constant dense<0xFF800000> : vector<8xf32>
    %191 = vector.multi_reduction <maximumf>, %190, %cst_80 [1] : vector<8x8xf32> to vector<8xf32>
    %192 = vector.shape_cast %191 : vector<8xf32> to vector<8x1xf32>
    %193 = vector.broadcast %192 : vector<8x1xf32> to vector<8x8xf32>
    %194 = arith.subf %190, %193 : vector<8x8xf32>
    %195 = math.exp %194 : vector<8x8xf32>
    %cst_81 = arith.constant dense<0.000000e+00> : vector<8xf32>
    %196 = vector.multi_reduction <add>, %195, %cst_81 [1] : vector<8x8xf32> to vector<8xf32>
    %197 = vector.shape_cast %196 : vector<8xf32> to vector<8x1xf32>
    %198 = tpu.reciprocal %197 {approx = true} : vector<8x1xf32> -> vector<8x1xf32>
    %199 = vector.broadcast %198 : vector<8x1xf32> to vector<8x8xf32>
    %200 = arith.mulf %195, %199 : vector<8x8xf32>
    %201 = vector.broadcast %184 : vector<1x32xf32> to vector<8x32xf32>
    %202 = arith.mulf %36, %201 : vector<8x32xf32>
    %cst_82 = arith.constant dense<0.000000e+00> : vector<8x32xf32>
    %203 = tpu.matmul %200, %202, %cst_82 {dimension_numbers = #tpu.dot_dimension_numbers<[1], [0], [0], [1], [0, 0, 1, 1], [], []>} : vector<8x8xf32>, vector<8x32xf32>, vector<8x32xf32> -> vector<8x32xf32>
    %204 = arith.addf %183, %203 : vector<8x32xf32>
    %cst_83 = arith.constant dense<0.000000e+00> : vector<8x32xf32>
    %205 = tpu.matmul %204, %12, %cst_83 {dimension_numbers = #tpu.dot_dimension_numbers<[1], [0], [0], [1], [0, 0, 1, 1], [], []>} : vector<8x32xf32>, vector<32x32xf32>, vector<8x32xf32> -> vector<8x32xf32>
    %206 = vector.broadcast %14 : vector<1x32xf32> to vector<8x32xf32>
    %207 = arith.addf %205, %206 : vector<8x32xf32>
    %208 = arith.addf %4, %207 : vector<8x32xf32>
    %cst_84 = arith.constant dense<0.000000e+00> : vector<8xf32>
    %209 = vector.multi_reduction <add>, %208, %cst_84 [1] : vector<8x32xf32> to vector<8xf32>
    %210 = vector.shape_cast %209 : vector<8xf32> to vector<8x1xf32>
    %cst_85 = arith.constant 3.200000e+01 : f32
    %211 = vector.broadcast %cst_85 : f32 to vector<8x1xf32>
    %212 = arith.divf %210, %211 : vector<8x1xf32>
    %213 = vector.broadcast %212 : vector<8x1xf32> to vector<8x32xf32>
    %214 = arith.subf %208, %213 : vector<8x32xf32>
    %215 = arith.mulf %214, %214 : vector<8x32xf32>
    %cst_86 = arith.constant dense<0.000000e+00> : vector<8xf32>
    %216 = vector.multi_reduction <add>, %215, %cst_86 [1] : vector<8x32xf32> to vector<8xf32>
    %217 = vector.shape_cast %216 : vector<8xf32> to vector<8x1xf32>
    %cst_87 = arith.constant 3.200000e+01 : f32
    %218 = vector.broadcast %cst_87 : f32 to vector<8x1xf32>
    %219 = arith.divf %217, %218 : vector<8x1xf32>
    %cst_88 = arith.constant 9.99999974E-6 : f32
    %220 = vector.broadcast %cst_88 : f32 to vector<8x1xf32>
    %221 = arith.addf %219, %220 : vector<8x1xf32>
    %222 = math.rsqrt %221 : vector<8x1xf32>
    %223 = vector.broadcast %222 : vector<8x1xf32> to vector<8x32xf32>
    %224 = arith.mulf %214, %223 : vector<8x32xf32>
    %225 = vector.broadcast %16 : vector<1x32xf32> to vector<8x32xf32>
    %226 = arith.mulf %224, %225 : vector<8x32xf32>
    %227 = vector.broadcast %18 : vector<1x32xf32> to vector<8x32xf32>
    %228 = arith.addf %226, %227 : vector<8x32xf32>
    %cst_89 = arith.constant dense<0.000000e+00> : vector<8x2048xf32>
    %229 = tpu.matmul %228, %20, %cst_89 {dimension_numbers = #tpu.dot_dimension_numbers<[1], [0], [0], [1], [0, 0, 1, 1], [], []>} : vector<8x32xf32>, vector<32x2048xf32>, vector<8x2048xf32> -> vector<8x2048xf32>
    %230 = vector.broadcast %22 : vector<1x2048xf32> to vector<8x2048xf32>
    %231 = arith.addf %229, %230 : vector<8x2048xf32>
    %cst_90 = arith.constant 0.000000e+00 : f32
    %232 = vector.broadcast %cst_90 : f32 to vector<8x2048xf32>
    %233 = arith.maximumf %231, %232 : vector<8x2048xf32>
    %cst_91 = arith.constant dense<0.000000e+00> : vector<8x32xf32>
    %234 = tpu.matmul %233, %24, %cst_91 {dimension_numbers = #tpu.dot_dimension_numbers<[1], [0], [0], [1], [0, 0, 1, 1], [], []>} : vector<8x2048xf32>, vector<2048x32xf32>, vector<8x32xf32> -> vector<8x32xf32>
    %235 = vector.broadcast %26 : vector<1x32xf32> to vector<8x32xf32>
    %236 = arith.addf %234, %235 : vector<8x32xf32>
    %237 = arith.addf %228, %236 : vector<8x32xf32>
    %cst_92 = arith.constant dense<0.000000e+00> : vector<8xf32>
    %238 = vector.multi_reduction <add>, %237, %cst_92 [1] : vector<8x32xf32> to vector<8xf32>
    %239 = vector.shape_cast %238 : vector<8xf32> to vector<8x1xf32>
    %cst_93 = arith.constant 3.200000e+01 : f32
    %240 = vector.broadcast %cst_93 : f32 to vector<8x1xf32>
    %241 = arith.divf %239, %240 : vector<8x1xf32>
    %242 = vector.broadcast %241 : vector<8x1xf32> to vector<8x32xf32>
    %243 = arith.subf %237, %242 : vector<8x32xf32>
    %244 = arith.mulf %243, %243 : vector<8x32xf32>
    %cst_94 = arith.constant dense<0.000000e+00> : vector<8xf32>
    %245 = vector.multi_reduction <add>, %244, %cst_94 [1] : vector<8x32xf32> to vector<8xf32>
    %246 = vector.shape_cast %245 : vector<8xf32> to vector<8x1xf32>
    %cst_95 = arith.constant 3.200000e+01 : f32
    %247 = vector.broadcast %cst_95 : f32 to vector<8x1xf32>
    %248 = arith.divf %246, %247 : vector<8x1xf32>
    %cst_96 = arith.constant 9.99999974E-6 : f32
    %249 = vector.broadcast %cst_96 : f32 to vector<8x1xf32>
    %250 = arith.addf %248, %249 : vector<8x1xf32>
    %251 = math.rsqrt %250 : vector<8x1xf32>
    %252 = vector.broadcast %251 : vector<8x1xf32> to vector<8x32xf32>
    %253 = arith.mulf %243, %252 : vector<8x32xf32>
    %254 = vector.broadcast %28 : vector<1x32xf32> to vector<8x32xf32>
    %255 = arith.mulf %253, %254 : vector<8x32xf32>
    %256 = vector.broadcast %30 : vector<1x32xf32> to vector<8x32xf32>
    %257 = arith.addf %255, %256 : vector<8x32xf32>
    %c5_i32 = arith.constant 5 : i32
    %258 = arith.cmpi eq, %arg1, %c5_i32 : i32
    %c0_97 = arith.constant 0 : index
    %c0_98 = arith.constant 0 : index
    %259 = vector.load %arg17[%c0_97, %c0_98] : memref<1x32xf32, #tpu.memory_space<vmem>>, vector<1x32xf32>
    %c0_99 = arith.constant 0 : index
    %c0_100 = arith.constant 0 : index
    %260 = vector.load %arg18[%c0_99, %c0_100] : memref<1x32xf32, #tpu.memory_space<vmem>>, vector<1x32xf32>
    %cst_101 = arith.constant dense<0.000000e+00> : vector<8xf32>
    %261 = vector.multi_reduction <add>, %257, %cst_101 [1] : vector<8x32xf32> to vector<8xf32>
    %262 = vector.shape_cast %261 : vector<8xf32> to vector<8x1xf32>
    %cst_102 = arith.constant 3.200000e+01 : f32
    %263 = vector.broadcast %cst_102 : f32 to vector<8x1xf32>
    %264 = arith.divf %262, %263 : vector<8x1xf32>
    %265 = vector.broadcast %264 : vector<8x1xf32> to vector<8x32xf32>
    %266 = arith.subf %257, %265 : vector<8x32xf32>
    %267 = arith.mulf %266, %266 : vector<8x32xf32>
    %cst_103 = arith.constant dense<0.000000e+00> : vector<8xf32>
    %268 = vector.multi_reduction <add>, %267, %cst_103 [1] : vector<8x32xf32> to vector<8xf32>
    %269 = vector.shape_cast %268 : vector<8xf32> to vector<8x1xf32>
    %cst_104 = arith.constant 3.200000e+01 : f32
    %270 = vector.broadcast %cst_104 : f32 to vector<8x1xf32>
    %271 = arith.divf %269, %270 : vector<8x1xf32>
    %cst_105 = arith.constant 9.99999974E-6 : f32
    %272 = vector.broadcast %cst_105 : f32 to vector<8x1xf32>
    %273 = arith.addf %271, %272 : vector<8x1xf32>
    %274 = math.rsqrt %273 : vector<8x1xf32>
    %275 = vector.broadcast %274 : vector<8x1xf32> to vector<8x32xf32>
    %276 = arith.mulf %266, %275 : vector<8x32xf32>
    %277 = vector.broadcast %259 : vector<1x32xf32> to vector<8x32xf32>
    %278 = arith.mulf %276, %277 : vector<8x32xf32>
    %279 = vector.broadcast %260 : vector<1x32xf32> to vector<8x32xf32>
    %280 = arith.addf %278, %279 : vector<8x32xf32>
    %281 = arith.select %258, %280, %257 : vector<8x32xf32>
    %c0_106 = arith.constant 0 : index
    %c0_107 = arith.constant 0 : index
    %c0_108 = arith.constant 0 : index
    %282 = vector.load %arg19[%c0_106, %c0_107, %c0_108] : memref<1x8x32xf32, #tpu.memory_space<vmem>>, vector<1x8x32xf32>
    %283 = vector.shape_cast %282 : vector<1x8x32xf32> to vector<8x32xf32>
    %284 = vector.shape_cast %281 : vector<8x32xf32> to vector<1x8x32xf32>
    tpu.vector_store %arg19[%c0_106, %c0_107, %c0_108], %284 {strides = array<i32>} : memref<1x8x32xf32, #tpu.memory_space<vmem>>, vector<1x8x32xf32>,
    return
  }
  func.func @transform_0(%arg0: i32, %arg1: i32) -> (i32, i32, i32) {
    %c0_i32 = arith.constant 0 : i32
    %c0_i32_0 = arith.constant 0 : i32
    %c0_i32_1 = arith.constant 0 : i32
    return %arg0, %c0_i32, %c0_i32_0 : i32, i32, i32
  }
  func.func @transform_1(%arg0: i32, %arg1: i32) -> (i32, i32) {
    %c0_i32 = arith.constant 0 : i32
    %c0_i32_0 = arith.constant 0 : i32
    %c0_i32_1 = arith.constant 0 : i32
    return %c0_i32, %c0_i32_0 : i32, i32
  }
  func.func @transform_2(%arg0: i32, %arg1: i32) -> (i32, i32) {
    %c0_i32 = arith.constant 0 : i32
    %c0_i32_0 = arith.constant 0 : i32
    %c0_i32_1 = arith.constant 0 : i32
    return %c0_i32, %c0_i32_0 : i32, i32
  }
  func.func @transform_3(%arg0: i32, %arg1: i32) -> (i32, i32, i32) {
    %c0_i32 = arith.constant 0 : i32
    %c0_i32_0 = arith.constant 0 : i32
    %c0_i32_1 = arith.constant 0 : i32
    return %arg1, %c0_i32, %c0_i32_0 : i32, i32, i32
  }
  func.func @transform_4(%arg0: i32, %arg1: i32) -> (i32, i32, i32) {
    %c0_i32 = arith.constant 0 : i32
    %c0_i32_0 = arith.constant 0 : i32
    %c0_i32_1 = arith.constant 0 : i32
    return %arg1, %c0_i32, %c0_i32_0 : i32, i32, i32
  }
  func.func @transform_5(%arg0: i32, %arg1: i32) -> (i32, i32, i32) {
    %c0_i32 = arith.constant 0 : i32
    %c0_i32_0 = arith.constant 0 : i32
    %c0_i32_1 = arith.constant 0 : i32
    return %arg1, %c0_i32, %c0_i32_0 : i32, i32, i32
  }
  func.func @transform_6(%arg0: i32, %arg1: i32) -> (i32, i32, i32) {
    %c0_i32 = arith.constant 0 : i32
    %c0_i32_0 = arith.constant 0 : i32
    %c0_i32_1 = arith.constant 0 : i32
    return %arg1, %c0_i32, %c0_i32_0 : i32, i32, i32
  }
  func.func @transform_7(%arg0: i32, %arg1: i32) -> (i32, i32, i32) {
    %c0_i32 = arith.constant 0 : i32
    %c0_i32_0 = arith.constant 0 : i32
    %c0_i32_1 = arith.constant 0 : i32
    return %arg1, %c0_i32, %c0_i32_0 : i32, i32, i32
  }
  func.func @transform_8(%arg0: i32, %arg1: i32) -> (i32, i32, i32) {
    %c0_i32 = arith.constant 0 : i32
    %c0_i32_0 = arith.constant 0 : i32
    %c0_i32_1 = arith.constant 0 : i32
    return %arg1, %c0_i32, %c0_i32_0 : i32, i32, i32
  }
  func.func @transform_9(%arg0: i32, %arg1: i32) -> (i32, i32, i32) {
    %c0_i32 = arith.constant 0 : i32
    %c0_i32_0 = arith.constant 0 : i32
    %c0_i32_1 = arith.constant 0 : i32
    return %arg1, %c0_i32, %c0_i32_0 : i32, i32, i32
  }
  func.func @transform_10(%arg0: i32, %arg1: i32) -> (i32, i32, i32) {
    %c0_i32 = arith.constant 0 : i32
    %c0_i32_0 = arith.constant 0 : i32
    %c0_i32_1 = arith.constant 0 : i32
    return %arg1, %c0_i32, %c0_i32_0 : i32, i32, i32
  }
  func.func @transform_11(%arg0: i32, %arg1: i32) -> (i32, i32, i32) {
    %c0_i32 = arith.constant 0 : i32
    %c0_i32_0 = arith.constant 0 : i32
    %c0_i32_1 = arith.constant 0 : i32
    return %arg1, %c0_i32, %c0_i32_0 : i32, i32, i32
  }
  func.func @transform_12(%arg0: i32, %arg1: i32) -> (i32, i32, i32) {
    %c0_i32 = arith.constant 0 : i32
    %c0_i32_0 = arith.constant 0 : i32
    %c0_i32_1 = arith.constant 0 : i32
    return %arg1, %c0_i32, %c0_i32_0 : i32, i32, i32
  }
  func.func @transform_13(%arg0: i32, %arg1: i32) -> (i32, i32, i32) {
    %c0_i32 = arith.constant 0 : i32
    %c0_i32_0 = arith.constant 0 : i32
    %c0_i32_1 = arith.constant 0 : i32
    return %arg1, %c0_i32, %c0_i32_0 : i32, i32, i32
  }
  func.func @transform_14(%arg0: i32, %arg1: i32) -> (i32, i32, i32) {
    %c0_i32 = arith.constant 0 : i32
    %c0_i32_0 = arith.constant 0 : i32
    %c0_i32_1 = arith.constant 0 : i32
    return %arg1, %c0_i32, %c0_i32_0 : i32, i32, i32
  }
  func.func @transform_15(%arg0: i32, %arg1: i32) -> (i32, i32) {
    %c0_i32 = arith.constant 0 : i32
    %c0_i32_0 = arith.constant 0 : i32
    %c0_i32_1 = arith.constant 0 : i32
    return %c0_i32, %c0_i32_0 : i32, i32
  }
  func.func @transform_16(%arg0: i32, %arg1: i32) -> (i32, i32) {
    %c0_i32 = arith.constant 0 : i32
    %c0_i32_0 = arith.constant 0 : i32
    %c0_i32_1 = arith.constant 0 : i32
    return %c0_i32, %c0_i32_0 : i32, i32
  }
  func.func @transform_17(%arg0: i32, %arg1: i32) -> (i32, i32, i32) {
    %c0_i32 = arith.constant 0 : i32
    %c0_i32_0 = arith.constant 0 : i32
    %c0_i32_1 = arith.constant 0 : i32
    return %arg0, %c0_i32, %c0_i32_0 : i32, i32, i32
  }
}

module attributes {stable_mosaic.version = 11 : i64} {
  func.func @_decoder_stack_kernel(%arg0: i32, %arg1: i32, %arg2: memref<1x6x32xf32, #tpu.memory_space<vmem>>, %arg3: memref<1x8x32xf32, #tpu.memory_space<vmem>>, %arg4: memref<6x6xf32, #tpu.memory_space<vmem>>, %arg5: memref<8x32xf32, #tpu.memory_space<vmem>>, %arg6: memref<1x32x96xf32, #tpu.memory_space<vmem>>, %arg7: memref<1x1x96xf32, #tpu.memory_space<vmem>>, %arg8: memref<1x32x32xf32, #tpu.memory_space<vmem>>, %arg9: memref<1x1x32xf32, #tpu.memory_space<vmem>>, %arg10: memref<1x1x32xf32, #tpu.memory_space<vmem>>, %arg11: memref<1x1x32xf32, #tpu.memory_space<vmem>>, %arg12: memref<1x32x32xf32, #tpu.memory_space<vmem>>, %arg13: memref<1x1x32xf32, #tpu.memory_space<vmem>>, %arg14: memref<1x32x64xf32, #tpu.memory_space<vmem>>, %arg15: memref<1x1x64xf32, #tpu.memory_space<vmem>>, %arg16: memref<1x32x32xf32, #tpu.memory_space<vmem>>, %arg17: memref<1x1x32xf32, #tpu.memory_space<vmem>>, %arg18: memref<1x1x32xf32, #tpu.memory_space<vmem>>, %arg19: memref<1x1x32xf32, #tpu.memory_space<vmem>>, %arg20: memref<1x32x2048xf32, #tpu.memory_space<vmem>>, %arg21: memref<1x1x2048xf32, #tpu.memory_space<vmem>>, %arg22: memref<1x2048x32xf32, #tpu.memory_space<vmem>>, %arg23: memref<1x1x32xf32, #tpu.memory_space<vmem>>, %arg24: memref<1x1x32xf32, #tpu.memory_space<vmem>>, %arg25: memref<1x1x32xf32, #tpu.memory_space<vmem>>, %arg26: memref<1x6x32xf32, #tpu.memory_space<vmem>>) attributes {dimension_semantics = [#tpu.dimension_semantics<parallel>, #tpu.dimension_semantics<arbitrary>], iteration_bounds = array<i64: 2, 6>, scalar_prefetch = 0 : i64, scratch_operands = 0 : i64, tpu.core_type = #tpu.core_type<tc>, window_params = [{transform_indices = @transform_0, window_bounds = array<i64: 1, 6, 32>}, {transform_indices = @transform_1, window_bounds = array<i64: 1, 8, 32>}, {pipeline_mode = #tpu.pipeline_mode<synchronous>, transform_indices = @transform_2, window_bounds = array<i64: 6, 6>}, {pipeline_mode = #tpu.pipeline_mode<synchronous>, transform_indices = @transform_3, window_bounds = array<i64: 8, 32>}, {transform_indices = @transform_4, window_bounds = array<i64: 1, 32, 96>}, {transform_indices = @transform_5, window_bounds = array<i64: 1, 1, 96>}, {transform_indices = @transform_6, window_bounds = array<i64: 1, 32, 32>}, {transform_indices = @transform_7, window_bounds = array<i64: 1, 1, 32>}, {transform_indices = @transform_8, window_bounds = array<i64: 1, 1, 32>}, {transform_indices = @transform_9, window_bounds = array<i64: 1, 1, 32>}, {transform_indices = @transform_10, window_bounds = array<i64: 1, 32, 32>}, {transform_indices = @transform_11, window_bounds = array<i64: 1, 1, 32>}, {transform_indices = @transform_12, window_bounds = array<i64: 1, 32, 64>}, {transform_indices = @transform_13, window_bounds = array<i64: 1, 1, 64>}, {transform_indices = @transform_14, window_bounds = array<i64: 1, 32, 32>}, {transform_indices = @transform_15, window_bounds = array<i64: 1, 1, 32>}, {transform_indices = @transform_16, window_bounds = array<i64: 1, 1, 32>}, {transform_indices = @transform_17, window_bounds = array<i64: 1, 1, 32>}, {transform_indices = @transform_18, window_bounds = array<i64: 1, 32, 2048>}, {transform_indices = @transform_19, window_bounds = array<i64: 1, 1, 2048>}, {transform_indices = @transform_20, window_bounds = array<i64: 1, 2048, 32>}, {transform_indices = @transform_21, window_bounds = array<i64: 1, 1, 32>}, {transform_indices = @transform_22, window_bounds = array<i64: 1, 1, 32>}, {transform_indices = @transform_23, window_bounds = array<i64: 1, 1, 32>}, {transform_indices = @transform_24, window_bounds = array<i64: 1, 6, 32>}]} {
    %c0_i32 = arith.constant 0 : i32
    %0 = arith.cmpi eq, %arg1, %c0_i32 : i32
    %1 = arith.extui %0 : i1 to i32
    %c0_i32_0 = arith.constant 0 : i32
    %2 = arith.cmpi ne, %1, %c0_i32_0 : i32
    scf.if %2 {
      %c0_175 = arith.constant 0 : index
      %c0_176 = arith.constant 0 : index
      %c0_177 = arith.constant 0 : index
      %471 = vector.load %arg2[%c0_175, %c0_176, %c0_177] : memref<1x6x32xf32, #tpu.memory_space<vmem>>, vector<1x6x32xf32>
      %472 = vector.shape_cast %471 : vector<1x6x32xf32> to vector<6x32xf32>
      %c0_178 = arith.constant 0 : index
      %c0_179 = arith.constant 0 : index
      %c0_180 = arith.constant 0 : index
      %473 = vector.load %arg26[%c0_178, %c0_179, %c0_180] : memref<1x6x32xf32, #tpu.memory_space<vmem>>, vector<1x6x32xf32>
      %474 = vector.shape_cast %473 : vector<1x6x32xf32> to vector<6x32xf32>
      %475 = vector.shape_cast %472 : vector<6x32xf32> to vector<1x6x32xf32>
      tpu.vector_store %arg26[%c0_178, %c0_179, %c0_180], %475 {strides = array<i32>} : memref<1x6x32xf32, #tpu.memory_space<vmem>>, vector<1x6x32xf32>,
    } else {
    }
    %c0 = arith.constant 0 : index
    %c0_1 = arith.constant 0 : index
    %c0_2 = arith.constant 0 : index
    %3 = vector.load %arg26[%c0, %c0_1, %c0_2] : memref<1x6x32xf32, #tpu.memory_space<vmem>>, vector<1x6x32xf32>
    %4 = vector.shape_cast %3 : vector<1x6x32xf32> to vector<6x32xf32>
    %c0_3 = arith.constant 0 : index
    %c0_4 = arith.constant 0 : index
    %c0_5 = arith.constant 0 : index
    %5 = vector.load %arg3[%c0_3, %c0_4, %c0_5] : memref<1x8x32xf32, #tpu.memory_space<vmem>>, vector<1x8x32xf32>
    %6 = vector.shape_cast %5 : vector<1x8x32xf32> to vector<8x32xf32>
    %c0_6 = arith.constant 0 : index
    %c0_7 = arith.constant 0 : index
    %7 = vector.load %arg4[%c0_6, %c0_7] : memref<6x6xf32, #tpu.memory_space<vmem>>, vector<6x6xf32>
    %c0_8 = arith.constant 0 : index
    %c0_9 = arith.constant 0 : index
    %8 = vector.load %arg5[%c0_8, %c0_9] : memref<8x32xf32, #tpu.memory_space<vmem>>, vector<8x32xf32>
    %c0_10 = arith.constant 0 : index
    %c0_11 = arith.constant 0 : index
    %c0_12 = arith.constant 0 : index
    %9 = vector.load %arg6[%c0_10, %c0_11, %c0_12] : memref<1x32x96xf32, #tpu.memory_space<vmem>>, vector<1x32x96xf32>
    %10 = vector.shape_cast %9 : vector<1x32x96xf32> to vector<32x96xf32>
    %cst = arith.constant dense<0.000000e+00> : vector<6x96xf32>
    %11 = tpu.matmul %4, %10, %cst {dimension_numbers = #tpu.dot_dimension_numbers<[1], [0], [0], [1], [0, 0, 1, 1], [], []>} : vector<6x32xf32>, vector<32x96xf32>, vector<6x96xf32> -> vector<6x96xf32>
    %c0_13 = arith.constant 0 : index
    %c0_14 = arith.constant 0 : index
    %c0_15 = arith.constant 0 : index
    %12 = vector.load %arg7[%c0_13, %c0_14, %c0_15] : memref<1x1x96xf32, #tpu.memory_space<vmem>>, vector<1x1x96xf32>
    %13 = vector.shape_cast %12 : vector<1x1x96xf32> to vector<1x96xf32>
    %14 = vector.broadcast %13 : vector<1x96xf32> to vector<6x96xf32>
    %15 = arith.addf %11, %14 : vector<6x96xf32>
    %16 = vector.extract_strided_slice %15 {offsets = [0, 0], sizes = [6, 32], strides = [1, 1]} : vector<6x96xf32> to vector<6x32xf32>
    %17 = vector.extract_strided_slice %15 {offsets = [0, 32], sizes = [6, 32], strides = [1, 1]} : vector<6x96xf32> to vector<6x32xf32>
    %18 = vector.extract_strided_slice %15 {offsets = [0, 64], sizes = [6, 32], strides = [1, 1]} : vector<6x96xf32> to vector<6x32xf32>
    %19 = tpu.transpose %17, [1, 0] : vector<6x32xf32> -> vector<32x6xf32>
    %20 = vector.extract_strided_slice %8 {offsets = [0, 0], sizes = [1, 32], strides = [1, 1]} : vector<8x32xf32> to vector<1x32xf32>
    %21 = vector.broadcast %20 : vector<1x32xf32> to vector<6x32xf32>
    %22 = arith.mulf %16, %21 : vector<6x32xf32>
    %cst_16 = arith.constant dense<0.000000e+00> : vector<6x6xf32>
    %23 = tpu.matmul %22, %19, %cst_16 {dimension_numbers = #tpu.dot_dimension_numbers<[1], [0], [0], [1], [0, 0, 1, 1], [], []>} : vector<6x32xf32>, vector<32x6xf32>, vector<6x6xf32> -> vector<6x6xf32>
    %cst_17 = arith.constant 5.000000e-01 : f32
    %24 = vector.broadcast %cst_17 : f32 to vector<6x6xf32>
    %25 = arith.mulf %23, %24 : vector<6x6xf32>
    %26 = arith.addf %25, %7 : vector<6x6xf32>
    %cst_18 = arith.constant dense<0xFF800000> : vector<6xf32>
    %27 = vector.multi_reduction <maximumf>, %26, %cst_18 [1] : vector<6x6xf32> to vector<6xf32>
    %28 = vector.shape_cast %27 : vector<6xf32> to vector<6x1xf32>
    %29 = vector.broadcast %28 : vector<6x1xf32> to vector<6x6xf32>
    %30 = arith.subf %26, %29 : vector<6x6xf32>
    %31 = math.exp %30 : vector<6x6xf32>
    %cst_19 = arith.constant dense<0.000000e+00> : vector<6xf32>
    %32 = vector.multi_reduction <add>, %31, %cst_19 [1] : vector<6x6xf32> to vector<6xf32>
    %33 = vector.shape_cast %32 : vector<6xf32> to vector<6x1xf32>
    %34 = tpu.reciprocal %33 {approx = true} : vector<6x1xf32> -> vector<6x1xf32>
    %35 = vector.broadcast %34 : vector<6x1xf32> to vector<6x6xf32>
    %36 = arith.mulf %31, %35 : vector<6x6xf32>
    %37 = vector.broadcast %20 : vector<1x32xf32> to vector<6x32xf32>
    %38 = arith.mulf %18, %37 : vector<6x32xf32>
    %cst_20 = arith.constant dense<0.000000e+00> : vector<6x32xf32>
    %39 = tpu.matmul %36, %38, %cst_20 {dimension_numbers = #tpu.dot_dimension_numbers<[1], [0], [0], [1], [0, 0, 1, 1], [], []>} : vector<6x6xf32>, vector<6x32xf32>, vector<6x32xf32> -> vector<6x32xf32>
    %40 = vector.extract_strided_slice %8 {offsets = [1, 0], sizes = [1, 32], strides = [1, 1]} : vector<8x32xf32> to vector<1x32xf32>
    %41 = vector.broadcast %40 : vector<1x32xf32> to vector<6x32xf32>
    %42 = arith.mulf %16, %41 : vector<6x32xf32>
    %cst_21 = arith.constant dense<0.000000e+00> : vector<6x6xf32>
    %43 = tpu.matmul %42, %19, %cst_21 {dimension_numbers = #tpu.dot_dimension_numbers<[1], [0], [0], [1], [0, 0, 1, 1], [], []>} : vector<6x32xf32>, vector<32x6xf32>, vector<6x6xf32> -> vector<6x6xf32>
    %cst_22 = arith.constant 5.000000e-01 : f32
    %44 = vector.broadcast %cst_22 : f32 to vector<6x6xf32>
    %45 = arith.mulf %43, %44 : vector<6x6xf32>
    %46 = arith.addf %45, %7 : vector<6x6xf32>
    %cst_23 = arith.constant dense<0xFF800000> : vector<6xf32>
    %47 = vector.multi_reduction <maximumf>, %46, %cst_23 [1] : vector<6x6xf32> to vector<6xf32>
    %48 = vector.shape_cast %47 : vector<6xf32> to vector<6x1xf32>
    %49 = vector.broadcast %48 : vector<6x1xf32> to vector<6x6xf32>
    %50 = arith.subf %46, %49 : vector<6x6xf32>
    %51 = math.exp %50 : vector<6x6xf32>
    %cst_24 = arith.constant dense<0.000000e+00> : vector<6xf32>
    %52 = vector.multi_reduction <add>, %51, %cst_24 [1] : vector<6x6xf32> to vector<6xf32>
    %53 = vector.shape_cast %52 : vector<6xf32> to vector<6x1xf32>
    %54 = tpu.reciprocal %53 {approx = true} : vector<6x1xf32> -> vector<6x1xf32>
    %55 = vector.broadcast %54 : vector<6x1xf32> to vector<6x6xf32>
    %56 = arith.mulf %51, %55 : vector<6x6xf32>
    %57 = vector.broadcast %40 : vector<1x32xf32> to vector<6x32xf32>
    %58 = arith.mulf %18, %57 : vector<6x32xf32>
    %cst_25 = arith.constant dense<0.000000e+00> : vector<6x32xf32>
    %59 = tpu.matmul %56, %58, %cst_25 {dimension_numbers = #tpu.dot_dimension_numbers<[1], [0], [0], [1], [0, 0, 1, 1], [], []>} : vector<6x6xf32>, vector<6x32xf32>, vector<6x32xf32> -> vector<6x32xf32>
    %60 = arith.addf %39, %59 : vector<6x32xf32>
    %61 = vector.extract_strided_slice %8 {offsets = [2, 0], sizes = [1, 32], strides = [1, 1]} : vector<8x32xf32> to vector<1x32xf32>
    %62 = vector.broadcast %61 : vector<1x32xf32> to vector<6x32xf32>
    %63 = arith.mulf %16, %62 : vector<6x32xf32>
    %cst_26 = arith.constant dense<0.000000e+00> : vector<6x6xf32>
    %64 = tpu.matmul %63, %19, %cst_26 {dimension_numbers = #tpu.dot_dimension_numbers<[1], [0], [0], [1], [0, 0, 1, 1], [], []>} : vector<6x32xf32>, vector<32x6xf32>, vector<6x6xf32> -> vector<6x6xf32>
    %cst_27 = arith.constant 5.000000e-01 : f32
    %65 = vector.broadcast %cst_27 : f32 to vector<6x6xf32>
    %66 = arith.mulf %64, %65 : vector<6x6xf32>
    %67 = arith.addf %66, %7 : vector<6x6xf32>
    %cst_28 = arith.constant dense<0xFF800000> : vector<6xf32>
    %68 = vector.multi_reduction <maximumf>, %67, %cst_28 [1] : vector<6x6xf32> to vector<6xf32>
    %69 = vector.shape_cast %68 : vector<6xf32> to vector<6x1xf32>
    %70 = vector.broadcast %69 : vector<6x1xf32> to vector<6x6xf32>
    %71 = arith.subf %67, %70 : vector<6x6xf32>
    %72 = math.exp %71 : vector<6x6xf32>
    %cst_29 = arith.constant dense<0.000000e+00> : vector<6xf32>
    %73 = vector.multi_reduction <add>, %72, %cst_29 [1] : vector<6x6xf32> to vector<6xf32>
    %74 = vector.shape_cast %73 : vector<6xf32> to vector<6x1xf32>
    %75 = tpu.reciprocal %74 {approx = true} : vector<6x1xf32> -> vector<6x1xf32>
    %76 = vector.broadcast %75 : vector<6x1xf32> to vector<6x6xf32>
    %77 = arith.mulf %72, %76 : vector<6x6xf32>
    %78 = vector.broadcast %61 : vector<1x32xf32> to vector<6x32xf32>
    %79 = arith.mulf %18, %78 : vector<6x32xf32>
    %cst_30 = arith.constant dense<0.000000e+00> : vector<6x32xf32>
    %80 = tpu.matmul %77, %79, %cst_30 {dimension_numbers = #tpu.dot_dimension_numbers<[1], [0], [0], [1], [0, 0, 1, 1], [], []>} : vector<6x6xf32>, vector<6x32xf32>, vector<6x32xf32> -> vector<6x32xf32>
    %81 = arith.addf %60, %80 : vector<6x32xf32>
    %82 = vector.extract_strided_slice %8 {offsets = [3, 0], sizes = [1, 32], strides = [1, 1]} : vector<8x32xf32> to vector<1x32xf32>
    %83 = vector.broadcast %82 : vector<1x32xf32> to vector<6x32xf32>
    %84 = arith.mulf %16, %83 : vector<6x32xf32>
    %cst_31 = arith.constant dense<0.000000e+00> : vector<6x6xf32>
    %85 = tpu.matmul %84, %19, %cst_31 {dimension_numbers = #tpu.dot_dimension_numbers<[1], [0], [0], [1], [0, 0, 1, 1], [], []>} : vector<6x32xf32>, vector<32x6xf32>, vector<6x6xf32> -> vector<6x6xf32>
    %cst_32 = arith.constant 5.000000e-01 : f32
    %86 = vector.broadcast %cst_32 : f32 to vector<6x6xf32>
    %87 = arith.mulf %85, %86 : vector<6x6xf32>
    %88 = arith.addf %87, %7 : vector<6x6xf32>
    %cst_33 = arith.constant dense<0xFF800000> : vector<6xf32>
    %89 = vector.multi_reduction <maximumf>, %88, %cst_33 [1] : vector<6x6xf32> to vector<6xf32>
    %90 = vector.shape_cast %89 : vector<6xf32> to vector<6x1xf32>
    %91 = vector.broadcast %90 : vector<6x1xf32> to vector<6x6xf32>
    %92 = arith.subf %88, %91 : vector<6x6xf32>
    %93 = math.exp %92 : vector<6x6xf32>
    %cst_34 = arith.constant dense<0.000000e+00> : vector<6xf32>
    %94 = vector.multi_reduction <add>, %93, %cst_34 [1] : vector<6x6xf32> to vector<6xf32>
    %95 = vector.shape_cast %94 : vector<6xf32> to vector<6x1xf32>
    %96 = tpu.reciprocal %95 {approx = true} : vector<6x1xf32> -> vector<6x1xf32>
    %97 = vector.broadcast %96 : vector<6x1xf32> to vector<6x6xf32>
    %98 = arith.mulf %93, %97 : vector<6x6xf32>
    %99 = vector.broadcast %82 : vector<1x32xf32> to vector<6x32xf32>
    %100 = arith.mulf %18, %99 : vector<6x32xf32>
    %cst_35 = arith.constant dense<0.000000e+00> : vector<6x32xf32>
    %101 = tpu.matmul %98, %100, %cst_35 {dimension_numbers = #tpu.dot_dimension_numbers<[1], [0], [0], [1], [0, 0, 1, 1], [], []>} : vector<6x6xf32>, vector<6x32xf32>, vector<6x32xf32> -> vector<6x32xf32>
    %102 = arith.addf %81, %101 : vector<6x32xf32>
    %103 = vector.extract_strided_slice %8 {offsets = [4, 0], sizes = [1, 32], strides = [1, 1]} : vector<8x32xf32> to vector<1x32xf32>
    %104 = vector.broadcast %103 : vector<1x32xf32> to vector<6x32xf32>
    %105 = arith.mulf %16, %104 : vector<6x32xf32>
    %cst_36 = arith.constant dense<0.000000e+00> : vector<6x6xf32>
    %106 = tpu.matmul %105, %19, %cst_36 {dimension_numbers = #tpu.dot_dimension_numbers<[1], [0], [0], [1], [0, 0, 1, 1], [], []>} : vector<6x32xf32>, vector<32x6xf32>, vector<6x6xf32> -> vector<6x6xf32>
    %cst_37 = arith.constant 5.000000e-01 : f32
    %107 = vector.broadcast %cst_37 : f32 to vector<6x6xf32>
    %108 = arith.mulf %106, %107 : vector<6x6xf32>
    %109 = arith.addf %108, %7 : vector<6x6xf32>
    %cst_38 = arith.constant dense<0xFF800000> : vector<6xf32>
    %110 = vector.multi_reduction <maximumf>, %109, %cst_38 [1] : vector<6x6xf32> to vector<6xf32>
    %111 = vector.shape_cast %110 : vector<6xf32> to vector<6x1xf32>
    %112 = vector.broadcast %111 : vector<6x1xf32> to vector<6x6xf32>
    %113 = arith.subf %109, %112 : vector<6x6xf32>
    %114 = math.exp %113 : vector<6x6xf32>
    %cst_39 = arith.constant dense<0.000000e+00> : vector<6xf32>
    %115 = vector.multi_reduction <add>, %114, %cst_39 [1] : vector<6x6xf32> to vector<6xf32>
    %116 = vector.shape_cast %115 : vector<6xf32> to vector<6x1xf32>
    %117 = tpu.reciprocal %116 {approx = true} : vector<6x1xf32> -> vector<6x1xf32>
    %118 = vector.broadcast %117 : vector<6x1xf32> to vector<6x6xf32>
    %119 = arith.mulf %114, %118 : vector<6x6xf32>
    %120 = vector.broadcast %103 : vector<1x32xf32> to vector<6x32xf32>
    %121 = arith.mulf %18, %120 : vector<6x32xf32>
    %cst_40 = arith.constant dense<0.000000e+00> : vector<6x32xf32>
    %122 = tpu.matmul %119, %121, %cst_40 {dimension_numbers = #tpu.dot_dimension_numbers<[1], [0], [0], [1], [0, 0, 1, 1], [], []>} : vector<6x6xf32>, vector<6x32xf32>, vector<6x32xf32> -> vector<6x32xf32>
    %123 = arith.addf %102, %122 : vector<6x32xf32>
    %124 = vector.extract_strided_slice %8 {offsets = [5, 0], sizes = [1, 32], strides = [1, 1]} : vector<8x32xf32> to vector<1x32xf32>
    %125 = vector.broadcast %124 : vector<1x32xf32> to vector<6x32xf32>
    %126 = arith.mulf %16, %125 : vector<6x32xf32>
    %cst_41 = arith.constant dense<0.000000e+00> : vector<6x6xf32>
    %127 = tpu.matmul %126, %19, %cst_41 {dimension_numbers = #tpu.dot_dimension_numbers<[1], [0], [0], [1], [0, 0, 1, 1], [], []>} : vector<6x32xf32>, vector<32x6xf32>, vector<6x6xf32> -> vector<6x6xf32>
    %cst_42 = arith.constant 5.000000e-01 : f32
    %128 = vector.broadcast %cst_42 : f32 to vector<6x6xf32>
    %129 = arith.mulf %127, %128 : vector<6x6xf32>
    %130 = arith.addf %129, %7 : vector<6x6xf32>
    %cst_43 = arith.constant dense<0xFF800000> : vector<6xf32>
    %131 = vector.multi_reduction <maximumf>, %130, %cst_43 [1] : vector<6x6xf32> to vector<6xf32>
    %132 = vector.shape_cast %131 : vector<6xf32> to vector<6x1xf32>
    %133 = vector.broadcast %132 : vector<6x1xf32> to vector<6x6xf32>
    %134 = arith.subf %130, %133 : vector<6x6xf32>
    %135 = math.exp %134 : vector<6x6xf32>
    %cst_44 = arith.constant dense<0.000000e+00> : vector<6xf32>
    %136 = vector.multi_reduction <add>, %135, %cst_44 [1] : vector<6x6xf32> to vector<6xf32>
    %137 = vector.shape_cast %136 : vector<6xf32> to vector<6x1xf32>
    %138 = tpu.reciprocal %137 {approx = true} : vector<6x1xf32> -> vector<6x1xf32>
    %139 = vector.broadcast %138 : vector<6x1xf32> to vector<6x6xf32>
    %140 = arith.mulf %135, %139 : vector<6x6xf32>
    %141 = vector.broadcast %124 : vector<1x32xf32> to vector<6x32xf32>
    %142 = arith.mulf %18, %141 : vector<6x32xf32>
    %cst_45 = arith.constant dense<0.000000e+00> : vector<6x32xf32>
    %143 = tpu.matmul %140, %142, %cst_45 {dimension_numbers = #tpu.dot_dimension_numbers<[1], [0], [0], [1], [0, 0, 1, 1], [], []>} : vector<6x6xf32>, vector<6x32xf32>, vector<6x32xf32> -> vector<6x32xf32>
    %144 = arith.addf %123, %143 : vector<6x32xf32>
    %145 = vector.extract_strided_slice %8 {offsets = [6, 0], sizes = [1, 32], strides = [1, 1]} : vector<8x32xf32> to vector<1x32xf32>
    %146 = vector.broadcast %145 : vector<1x32xf32> to vector<6x32xf32>
    %147 = arith.mulf %16, %146 : vector<6x32xf32>
    %cst_46 = arith.constant dense<0.000000e+00> : vector<6x6xf32>
    %148 = tpu.matmul %147, %19, %cst_46 {dimension_numbers = #tpu.dot_dimension_numbers<[1], [0], [0], [1], [0, 0, 1, 1], [], []>} : vector<6x32xf32>, vector<32x6xf32>, vector<6x6xf32> -> vector<6x6xf32>
    %cst_47 = arith.constant 5.000000e-01 : f32
    %149 = vector.broadcast %cst_47 : f32 to vector<6x6xf32>
    %150 = arith.mulf %148, %149 : vector<6x6xf32>
    %151 = arith.addf %150, %7 : vector<6x6xf32>
    %cst_48 = arith.constant dense<0xFF800000> : vector<6xf32>
    %152 = vector.multi_reduction <maximumf>, %151, %cst_48 [1] : vector<6x6xf32> to vector<6xf32>
    %153 = vector.shape_cast %152 : vector<6xf32> to vector<6x1xf32>
    %154 = vector.broadcast %153 : vector<6x1xf32> to vector<6x6xf32>
    %155 = arith.subf %151, %154 : vector<6x6xf32>
    %156 = math.exp %155 : vector<6x6xf32>
    %cst_49 = arith.constant dense<0.000000e+00> : vector<6xf32>
    %157 = vector.multi_reduction <add>, %156, %cst_49 [1] : vector<6x6xf32> to vector<6xf32>
    %158 = vector.shape_cast %157 : vector<6xf32> to vector<6x1xf32>
    %159 = tpu.reciprocal %158 {approx = true} : vector<6x1xf32> -> vector<6x1xf32>
    %160 = vector.broadcast %159 : vector<6x1xf32> to vector<6x6xf32>
    %161 = arith.mulf %156, %160 : vector<6x6xf32>
    %162 = vector.broadcast %145 : vector<1x32xf32> to vector<6x32xf32>
    %163 = arith.mulf %18, %162 : vector<6x32xf32>
    %cst_50 = arith.constant dense<0.000000e+00> : vector<6x32xf32>
    %164 = tpu.matmul %161, %163, %cst_50 {dimension_numbers = #tpu.dot_dimension_numbers<[1], [0], [0], [1], [0, 0, 1, 1], [], []>} : vector<6x6xf32>, vector<6x32xf32>, vector<6x32xf32> -> vector<6x32xf32>
    %165 = arith.addf %144, %164 : vector<6x32xf32>
    %166 = vector.extract_strided_slice %8 {offsets = [7, 0], sizes = [1, 32], strides = [1, 1]} : vector<8x32xf32> to vector<1x32xf32>
    %167 = vector.broadcast %166 : vector<1x32xf32> to vector<6x32xf32>
    %168 = arith.mulf %16, %167 : vector<6x32xf32>
    %cst_51 = arith.constant dense<0.000000e+00> : vector<6x6xf32>
    %169 = tpu.matmul %168, %19, %cst_51 {dimension_numbers = #tpu.dot_dimension_numbers<[1], [0], [0], [1], [0, 0, 1, 1], [], []>} : vector<6x32xf32>, vector<32x6xf32>, vector<6x6xf32> -> vector<6x6xf32>
    %cst_52 = arith.constant 5.000000e-01 : f32
    %170 = vector.broadcast %cst_52 : f32 to vector<6x6xf32>
    %171 = arith.mulf %169, %170 : vector<6x6xf32>
    %172 = arith.addf %171, %7 : vector<6x6xf32>
    %cst_53 = arith.constant dense<0xFF800000> : vector<6xf32>
    %173 = vector.multi_reduction <maximumf>, %172, %cst_53 [1] : vector<6x6xf32> to vector<6xf32>
    %174 = vector.shape_cast %173 : vector<6xf32> to vector<6x1xf32>
    %175 = vector.broadcast %174 : vector<6x1xf32> to vector<6x6xf32>
    %176 = arith.subf %172, %175 : vector<6x6xf32>
    %177 = math.exp %176 : vector<6x6xf32>
    %cst_54 = arith.constant dense<0.000000e+00> : vector<6xf32>
    %178 = vector.multi_reduction <add>, %177, %cst_54 [1] : vector<6x6xf32> to vector<6xf32>
    %179 = vector.shape_cast %178 : vector<6xf32> to vector<6x1xf32>
    %180 = tpu.reciprocal %179 {approx = true} : vector<6x1xf32> -> vector<6x1xf32>
    %181 = vector.broadcast %180 : vector<6x1xf32> to vector<6x6xf32>
    %182 = arith.mulf %177, %181 : vector<6x6xf32>
    %183 = vector.broadcast %166 : vector<1x32xf32> to vector<6x32xf32>
    %184 = arith.mulf %18, %183 : vector<6x32xf32>
    %cst_55 = arith.constant dense<0.000000e+00> : vector<6x32xf32>
    %185 = tpu.matmul %182, %184, %cst_55 {dimension_numbers = #tpu.dot_dimension_numbers<[1], [0], [0], [1], [0, 0, 1, 1], [], []>} : vector<6x6xf32>, vector<6x32xf32>, vector<6x32xf32> -> vector<6x32xf32>
    %186 = arith.addf %165, %185 : vector<6x32xf32>
    %c0_56 = arith.constant 0 : index
    %c0_57 = arith.constant 0 : index
    %c0_58 = arith.constant 0 : index
    %187 = vector.load %arg8[%c0_56, %c0_57, %c0_58] : memref<1x32x32xf32, #tpu.memory_space<vmem>>, vector<1x32x32xf32>
    %188 = vector.shape_cast %187 : vector<1x32x32xf32> to vector<32x32xf32>
    %cst_59 = arith.constant dense<0.000000e+00> : vector<6x32xf32>
    %189 = tpu.matmul %186, %188, %cst_59 {dimension_numbers = #tpu.dot_dimension_numbers<[1], [0], [0], [1], [0, 0, 1, 1], [], []>} : vector<6x32xf32>, vector<32x32xf32>, vector<6x32xf32> -> vector<6x32xf32>
    %c0_60 = arith.constant 0 : index
    %c0_61 = arith.constant 0 : index
    %c0_62 = arith.constant 0 : index
    %190 = vector.load %arg9[%c0_60, %c0_61, %c0_62] : memref<1x1x32xf32, #tpu.memory_space<vmem>>, vector<1x1x32xf32>
    %191 = vector.shape_cast %190 : vector<1x1x32xf32> to vector<1x32xf32>
    %192 = vector.broadcast %191 : vector<1x32xf32> to vector<6x32xf32>
    %193 = arith.addf %189, %192 : vector<6x32xf32>
    %194 = arith.addf %4, %193 : vector<6x32xf32>
    %c0_63 = arith.constant 0 : index
    %c0_64 = arith.constant 0 : index
    %c0_65 = arith.constant 0 : index
    %195 = vector.load %arg10[%c0_63, %c0_64, %c0_65] : memref<1x1x32xf32, #tpu.memory_space<vmem>>, vector<1x1x32xf32>
    %196 = vector.shape_cast %195 : vector<1x1x32xf32> to vector<1x32xf32>
    %c0_66 = arith.constant 0 : index
    %c0_67 = arith.constant 0 : index
    %c0_68 = arith.constant 0 : index
    %197 = vector.load %arg11[%c0_66, %c0_67, %c0_68] : memref<1x1x32xf32, #tpu.memory_space<vmem>>, vector<1x1x32xf32>
    %198 = vector.shape_cast %197 : vector<1x1x32xf32> to vector<1x32xf32>
    %cst_69 = arith.constant dense<0.000000e+00> : vector<6xf32>
    %199 = vector.multi_reduction <add>, %194, %cst_69 [1] : vector<6x32xf32> to vector<6xf32>
    %200 = vector.shape_cast %199 : vector<6xf32> to vector<6x1xf32>
    %cst_70 = arith.constant 3.200000e+01 : f32
    %201 = vector.broadcast %cst_70 : f32 to vector<6x1xf32>
    %202 = arith.divf %200, %201 : vector<6x1xf32>
    %203 = vector.broadcast %202 : vector<6x1xf32> to vector<6x32xf32>
    %204 = arith.subf %194, %203 : vector<6x32xf32>
    %205 = arith.mulf %204, %204 : vector<6x32xf32>
    %cst_71 = arith.constant dense<0.000000e+00> : vector<6xf32>
    %206 = vector.multi_reduction <add>, %205, %cst_71 [1] : vector<6x32xf32> to vector<6xf32>
    %207 = vector.shape_cast %206 : vector<6xf32> to vector<6x1xf32>
    %cst_72 = arith.constant 3.200000e+01 : f32
    %208 = vector.broadcast %cst_72 : f32 to vector<6x1xf32>
    %209 = arith.divf %207, %208 : vector<6x1xf32>
    %cst_73 = arith.constant 9.99999974E-6 : f32
    %210 = vector.broadcast %cst_73 : f32 to vector<6x1xf32>
    %211 = arith.addf %209, %210 : vector<6x1xf32>
    %212 = math.rsqrt %211 : vector<6x1xf32>
    %213 = vector.broadcast %212 : vector<6x1xf32> to vector<6x32xf32>
    %214 = arith.mulf %204, %213 : vector<6x32xf32>
    %215 = vector.broadcast %196 : vector<1x32xf32> to vector<6x32xf32>
    %216 = arith.mulf %214, %215 : vector<6x32xf32>
    %217 = vector.broadcast %198 : vector<1x32xf32> to vector<6x32xf32>
    %218 = arith.addf %216, %217 : vector<6x32xf32>
    %c0_74 = arith.constant 0 : index
    %c0_75 = arith.constant 0 : index
    %c0_76 = arith.constant 0 : index
    %219 = vector.load %arg12[%c0_74, %c0_75, %c0_76] : memref<1x32x32xf32, #tpu.memory_space<vmem>>, vector<1x32x32xf32>
    %220 = vector.shape_cast %219 : vector<1x32x32xf32> to vector<32x32xf32>
    %cst_77 = arith.constant dense<0.000000e+00> : vector<6x32xf32>
    %221 = tpu.matmul %218, %220, %cst_77 {dimension_numbers = #tpu.dot_dimension_numbers<[1], [0], [0], [1], [0, 0, 1, 1], [], []>} : vector<6x32xf32>, vector<32x32xf32>, vector<6x32xf32> -> vector<6x32xf32>
    %c0_78 = arith.constant 0 : index
    %c0_79 = arith.constant 0 : index
    %c0_80 = arith.constant 0 : index
    %222 = vector.load %arg13[%c0_78, %c0_79, %c0_80] : memref<1x1x32xf32, #tpu.memory_space<vmem>>, vector<1x1x32xf32>
    %223 = vector.shape_cast %222 : vector<1x1x32xf32> to vector<1x32xf32>
    %224 = vector.broadcast %223 : vector<1x32xf32> to vector<6x32xf32>
    %225 = arith.addf %221, %224 : vector<6x32xf32>
    %c0_81 = arith.constant 0 : index
    %c0_82 = arith.constant 0 : index
    %c0_83 = arith.constant 0 : index
    %226 = vector.load %arg14[%c0_81, %c0_82, %c0_83] : memref<1x32x64xf32, #tpu.memory_space<vmem>>, vector<1x32x64xf32>
    %227 = vector.shape_cast %226 : vector<1x32x64xf32> to vector<32x64xf32>
    %cst_84 = arith.constant dense<0.000000e+00> : vector<8x64xf32>
    %228 = tpu.matmul %6, %227, %cst_84 {dimension_numbers = #tpu.dot_dimension_numbers<[1], [0], [0], [1], [0, 0, 1, 1], [], []>} : vector<8x32xf32>, vector<32x64xf32>, vector<8x64xf32> -> vector<8x64xf32>
    %c0_85 = arith.constant 0 : index
    %c0_86 = arith.constant 0 : index
    %c0_87 = arith.constant 0 : index
    %229 = vector.load %arg15[%c0_85, %c0_86, %c0_87] : memref<1x1x64xf32, #tpu.memory_space<vmem>>, vector<1x1x64xf32>
    %230 = vector.shape_cast %229 : vector<1x1x64xf32> to vector<1x64xf32>
    %231 = vector.broadcast %230 : vector<1x64xf32> to vector<8x64xf32>
    %232 = arith.addf %228, %231 : vector<8x64xf32>
    %233 = vector.extract_strided_slice %232 {offsets = [0, 0], sizes = [8, 32], strides = [1, 1]} : vector<8x64xf32> to vector<8x32xf32>
    %234 = vector.extract_strided_slice %232 {offsets = [0, 32], sizes = [8, 32], strides = [1, 1]} : vector<8x64xf32> to vector<8x32xf32>
    %235 = tpu.transpose %233, [1, 0] : vector<8x32xf32> -> vector<32x8xf32>
    %236 = vector.extract_strided_slice %8 {offsets = [0, 0], sizes = [1, 32], strides = [1, 1]} : vector<8x32xf32> to vector<1x32xf32>
    %237 = vector.broadcast %236 : vector<1x32xf32> to vector<6x32xf32>
    %238 = arith.mulf %225, %237 : vector<6x32xf32>
    %cst_88 = arith.constant dense<0.000000e+00> : vector<6x8xf32>
    %239 = tpu.matmul %238, %235, %cst_88 {dimension_numbers = #tpu.dot_dimension_numbers<[1], [0], [0], [1], [0, 0, 1, 1], [], []>} : vector<6x32xf32>, vector<32x8xf32>, vector<6x8xf32> -> vector<6x8xf32>
    %cst_89 = arith.constant 5.000000e-01 : f32
    %240 = vector.broadcast %cst_89 : f32 to vector<6x8xf32>
    %241 = arith.mulf %239, %240 : vector<6x8xf32>
    %cst_90 = arith.constant dense<0xFF800000> : vector<6xf32>
    %242 = vector.multi_reduction <maximumf>, %241, %cst_90 [1] : vector<6x8xf32> to vector<6xf32>
    %243 = vector.shape_cast %242 : vector<6xf32> to vector<6x1xf32>
    %244 = vector.broadcast %243 : vector<6x1xf32> to vector<6x8xf32>
    %245 = arith.subf %241, %244 : vector<6x8xf32>
    %246 = math.exp %245 : vector<6x8xf32>
    %cst_91 = arith.constant dense<0.000000e+00> : vector<6xf32>
    %247 = vector.multi_reduction <add>, %246, %cst_91 [1] : vector<6x8xf32> to vector<6xf32>
    %248 = vector.shape_cast %247 : vector<6xf32> to vector<6x1xf32>
    %249 = tpu.reciprocal %248 {approx = true} : vector<6x1xf32> -> vector<6x1xf32>
    %250 = vector.broadcast %249 : vector<6x1xf32> to vector<6x8xf32>
    %251 = arith.mulf %246, %250 : vector<6x8xf32>
    %252 = vector.broadcast %236 : vector<1x32xf32> to vector<8x32xf32>
    %253 = arith.mulf %234, %252 : vector<8x32xf32>
    %cst_92 = arith.constant dense<0.000000e+00> : vector<6x32xf32>
    %254 = tpu.matmul %251, %253, %cst_92 {dimension_numbers = #tpu.dot_dimension_numbers<[1], [0], [0], [1], [0, 0, 1, 1], [], []>} : vector<6x8xf32>, vector<8x32xf32>, vector<6x32xf32> -> vector<6x32xf32>
    %255 = vector.extract_strided_slice %8 {offsets = [1, 0], sizes = [1, 32], strides = [1, 1]} : vector<8x32xf32> to vector<1x32xf32>
    %256 = vector.broadcast %255 : vector<1x32xf32> to vector<6x32xf32>
    %257 = arith.mulf %225, %256 : vector<6x32xf32>
    %cst_93 = arith.constant dense<0.000000e+00> : vector<6x8xf32>
    %258 = tpu.matmul %257, %235, %cst_93 {dimension_numbers = #tpu.dot_dimension_numbers<[1], [0], [0], [1], [0, 0, 1, 1], [], []>} : vector<6x32xf32>, vector<32x8xf32>, vector<6x8xf32> -> vector<6x8xf32>
    %cst_94 = arith.constant 5.000000e-01 : f32
    %259 = vector.broadcast %cst_94 : f32 to vector<6x8xf32>
    %260 = arith.mulf %258, %259 : vector<6x8xf32>
    %cst_95 = arith.constant dense<0xFF800000> : vector<6xf32>
    %261 = vector.multi_reduction <maximumf>, %260, %cst_95 [1] : vector<6x8xf32> to vector<6xf32>
    %262 = vector.shape_cast %261 : vector<6xf32> to vector<6x1xf32>
    %263 = vector.broadcast %262 : vector<6x1xf32> to vector<6x8xf32>
    %264 = arith.subf %260, %263 : vector<6x8xf32>
    %265 = math.exp %264 : vector<6x8xf32>
    %cst_96 = arith.constant dense<0.000000e+00> : vector<6xf32>
    %266 = vector.multi_reduction <add>, %265, %cst_96 [1] : vector<6x8xf32> to vector<6xf32>
    %267 = vector.shape_cast %266 : vector<6xf32> to vector<6x1xf32>
    %268 = tpu.reciprocal %267 {approx = true} : vector<6x1xf32> -> vector<6x1xf32>
    %269 = vector.broadcast %268 : vector<6x1xf32> to vector<6x8xf32>
    %270 = arith.mulf %265, %269 : vector<6x8xf32>
    %271 = vector.broadcast %255 : vector<1x32xf32> to vector<8x32xf32>
    %272 = arith.mulf %234, %271 : vector<8x32xf32>
    %cst_97 = arith.constant dense<0.000000e+00> : vector<6x32xf32>
    %273 = tpu.matmul %270, %272, %cst_97 {dimension_numbers = #tpu.dot_dimension_numbers<[1], [0], [0], [1], [0, 0, 1, 1], [], []>} : vector<6x8xf32>, vector<8x32xf32>, vector<6x32xf32> -> vector<6x32xf32>
    %274 = arith.addf %254, %273 : vector<6x32xf32>
    %275 = vector.extract_strided_slice %8 {offsets = [2, 0], sizes = [1, 32], strides = [1, 1]} : vector<8x32xf32> to vector<1x32xf32>
    %276 = vector.broadcast %275 : vector<1x32xf32> to vector<6x32xf32>
    %277 = arith.mulf %225, %276 : vector<6x32xf32>
    %cst_98 = arith.constant dense<0.000000e+00> : vector<6x8xf32>
    %278 = tpu.matmul %277, %235, %cst_98 {dimension_numbers = #tpu.dot_dimension_numbers<[1], [0], [0], [1], [0, 0, 1, 1], [], []>} : vector<6x32xf32>, vector<32x8xf32>, vector<6x8xf32> -> vector<6x8xf32>
    %cst_99 = arith.constant 5.000000e-01 : f32
    %279 = vector.broadcast %cst_99 : f32 to vector<6x8xf32>
    %280 = arith.mulf %278, %279 : vector<6x8xf32>
    %cst_100 = arith.constant dense<0xFF800000> : vector<6xf32>
    %281 = vector.multi_reduction <maximumf>, %280, %cst_100 [1] : vector<6x8xf32> to vector<6xf32>
    %282 = vector.shape_cast %281 : vector<6xf32> to vector<6x1xf32>
    %283 = vector.broadcast %282 : vector<6x1xf32> to vector<6x8xf32>
    %284 = arith.subf %280, %283 : vector<6x8xf32>
    %285 = math.exp %284 : vector<6x8xf32>
    %cst_101 = arith.constant dense<0.000000e+00> : vector<6xf32>
    %286 = vector.multi_reduction <add>, %285, %cst_101 [1] : vector<6x8xf32> to vector<6xf32>
    %287 = vector.shape_cast %286 : vector<6xf32> to vector<6x1xf32>
    %288 = tpu.reciprocal %287 {approx = true} : vector<6x1xf32> -> vector<6x1xf32>
    %289 = vector.broadcast %288 : vector<6x1xf32> to vector<6x8xf32>
    %290 = arith.mulf %285, %289 : vector<6x8xf32>
    %291 = vector.broadcast %275 : vector<1x32xf32> to vector<8x32xf32>
    %292 = arith.mulf %234, %291 : vector<8x32xf32>
    %cst_102 = arith.constant dense<0.000000e+00> : vector<6x32xf32>
    %293 = tpu.matmul %290, %292, %cst_102 {dimension_numbers = #tpu.dot_dimension_numbers<[1], [0], [0], [1], [0, 0, 1, 1], [], []>} : vector<6x8xf32>, vector<8x32xf32>, vector<6x32xf32> -> vector<6x32xf32>
    %294 = arith.addf %274, %293 : vector<6x32xf32>
    %295 = vector.extract_strided_slice %8 {offsets = [3, 0], sizes = [1, 32], strides = [1, 1]} : vector<8x32xf32> to vector<1x32xf32>
    %296 = vector.broadcast %295 : vector<1x32xf32> to vector<6x32xf32>
    %297 = arith.mulf %225, %296 : vector<6x32xf32>
    %cst_103 = arith.constant dense<0.000000e+00> : vector<6x8xf32>
    %298 = tpu.matmul %297, %235, %cst_103 {dimension_numbers = #tpu.dot_dimension_numbers<[1], [0], [0], [1], [0, 0, 1, 1], [], []>} : vector<6x32xf32>, vector<32x8xf32>, vector<6x8xf32> -> vector<6x8xf32>
    %cst_104 = arith.constant 5.000000e-01 : f32
    %299 = vector.broadcast %cst_104 : f32 to vector<6x8xf32>
    %300 = arith.mulf %298, %299 : vector<6x8xf32>
    %cst_105 = arith.constant dense<0xFF800000> : vector<6xf32>
    %301 = vector.multi_reduction <maximumf>, %300, %cst_105 [1] : vector<6x8xf32> to vector<6xf32>
    %302 = vector.shape_cast %301 : vector<6xf32> to vector<6x1xf32>
    %303 = vector.broadcast %302 : vector<6x1xf32> to vector<6x8xf32>
    %304 = arith.subf %300, %303 : vector<6x8xf32>
    %305 = math.exp %304 : vector<6x8xf32>
    %cst_106 = arith.constant dense<0.000000e+00> : vector<6xf32>
    %306 = vector.multi_reduction <add>, %305, %cst_106 [1] : vector<6x8xf32> to vector<6xf32>
    %307 = vector.shape_cast %306 : vector<6xf32> to vector<6x1xf32>
    %308 = tpu.reciprocal %307 {approx = true} : vector<6x1xf32> -> vector<6x1xf32>
    %309 = vector.broadcast %308 : vector<6x1xf32> to vector<6x8xf32>
    %310 = arith.mulf %305, %309 : vector<6x8xf32>
    %311 = vector.broadcast %295 : vector<1x32xf32> to vector<8x32xf32>
    %312 = arith.mulf %234, %311 : vector<8x32xf32>
    %cst_107 = arith.constant dense<0.000000e+00> : vector<6x32xf32>
    %313 = tpu.matmul %310, %312, %cst_107 {dimension_numbers = #tpu.dot_dimension_numbers<[1], [0], [0], [1], [0, 0, 1, 1], [], []>} : vector<6x8xf32>, vector<8x32xf32>, vector<6x32xf32> -> vector<6x32xf32>
    %314 = arith.addf %294, %313 : vector<6x32xf32>
    %315 = vector.extract_strided_slice %8 {offsets = [4, 0], sizes = [1, 32], strides = [1, 1]} : vector<8x32xf32> to vector<1x32xf32>
    %316 = vector.broadcast %315 : vector<1x32xf32> to vector<6x32xf32>
    %317 = arith.mulf %225, %316 : vector<6x32xf32>
    %cst_108 = arith.constant dense<0.000000e+00> : vector<6x8xf32>
    %318 = tpu.matmul %317, %235, %cst_108 {dimension_numbers = #tpu.dot_dimension_numbers<[1], [0], [0], [1], [0, 0, 1, 1], [], []>} : vector<6x32xf32>, vector<32x8xf32>, vector<6x8xf32> -> vector<6x8xf32>
    %cst_109 = arith.constant 5.000000e-01 : f32
    %319 = vector.broadcast %cst_109 : f32 to vector<6x8xf32>
    %320 = arith.mulf %318, %319 : vector<6x8xf32>
    %cst_110 = arith.constant dense<0xFF800000> : vector<6xf32>
    %321 = vector.multi_reduction <maximumf>, %320, %cst_110 [1] : vector<6x8xf32> to vector<6xf32>
    %322 = vector.shape_cast %321 : vector<6xf32> to vector<6x1xf32>
    %323 = vector.broadcast %322 : vector<6x1xf32> to vector<6x8xf32>
    %324 = arith.subf %320, %323 : vector<6x8xf32>
    %325 = math.exp %324 : vector<6x8xf32>
    %cst_111 = arith.constant dense<0.000000e+00> : vector<6xf32>
    %326 = vector.multi_reduction <add>, %325, %cst_111 [1] : vector<6x8xf32> to vector<6xf32>
    %327 = vector.shape_cast %326 : vector<6xf32> to vector<6x1xf32>
    %328 = tpu.reciprocal %327 {approx = true} : vector<6x1xf32> -> vector<6x1xf32>
    %329 = vector.broadcast %328 : vector<6x1xf32> to vector<6x8xf32>
    %330 = arith.mulf %325, %329 : vector<6x8xf32>
    %331 = vector.broadcast %315 : vector<1x32xf32> to vector<8x32xf32>
    %332 = arith.mulf %234, %331 : vector<8x32xf32>
    %cst_112 = arith.constant dense<0.000000e+00> : vector<6x32xf32>
    %333 = tpu.matmul %330, %332, %cst_112 {dimension_numbers = #tpu.dot_dimension_numbers<[1], [0], [0], [1], [0, 0, 1, 1], [], []>} : vector<6x8xf32>, vector<8x32xf32>, vector<6x32xf32> -> vector<6x32xf32>
    %334 = arith.addf %314, %333 : vector<6x32xf32>
    %335 = vector.extract_strided_slice %8 {offsets = [5, 0], sizes = [1, 32], strides = [1, 1]} : vector<8x32xf32> to vector<1x32xf32>
    %336 = vector.broadcast %335 : vector<1x32xf32> to vector<6x32xf32>
    %337 = arith.mulf %225, %336 : vector<6x32xf32>
    %cst_113 = arith.constant dense<0.000000e+00> : vector<6x8xf32>
    %338 = tpu.matmul %337, %235, %cst_113 {dimension_numbers = #tpu.dot_dimension_numbers<[1], [0], [0], [1], [0, 0, 1, 1], [], []>} : vector<6x32xf32>, vector<32x8xf32>, vector<6x8xf32> -> vector<6x8xf32>
    %cst_114 = arith.constant 5.000000e-01 : f32
    %339 = vector.broadcast %cst_114 : f32 to vector<6x8xf32>
    %340 = arith.mulf %338, %339 : vector<6x8xf32>
    %cst_115 = arith.constant dense<0xFF800000> : vector<6xf32>
    %341 = vector.multi_reduction <maximumf>, %340, %cst_115 [1] : vector<6x8xf32> to vector<6xf32>
    %342 = vector.shape_cast %341 : vector<6xf32> to vector<6x1xf32>
    %343 = vector.broadcast %342 : vector<6x1xf32> to vector<6x8xf32>
    %344 = arith.subf %340, %343 : vector<6x8xf32>
    %345 = math.exp %344 : vector<6x8xf32>
    %cst_116 = arith.constant dense<0.000000e+00> : vector<6xf32>
    %346 = vector.multi_reduction <add>, %345, %cst_116 [1] : vector<6x8xf32> to vector<6xf32>
    %347 = vector.shape_cast %346 : vector<6xf32> to vector<6x1xf32>
    %348 = tpu.reciprocal %347 {approx = true} : vector<6x1xf32> -> vector<6x1xf32>
    %349 = vector.broadcast %348 : vector<6x1xf32> to vector<6x8xf32>
    %350 = arith.mulf %345, %349 : vector<6x8xf32>
    %351 = vector.broadcast %335 : vector<1x32xf32> to vector<8x32xf32>
    %352 = arith.mulf %234, %351 : vector<8x32xf32>
    %cst_117 = arith.constant dense<0.000000e+00> : vector<6x32xf32>
    %353 = tpu.matmul %350, %352, %cst_117 {dimension_numbers = #tpu.dot_dimension_numbers<[1], [0], [0], [1], [0, 0, 1, 1], [], []>} : vector<6x8xf32>, vector<8x32xf32>, vector<6x32xf32> -> vector<6x32xf32>
    %354 = arith.addf %334, %353 : vector<6x32xf32>
    %355 = vector.extract_strided_slice %8 {offsets = [6, 0], sizes = [1, 32], strides = [1, 1]} : vector<8x32xf32> to vector<1x32xf32>
    %356 = vector.broadcast %355 : vector<1x32xf32> to vector<6x32xf32>
    %357 = arith.mulf %225, %356 : vector<6x32xf32>
    %cst_118 = arith.constant dense<0.000000e+00> : vector<6x8xf32>
    %358 = tpu.matmul %357, %235, %cst_118 {dimension_numbers = #tpu.dot_dimension_numbers<[1], [0], [0], [1], [0, 0, 1, 1], [], []>} : vector<6x32xf32>, vector<32x8xf32>, vector<6x8xf32> -> vector<6x8xf32>
    %cst_119 = arith.constant 5.000000e-01 : f32
    %359 = vector.broadcast %cst_119 : f32 to vector<6x8xf32>
    %360 = arith.mulf %358, %359 : vector<6x8xf32>
    %cst_120 = arith.constant dense<0xFF800000> : vector<6xf32>
    %361 = vector.multi_reduction <maximumf>, %360, %cst_120 [1] : vector<6x8xf32> to vector<6xf32>
    %362 = vector.shape_cast %361 : vector<6xf32> to vector<6x1xf32>
    %363 = vector.broadcast %362 : vector<6x1xf32> to vector<6x8xf32>
    %364 = arith.subf %360, %363 : vector<6x8xf32>
    %365 = math.exp %364 : vector<6x8xf32>
    %cst_121 = arith.constant dense<0.000000e+00> : vector<6xf32>
    %366 = vector.multi_reduction <add>, %365, %cst_121 [1] : vector<6x8xf32> to vector<6xf32>
    %367 = vector.shape_cast %366 : vector<6xf32> to vector<6x1xf32>
    %368 = tpu.reciprocal %367 {approx = true} : vector<6x1xf32> -> vector<6x1xf32>
    %369 = vector.broadcast %368 : vector<6x1xf32> to vector<6x8xf32>
    %370 = arith.mulf %365, %369 : vector<6x8xf32>
    %371 = vector.broadcast %355 : vector<1x32xf32> to vector<8x32xf32>
    %372 = arith.mulf %234, %371 : vector<8x32xf32>
    %cst_122 = arith.constant dense<0.000000e+00> : vector<6x32xf32>
    %373 = tpu.matmul %370, %372, %cst_122 {dimension_numbers = #tpu.dot_dimension_numbers<[1], [0], [0], [1], [0, 0, 1, 1], [], []>} : vector<6x8xf32>, vector<8x32xf32>, vector<6x32xf32> -> vector<6x32xf32>
    %374 = arith.addf %354, %373 : vector<6x32xf32>
    %375 = vector.extract_strided_slice %8 {offsets = [7, 0], sizes = [1, 32], strides = [1, 1]} : vector<8x32xf32> to vector<1x32xf32>
    %376 = vector.broadcast %375 : vector<1x32xf32> to vector<6x32xf32>
    %377 = arith.mulf %225, %376 : vector<6x32xf32>
    %cst_123 = arith.constant dense<0.000000e+00> : vector<6x8xf32>
    %378 = tpu.matmul %377, %235, %cst_123 {dimension_numbers = #tpu.dot_dimension_numbers<[1], [0], [0], [1], [0, 0, 1, 1], [], []>} : vector<6x32xf32>, vector<32x8xf32>, vector<6x8xf32> -> vector<6x8xf32>
    %cst_124 = arith.constant 5.000000e-01 : f32
    %379 = vector.broadcast %cst_124 : f32 to vector<6x8xf32>
    %380 = arith.mulf %378, %379 : vector<6x8xf32>
    %cst_125 = arith.constant dense<0xFF800000> : vector<6xf32>
    %381 = vector.multi_reduction <maximumf>, %380, %cst_125 [1] : vector<6x8xf32> to vector<6xf32>
    %382 = vector.shape_cast %381 : vector<6xf32> to vector<6x1xf32>
    %383 = vector.broadcast %382 : vector<6x1xf32> to vector<6x8xf32>
    %384 = arith.subf %380, %383 : vector<6x8xf32>
    %385 = math.exp %384 : vector<6x8xf32>
    %cst_126 = arith.constant dense<0.000000e+00> : vector<6xf32>
    %386 = vector.multi_reduction <add>, %385, %cst_126 [1] : vector<6x8xf32> to vector<6xf32>
    %387 = vector.shape_cast %386 : vector<6xf32> to vector<6x1xf32>
    %388 = tpu.reciprocal %387 {approx = true} : vector<6x1xf32> -> vector<6x1xf32>
    %389 = vector.broadcast %388 : vector<6x1xf32> to vector<6x8xf32>
    %390 = arith.mulf %385, %389 : vector<6x8xf32>
    %391 = vector.broadcast %375 : vector<1x32xf32> to vector<8x32xf32>
    %392 = arith.mulf %234, %391 : vector<8x32xf32>
    %cst_127 = arith.constant dense<0.000000e+00> : vector<6x32xf32>
    %393 = tpu.matmul %390, %392, %cst_127 {dimension_numbers = #tpu.dot_dimension_numbers<[1], [0], [0], [1], [0, 0, 1, 1], [], []>} : vector<6x8xf32>, vector<8x32xf32>, vector<6x32xf32> -> vector<6x32xf32>
    %394 = arith.addf %374, %393 : vector<6x32xf32>
    %c0_128 = arith.constant 0 : index
    %c0_129 = arith.constant 0 : index
    %c0_130 = arith.constant 0 : index
    %395 = vector.load %arg16[%c0_128, %c0_129, %c0_130] : memref<1x32x32xf32, #tpu.memory_space<vmem>>, vector<1x32x32xf32>
    %396 = vector.shape_cast %395 : vector<1x32x32xf32> to vector<32x32xf32>
    %cst_131 = arith.constant dense<0.000000e+00> : vector<6x32xf32>
    %397 = tpu.matmul %394, %396, %cst_131 {dimension_numbers = #tpu.dot_dimension_numbers<[1], [0], [0], [1], [0, 0, 1, 1], [], []>} : vector<6x32xf32>, vector<32x32xf32>, vector<6x32xf32> -> vector<6x32xf32>
    %c0_132 = arith.constant 0 : index
    %c0_133 = arith.constant 0 : index
    %c0_134 = arith.constant 0 : index
    %398 = vector.load %arg17[%c0_132, %c0_133, %c0_134] : memref<1x1x32xf32, #tpu.memory_space<vmem>>, vector<1x1x32xf32>
    %399 = vector.shape_cast %398 : vector<1x1x32xf32> to vector<1x32xf32>
    %400 = vector.broadcast %399 : vector<1x32xf32> to vector<6x32xf32>
    %401 = arith.addf %397, %400 : vector<6x32xf32>
    %402 = arith.addf %218, %401 : vector<6x32xf32>
    %c0_135 = arith.constant 0 : index
    %c0_136 = arith.constant 0 : index
    %c0_137 = arith.constant 0 : index
    %403 = vector.load %arg18[%c0_135, %c0_136, %c0_137] : memref<1x1x32xf32, #tpu.memory_space<vmem>>, vector<1x1x32xf32>
    %404 = vector.shape_cast %403 : vector<1x1x32xf32> to vector<1x32xf32>
    %c0_138 = arith.constant 0 : index
    %c0_139 = arith.constant 0 : index
    %c0_140 = arith.constant 0 : index
    %405 = vector.load %arg19[%c0_138, %c0_139, %c0_140] : memref<1x1x32xf32, #tpu.memory_space<vmem>>, vector<1x1x32xf32>
    %406 = vector.shape_cast %405 : vector<1x1x32xf32> to vector<1x32xf32>
    %cst_141 = arith.constant dense<0.000000e+00> : vector<6xf32>
    %407 = vector.multi_reduction <add>, %402, %cst_141 [1] : vector<6x32xf32> to vector<6xf32>
    %408 = vector.shape_cast %407 : vector<6xf32> to vector<6x1xf32>
    %cst_142 = arith.constant 3.200000e+01 : f32
    %409 = vector.broadcast %cst_142 : f32 to vector<6x1xf32>
    %410 = arith.divf %408, %409 : vector<6x1xf32>
    %411 = vector.broadcast %410 : vector<6x1xf32> to vector<6x32xf32>
    %412 = arith.subf %402, %411 : vector<6x32xf32>
    %413 = arith.mulf %412, %412 : vector<6x32xf32>
    %cst_143 = arith.constant dense<0.000000e+00> : vector<6xf32>
    %414 = vector.multi_reduction <add>, %413, %cst_143 [1] : vector<6x32xf32> to vector<6xf32>
    %415 = vector.shape_cast %414 : vector<6xf32> to vector<6x1xf32>
    %cst_144 = arith.constant 3.200000e+01 : f32
    %416 = vector.broadcast %cst_144 : f32 to vector<6x1xf32>
    %417 = arith.divf %415, %416 : vector<6x1xf32>
    %cst_145 = arith.constant 9.99999974E-6 : f32
    %418 = vector.broadcast %cst_145 : f32 to vector<6x1xf32>
    %419 = arith.addf %417, %418 : vector<6x1xf32>
    %420 = math.rsqrt %419 : vector<6x1xf32>
    %421 = vector.broadcast %420 : vector<6x1xf32> to vector<6x32xf32>
    %422 = arith.mulf %412, %421 : vector<6x32xf32>
    %423 = vector.broadcast %404 : vector<1x32xf32> to vector<6x32xf32>
    %424 = arith.mulf %422, %423 : vector<6x32xf32>
    %425 = vector.broadcast %406 : vector<1x32xf32> to vector<6x32xf32>
    %426 = arith.addf %424, %425 : vector<6x32xf32>
    %c0_146 = arith.constant 0 : index
    %c0_147 = arith.constant 0 : index
    %c0_148 = arith.constant 0 : index
    %427 = vector.load %arg20[%c0_146, %c0_147, %c0_148] : memref<1x32x2048xf32, #tpu.memory_space<vmem>>, vector<1x32x2048xf32>
    %428 = vector.shape_cast %427 : vector<1x32x2048xf32> to vector<32x2048xf32>
    %cst_149 = arith.constant dense<0.000000e+00> : vector<6x2048xf32>
    %429 = tpu.matmul %426, %428, %cst_149 {dimension_numbers = #tpu.dot_dimension_numbers<[1], [0], [0], [1], [0, 0, 1, 1], [], []>} : vector<6x32xf32>, vector<32x2048xf32>, vector<6x2048xf32> -> vector<6x2048xf32>
    %c0_150 = arith.constant 0 : index
    %c0_151 = arith.constant 0 : index
    %c0_152 = arith.constant 0 : index
    %430 = vector.load %arg21[%c0_150, %c0_151, %c0_152] : memref<1x1x2048xf32, #tpu.memory_space<vmem>>, vector<1x1x2048xf32>
    %431 = vector.shape_cast %430 : vector<1x1x2048xf32> to vector<1x2048xf32>
    %432 = vector.broadcast %431 : vector<1x2048xf32> to vector<6x2048xf32>
    %433 = arith.addf %429, %432 : vector<6x2048xf32>
    %cst_153 = arith.constant 0.000000e+00 : f32
    %434 = vector.broadcast %cst_153 : f32 to vector<6x2048xf32>
    %435 = arith.maximumf %433, %434 : vector<6x2048xf32>
    %c0_154 = arith.constant 0 : index
    %c0_155 = arith.constant 0 : index
    %c0_156 = arith.constant 0 : index
    %436 = vector.load %arg22[%c0_154, %c0_155, %c0_156] : memref<1x2048x32xf32, #tpu.memory_space<vmem>>, vector<1x2048x32xf32>
    %437 = vector.shape_cast %436 : vector<1x2048x32xf32> to vector<2048x32xf32>
    %cst_157 = arith.constant dense<0.000000e+00> : vector<6x32xf32>
    %438 = tpu.matmul %435, %437, %cst_157 {dimension_numbers = #tpu.dot_dimension_numbers<[1], [0], [0], [1], [0, 0, 1, 1], [], []>} : vector<6x2048xf32>, vector<2048x32xf32>, vector<6x32xf32> -> vector<6x32xf32>
    %c0_158 = arith.constant 0 : index
    %c0_159 = arith.constant 0 : index
    %c0_160 = arith.constant 0 : index
    %439 = vector.load %arg23[%c0_158, %c0_159, %c0_160] : memref<1x1x32xf32, #tpu.memory_space<vmem>>, vector<1x1x32xf32>
    %440 = vector.shape_cast %439 : vector<1x1x32xf32> to vector<1x32xf32>
    %441 = vector.broadcast %440 : vector<1x32xf32> to vector<6x32xf32>
    %442 = arith.addf %438, %441 : vector<6x32xf32>
    %443 = arith.addf %426, %442 : vector<6x32xf32>
    %c0_161 = arith.constant 0 : index
    %c0_162 = arith.constant 0 : index
    %c0_163 = arith.constant 0 : index
    %444 = vector.load %arg24[%c0_161, %c0_162, %c0_163] : memref<1x1x32xf32, #tpu.memory_space<vmem>>, vector<1x1x32xf32>
    %445 = vector.shape_cast %444 : vector<1x1x32xf32> to vector<1x32xf32>
    %c0_164 = arith.constant 0 : index
    %c0_165 = arith.constant 0 : index
    %c0_166 = arith.constant 0 : index
    %446 = vector.load %arg25[%c0_164, %c0_165, %c0_166] : memref<1x1x32xf32, #tpu.memory_space<vmem>>, vector<1x1x32xf32>
    %447 = vector.shape_cast %446 : vector<1x1x32xf32> to vector<1x32xf32>
    %cst_167 = arith.constant dense<0.000000e+00> : vector<6xf32>
    %448 = vector.multi_reduction <add>, %443, %cst_167 [1] : vector<6x32xf32> to vector<6xf32>
    %449 = vector.shape_cast %448 : vector<6xf32> to vector<6x1xf32>
    %cst_168 = arith.constant 3.200000e+01 : f32
    %450 = vector.broadcast %cst_168 : f32 to vector<6x1xf32>
    %451 = arith.divf %449, %450 : vector<6x1xf32>
    %452 = vector.broadcast %451 : vector<6x1xf32> to vector<6x32xf32>
    %453 = arith.subf %443, %452 : vector<6x32xf32>
    %454 = arith.mulf %453, %453 : vector<6x32xf32>
    %cst_169 = arith.constant dense<0.000000e+00> : vector<6xf32>
    %455 = vector.multi_reduction <add>, %454, %cst_169 [1] : vector<6x32xf32> to vector<6xf32>
    %456 = vector.shape_cast %455 : vector<6xf32> to vector<6x1xf32>
    %cst_170 = arith.constant 3.200000e+01 : f32
    %457 = vector.broadcast %cst_170 : f32 to vector<6x1xf32>
    %458 = arith.divf %456, %457 : vector<6x1xf32>
    %cst_171 = arith.constant 9.99999974E-6 : f32
    %459 = vector.broadcast %cst_171 : f32 to vector<6x1xf32>
    %460 = arith.addf %458, %459 : vector<6x1xf32>
    %461 = math.rsqrt %460 : vector<6x1xf32>
    %462 = vector.broadcast %461 : vector<6x1xf32> to vector<6x32xf32>
    %463 = arith.mulf %453, %462 : vector<6x32xf32>
    %464 = vector.broadcast %445 : vector<1x32xf32> to vector<6x32xf32>
    %465 = arith.mulf %463, %464 : vector<6x32xf32>
    %466 = vector.broadcast %447 : vector<1x32xf32> to vector<6x32xf32>
    %467 = arith.addf %465, %466 : vector<6x32xf32>
    %c0_172 = arith.constant 0 : index
    %c0_173 = arith.constant 0 : index
    %c0_174 = arith.constant 0 : index
    %468 = vector.load %arg26[%c0_172, %c0_173, %c0_174] : memref<1x6x32xf32, #tpu.memory_space<vmem>>, vector<1x6x32xf32>
    %469 = vector.shape_cast %468 : vector<1x6x32xf32> to vector<6x32xf32>
    %470 = vector.shape_cast %467 : vector<6x32xf32> to vector<1x6x32xf32>
    tpu.vector_store %arg26[%c0_172, %c0_173, %c0_174], %470 {strides = array<i32>} : memref<1x6x32xf32, #tpu.memory_space<vmem>>, vector<1x6x32xf32>,
    return
  }
  func.func @transform_0(%arg0: i32, %arg1: i32) -> (i32, i32, i32) {
    %c0_i32 = arith.constant 0 : i32
    %c0_i32_0 = arith.constant 0 : i32
    %c0_i32_1 = arith.constant 0 : i32
    return %arg0, %c0_i32, %c0_i32_0 : i32, i32, i32
  }
  func.func @transform_1(%arg0: i32, %arg1: i32) -> (i32, i32, i32) {
    %c0_i32 = arith.constant 0 : i32
    %c0_i32_0 = arith.constant 0 : i32
    %c0_i32_1 = arith.constant 0 : i32
    return %arg0, %c0_i32, %c0_i32_0 : i32, i32, i32
  }
  func.func @transform_2(%arg0: i32, %arg1: i32) -> (i32, i32) {
    %c0_i32 = arith.constant 0 : i32
    %c0_i32_0 = arith.constant 0 : i32
    %c0_i32_1 = arith.constant 0 : i32
    return %c0_i32, %c0_i32_0 : i32, i32
  }
  func.func @transform_3(%arg0: i32, %arg1: i32) -> (i32, i32) {
    %c0_i32 = arith.constant 0 : i32
    %c0_i32_0 = arith.constant 0 : i32
    %c0_i32_1 = arith.constant 0 : i32
    return %c0_i32, %c0_i32_0 : i32, i32
  }
  func.func @transform_4(%arg0: i32, %arg1: i32) -> (i32, i32, i32) {
    %c0_i32 = arith.constant 0 : i32
    %c0_i32_0 = arith.constant 0 : i32
    %c0_i32_1 = arith.constant 0 : i32
    return %arg1, %c0_i32, %c0_i32_0 : i32, i32, i32
  }
  func.func @transform_5(%arg0: i32, %arg1: i32) -> (i32, i32, i32) {
    %c0_i32 = arith.constant 0 : i32
    %c0_i32_0 = arith.constant 0 : i32
    %c0_i32_1 = arith.constant 0 : i32
    return %arg1, %c0_i32, %c0_i32_0 : i32, i32, i32
  }
  func.func @transform_6(%arg0: i32, %arg1: i32) -> (i32, i32, i32) {
    %c0_i32 = arith.constant 0 : i32
    %c0_i32_0 = arith.constant 0 : i32
    %c0_i32_1 = arith.constant 0 : i32
    return %arg1, %c0_i32, %c0_i32_0 : i32, i32, i32
  }
  func.func @transform_7(%arg0: i32, %arg1: i32) -> (i32, i32, i32) {
    %c0_i32 = arith.constant 0 : i32
    %c0_i32_0 = arith.constant 0 : i32
    %c0_i32_1 = arith.constant 0 : i32
    return %arg1, %c0_i32, %c0_i32_0 : i32, i32, i32
  }
  func.func @transform_8(%arg0: i32, %arg1: i32) -> (i32, i32, i32) {
    %c0_i32 = arith.constant 0 : i32
    %c0_i32_0 = arith.constant 0 : i32
    %c0_i32_1 = arith.constant 0 : i32
    return %arg1, %c0_i32, %c0_i32_0 : i32, i32, i32
  }
  func.func @transform_9(%arg0: i32, %arg1: i32) -> (i32, i32, i32) {
    %c0_i32 = arith.constant 0 : i32
    %c0_i32_0 = arith.constant 0 : i32
    %c0_i32_1 = arith.constant 0 : i32
    return %arg1, %c0_i32, %c0_i32_0 : i32, i32, i32
  }
  func.func @transform_10(%arg0: i32, %arg1: i32) -> (i32, i32, i32) {
    %c0_i32 = arith.constant 0 : i32
    %c0_i32_0 = arith.constant 0 : i32
    %c0_i32_1 = arith.constant 0 : i32
    return %arg1, %c0_i32, %c0_i32_0 : i32, i32, i32
  }
  func.func @transform_11(%arg0: i32, %arg1: i32) -> (i32, i32, i32) {
    %c0_i32 = arith.constant 0 : i32
    %c0_i32_0 = arith.constant 0 : i32
    %c0_i32_1 = arith.constant 0 : i32
    return %arg1, %c0_i32, %c0_i32_0 : i32, i32, i32
  }
  func.func @transform_12(%arg0: i32, %arg1: i32) -> (i32, i32, i32) {
    %c0_i32 = arith.constant 0 : i32
    %c0_i32_0 = arith.constant 0 : i32
    %c0_i32_1 = arith.constant 0 : i32
    return %arg1, %c0_i32, %c0_i32_0 : i32, i32, i32
  }
  func.func @transform_13(%arg0: i32, %arg1: i32) -> (i32, i32, i32) {
    %c0_i32 = arith.constant 0 : i32
    %c0_i32_0 = arith.constant 0 : i32
    %c0_i32_1 = arith.constant 0 : i32
    return %arg1, %c0_i32, %c0_i32_0 : i32, i32, i32
  }
  func.func @transform_14(%arg0: i32, %arg1: i32) -> (i32, i32, i32) {
    %c0_i32 = arith.constant 0 : i32
    %c0_i32_0 = arith.constant 0 : i32
    %c0_i32_1 = arith.constant 0 : i32
    return %arg1, %c0_i32, %c0_i32_0 : i32, i32, i32
  }
  func.func @transform_15(%arg0: i32, %arg1: i32) -> (i32, i32, i32) {
    %c0_i32 = arith.constant 0 : i32
    %c0_i32_0 = arith.constant 0 : i32
    %c0_i32_1 = arith.constant 0 : i32
    return %arg1, %c0_i32, %c0_i32_0 : i32, i32, i32
  }
  func.func @transform_16(%arg0: i32, %arg1: i32) -> (i32, i32, i32) {
    %c0_i32 = arith.constant 0 : i32
    %c0_i32_0 = arith.constant 0 : i32
    %c0_i32_1 = arith.constant 0 : i32
    return %arg1, %c0_i32, %c0_i32_0 : i32, i32, i32
  }
  func.func @transform_17(%arg0: i32, %arg1: i32) -> (i32, i32, i32) {
    %c0_i32 = arith.constant 0 : i32
    %c0_i32_0 = arith.constant 0 : i32
    %c0_i32_1 = arith.constant 0 : i32
    return %arg1, %c0_i32, %c0_i32_0 : i32, i32, i32
  }
  func.func @transform_18(%arg0: i32, %arg1: i32) -> (i32, i32, i32) {
    %c0_i32 = arith.constant 0 : i32
    %c0_i32_0 = arith.constant 0 : i32
    %c0_i32_1 = arith.constant 0 : i32
    return %arg1, %c0_i32, %c0_i32_0 : i32, i32, i32
  }
  func.func @transform_19(%arg0: i32, %arg1: i32) -> (i32, i32, i32) {
    %c0_i32 = arith.constant 0 : i32
    %c0_i32_0 = arith.constant 0 : i32
    %c0_i32_1 = arith.constant 0 : i32
    return %arg1, %c0_i32, %c0_i32_0 : i32, i32, i32
  }
  func.func @transform_20(%arg0: i32, %arg1: i32) -> (i32, i32, i32) {
    %c0_i32 = arith.constant 0 : i32
    %c0_i32_0 = arith.constant 0 : i32
    %c0_i32_1 = arith.constant 0 : i32
    return %arg1, %c0_i32, %c0_i32_0 : i32, i32, i32
  }
  func.func @transform_21(%arg0: i32, %arg1: i32) -> (i32, i32, i32) {
    %c0_i32 = arith.constant 0 : i32
    %c0_i32_0 = arith.constant 0 : i32
    %c0_i32_1 = arith.constant 0 : i32
    return %arg1, %c0_i32, %c0_i32_0 : i32, i32, i32
  }
  func.func @transform_22(%arg0: i32, %arg1: i32) -> (i32, i32, i32) {
    %c0_i32 = arith.constant 0 : i32
    %c0_i32_0 = arith.constant 0 : i32
    %c0_i32_1 = arith.constant 0 : i32
    return %arg1, %c0_i32, %c0_i32_0 : i32, i32, i32
  }
  func.func @transform_23(%arg0: i32, %arg1: i32) -> (i32, i32, i32) {
    %c0_i32 = arith.constant 0 : i32
    %c0_i32_0 = arith.constant 0 : i32
    %c0_i32_1 = arith.constant 0 : i32
    return %arg1, %c0_i32, %c0_i32_0 : i32, i32, i32
  }
  func.func @transform_24(%arg0: i32, %arg1: i32) -> (i32, i32, i32) {
    %c0_i32 = arith.constant 0 : i32
    %c0_i32_0 = arith.constant 0 : i32
    %c0_i32_1 = arith.constant 0 : i32
    return %arg0, %c0_i32, %c0_i32_0 : i32, i32, i32
  }
}

module attributes {stable_mosaic.version = 11 : i64} {
  func.func @_norm_head_kernel(%arg0: i32, %arg1: memref<12x32xf32, #tpu.memory_space<vmem>>, %arg2: memref<1x32xf32, #tpu.memory_space<vmem>>, %arg3: memref<1x32xf32, #tpu.memory_space<vmem>>, %arg4: memref<32x128xf32, #tpu.memory_space<vmem>>, %arg5: memref<1x128xf32, #tpu.memory_space<vmem>>, %arg6: memref<12x128xf32, #tpu.memory_space<vmem>>) attributes {dimension_semantics = [#tpu.dimension_semantics<parallel>], iteration_bounds = array<i64: 1>, scalar_prefetch = 0 : i64, scratch_operands = 0 : i64, tpu.core_type = #tpu.core_type<tc>, window_params = [{pipeline_mode = #tpu.pipeline_mode<synchronous>, transform_indices = @transform_0, window_bounds = array<i64: 12, 32>}, {pipeline_mode = #tpu.pipeline_mode<synchronous>, transform_indices = @transform_1, window_bounds = array<i64: 1, 32>}, {pipeline_mode = #tpu.pipeline_mode<synchronous>, transform_indices = @transform_2, window_bounds = array<i64: 1, 32>}, {transform_indices = @transform_3, window_bounds = array<i64: 32, 128>}, {transform_indices = @transform_4, window_bounds = array<i64: 1, 128>}, {transform_indices = @transform_5, window_bounds = array<i64: 12, 128>}]} {
    %c0 = arith.constant 0 : index
    %c0_0 = arith.constant 0 : index
    %0 = vector.load %arg1[%c0, %c0_0] : memref<12x32xf32, #tpu.memory_space<vmem>>, vector<12x32xf32>
    %c0_1 = arith.constant 0 : index
    %c0_2 = arith.constant 0 : index
    %1 = vector.load %arg2[%c0_1, %c0_2] : memref<1x32xf32, #tpu.memory_space<vmem>>, vector<1x32xf32>
    %c0_3 = arith.constant 0 : index
    %c0_4 = arith.constant 0 : index
    %2 = vector.load %arg3[%c0_3, %c0_4] : memref<1x32xf32, #tpu.memory_space<vmem>>, vector<1x32xf32>
    %cst = arith.constant dense<0.000000e+00> : vector<12xf32>
    %3 = vector.multi_reduction <add>, %0, %cst [1] : vector<12x32xf32> to vector<12xf32>
    %4 = vector.shape_cast %3 : vector<12xf32> to vector<12x1xf32>
    %cst_5 = arith.constant 3.200000e+01 : f32
    %5 = vector.broadcast %cst_5 : f32 to vector<12x1xf32>
    %6 = arith.divf %4, %5 : vector<12x1xf32>
    %7 = vector.broadcast %6 : vector<12x1xf32> to vector<12x32xf32>
    %8 = arith.subf %0, %7 : vector<12x32xf32>
    %9 = arith.mulf %8, %8 : vector<12x32xf32>
    %cst_6 = arith.constant dense<0.000000e+00> : vector<12xf32>
    %10 = vector.multi_reduction <add>, %9, %cst_6 [1] : vector<12x32xf32> to vector<12xf32>
    %11 = vector.shape_cast %10 : vector<12xf32> to vector<12x1xf32>
    %cst_7 = arith.constant 3.200000e+01 : f32
    %12 = vector.broadcast %cst_7 : f32 to vector<12x1xf32>
    %13 = arith.divf %11, %12 : vector<12x1xf32>
    %cst_8 = arith.constant 9.99999974E-6 : f32
    %14 = vector.broadcast %cst_8 : f32 to vector<12x1xf32>
    %15 = arith.addf %13, %14 : vector<12x1xf32>
    %16 = math.rsqrt %15 : vector<12x1xf32>
    %17 = vector.broadcast %16 : vector<12x1xf32> to vector<12x32xf32>
    %18 = arith.mulf %8, %17 : vector<12x32xf32>
    %19 = vector.broadcast %1 : vector<1x32xf32> to vector<12x32xf32>
    %20 = arith.mulf %18, %19 : vector<12x32xf32>
    %21 = vector.broadcast %2 : vector<1x32xf32> to vector<12x32xf32>
    %22 = arith.addf %20, %21 : vector<12x32xf32>
    %c0_9 = arith.constant 0 : index
    %c0_10 = arith.constant 0 : index
    %23 = vector.load %arg4[%c0_9, %c0_10] : memref<32x128xf32, #tpu.memory_space<vmem>>, vector<32x128xf32>
    %cst_11 = arith.constant dense<0.000000e+00> : vector<12x128xf32>
    %24 = tpu.matmul %22, %23, %cst_11 {dimension_numbers = #tpu.dot_dimension_numbers<[1], [0], [0], [1], [0, 0, 1, 1], [], []>} : vector<12x32xf32>, vector<32x128xf32>, vector<12x128xf32> -> vector<12x128xf32>
    %c0_12 = arith.constant 0 : index
    %c0_13 = arith.constant 0 : index
    %25 = vector.load %arg5[%c0_12, %c0_13] : memref<1x128xf32, #tpu.memory_space<vmem>>, vector<1x128xf32>
    %26 = vector.broadcast %25 : vector<1x128xf32> to vector<12x128xf32>
    %27 = arith.addf %24, %26 : vector<12x128xf32>
    %c0_14 = arith.constant 0 : index
    %c0_15 = arith.constant 0 : index
    %28 = vector.load %arg6[%c0_14, %c0_15] : memref<12x128xf32, #tpu.memory_space<vmem>>, vector<12x128xf32>
    tpu.vector_store %arg6[%c0_14, %c0_15], %27 {strides = array<i32>} : memref<12x128xf32, #tpu.memory_space<vmem>>, vector<12x128xf32>,
    return
  }
  func.func @transform_0(%arg0: i32) -> (i32, i32) {
    %c0_i32 = arith.constant 0 : i32
    %c0_i32_0 = arith.constant 0 : i32
    %c0_i32_1 = arith.constant 0 : i32
    return %c0_i32, %c0_i32_0 : i32, i32
  }
  func.func @transform_1(%arg0: i32) -> (i32, i32) {
    %c0_i32 = arith.constant 0 : i32
    %c0_i32_0 = arith.constant 0 : i32
    %c0_i32_1 = arith.constant 0 : i32
    return %c0_i32, %c0_i32_0 : i32, i32
  }
  func.func @transform_2(%arg0: i32) -> (i32, i32) {
    %c0_i32 = arith.constant 0 : i32
    %c0_i32_0 = arith.constant 0 : i32
    %c0_i32_1 = arith.constant 0 : i32
    return %c0_i32, %c0_i32_0 : i32, i32
  }
  func.func @transform_3(%arg0: i32) -> (i32, i32) {
    %c0_i32 = arith.constant 0 : i32
    %c0_i32_0 = arith.constant 0 : i32
    return %c0_i32, %arg0 : i32, i32
  }
  func.func @transform_4(%arg0: i32) -> (i32, i32) {
    %c0_i32 = arith.constant 0 : i32
    %c0_i32_0 = arith.constant 0 : i32
    return %c0_i32, %arg0 : i32, i32
  }
  func.func @transform_5(%arg0: i32) -> (i32, i32) {
    %c0_i32 = arith.constant 0 : i32
    %c0_i32_0 = arith.constant 0 : i32
    return %c0_i32, %arg0 : i32, i32
  }
}

</mosaic_0001>

<bundles_post_ra>
// kernel: seq2seq_forward.3
= control target key start
LH: loop header
LB: loop body
LE: loop exit
PB: predicated region body
PF: predicated region fallthrough
CT: control target
= control target key end

     0   :  { %s3023_s24 = smov 0   ;;  %s3025_s25 = smov 0   ;;  %s3717_s0 = inlined_call_operand.vmem [shape: f32[2,8,32], index: 0, kind: input, shape index: {}]   ;;  %s3718_s1 = inlined_call_operand.vmem [shape: f32[8,8], index: 1, kind: input, shape index: {}]   ;;  %s3719_s2 = inlined_call_operand.vmem [shape: f32[8,32], index: 2, kind: input, shape index: {}]   ;;  %s3720_s3 = inlined_call_operand.vmem [shape: f32[6,32,96], index: 3, kind: input, shape index: {}]   ;;  %s3721_s4 = inlined_call_operand.vmem [shape: f32[6,1,96], index: 4, kind: input, shape index: {}]   ;;  %s3722_s5 = inlined_call_operand.vmem [shape: f32[6,32,32], index: 5, kind: input, shape index: {}]   ;;  %s3723_s6 = inlined_call_operand.vmem [shape: f32[6,1,32], index: 6, kind: input, shape index: {}]   ;;  %s3724_s7 = inlined_call_operand.vmem [shape: f32[6,1,32], index: 7, kind: input, shape index: {}]   ;;  %s3725_s8 = inlined_call_operand.vmem [shape: f32[6,1,32], index: 8, kind: input, shape index: {}]   ;;  %s3726_s9 = inlined_call_operand.vmem [shape: f32[6,32,2048], index: 9, kind: input, shape index: {}]   ;;  %s3727_s10 = inlined_call_operand.vmem [shape: f32[6,1,2048], index: 10, kind: input, shape index: {}]   ;;  %s3728_s11 = inlined_call_operand.vmem [shape: f32[6,2048,32], index: 11, kind: input, shape index: {}]   ;;  %s3729_s12 = inlined_call_operand.vmem [shape: f32[6,1,32], index: 12, kind: input, shape index: {}]   ;;  %s3730_s13 = inlined_call_operand.vmem [shape: f32[6,1,32], index: 13, kind: input, shape index: {}]   ;;  %s3731_s14 = inlined_call_operand.vmem [shape: f32[6,1,32], index: 14, kind: input, shape index: {}]   ;;  %s3732_s15 = inlined_call_operand.vmem [shape: f32[1,32], index: 15, kind: input, shape index: {}]   ;;  %s3733_s16 = inlined_call_operand.vmem [shape: f32[1,32], index: 16, kind: input, shape index: {}]   ;;  %s3734_s17 = inlined_call_operand.vmem [shape: f32[2,8,32], index: 17, kind: output, shape index: {}]  }
   0x1   :  { %3740 = sst [smem:[#allocation9_spill]] %s3717_s0  ;;  %s3027_s26 = smov 0  }
   0x2   :  { %3741 = sst [smem:[#allocation10_spill]] %s3718_s1  ;;  %s3029_s27 = smov 0  }
   0x3   :  { %3742 = sst [smem:[#allocation11_spill]] %s3719_s2  ;;  %s3031_s28 = smov 0  }
   0x4   :  { %3743 = sst [smem:[#allocation12_spill]] %s3720_s3 }
   0x5   :  { %3744 = sst [smem:[#allocation13_spill]] %s3722_s5 }
   0x6   :  { %3745 = sst [smem:[#allocation14_spill]] %s3726_s9 }
   0x7   :  { %3746 = sst [smem:[#allocation15_spill]] %s3727_s10 }
   0x8   :  { %3747 = sst [smem:[#allocation16_spill]] %s3731_s14 }
   0x9   :  { %3748 = sst [smem:[#allocation17_spill]] %s3732_s15 }
   0xa   :  { %3749 = sst [smem:[#allocation18_spill]] %s3733_s16 }
   0xb   :  { %3750 = sst [smem:[#allocation19_spill]] %s3734_s17 }
   0xc LB: > { %3751 = sst [smem:[#allocation2_spill]] %s2912_s24  ;;  %s36_s29 = sadd.s32 1, %s2920_s26  ;;  %s2928_s28 = sphi %s3031_s28, %s27_s28   ;;  %s2924_s27 = sphi %s3029_s27, %s3781_s27   ;;  %s2920_s26 = sphi %s3027_s26, %s3780_s26   ;;  %s2916_s25 = sphi %s3025_s25, %s3779_s25   ;;  %s2912_s24 = sphi %s3023_s24, %s3778_s24  }
   0xd   : > { %3752 = sst [smem:[#allocation3_spill]] %s2920_s26  ;;  %s39_s0 = sadd.s32 1, %s2924_s27 }
   0xe   : > { %3753 = sst [smem:[#allocation4_spill]] %s2924_s27  ;;  %p37_p0 = scmp.ge.s32.totalorder %s36_s29, 6 }
   0xf   : > { %3754 = sst [smem:[#allocation5_spill]] %s2928_s28  ;;  %p2717_p1 = scmp.ge.s32.totalorder %s2928_s28, 1 }
  0x10   : > { %p603_p2 = scmp.lt.s32.totalorder %s2928_s28, 13  ;;  %s3783_s29 = smov (%p37_p0, %s36_s29), 0 }
  0x11   : > { %3755 = sst [smem:[#allocation6_spill]] %s3783_s29  ;;  %s3785_s0 = smov (!%p37_p0, %s39_s0), %s2924_s27 }
  0x12   : > { %p604_p3 = pnand %p2717_p1, %p603_p2  ;;  %p41_p4 = scmp.ge.s32.totalorder %s3785_s0, 2 }
  0x14   : > { %s3787_s0 = smov (%p41_p4, %s3785_s0), 0  ;;  %607 = sbr.rel (%p604_p3) target bundleno = 2199 (0x897), region = 88 }
  0x15   : > { %3756 = sst [smem:[#allocation7_spill]] %s3787_s0 }
  0x19   : > { %p698_p5 = scmp.lt.s32.totalorder %s2916_s25, 1  ;;  %p702_p6 = scmp.lt.s32.totalorder %s2912_s24, 5 }
  0x1a   : > { %s3757_s20 = sld [smem:[#allocation9_spill]] }
  0x1b   : > { %s3789_s25 = smov (!%p698_p5, %s2916_s25), 1  ;;  %s3758_s3 = sld [smem:[#allocation12_spill]] }
  0x1c   : > { %s3057_s30 = scalar_select %p702_p6, %s2912_s24, 5 }
  0x1d   : > { %s2718_s18 = sshll.u32 %s3789_s25, 3  ;;  %s3759_s5 = sld [smem:[#allocation13_spill]] }
  0x1e   : > { %s2774_s22 = sshll.u32 %s3057_s30, 5  ;;  %s2725_s26 = sshll.u32 %s3057_s30, 4 }
  0x1f   : > { %s3760_s9 = sld [smem:[#allocation14_spill]]  ;;  %s2777_s25 = sshll.u32 %s3057_s30, 11 }
  0x20   : > { %s701_s21 = scalar_lea.vmem %s3757_s20, %s2718_s18  ;;  %s3761_s10 = sld [smem:[#allocation15_spill]] }
  0x21   : > { %s706_s29 = scalar_lea.vmem %s3758_s3, %s2774_s22  ;;  %s2776_s3 = sshll.u32 %s3057_s30, 9 }
  0x22   : > { %s740_s20 = scalar_lea.vmem %s3729_s12, %s3057_s30  ;;  %s3107_s0 = scalar_lea.vmem %s3728_s11, %s2777_s25 }
  0x23   : > { %s3073_s2 = scalar_lea.vmem %s3759_s5, %s2774_s22  ;;  %s3765_s19 = sld [smem:[#allocation2_spill]] }
  0x25   : > { %s3092_s15 = scalar_lea.vmem %s3760_s9, %s2776_s3  ;;  %s743_s3 = scalar_lea.vmem %s3730_s13, %s3057_s30 }
  0x26   : > { %s3097_s24 = scalar_lea.vmem %s3761_s10, %s2725_s26  ;;  %s3763_s9 = sld [smem:[#allocation16_spill]] }
  0x27   : > { %3762 = sst [smem:[#allocation8_spill]] %s3097_s24 }
  0x28   : > { %s3764_s10 = sld [smem:[#allocation19_spill]] }
  0x29   : > { %p2729_p7 = scmp.ne.s32.totalorder %s3765_s19, 0 }
  0x2b   : > { %754 = sbr.rel (%p2729_p7) target bundleno = 50 (0x32), region = 92 }
  0x2c   : > { %s746_s16 = scalar_lea.vmem %s3763_s9, %s3057_s30 }
  0x2e   : > { %s3120_s24 = scalar_lea.vmem %s3764_s10, %s2718_s18 }
  0x30   : > { %v755_v0 = vld [vmem:[%s701_s21] sm:$0xff]  ;;  %vm756_vm0 = vcmask 261120  }
  0x31   : > { %757 = vst.msk [vmem:[%s3120_s24] sm:$0xff] %vm756_vm0, %v755_v0 }
  0x32 PF: > { %v764_v1 = vld [vmem:[%s706_s29 + $0x18] sm:$0xff]  ;;  %v763_v2 = vld [vmem:[%s706_s29 + $0x10] sm:$0xff]  ;;  %s3766_s9 = sld [smem:[#allocation11_spill]]  ;;  %v762_v4 = vld [vmem:[%s706_s29 + $0x8] sm:$0xff]  ;;  %vm1101_vm1 = vcmask 261120   ;;  %s2930_s10 = smov 64  }
  0x33   : > { %1117 = vmatpush.msra.mxu0 %v764_v1  ;;  %v761_v5 = vld [vmem:[%s706_s29] sm:$0xff]  ;;  %s3767_s21 = scalar_lea.vmem %s3721_s4, %s3057_s30  ;;  %s2931_s23 = smov 96   ;;  %vm1157_vm2 = vcmask 64512  }
  0x34   : > { %v2841_v10 = vld [vmem:[%s3767_s21] ss:$0 sm:$0xff]  ;;  %s3768_s14 = sld [smem:[#allocation10_spill]]  ;;  %s3769_s27 = scalar_lea.vmem %s3723_s6, %s3057_s30 }
  0x35   : > { %1118 = vmatpush.msra.mxu0 %v763_v2  ;;  %s3770_s19 = scalar_lea.vmem %s3724_s7, %s3057_s30  ;;  %s3774_s25 = sld [smem:[#allocation2_spill]] }
  0x36   : > { %s3775_s1 = sld [smem:[#allocation17_spill]] }
  0x37   : > { %1119 = vmatpush.msra.mxu0 %v762_v4 }
  0x38   : > { %v3127_v3 = vld [vmem:[%s3766_s9] sm:$0xff]  ;;  %s3771_s9 = scalar_lea.vmem %s3725_s8, %s3057_s30 }
  0x39   : > { %v1125_v6 = vperm.slane %v3127_v3, 0  ;;  %v1174_v7 = vperm.slane %v3127_v3, 1  ;;  %v3132_v8 = vld [vmem:[%s3120_s24] sm:$0xff]  ;;  %1120 = vmatpush.msra.mxu0 %v761_v5  ;;  %v1271_v9 = vperm.slane %v3127_v3, 2  ;;  %v1342_v13 = vperm.slane %v3127_v3, 3 }
  0x3a   : > { %2730 = vmatmul.msk.f32.vlgmr.msra.gmra.mxu0 %vm1101_vm1, %v3132_v8  ;;  %v1484_v18 = vperm.slane %v3127_v3, 5  ;;  %v1413_v21 = vperm.slane %v3127_v3, 4  ;;  %v1626_v22 = vperm.slane %v3127_v3, 7  ;;  %v1555_v25 = vperm.slane %v3127_v3, 6  ;;  %v759_v28 = vld [vmem:[%s3768_s14] sm:$0xff] }
  0x3b   : > { %1170 = vrot.lane.b32.xlu1 %v1125_v6, %s2930_s10  ;;  %1213 = vrot.lane.b32.xlu2 %v1174_v7, %s2930_s10  ;;  %p2488_p8 = scmp.eq.s32.totalorder %s3774_s25, 5 }
  0x3d   : > { %s2521_s30 = scalar_select %p2488_p8, 1, 0 }
  0x43   : > { %1310 = vrot.lane.b32.xlu1 %v1271_v9, %s2930_s10 }
  0x95   : > { %v1214_v60 = vpop.permute.xlu2 %1213 }
  0xad   : > { %v1171_v61 = vpop.permute.xlu1 %1170 }
  0xb5   : > { %v1311_v1 = vpop.permute.xlu1 %1310 }
  0xb7   : > { %v1122_v11 = vpop.f32.mrf.mxu0 }
  0xb8   : > { %v3145_v12 = vadd.f32 %v2841_v10, %v1122_v11 }
  0xba   : > { %1128 = vrot.lane.b32.xlu0 %v3145_v12, %s2931_s23  ;;  %v1126_v15 = vmul.f32 %v1125_v6, %v3145_v12  ;;  %v1175_v16 = vmul.f32 %v1174_v7, %v3145_v12  ;;  %v1343_v17 = vmul.f32 %v1342_v13, %v3145_v12  ;;  %v1272_v19 = vmul.f32 %v1271_v9, %v3145_v12 }
  0xbb   : > { %v1485_v20 = vmul.f32 %v1484_v18, %v3145_v12  ;;  %v1414_v23 = vmul.f32 %v1413_v21, %v3145_v12  ;;  %v1627_v24 = vmul.f32 %v1626_v22, %v3145_v12  ;;  %v1556_v26 = vmul.f32 %v1555_v25, %v3145_v12 }
  0xbc   : > { %v1173_v62 = vmul.f32 %v1171_v61, %v3145_v12  ;;  %v1216_v63 = vmul.f32 %v1214_v60, %v3145_v12 }
  0xbe   : > { %v2821_v0 = vpack.i.bf16 %v1173_v62, %v1216_v63 }
 0x12c   : > { %v1129_v14 = vpop.permute.xlu0 %1128 }
 0x12d   : > { %2731 = vmatpush.xpose.msk.msra.mxu1 %vm1101_vm1, %v1129_v14  ;;  %2733 = vmatpush.xpose.msk.msra.mxu2 %vm1101_vm1, %v1129_v14 }
 0x12e   : > { %2740 = vmatpush.xpose.msk.msrb.mxu0 %vm1101_vm1, %v1129_v14 }
 0x130   : > { %2732 = vmatmul.msk.f32.vlgmr.msra.gmra.mxu1 %vm1101_vm1, %v1126_v15  ;;  %2734 = vmatmul.msk.f32.vlgmr.msra.gmra.mxu2 %vm1101_vm1, %v1175_v16 }
 0x131   : > { %2737 = vmatpush.xpose.msk.msrb.mxu1 %vm1101_vm1, %v1129_v14  ;;  %2741 = vmatmul.msk.f32.vlgmr.msrb.gmra.mxu0 %vm1101_vm1, %v1343_v17 }
 0x132   : > { %2746 = vmatpush.xpose.msk.msra.mxu0 %vm1101_vm1, %v1129_v14 }
 0x135   : > { %2743 = vmatpush.xpose.msk.msra.mxu1 %vm1101_vm1, %v1129_v14 }
 0x136   : > { %2752 = vmatpush.xpose.msk.msrb.mxu0 %vm1101_vm1, %v1129_v14 }
 0x138   : > { %2738 = vmatmul.msk.f32.vlgmr.msrb.gmra.mxu1 %vm1101_vm1, %v1272_v19 }
 0x139   : > { %2747 = vmatmul.msk.f32.vlgmr.msra.gmra.mxu0 %vm1101_vm1, %v1485_v20  ;;  %2749 = vmatpush.xpose.msk.msrb.mxu1 %vm1101_vm1, %v1129_v14 }
 0x140   : > { %2744 = vmatmul.msk.f32.vlgmr.msra.gmra.mxu1 %vm1101_vm1, %v1414_v23 }
 0x141   : > { %2753 = vmatmul.msk.f32.vlgmr.msrb.gmra.mxu0 %vm1101_vm1, %v1627_v24 }
 0x148   : > { %2750 = vmatmul.msk.f32.vlgmr.msrb.gmra.mxu1 %vm1101_vm1, %v1556_v26 }
 0x1ad   : > { %v1152_v27 = vpop.f32.mrf.mxu1 }
 0x1ae   : > { %v1155_v29 = vmul.f32 0.5, %v1152_v27  ;;  %v1364_v30 = vpop.f32.mrf.mxu0 }
 0x1af   : > { %v1367_v31 = vmul.f32 0.5, %v1364_v30 }
 0x1b0   : > { %v3182_v32 = vadd.f32 %v1155_v29, %v759_v28 }
 0x1b1   : > { %v1368_v33 = vadd.f32 %v1367_v31, %v759_v28 }
 0x1b2   : > { %v1158_v34 = vsel %vm1157_vm2, %v3182_v32, -inf }
 0x1b3   : > { %v1369_v35 = vsel %vm1157_vm2, %v1368_v33, -inf  ;;  %v1196_v36 = vpop.f32.mrf.mxu2  ;;  %1159 = vmax.xlane.f32.xlu1 %v1158_v34 }
 0x1b4   : > { %1370 = vmax.xlane.f32.xlu2 %v1369_v35  ;;  %v1199_v37 = vmul.f32 0.5, %v1196_v36 }
 0x1b5   : > { %v1293_v38 = vpop.f32.mrf.mxu1 }
 0x1b6   : > { %v1296_v39 = vmul.f32 0.5, %v1293_v38  ;;  %v1506_v40 = vpop.f32.mrf.mxu0  ;;  %v1200_v41 = vadd.f32 %v1199_v37, %v759_v28 }
 0x1b7   : > { %v1509_v44 = vmul.f32 0.5, %v1506_v40 }
 0x1b8   : > { %v1201_v42 = vsel %vm1157_vm2, %v1200_v41, -inf  ;;  %v1297_v43 = vadd.f32 %v1296_v39, %v759_v28 }
 0x1b9   : > { %1202 = vmax.xlane.f32.xlu0 %v1201_v42  ;;  %v1510_v47 = vadd.f32 %v1509_v44, %v759_v28 }
 0x1ba   : > { %v1298_v45 = vsel %vm1157_vm2, %v1297_v43, -inf }
 0x1bb   : > { %1299 = vmax.xlane.f32.xlu1 %v1298_v45  ;;  %v1511_v52 = vsel %vm1157_vm2, %v1510_v47, -inf }
 0x1bd   : > { %v1435_v48 = vpop.f32.mrf.mxu1 }
 0x1be   : > { %v1648_v46 = vpop.f32.mrf.mxu0  ;;  %v1438_v51 = vmul.f32 0.5, %v1435_v48 }
 0x1bf   : > { %v1651_v49 = vmul.f32 0.5, %v1648_v46 }
 0x1c0   : > { %v1439_v54 = vadd.f32 %v1438_v51, %v759_v28 }
 0x1c1   : > { %v3189_v50 = vadd.f32 %v1651_v49, %v759_v28 }
 0x1c2   : > { %v1440_v55 = vsel %vm1157_vm2, %v1439_v54, -inf }
 0x1c3   : > { %v1653_v53 = vsel %vm1157_vm2, %v3189_v50, -inf  ;;  %1512 = vmax.xlane.f32.xlu1 %v1511_v52 }
 0x1c4   : > { %1654 = vmax.xlane.f32.xlu0 %v1653_v53 }
 0x1c5   : > { %v1577_v56 = vpop.f32.mrf.mxu1 }
 0x1c6   : > { %v1580_v57 = vmul.f32 0.5, %v1577_v56 }
 0x1c8   : > { %v3201_v58 = vadd.f32 %v1580_v57, %v759_v28 }
 0x1ca   : > { %v1582_v59 = vsel %vm1157_vm2, %v3201_v58, -inf }
 0x1cb   : > { %1441 = vmax.xlane.f32.xlu1 %v1440_v55 }
 0x1cc   : > { %1594 = vrot.lane.b32.xlu2 %v1555_v25, %s2930_s10 }
 0x1d8   : > { %1381 = vrot.lane.b32.xlu0 %v1342_v13, %s2930_s10 }
 0x1e4   : > { %1452 = vrot.lane.b32.xlu1 %v1413_v21, %s2930_s10 }
 0x1ec   : > { %1523 = vrot.lane.b32.xlu1 %v1484_v18, %s2930_s10 }
 0x1f4   : > { %1665 = vrot.lane.b32.xlu1 %v1626_v22, %s2930_s10 }
 0x1f5   : > { %1583 = vmax.xlane.f32.xlu2 %v1582_v59 }
 0x20d   : > { %2822 = vrot.lane.b32.xlu2 %v2821_v0, %s2930_s10 }
 0x226   : > { %v1160_v2 = vpop.xlane.xlu1 %1159 }
 0x227   : > { %v1371_v3 = vpop.xlane.xlu2 %1370  ;;  %v1161_v42 = vsub.f32 %v3182_v32, %v1160_v2 }
 0x228   : > { %v1372_v4 = vsub.f32 %v1368_v33, %v1371_v3  ;;  %v1313_v33 = vmul.f32 %v1311_v1, %v3145_v12 }
 0x229   : > { %v1162_v45 = vmul.f32 1.442695, %v1161_v42 }
 0x22a   : > { %v1373_v5 = vmul.f32 1.442695, %v1372_v4 }
 0x22c   : > { %2850 = vpow2.f32 %v1373_v5  ;;  %v1203_v6 = vpop.xlane.xlu0 %1202 }
 0x22d   : > { %v1204_v7 = vsub.f32 %v1200_v41, %v1203_v6 }
 0x22e   : > { %v1300_v9 = vpop.xlane.xlu1 %1299 }
 0x22f   : > { %v1205_v10 = vmul.f32 1.442695, %v1204_v7  ;;  %v1301_v11 = vsub.f32 %v1297_v43, %v1300_v9  ;;  %v1595_v40 = vpop.permute.xlu2 %1594 }
 0x230   : > { %v1597_v59 = vmul.f32 %v1595_v40, %v3145_v12 }
 0x231   : > { %v1302_v13 = vmul.f32 1.442695, %v1301_v11  ;;  %2852 = vpow2.f32 %v1205_v10 }
 0x232   : > { %v3209_v14 = vpop.eup %2850 }
 0x233   : > { %2854 = vpow2.f32 %v1302_v13  ;;  %v1375_v15 = vsel %vm1157_vm2, %v3209_v14, 0.0 }
 0x234   : > { %1376 = vadd.xlane.f32.xlu0 %v1375_v15 }
 0x236   : > { %v1513_v16 = vpop.xlane.xlu1 %1512 }
 0x237   : > { %v1514_v17 = vsub.f32 %v1510_v47, %v1513_v16  ;;  %v3213_v18 = vpop.eup %2852  ;;  %v1655_v27 = vpop.xlane.xlu0 %1654 }
 0x238   : > { %v1207_v22 = vsel %vm1157_vm2, %v3213_v18, 0.0  ;;  %v1656_v46 = vsub.f32 %v3189_v50, %v1655_v27 }
 0x239   : > { %v3215_v19 = vpop.eup %2854  ;;  %v1515_v20 = vmul.f32 1.442695, %v1514_v17 }
 0x23a   : > { %v1304_v21 = vsel %vm1157_vm2, %v3215_v19, 0.0  ;;  %v1657_v48 = vmul.f32 1.442695, %v1656_v46 }
 0x23b   : > { %2856 = vpow2.f32 %v1515_v20  ;;  %1305 = vadd.xlane.f32.xlu2 %v1304_v21 }
 0x23c   : > { %1208 = vadd.xlane.f32.xlu0 %v1207_v22 }
 0x23e   : > { %v1442_v23 = vpop.xlane.xlu1 %1441 }
 0x23f   : > { %v1443_v24 = vsub.f32 %v1439_v54, %v1442_v23 }
 0x241   : > { %v3221_v25 = vpop.eup %2856  ;;  %v1444_v26 = vmul.f32 1.442695, %v1443_v24 }
 0x242   : > { %v1517_v28 = vsel %vm1157_vm2, %v3221_v25, 0.0 }
 0x243   : > { %2858 = vpow2.f32 %v1444_v26 }
 0x244   : > { %1518 = vadd.xlane.f32.xlu0 %v1517_v28 }
 0x249   : > { %v3225_v29 = vpop.eup %2858 }
 0x24a   : > { %v1382_v30 = vpop.permute.xlu0 %1381  ;;  %v1446_v31 = vsel %vm1157_vm2, %v3225_v29, 0.0 }
 0x24b   : > { %v1384_v34 = vmul.f32 %v1382_v30, %v3145_v12 }
 0x24c   : > { %1447 = vadd.xlane.f32.xlu0 %v1446_v31 }
 0x24d   : > { %v2826_v35 = vpack.i.bf16 %v1384_v34, %v1313_v33  ;;  %v769_v33 = vld [vmem:[%s3073_s2 + $0x18] sm:$0xff]  ;;  %v768_v34 = vld [vmem:[%s3073_s2 + $0x10] sm:$0xff] }
 0x24e   : > { %1715 = vmatpush.msra.mxu1 %v769_v33  ;;  %v795_v33 = vld [vmem:[%s3092_s15 + $0xb0] sm:$0xff] }
 0x24f   : > { %2827 = vrot.lane.b32.xlu1 %v2826_v35, %s2930_s10  ;;  %v767_v35 = vld [vmem:[%s3073_s2 + $0x8] sm:$0xff] }
 0x250   : > { %1716 = vmatpush.msra.mxu1 %v768_v34  ;;  %v796_v34 = vld [vmem:[%s3092_s15 + $0xb8] sm:$0xff] }
 0x252   : > { %1717 = vmatpush.msra.mxu1 %v767_v35  ;;  %v778_v35 = vld [vmem:[%s3092_s15 + $0x28] sm:$0xff] }
 0x256   : > { %v1453_v36 = vpop.permute.xlu1 %1452 }
 0x257   : > { %v1455_v38 = vmul.f32 %v1453_v36, %v3145_v12  ;;  %v766_v36 = vld [vmem:[%s3073_s2] sm:$0xff]  ;;  %s3776_s2 = sld [smem:[#allocation18_spill]] }
 0x258   : > { %1718 = vmatpush.msra.mxu1 %v766_v36 }
 0x25e   : > { %v1524_v37 = vpop.permute.xlu1 %1523 }
 0x25f   : > { %v1526_v39 = vmul.f32 %v1524_v37, %v3145_v12 }
 0x261   : > { %v2831_v41 = vpack.i.bf16 %v1526_v39, %v1455_v38 }
 0x263   : > { %2832 = vrot.lane.b32.xlu2 %v2831_v41, %s2930_s10 }
 0x266   : > { %v1666_v57 = vpop.permute.xlu1 %1665 }
 0x268   : > { %v1584_v43 = vpop.xlane.xlu2 %1583 }
 0x269   : > { %v1585_v44 = vsub.f32 %v3201_v58, %v1584_v43  ;;  %v1668_v58 = vmul.f32 %v1666_v57, %v3145_v12 }
 0x26b   : > { %v1586_v47 = vmul.f32 1.442695, %v1585_v44  ;;  %v2836_v60 = vpack.i.bf16 %v1668_v58, %v1597_v59 }
 0x26d   : > { %2860 = vpow2.f32 %v1586_v47 }
 0x26e   : > { %2862 = vpow2.f32 %v1162_v45 }
 0x26f   : > { %2864 = vpow2.f32 %v1657_v48 }
 0x270   : > { %v2823_v49 = vpop.permute.xlu2 %2822 }
 0x271   : > { %v2824_v51 = vunpack.i.l.bf16 %v2823_v49  ;;  %v2825_v52 = vunpack.i.h.bf16 %v2823_v49 }
 0x273   : > { %v3238_v53 = vpop.eup %2860  ;;  %1239 = vmatpush.msra.mxu3 %v2824_v51 }
 0x274   : > { %v1588_v32 = vsel %vm1157_vm2, %v3238_v53, 0.0  ;;  %v2863_v54 = vpop.eup %2862 }
 0x275   : > { %1266 = vmatpush.msrb.mxu3 %v2825_v52  ;;  %1589 = vadd.xlane.f32.xlu0 %v1588_v32  ;;  %v1164_v55 = vsel %vm1157_vm2, %v2863_v54, 0.0  ;;  %v2865_v50 = vpop.eup %2864  ;;  %v2842_v52 = vld [vmem:[%s3769_s27] ss:$0 sm:$0xff] }
 0x276   : > { %v1659_v56 = vsel %vm1157_vm2, %v2865_v50, 0.0 }
 0x279   : > { %1165 = vadd.xlane.f32.xlu1 %v1164_v55 }
 0x27d   : > { %1660 = vadd.xlane.f32.xlu0 %v1659_v56 }
 0x292   : > { %2837 = vrot.lane.b32.xlu1 %v2836_v60, %s2930_s10 }
 0x2a7   : > { %v1377_v61 = vpop.xlane.xlu0 %1376 }
 0x2ae   : > { %v1306_v0 = vpop.xlane.xlu2 %1305 }
 0x2af   : > { %v1209_v62 = vpop.xlane.xlu0 %1208 }
 0x2b0   : > { %2866 = vrcp.f32 %v1209_v62 }
 0x2b1   : > { %2868 = vrcp.f32 %v1306_v0 }
 0x2b6   : > { %v2867_v63 = vpop.eup %2866 }
 0x2b7   : > { %v1519_v1 = vpop.xlane.xlu0 %1518  ;;  %v1211_v2 = vmul.f32 %v2867_v63, %v3213_v18  ;;  %v2869_v4 = vpop.eup %2868 }
 0x2b8   : > { %v1308_v9 = vmul.f32 %v2869_v4, %v3215_v19  ;;  %v823_v4 = vld [vmem:[%s3092_s15 + $0x190] sm:$0xff] }
 0x2b9   : > { %2735 = vmatmul.msk.f32.vlgmr.msra.gmra.mxu3 %vm1157_vm2, %v1211_v2  ;;  %v821_v2 = vld [vmem:[%s3092_s15 + $0x180] sm:$0xff] }
 0x2bd   : > { %v2833_v5 = vpop.permute.xlu2 %2832 }
 0x2be   : > { %v2834_v10 = vunpack.i.l.bf16 %v2833_v5  ;;  %v2835_v18 = vunpack.i.h.bf16 %v2833_v5  ;;  %v824_v5 = vld [vmem:[%s3092_s15 + $0x198] sm:$0xff] }
 0x2bf   : > { %v1448_v3 = vpop.xlane.xlu0 %1447  ;;  %1870 = vmatpush.msrb.mxu1 %v824_v5  ;;  %v836_v5 = vld [vmem:[%s3092_s15 + $0x1f8] sm:$0xff] }
 0x2c0   : > { %2870 = vrcp.f32 %v1448_v3  ;;  %v822_v3 = vld [vmem:[%s3092_s15 + $0x188] sm:$0xff] }
 0x2c1   : > { %v2828_v6 = vpop.permute.xlu1 %2827  ;;  %1830 = vmatpush.msra.mxu0 %v822_v3  ;;  %v834_v3 = vld [vmem:[%s3092_s15 + $0x1e8] sm:$0xff] }
 0x2c2   : > { %v2830_v12 = vunpack.i.h.bf16 %v2828_v6  ;;  %v2829_v7 = vunpack.i.l.bf16 %v2828_v6  ;;  %v805_v6 = vld [vmem:[%s3092_s15 + $0x100] sm:$0xff] }
 0x2c4   : > { %1336 = vmatpush.msrb.mxu2 %v2829_v7  ;;  %1407 = vmatpush.msra.mxu3 %v2830_v12  ;;  %v806_v12 = vld [vmem:[%s3092_s15 + $0x108] sm:$0xff]  ;;  %v807_v7 = vld [vmem:[%s3092_s15 + $0x110] sm:$0xff] }
 0x2c5   : > { %2739 = vmatmul.msk.f32.vlgmr.msrb.gmra.mxu2 %vm1157_vm2, %v1308_v9  ;;  %1831 = vmatpush.msra.mxu0 %v806_v12  ;;  %v808_v9 = vld [vmem:[%s3092_s15 + $0x118] sm:$0xff]  ;;  %v818_v12 = vld [vmem:[%s3092_s15 + $0x168] sm:$0xff] }
 0x2c6   : > { %1478 = vmatpush.msra.mxu2 %v2834_v10  ;;  %v2871_v11 = vpop.eup %2870  ;;  %1871 = vmatpush.msrb.mxu1 %v808_v9  ;;  %v789_v10 = vld [vmem:[%s3092_s15 + $0x80] sm:$0xff]  ;;  %v820_v9 = vld [vmem:[%s3092_s15 + $0x178] sm:$0xff] }
 0x2c7   : > { %v1450_v13 = vmul.f32 %v2871_v11, %v3225_v29  ;;  %v790_v11 = vld [vmem:[%s3092_s15 + $0x88] sm:$0xff] }
 0x2c8   : > { %1832 = vmatpush.msra.mxu0 %v790_v11  ;;  %v802_v11 = vld [vmem:[%s3092_s15 + $0xe8] sm:$0xff] }
 0x2cd   : > { %2745 = vmatmul.msk.f32.vlgmr.msra.gmra.mxu2 %vm1157_vm2, %v1450_v13  ;;  %v791_v13 = vld [vmem:[%s3092_s15 + $0x90] sm:$0xff] }
 0x2e8   : > { %v1590_v20 = vpop.xlane.xlu0 %1589 }
 0x2ec   : > { %v1166_v15 = vpop.xlane.xlu1 %1165 }
 0x2ed   : > { %2872 = vrcp.f32 %v1166_v15  ;;  %v792_v15 = vld [vmem:[%s3092_s15 + $0x98] sm:$0xff] }
 0x2ee   : > { %2874 = vrcp.f32 %v1377_v61  ;;  %1872 = vmatpush.msrb.mxu1 %v792_v15  ;;  %v804_v15 = vld [vmem:[%s3092_s15 + $0xf8] sm:$0xff] }
 0x2ef   : > { %2876 = vrcp.f32 %v1519_v1 }
 0x2f0   : > { %2878 = vrcp.f32 %v1590_v20  ;;  %v1661_v22 = vpop.xlane.xlu0 %1660  ;;  %v776_v20 = vld [vmem:[%s3092_s15 + $0x18] sm:$0xff] }
 0x2f1   : > { %2880 = vrcp.f32 %v1661_v22  ;;  %1873 = vmatpush.msrb.mxu1 %v776_v20  ;;  %v827_v22 = vld [vmem:[%s3092_s15 + $0x1b0] sm:$0xff]  ;;  %v788_v20 = vld [vmem:[%s3092_s15 + $0x78] sm:$0xff] }
 0x2f3   : > { %v2873_v16 = vpop.eup %2872 }
 0x2f4   : > { %v1168_v17 = vmul.f32 %v2873_v16, %v2863_v54  ;;  %v2875_v19 = vpop.eup %2874  ;;  %v773_v16 = vld [vmem:[%s3092_s15] sm:$0xff] }
 0x2f5   : > { %v1379_v21 = vmul.f32 %v2875_v19, %v3209_v14  ;;  %v2877_v23 = vpop.eup %2876  ;;  %v825_v19 = vld [vmem:[%s3092_s15 + $0x1a0] sm:$0xff] }
 0x2f6   : > { %2736 = vmatmul.msk.f32.vlgmr.msrb.gmra.mxu3 %vm1157_vm2, %v1168_v17  ;;  %v2879_v24 = vpop.eup %2878  ;;  %v1521_v26 = vmul.f32 %v2877_v23, %v3221_v25  ;;  %v774_v17 = vld [vmem:[%s3092_s15 + $0x8] sm:$0xff]  ;;  %v828_v23 = vld [vmem:[%s3092_s15 + $0x1b8] sm:$0xff] }
 0x2f7   : > { %1549 = vmatpush.msrb.mxu3 %v2835_v18  ;;  %v1592_v30 = vmul.f32 %v2879_v24, %v3238_v53  ;;  %v2881_v14 = vpop.eup %2880  ;;  %v775_v18 = vld [vmem:[%s3092_s15 + $0x10] sm:$0xff]  ;;  %1833 = vmatpush.msra.mxu0 %v774_v17  ;;  %v809_v24 = vld [vmem:[%s3092_s15 + $0x120] sm:$0xff]  ;;  %v786_v17 = vld [vmem:[%s3092_s15 + $0x68] sm:$0xff] }
 0x2f8   : > { %v1663_v31 = vmul.f32 %v2881_v14, %v2865_v50  ;;  %v2932_v50 = vmov 32.0  }
 0x2f9   : > { %2882 = vrcp.f32 %v2932_v50  ;;  %v814_v50 = vld [vmem:[%s3092_s15 + $0x148] sm:$0xff] }
 0x2fe   : > { %2742 = vmatmul.msk.f32.vlgmr.msra.gmra.mxu3 %vm1157_vm2, %v1379_v21  ;;  %v826_v21 = vld [vmem:[%s3092_s15 + $0x1a8] sm:$0xff] }
 0x2ff   : > { %v2883_v56 = vpop.eup %2882  ;;  %1910 = vmatpush.msrb.mxu0 %v826_v21  ;;  %v902_v21 = vld [vmem:[%s3107_s0 + $0x1f8] sm:$0xff] }
 0x300   : > { %v1728_v57 = vmul.f32 32.0, %v2883_v56  ;;  %vm1732_vm3 = vweird.f32 %v2883_v56 }
 0x302   : > { %v1729_v58 = vsub.f32 1.0, %v1728_v57  ;;  %v816_v57 = vld [vmem:[%s3092_s15 + $0x158] sm:$0xff] }
 0x304   : > { %v2838_v27 = vpop.permute.xlu1 %2837  ;;  %v1730_v59 = vmul.f32 %v2883_v56, %v1729_v58  ;;  %v797_v58 = vld [vmem:[%s3092_s15 + $0xc0] sm:$0xff] }
 0x305   : > { %v2840_v28 = vunpack.i.h.bf16 %v2838_v27  ;;  %v2839_v29 = vunpack.i.l.bf16 %v2838_v27 }
 0x306   : > { %2748 = vmatmul.msk.f32.vlgmr.msrb.gmra.mxu3 %vm1157_vm2, %v1521_v26  ;;  %v1731_v60 = vadd.f32 %v2883_v56, %v1730_v59  ;;  %v810_v26 = vld [vmem:[%s3092_s15 + $0x128] sm:$0xff] }
 0x307   : > { %1620 = vmatpush.msrb.mxu2 %v2839_v29  ;;  %1691 = vmatpush.msra.mxu3 %v2840_v28  ;;  %v811_v28 = vld [vmem:[%s3092_s15 + $0x130] sm:$0xff]  ;;  %v812_v29 = vld [vmem:[%s3092_s15 + $0x138] sm:$0xff]  ;;  %v798_v59 = vld [vmem:[%s3092_s15 + $0xc8] sm:$0xff] }
 0x308   : > { %2751 = vmatmul.msk.f32.vlgmr.msrb.gmra.mxu2 %vm1157_vm2, %v1592_v30  ;;  %v3273_v61 = vsel %vm1732_vm3, %v2883_v56, %v1731_v60  ;;  %v793_v30 = vld [vmem:[%s3092_s15 + $0xa0] sm:$0xff]  ;;  %1911 = vmatpush.msrb.mxu0 %v810_v26  ;;  %v815_v56 = vld [vmem:[%s3092_s15 + $0x150] sm:$0xff] }
 0x309   : > { %1810 = vmatpush.msra.mxu2 %v821_v2  ;;  %1850 = vmatpush.msrb.mxu3 %v823_v4  ;;  %v799_v60 = vld [vmem:[%s3092_s15 + $0xd0] sm:$0xff]  ;;  %v833_v2 = vld [vmem:[%s3092_s15 + $0x1e0] sm:$0xff] }
 0x30a   : > { %v835_v4 = vld [vmem:[%s3092_s15 + $0x1f0] sm:$0xff] }
 0x30b   : > { %1811 = vmatpush.msra.mxu2 %v805_v6  ;;  %1851 = vmatpush.msrb.mxu3 %v807_v7  ;;  %v817_v6 = vld [vmem:[%s3092_s15 + $0x160] sm:$0xff]  ;;  %v819_v7 = vld [vmem:[%s3092_s15 + $0x170] sm:$0xff] }
 0x30c   : > { %v901_v26 = vld [vmem:[%s3107_s0 + $0x1f0] sm:$0xff] }
 0x30d   : > { %1812 = vmatpush.msra.mxu2 %v789_v10  ;;  %1852 = vmatpush.msrb.mxu3 %v791_v13  ;;  %v801_v10 = vld [vmem:[%s3092_s15 + $0xe0] sm:$0xff]  ;;  %v803_v13 = vld [vmem:[%s3092_s15 + $0xf0] sm:$0xff] }
 0x30e   : > { %2754 = vmatmul.msk.f32.vlgmr.msra.gmra.mxu3 %vm1157_vm2, %v1663_v31  ;;  %v794_v31 = vld [vmem:[%s3092_s15 + $0xa8] sm:$0xff] }
 0x30f   : > { %1813 = vmatpush.msra.mxu2 %v773_v16  ;;  %1853 = vmatpush.msrb.mxu3 %v775_v18  ;;  %v785_v16 = vld [vmem:[%s3092_s15 + $0x60] sm:$0xff]  ;;  %v787_v18 = vld [vmem:[%s3092_s15 + $0x70] sm:$0xff] }
 0x310   : > { %1912 = vmatpush.msrb.mxu0 %v794_v31  ;;  %v884_v31 = vld [vmem:[%s3107_s0 + $0x168] sm:$0xff] }
 0x311   : > { %1890 = vmatpush.msrb.mxu2 %v825_v19  ;;  %1930 = vmatpush.msra.mxu3 %v827_v22  ;;  %v870_v19 = vld [vmem:[%s3107_s0 + $0xf8] sm:$0xff] }
 0x312   : > { %1913 = vmatpush.msrb.mxu0 %v778_v35  ;;  %v854_v22 = vld [vmem:[%s3107_s0 + $0x78] sm:$0xff]  ;;  %v883_v35 = vld [vmem:[%s3107_s0 + $0x160] sm:$0xff] }
 0x313   : > { %1891 = vmatpush.msrb.mxu2 %v809_v24  ;;  %1931 = vmatpush.msra.mxu3 %v811_v28  ;;  %v869_v24 = vld [vmem:[%s3107_s0 + $0xf0] sm:$0xff] }
 0x314   : > { %v885_v28 = vld [vmem:[%s3107_s0 + $0x170] sm:$0xff] }
 0x315   : > { %1892 = vmatpush.msrb.mxu2 %v793_v30  ;;  %1932 = vmatpush.msra.mxu3 %v795_v33  ;;  %v900_v30 = vld [vmem:[%s3107_s0 + $0x1e8] sm:$0xff]  ;;  %v867_v33 = vld [vmem:[%s3107_s0 + $0xe0] sm:$0xff] }
 0x33c   : > { %v1241_v25 = vpop.f32.mrf.mxu3 }
 0x348   : > { %v1338_v38 = vpop.f32.mrf.mxu2 }
 0x350   : > { %v1480_v42 = vpop.f32.mrf.mxu2 }
 0x379   : > { %v1268_v37 = vpop.f32.mrf.mxu3 }
 0x37a   : > { %v1269_v39 = vadd.f32 %v1268_v37, %v1241_v25  ;;  %v777_v25 = vld [vmem:[%s3092_s15 + $0x20] sm:$0xff]  ;;  %v779_v37 = vld [vmem:[%s3092_s15 + $0x30] sm:$0xff] }
 0x37b   : > { %1893 = vmatpush.msrb.mxu2 %v777_v25  ;;  %1933 = vmatpush.msra.mxu3 %v779_v37  ;;  %v851_v25 = vld [vmem:[%s3107_s0 + $0x60] sm:$0xff]  ;;  %v898_v37 = vld [vmem:[%s3107_s0 + $0x1d8] sm:$0xff] }
 0x37c   : > { %v1341_v41 = vadd.f32 %v1338_v38, %v1269_v39  ;;  %v780_v38 = vld [vmem:[%s3092_s15 + $0x38] sm:$0xff] }
 0x381   : > { %v1409_v40 = vpop.f32.mrf.mxu3 }
 0x382   : > { %v1412_v43 = vadd.f32 %v1409_v40, %v1341_v41 }
 0x384   : > { %v1483_v45 = vadd.f32 %v1480_v42, %v1412_v43 }
 0x389   : > { %v1551_v44 = vpop.f32.mrf.mxu3 }
 0x38a   : > { %v1554_v46 = vadd.f32 %v1551_v44, %v1483_v45  ;;  %v2843_v45 = vld [vmem:[%s3770_s19] ss:$0 sm:$0xff] }
 0x38b   : > { %v1622_v47 = vpop.f32.mrf.mxu2 }
 0x38c   : > { %v1625_v48 = vadd.f32 %v1622_v47, %v1554_v46  ;;  %v2844_v47 = vld [vmem:[%s3771_s9] ss:$0 sm:$0xff] }
 0x391   : > { %v1693_v49 = vpop.f32.mrf.mxu3 }
 0x392   : > { %v1696_v51 = vadd.f32 %v1693_v49, %v1625_v48 }
 0x394   : > { %2755 = vmatmul.msk.f32.vlgmr.msra.gmra.mxu1 %vm1101_vm1, %v1696_v51 }
 0x395   : > { %1950 = vmatpush.msra.mxu1 %v828_v23  ;;  %v886_v23 = vld [vmem:[%s3107_s0 + $0x178] sm:$0xff] }
 0x397   : > { %1951 = vmatpush.msra.mxu1 %v812_v29  ;;  %v868_v29 = vld [vmem:[%s3107_s0 + $0xe8] sm:$0xff] }
 0x399   : > { %1952 = vmatpush.msra.mxu1 %v796_v34  ;;  %v899_v34 = vld [vmem:[%s3107_s0 + $0x1e0] sm:$0xff] }
 0x39b   : > { %1953 = vmatpush.msra.mxu1 %v780_v38  ;;  %v850_v38 = vld [vmem:[%s3107_s0 + $0x58] sm:$0xff] }
 0x411   : > { %v1720_v53 = vpop.f32.mrf.mxu1 }
 0x412   : > { %v1721_v32 = vadd.f32 %v2842_v52, %v1720_v53  ;;  %v829_v52 = vld [vmem:[%s3092_s15 + $0x1c0] sm:$0xff]  ;;  %v830_v53 = vld [vmem:[%s3092_s15 + $0x1c8] sm:$0xff] }
 0x414   : > { %v1723_v54 = vadd.f32 %v1721_v32, %v3132_v8  ;;  %v831_v32 = vld [vmem:[%s3092_s15 + $0x1d0] sm:$0xff] }
 0x416   : > { %v1724_v55 = vsel %vm1101_vm1, %v1723_v54, 0.0 }
 0x417   : > { %1725 = vadd.xlane.f32.xlu0 %v1724_v55  ;;  %v813_v55 = vld [vmem:[%s3092_s15 + $0x140] sm:$0xff] }
 0x48a   : > { %v1726_v8 = vpop.xlane.xlu0 %1725 }
 0x48b   : > { %v1734_v62 = vmul.f32 %v3273_v61, %v1726_v8  ;;  %v800_v8 = vld [vmem:[%s3092_s15 + $0xd8] sm:$0xff] }
 0x48d   : > { %v3276_v63 = vsub.f32 %v1723_v54, %v1734_v62  ;;  %v832_v54 = vld [vmem:[%s3092_s15 + $0x1d8] sm:$0xff]  ;;  %v781_v62 = vld [vmem:[%s3092_s15 + $0x40] sm:$0xff] }
 0x48f   : > { %v1736_v0 = vmul.f32 %v3276_v63, %v3276_v63 }
 0x491   : > { %v1737_v1 = vsel %vm1101_vm1, %v1736_v0, 0.0  ;;  %v783_v0 = vld [vmem:[%s3092_s15 + $0x50] sm:$0xff] }
 0x492   : > { %1738 = vadd.xlane.f32.xlu1 %v1737_v1  ;;  %v784_v1 = vld [vmem:[%s3092_s15 + $0x58] sm:$0xff] }
 0x505   : > { %v1739_v27 = vpop.xlane.xlu1 %1738 }
 0x506   : > { %v1740_v14 = vmul.f32 %v1739_v27, %v3273_v61  ;;  %v853_v27 = vld [vmem:[%s3107_s0 + $0x70] sm:$0xff] }
 0x508   : > { %v1741_v36 = vadd.f32 1e-05, %v1740_v14  ;;  %v852_v14 = vld [vmem:[%s3107_s0 + $0x68] sm:$0xff] }
 0x50a   : > { %2884 = vrsqrt.f32 %v1741_v36  ;;  %vm1748_vm5 = vweird.f32 %v1741_v36 }
 0x510   : > { %v2885_v39 = vpop.eup %2884 }
 0x511   : > { %v1743_v40 = vmul.f32 %v2885_v39, %v1741_v36  ;;  %vm1749_vm4 = vweird.f32 %v2885_v39  ;;  %v866_v36 = vld [vmem:[%s3107_s0 + $0xd8] sm:$0xff] }
 0x512   : > { %vm1750_vm6 = vmor %vm1748_vm5, %vm1749_vm4 }
 0x513   : > { %v1744_v41 = vmul.f32 %v2885_v39, %v1743_v40  ;;  %v865_v40 = vld [vmem:[%s3107_s0 + $0xd0] sm:$0xff] }
 0x515   : > { %v1745_v42 = vmul.f32 0.5, %v1744_v41  ;;  %v897_v41 = vld [vmem:[%s3107_s0 + $0x1d0] sm:$0xff] }
 0x517   : > { %v1746_v43 = vsub.f32 1.5, %v1745_v42  ;;  %v849_v42 = vld [vmem:[%s3107_s0 + $0x50] sm:$0xff] }
 0x519   : > { %v1747_v44 = vmul.f32 %v2885_v39, %v1746_v43  ;;  %v881_v43 = vld [vmem:[%s3107_s0 + $0x150] sm:$0xff] }
 0x51b   : > { %v1751_v46 = vsel %vm1750_vm6, %v2885_v39, %v1747_v44  ;;  %v882_v39 = vld [vmem:[%s3107_s0 + $0x158] sm:$0xff]  ;;  %v864_v44 = vld [vmem:[%s3107_s0 + $0xc8] sm:$0xff] }
 0x51c   : > { %v1752_v48 = vmul.f32 %v1751_v46, %v3276_v63  ;;  %v782_v63 = vld [vmem:[%s3092_s15 + $0x48] sm:$0xff]  ;;  %s3772_s15 = sld [smem:[#allocation8_spill]] }
 0x51d   : > { %v848_v46 = vld [vmem:[%s3107_s0 + $0x48] sm:$0xff] }
 0x51e   : > { %v1756_v49 = vmul.f32 %v2843_v45, %v1752_v48  ;;  %v896_v45 = vld [vmem:[%s3107_s0 + $0x1c8] sm:$0xff]  ;;  %v863_v48 = vld [vmem:[%s3107_s0 + $0xc0] sm:$0xff] }
 0x520   : > { %v3325_v51 = vadd.f32 %v2844_v47, %v1756_v49  ;;  %v880_v47 = vld [vmem:[%s3107_s0 + $0x148] sm:$0xff]  ;;  %v895_v49 = vld [vmem:[%s3107_s0 + $0x1c0] sm:$0xff] }
 0x522   : > { %2756 = vmatmul.msk.f32.vlgmr.msra.gmra.mxu2 %vm1101_vm1, %v3325_v51  ;;  %2757 = vmatmul.msk.f32.vlgmr.msra.gmra.mxu0 %vm1101_vm1, %v3325_v51 }
 0x523   : > { %2758 = vmatmul.msk.f32.vlgmr.msrb.gmra.mxu3 %vm1101_vm1, %v3325_v51  ;;  %2759 = vmatmul.msk.f32.vlgmr.msrb.gmra.mxu1 %vm1101_vm1, %v3325_v51 }
 0x524   : > { %1970 = vmatpush.msra.mxu2 %v829_v52  ;;  %1990 = vmatpush.msra.mxu0 %v830_v53  ;;  %v847_v52 = vld [vmem:[%s3107_s0 + $0x40] sm:$0xff] }
 0x525   : > { %2010 = vmatpush.msrb.mxu3 %v831_v32  ;;  %2030 = vmatpush.msrb.mxu1 %v832_v54  ;;  %v879_v53 = vld [vmem:[%s3107_s0 + $0x140] sm:$0xff]  ;;  %v862_v32 = vld [vmem:[%s3107_s0 + $0xb8] sm:$0xff] }
 0x526   : > { %1971 = vmatpush.msra.mxu2 %v813_v55  ;;  %1991 = vmatpush.msra.mxu0 %v814_v50  ;;  %v894_v54 = vld [vmem:[%s3107_s0 + $0x1b8] sm:$0xff] }
 0x527   : > { %2011 = vmatpush.msrb.mxu3 %v815_v56  ;;  %2031 = vmatpush.msrb.mxu1 %v816_v57  ;;  %v846_v55 = vld [vmem:[%s3107_s0 + $0x38] sm:$0xff]  ;;  %v861_v56 = vld [vmem:[%s3107_s0 + $0xb0] sm:$0xff] }
 0x528   : > { %1972 = vmatpush.msra.mxu2 %v797_v58  ;;  %1992 = vmatpush.msra.mxu0 %v798_v59  ;;  %v878_v50 = vld [vmem:[%s3107_s0 + $0x138] sm:$0xff]  ;;  %v893_v57 = vld [vmem:[%s3107_s0 + $0x1b0] sm:$0xff] }
 0x529   : > { %2012 = vmatpush.msrb.mxu3 %v799_v60  ;;  %2032 = vmatpush.msrb.mxu1 %v800_v8  ;;  %v845_v58 = vld [vmem:[%s3107_s0 + $0x30] sm:$0xff]  ;;  %v860_v60 = vld [vmem:[%s3107_s0 + $0xa8] sm:$0xff] }
 0x52a   : > { %2760 = vmatmul.msk.f32.vlgmr.msrb.gmra.mxu2 %vm1101_vm1, %v3325_v51  ;;  %2761 = vmatmul.msk.f32.vlgmr.msrb.gmra.mxu0 %vm1101_vm1, %v3325_v51  ;;  %v877_v59 = vld [vmem:[%s3107_s0 + $0x130] sm:$0xff]  ;;  %v892_v8 = vld [vmem:[%s3107_s0 + $0x1a8] sm:$0xff] }
 0x52b   : > { %2762 = vmatmul.msk.f32.vlgmr.msra.gmra.mxu3 %vm1101_vm1, %v3325_v51  ;;  %2763 = vmatmul.msk.f32.vlgmr.msra.gmra.mxu1 %vm1101_vm1, %v3325_v51 }
 0x52c   : > { %1973 = vmatpush.msra.mxu2 %v781_v62  ;;  %1993 = vmatpush.msra.mxu0 %v782_v63  ;;  %v844_v62 = vld [vmem:[%s3107_s0 + $0x28] sm:$0xff] }
 0x52d   : > { %2013 = vmatpush.msrb.mxu3 %v783_v0  ;;  %2033 = vmatpush.msrb.mxu1 %v784_v1  ;;  %v876_v63 = vld [vmem:[%s3107_s0 + $0x128] sm:$0xff]  ;;  %v859_v0 = vld [vmem:[%s3107_s0 + $0xa0] sm:$0xff] }
 0x52e   : > { %2050 = vmatpush.msrb.mxu2 %v833_v2  ;;  %2070 = vmatpush.msrb.mxu0 %v834_v3  ;;  %v891_v1 = vld [vmem:[%s3107_s0 + $0x1a0] sm:$0xff] }
 0x52f   : > { %2090 = vmatpush.msra.mxu3 %v835_v4  ;;  %2110 = vmatpush.msra.mxu1 %v836_v5  ;;  %v843_v2 = vld [vmem:[%s3107_s0 + $0x20] sm:$0xff]  ;;  %v858_v4 = vld [vmem:[%s3107_s0 + $0x98] sm:$0xff] }
 0x530   : > { %2051 = vmatpush.msrb.mxu2 %v817_v6  ;;  %2071 = vmatpush.msrb.mxu0 %v818_v12  ;;  %v875_v3 = vld [vmem:[%s3107_s0 + $0x120] sm:$0xff]  ;;  %v890_v5 = vld [vmem:[%s3107_s0 + $0x198] sm:$0xff] }
 0x531   : > { %2091 = vmatpush.msra.mxu3 %v819_v7  ;;  %2111 = vmatpush.msra.mxu1 %v820_v9  ;;  %v842_v6 = vld [vmem:[%s3107_s0 + $0x18] sm:$0xff]  ;;  %v857_v7 = vld [vmem:[%s3107_s0 + $0x90] sm:$0xff] }
 0x532   : > { %2764 = vmatmul.msk.f32.vlgmr.msra.gmra.mxu2 %vm1101_vm1, %v3325_v51  ;;  %2765 = vmatmul.msk.f32.vlgmr.msra.gmra.mxu0 %vm1101_vm1, %v3325_v51  ;;  %v874_v12 = vld [vmem:[%s3107_s0 + $0x118] sm:$0xff]  ;;  %v889_v9 = vld [vmem:[%s3107_s0 + $0x190] sm:$0xff] }
 0x533   : > { %2766 = vmatmul.msk.f32.vlgmr.msrb.gmra.mxu3 %vm1101_vm1, %v3325_v51  ;;  %2767 = vmatmul.msk.f32.vlgmr.msrb.gmra.mxu1 %vm1101_vm1, %v3325_v51 }
 0x534   : > { %2052 = vmatpush.msrb.mxu2 %v801_v10  ;;  %2072 = vmatpush.msrb.mxu0 %v802_v11  ;;  %v841_v10 = vld [vmem:[%s3107_s0 + $0x10] sm:$0xff] }
 0x535   : > { %2092 = vmatpush.msra.mxu3 %v803_v13  ;;  %2112 = vmatpush.msra.mxu1 %v804_v15  ;;  %v873_v11 = vld [vmem:[%s3107_s0 + $0x110] sm:$0xff]  ;;  %v856_v13 = vld [vmem:[%s3107_s0 + $0x88] sm:$0xff] }
 0x536   : > { %2053 = vmatpush.msrb.mxu2 %v785_v16  ;;  %2073 = vmatpush.msrb.mxu0 %v786_v17  ;;  %v888_v15 = vld [vmem:[%s3107_s0 + $0x188] sm:$0xff] }
 0x537   : > { %2093 = vmatpush.msra.mxu3 %v787_v18  ;;  %2113 = vmatpush.msra.mxu1 %v788_v20  ;;  %v840_v16 = vld [vmem:[%s3107_s0 + $0x8] sm:$0xff]  ;;  %v855_v18 = vld [vmem:[%s3107_s0 + $0x80] sm:$0xff] }
 0x538   : > { %2157 = vmatpush.msra.mxu0 %v870_v19  ;;  %2137 = vmatpush.msra.mxu2 %v854_v22  ;;  %v872_v17 = vld [vmem:[%s3107_s0 + $0x108] sm:$0xff]  ;;  %v887_v20 = vld [vmem:[%s3107_s0 + $0x180] sm:$0xff]  ;;  %v934_v19 = vld [vmem:[%s3107_s0 + $0x2f8] sm:$0xff] }
 0x539   : > { %2197 = vmatpush.msrb.mxu1 %v902_v21  ;;  %2177 = vmatpush.msrb.mxu3 %v886_v23  ;;  %v966_v21 = vld [vmem:[%s3107_s0 + $0x3f8] sm:$0xff]  ;;  %v839_v22 = vld [vmem:[%s3107_s0] sm:$0xff] }
 0x53a   : > { %2768 = vmatmul.msk.f32.vlgmr.msrb.gmra.mxu2 %vm1101_vm1, %v3325_v51  ;;  %2769 = vmatmul.msk.f32.vlgmr.msrb.gmra.mxu0 %vm1101_vm1, %v3325_v51  ;;  %v871_v23 = vld [vmem:[%s3107_s0 + $0x100] sm:$0xff] }
 0x53b   : > { %2770 = vmatmul.msk.f32.vlgmr.msra.gmra.mxu3 %vm1101_vm1, %v3325_v51  ;;  %2771 = vmatmul.msk.f32.vlgmr.msra.gmra.mxu1 %vm1101_vm1, %v3325_v51 }
 0x53c   : > { %2158 = vmatpush.msra.mxu0 %v869_v24  ;;  %2198 = vmatpush.msrb.mxu1 %v901_v26  ;;  %v933_v24 = vld [vmem:[%s3107_s0 + $0x2f0] sm:$0xff] }
 0x53d   : > { %2138 = vmatpush.msra.mxu2 %v853_v27  ;;  %2178 = vmatpush.msrb.mxu3 %v885_v28  ;;  %v965_v26 = vld [vmem:[%s3107_s0 + $0x3f0] sm:$0xff]  ;;  %v918_v27 = vld [vmem:[%s3107_s0 + $0x278] sm:$0xff] }
 0x53e   : > { %2159 = vmatpush.msra.mxu0 %v868_v29  ;;  %2199 = vmatpush.msrb.mxu1 %v900_v30  ;;  %v950_v28 = vld [vmem:[%s3107_s0 + $0x378] sm:$0xff]  ;;  %v932_v29 = vld [vmem:[%s3107_s0 + $0x2e8] sm:$0xff] }
 0x53f   : > { %2139 = vmatpush.msra.mxu2 %v852_v14  ;;  %2179 = vmatpush.msrb.mxu3 %v884_v31  ;;  %v964_v30 = vld [vmem:[%s3107_s0 + $0x3e8] sm:$0xff]  ;;  %v917_v14 = vld [vmem:[%s3107_s0 + $0x270] sm:$0xff] }
 0x540   : > { %2160 = vmatpush.msra.mxu0 %v867_v33  ;;  %2200 = vmatpush.msrb.mxu1 %v899_v34  ;;  %v949_v31 = vld [vmem:[%s3107_s0 + $0x370] sm:$0xff]  ;;  %v931_v33 = vld [vmem:[%s3107_s0 + $0x2e0] sm:$0xff] }
 0x541   : > { %2140 = vmatpush.msra.mxu2 %v851_v25  ;;  %2180 = vmatpush.msrb.mxu3 %v883_v35  ;;  %v963_v34 = vld [vmem:[%s3107_s0 + $0x3e0] sm:$0xff]  ;;  %v916_v25 = vld [vmem:[%s3107_s0 + $0x268] sm:$0xff] }
 0x542   : > { %2161 = vmatpush.msra.mxu0 %v866_v36  ;;  %2201 = vmatpush.msrb.mxu1 %v898_v37  ;;  %v948_v35 = vld [vmem:[%s3107_s0 + $0x368] sm:$0xff]  ;;  %v930_v36 = vld [vmem:[%s3107_s0 + $0x2d8] sm:$0xff] }
 0x543   : > { %2141 = vmatpush.msra.mxu2 %v850_v38  ;;  %2181 = vmatpush.msrb.mxu3 %v882_v39  ;;  %v962_v37 = vld [vmem:[%s3107_s0 + $0x3d8] sm:$0xff]  ;;  %v915_v38 = vld [vmem:[%s3107_s0 + $0x260] sm:$0xff] }
 0x544   : > { %2162 = vmatpush.msra.mxu0 %v865_v40  ;;  %2202 = vmatpush.msrb.mxu1 %v897_v41  ;;  %v947_v39 = vld [vmem:[%s3107_s0 + $0x360] sm:$0xff]  ;;  %v929_v40 = vld [vmem:[%s3107_s0 + $0x2d0] sm:$0xff] }
 0x545   : > { %2142 = vmatpush.msra.mxu2 %v849_v42  ;;  %2182 = vmatpush.msrb.mxu3 %v881_v43  ;;  %v961_v41 = vld [vmem:[%s3107_s0 + $0x3d0] sm:$0xff]  ;;  %v914_v42 = vld [vmem:[%s3107_s0 + $0x258] sm:$0xff] }
 0x546   : > { %2163 = vmatpush.msra.mxu0 %v864_v44  ;;  %2203 = vmatpush.msrb.mxu1 %v896_v45  ;;  %v946_v43 = vld [vmem:[%s3107_s0 + $0x358] sm:$0xff]  ;;  %v928_v44 = vld [vmem:[%s3107_s0 + $0x2c8] sm:$0xff] }
 0x547   : > { %2143 = vmatpush.msra.mxu2 %v848_v46  ;;  %2183 = vmatpush.msrb.mxu3 %v880_v47  ;;  %v960_v45 = vld [vmem:[%s3107_s0 + $0x3c8] sm:$0xff]  ;;  %v913_v46 = vld [vmem:[%s3107_s0 + $0x250] sm:$0xff] }
 0x548   : > { %2164 = vmatpush.msra.mxu0 %v863_v48  ;;  %2204 = vmatpush.msrb.mxu1 %v895_v49  ;;  %v945_v47 = vld [vmem:[%s3107_s0 + $0x350] sm:$0xff]  ;;  %v927_v48 = vld [vmem:[%s3107_s0 + $0x2c0] sm:$0xff] }
 0x549   : > { %2144 = vmatpush.msra.mxu2 %v847_v52  ;;  %2184 = vmatpush.msrb.mxu3 %v879_v53  ;;  %v959_v49 = vld [vmem:[%s3107_s0 + $0x3c0] sm:$0xff]  ;;  %v912_v52 = vld [vmem:[%s3107_s0 + $0x248] sm:$0xff] }
 0x54a   : > { %2165 = vmatpush.msra.mxu0 %v862_v32  ;;  %2205 = vmatpush.msrb.mxu1 %v894_v54  ;;  %v944_v53 = vld [vmem:[%s3107_s0 + $0x348] sm:$0xff]  ;;  %v926_v32 = vld [vmem:[%s3107_s0 + $0x2b8] sm:$0xff] }
 0x54b   : > { %2145 = vmatpush.msra.mxu2 %v846_v55  ;;  %2185 = vmatpush.msrb.mxu3 %v878_v50  ;;  %v958_v54 = vld [vmem:[%s3107_s0 + $0x3b8] sm:$0xff]  ;;  %v911_v55 = vld [vmem:[%s3107_s0 + $0x240] sm:$0xff] }
 0x54c   : > { %2166 = vmatpush.msra.mxu0 %v861_v56  ;;  %2206 = vmatpush.msrb.mxu1 %v893_v57  ;;  %v943_v50 = vld [vmem:[%s3107_s0 + $0x340] sm:$0xff]  ;;  %v925_v56 = vld [vmem:[%s3107_s0 + $0x2b0] sm:$0xff] }
 0x54d   : > { %2146 = vmatpush.msra.mxu2 %v845_v58  ;;  %2186 = vmatpush.msrb.mxu3 %v877_v59  ;;  %v957_v57 = vld [vmem:[%s3107_s0 + $0x3b0] sm:$0xff]  ;;  %v910_v58 = vld [vmem:[%s3107_s0 + $0x238] sm:$0xff] }
 0x54e   : > { %2167 = vmatpush.msra.mxu0 %v860_v60  ;;  %2207 = vmatpush.msrb.mxu1 %v892_v8  ;;  %v942_v59 = vld [vmem:[%s3107_s0 + $0x338] sm:$0xff]  ;;  %v924_v60 = vld [vmem:[%s3107_s0 + $0x2a8] sm:$0xff] }
 0x54f   : > { %2147 = vmatpush.msra.mxu2 %v844_v62  ;;  %2187 = vmatpush.msrb.mxu3 %v876_v63  ;;  %v956_v8 = vld [vmem:[%s3107_s0 + $0x3a8] sm:$0xff]  ;;  %v909_v62 = vld [vmem:[%s3107_s0 + $0x230] sm:$0xff] }
 0x550   : > { %2168 = vmatpush.msra.mxu0 %v859_v0  ;;  %2208 = vmatpush.msrb.mxu1 %v891_v1  ;;  %v941_v63 = vld [vmem:[%s3107_s0 + $0x330] sm:$0xff]  ;;  %v923_v0 = vld [vmem:[%s3107_s0 + $0x2a0] sm:$0xff] }
 0x551   : > { %2148 = vmatpush.msra.mxu2 %v843_v2  ;;  %2188 = vmatpush.msrb.mxu3 %v875_v3  ;;  %v955_v1 = vld [vmem:[%s3107_s0 + $0x3a0] sm:$0xff]  ;;  %v922_v2 = vld [vmem:[%s3107_s0 + $0x298] sm:$0xff] }
 0x552   : > { %2169 = vmatpush.msra.mxu0 %v858_v4  ;;  %2209 = vmatpush.msrb.mxu1 %v890_v5  ;;  %v954_v3 = vld [vmem:[%s3107_s0 + $0x398] sm:$0xff]  ;;  %v908_v4 = vld [vmem:[%s3107_s0 + $0x228] sm:$0xff]  ;;  %v921_v5 = vld [vmem:[%s3107_s0 + $0x290] sm:$0xff] }
 0x553   : > { %2149 = vmatpush.msra.mxu2 %v842_v6  ;;  %2189 = vmatpush.msrb.mxu3 %v874_v12  ;;  %v940_v6 = vld [vmem:[%s3107_s0 + $0x328] sm:$0xff]  ;;  %v953_v12 = vld [vmem:[%s3107_s0 + $0x390] sm:$0xff] }
 0x554   : > { %2170 = vmatpush.msra.mxu0 %v857_v7  ;;  %2210 = vmatpush.msrb.mxu1 %v889_v9  ;;  %v907_v7 = vld [vmem:[%s3107_s0 + $0x220] sm:$0xff]  ;;  %v920_v9 = vld [vmem:[%s3107_s0 + $0x288] sm:$0xff] }
 0x555   : > { %2150 = vmatpush.msra.mxu2 %v841_v10  ;;  %2190 = vmatpush.msrb.mxu3 %v873_v11  ;;  %v939_v10 = vld [vmem:[%s3107_s0 + $0x320] sm:$0xff]  ;;  %v952_v11 = vld [vmem:[%s3107_s0 + $0x388] sm:$0xff] }
 0x556   : > { %2171 = vmatpush.msra.mxu0 %v856_v13  ;;  %2211 = vmatpush.msrb.mxu1 %v888_v15  ;;  %v906_v13 = vld [vmem:[%s3107_s0 + $0x218] sm:$0xff]  ;;  %v919_v15 = vld [vmem:[%s3107_s0 + $0x280] sm:$0xff] }
 0x557   : > { %2151 = vmatpush.msra.mxu2 %v840_v16  ;;  %2191 = vmatpush.msrb.mxu3 %v872_v17  ;;  %v938_v16 = vld [vmem:[%s3107_s0 + $0x318] sm:$0xff]  ;;  %v951_v17 = vld [vmem:[%s3107_s0 + $0x380] sm:$0xff] }
 0x558   : > { %2172 = vmatpush.msra.mxu0 %v855_v18  ;;  %2212 = vmatpush.msrb.mxu1 %v887_v20  ;;  %v905_v18 = vld [vmem:[%s3107_s0 + $0x210] sm:$0xff] }
 0x559   : > { %2152 = vmatpush.msra.mxu2 %v839_v22  ;;  %2192 = vmatpush.msrb.mxu3 %v871_v23  ;;  %v937_v20 = vld [vmem:[%s3107_s0 + $0x310] sm:$0xff]  ;;  %v903_v22 = vld [vmem:[%s3107_s0 + $0x200] sm:$0xff] }
 0x55a   : > { %2237 = vmatpush.msrb.mxu0 %v934_v19  ;;  %2277 = vmatpush.msra.mxu1 %v966_v21  ;;  %v904_v19 = vld [vmem:[%s3107_s0 + $0x208] sm:$0xff]  ;;  %v935_v23 = vld [vmem:[%s3107_s0 + $0x300] sm:$0xff] }
 0x55b   : > { %2217 = vmatpush.msrb.mxu2 %v918_v27  ;;  %2257 = vmatpush.msra.mxu3 %v950_v28  ;;  %v936_v21 = vld [vmem:[%s3107_s0 + $0x308] sm:$0xff] }
 0x55c   : > { %2238 = vmatpush.msrb.mxu0 %v933_v24  ;;  %2278 = vmatpush.msra.mxu1 %v965_v26  ;;  %v3520_v24 = vld [vmem:[%s3772_s15] sm:$0xff] }
 0x55d   : > { %2218 = vmatpush.msrb.mxu2 %v917_v14  ;;  %2258 = vmatpush.msra.mxu3 %v949_v31  ;;  %v1764_v26 = vperm.slane %v3520_v24, 1  ;;  %v1766_v27 = vperm.slane %v3520_v24, 3 }
 0x55e   : > { %2239 = vmatpush.msrb.mxu0 %v932_v29  ;;  %2279 = vmatpush.msra.mxu1 %v964_v30 }
 0x55f   : > { %2219 = vmatpush.msrb.mxu2 %v916_v25  ;;  %2259 = vmatpush.msra.mxu3 %v948_v35  ;;  %v1030_v35 = vld [vmem:[%s3107_s0 + $0x5f8] sm:$0xff] }
 0x560   : > { %2240 = vmatpush.msrb.mxu0 %v931_v33  ;;  %2280 = vmatpush.msra.mxu1 %v963_v34  ;;  %v998_v33 = vld [vmem:[%s3107_s0 + $0x4f8] sm:$0xff]  ;;  %v1763_v34 = vperm.slane %v3520_v24, 0 }
 0x561   : > { %2220 = vmatpush.msrb.mxu2 %v915_v38  ;;  %2260 = vmatpush.msra.mxu3 %v947_v39  ;;  %v1768_v38 = vperm.slane %v3520_v24, 5 }
 0x562   : > { %2241 = vmatpush.msrb.mxu0 %v930_v36  ;;  %2281 = vmatpush.msra.mxu1 %v962_v37  ;;  %v1765_v36 = vperm.slane %v3520_v24, 2  ;;  %v997_v37 = vld [vmem:[%s3107_s0 + $0x4f0] sm:$0xff] }
 0x563   : > { %2221 = vmatpush.msrb.mxu2 %v914_v42  ;;  %2261 = vmatpush.msra.mxu3 %v946_v43 }
 0x564   : > { %2242 = vmatpush.msrb.mxu0 %v929_v40  ;;  %2282 = vmatpush.msra.mxu1 %v961_v41  ;;  %v1029_v40 = vld [vmem:[%s3107_s0 + $0x5f0] sm:$0xff]  ;;  %v1770_v41 = vperm.slane %v3520_v24, 7 }
 0x565   : > { %2222 = vmatpush.msrb.mxu2 %v913_v46  ;;  %2262 = vmatpush.msra.mxu3 %v945_v47  ;;  %v1028_v47 = vld [vmem:[%s3107_s0 + $0x5e8] sm:$0xff] }
 0x566   : > { %2243 = vmatpush.msrb.mxu0 %v928_v44  ;;  %2283 = vmatpush.msra.mxu1 %v960_v45  ;;  %v996_v44 = vld [vmem:[%s3107_s0 + $0x4e8] sm:$0xff] }
 0x567   : > { %2223 = vmatpush.msrb.mxu2 %v912_v52  ;;  %2263 = vmatpush.msra.mxu3 %v944_v53  ;;  %v982_v53 = vld [vmem:[%s3107_s0 + $0x478] sm:$0xff] }
 0x568   : > { %2244 = vmatpush.msrb.mxu0 %v927_v48  ;;  %2284 = vmatpush.msra.mxu1 %v959_v49 }
 0x569   : > { %2224 = vmatpush.msrb.mxu2 %v911_v55  ;;  %2264 = vmatpush.msra.mxu3 %v943_v50  ;;  %v995_v55 = vld [vmem:[%s3107_s0 + $0x4e0] sm:$0xff]  ;;  %v1014_v50 = vld [vmem:[%s3107_s0 + $0x578] sm:$0xff] }
 0x56a   : > { %2245 = vmatpush.msrb.mxu0 %v926_v32  ;;  %2285 = vmatpush.msra.mxu1 %v958_v54 }
 0x56b   : > { %2225 = vmatpush.msrb.mxu2 %v910_v58  ;;  %2265 = vmatpush.msra.mxu3 %v942_v59  ;;  %v1767_v58 = vperm.slane %v3520_v24, 4 }
 0x56c   : > { %2246 = vmatpush.msrb.mxu0 %v925_v56  ;;  %2286 = vmatpush.msra.mxu1 %v957_v57  ;;  %v1027_v57 = vld [vmem:[%s3107_s0 + $0x5e0] sm:$0xff] }
 0x56d   : > { %2226 = vmatpush.msrb.mxu2 %v909_v62  ;;  %2266 = vmatpush.msra.mxu3 %v941_v63  ;;  %v994_v62 = vld [vmem:[%s3107_s0 + $0x4d8] sm:$0xff]  ;;  %v1013_v63 = vld [vmem:[%s3107_s0 + $0x570] sm:$0xff] }
 0x56e   : > { %2247 = vmatpush.msrb.mxu0 %v924_v60  ;;  %2287 = vmatpush.msra.mxu1 %v956_v8  ;;  %v981_v60 = vld [vmem:[%s3107_s0 + $0x470] sm:$0xff]  ;;  %v1769_v8 = vperm.slane %v3520_v24, 6  ;;  %v1022_v24 = vld [vmem:[%s3107_s0 + $0x5b8] sm:$0xff] }
 0x56f   : > { %2227 = vmatpush.msrb.mxu2 %v908_v4  ;;  %2267 = vmatpush.msra.mxu3 %v940_v6  ;;  %v1012_v6 = vld [vmem:[%s3107_s0 + $0x568] sm:$0xff] }
 0x570   : > { %2248 = vmatpush.msrb.mxu0 %v923_v0  ;;  %2288 = vmatpush.msra.mxu1 %v955_v1  ;;  %v1026_v0 = vld [vmem:[%s3107_s0 + $0x5d8] sm:$0xff] }
 0x571   : > { %2228 = vmatpush.msrb.mxu2 %v907_v7  ;;  %2268 = vmatpush.msra.mxu3 %v939_v10  ;;  %v1025_v7 = vld [vmem:[%s3107_s0 + $0x5d0] sm:$0xff] }
 0x572   : > { %2249 = vmatpush.msrb.mxu0 %v922_v2  ;;  %2289 = vmatpush.msra.mxu1 %v954_v3  ;;  %v980_v2 = vld [vmem:[%s3107_s0 + $0x468] sm:$0xff] }
 0x573   : > { %2229 = vmatpush.msrb.mxu2 %v906_v13  ;;  %2269 = vmatpush.msra.mxu3 %v938_v16  ;;  %v1011_v13 = vld [vmem:[%s3107_s0 + $0x560] sm:$0xff]  ;;  %v1024_v16 = vld [vmem:[%s3107_s0 + $0x5c8] sm:$0xff] }
 0x574   : > { %2250 = vmatpush.msrb.mxu0 %v921_v5  ;;  %2290 = vmatpush.msra.mxu1 %v953_v12  ;;  %v993_v5 = vld [vmem:[%s3107_s0 + $0x4d0] sm:$0xff] }
 0x575   : > { %2230 = vmatpush.msrb.mxu2 %v905_v18  ;;  %2270 = vmatpush.msra.mxu3 %v937_v20  ;;  %v991_v18 = vld [vmem:[%s3107_s0 + $0x4c0] sm:$0xff]  ;;  %v1010_v20 = vld [vmem:[%s3107_s0 + $0x558] sm:$0xff] }
 0x576   : > { %2251 = vmatpush.msrb.mxu0 %v920_v9  ;;  %2291 = vmatpush.msra.mxu1 %v952_v11  ;;  %v979_v9 = vld [vmem:[%s3107_s0 + $0x460] sm:$0xff]  ;;  %v992_v11 = vld [vmem:[%s3107_s0 + $0x4c8] sm:$0xff] }
 0x577   : > { %2231 = vmatpush.msrb.mxu2 %v904_v19  ;;  %2271 = vmatpush.msra.mxu3 %v936_v21  ;;  %v1023_v19 = vld [vmem:[%s3107_s0 + $0x5c0] sm:$0xff]  ;;  %v977_v21 = vld [vmem:[%s3107_s0 + $0x450] sm:$0xff] }
 0x578   : > { %2252 = vmatpush.msrb.mxu0 %v919_v15  ;;  %2292 = vmatpush.msra.mxu1 %v951_v17  ;;  %v978_v17 = vld [vmem:[%s3107_s0 + $0x458] sm:$0xff] }
 0x579   : > { %2232 = vmatpush.msrb.mxu2 %v903_v22  ;;  %2272 = vmatpush.msra.mxu3 %v935_v23  ;;  %v990_v22 = vld [vmem:[%s3107_s0 + $0x4b8] sm:$0xff]  ;;  %v1009_v23 = vld [vmem:[%s3107_s0 + $0x550] sm:$0xff] }
 0x59f   : > { %v1835_v28 = vpop.f32.mrf.mxu0 }
 0x5a0   : > { %v1836_v29 = vadd.f32 %v1835_v28, %v1764_v26  ;;  %v1875_v30 = vpop.f32.mrf.mxu1  ;;  %v976_v26 = vld [vmem:[%s3107_s0 + $0x448] sm:$0xff] }
 0x5a1   : > { %v1876_v14 = vadd.f32 %v1875_v30, %v1766_v27  ;;  %v989_v27 = vld [vmem:[%s3107_s0 + $0x4b0] sm:$0xff]  ;;  %v1008_v28 = vld [vmem:[%s3107_s0 + $0x548] sm:$0xff]  ;;  %v975_v30 = vld [vmem:[%s3107_s0 + $0x440] sm:$0xff] }
 0x5a2   : > { %v2119_v31 = vmax.f32 %v1836_v29, 0.0  ;;  %v1021_v29 = vld [vmem:[%s3107_s0 + $0x5b0] sm:$0xff] }
 0x5a3   : > { %v2121_v25 = vmax.f32 %v1876_v14, 0.0  ;;  %v988_v14 = vld [vmem:[%s3107_s0 + $0x4a8] sm:$0xff] }
 0x5a4   : > { %2173 = vmatmul.f32.vlgmr.msra.gmra.mxu0 %v2119_v31  ;;  %v1007_v31 = vld [vmem:[%s3107_s0 + $0x540] sm:$0xff] }
 0x5a5   : > { %2213 = vmatmul.f32.vlgmr.msrb.gmra.mxu1 %v2121_v25  ;;  %2317 = vmatpush.msra.mxu0 %v998_v33  ;;  %v1815_v39 = vpop.f32.mrf.mxu2  ;;  %v3568_v33 = vld [vmem:[%s3772_s15 + $0x8] sm:$0xff]  ;;  %v974_v25 = vld [vmem:[%s3107_s0 + $0x438] sm:$0xff] }
 0x5a6   : > { %2357 = vmatpush.msrb.mxu1 %v1030_v35  ;;  %v1816_v42 = vadd.f32 %v1815_v39, %v1763_v34  ;;  %v1855_v43 = vpop.f32.mrf.mxu3  ;;  %v1020_v34 = vld [vmem:[%s3107_s0 + $0x5a8] sm:$0xff]  ;;  %v987_v35 = vld [vmem:[%s3107_s0 + $0x4a0] sm:$0xff]  ;;  %v1772_v39 = vperm.slane %v3568_v33, 1 }
 0x5a7   : > { %v1856_v45 = vadd.f32 %v1855_v43, %v1765_v36  ;;  %2318 = vmatpush.msra.mxu0 %v997_v37  ;;  %v1915_v46 = vpop.f32.mrf.mxu0  ;;  %v1006_v36 = vld [vmem:[%s3107_s0 + $0x538] sm:$0xff]  ;;  %v1019_v37 = vld [vmem:[%s3107_s0 + $0x5a0] sm:$0xff]  ;;  %v1774_v43 = vperm.slane %v3568_v33, 3 }
 0x5a8   : > { %v2118_v48 = vmax.f32 %v1816_v42, 0.0  ;;  %2358 = vmatpush.msrb.mxu1 %v1029_v40  ;;  %v1916_v49 = vadd.f32 %v1915_v46, %v1768_v38  ;;  %v1955_v52 = vpop.f32.mrf.mxu1  ;;  %v973_v38 = vld [vmem:[%s3107_s0 + $0x430] sm:$0xff]  ;;  %v986_v40 = vld [vmem:[%s3107_s0 + $0x498] sm:$0xff] }
 0x5a9   : > { %v2120_v32 = vmax.f32 %v1856_v45, 0.0  ;;  %v1956_v54 = vadd.f32 %v1955_v52, %v1770_v41  ;;  %2319 = vmatpush.msra.mxu0 %v996_v44  ;;  %v1005_v41 = vld [vmem:[%s3107_s0 + $0x530] sm:$0xff]  ;;  %v1018_v44 = vld [vmem:[%s3107_s0 + $0x598] sm:$0xff]  ;;  %v972_v45 = vld [vmem:[%s3107_s0 + $0x428] sm:$0xff] }
 0x5aa   : > { %v2123_v56 = vmax.f32 %v1916_v49, 0.0  ;;  %2359 = vmatpush.msrb.mxu1 %v1028_v47  ;;  %2153 = vmatmul.f32.vlgmr.msra.gmra.mxu2 %v2118_v48  ;;  %v985_v47 = vld [vmem:[%s3107_s0 + $0x490] sm:$0xff]  ;;  %v1004_v48 = vld [vmem:[%s3107_s0 + $0x528] sm:$0xff]  ;;  %v971_v52 = vld [vmem:[%s3107_s0 + $0x420] sm:$0xff] }
 0x5ab   : > { %v2125_v59 = vmax.f32 %v1956_v54, 0.0  ;;  %2193 = vmatmul.f32.vlgmr.msrb.gmra.mxu3 %v2120_v32  ;;  %2297 = vmatpush.msra.mxu2 %v982_v53  ;;  %v1017_v49 = vld [vmem:[%s3107_s0 + $0x590] sm:$0xff]  ;;  %v984_v32 = vld [vmem:[%s3107_s0 + $0x488] sm:$0xff]  ;;  %v1003_v54 = vld [vmem:[%s3107_s0 + $0x520] sm:$0xff] }
 0x5ac   : > { %2320 = vmatpush.msra.mxu0 %v995_v55  ;;  %2337 = vmatpush.msrb.mxu3 %v1014_v50  ;;  %v1016_v50 = vld [vmem:[%s3107_s0 + $0x588] sm:$0xff] }
 0x5ad   : > { %2360 = vmatpush.msrb.mxu1 %v1027_v57  ;;  %2253 = vmatmul.f32.vlgmr.msrb.gmra.mxu0 %v2123_v56  ;;  %v1895_v1 = vpop.f32.mrf.mxu2  ;;  %v970_v56 = vld [vmem:[%s3107_s0 + $0x418] sm:$0xff]  ;;  %v983_v57 = vld [vmem:[%s3107_s0 + $0x480] sm:$0xff] }
 0x5ae   : > { %2293 = vmatmul.f32.vlgmr.msra.gmra.mxu1 %v2125_v59  ;;  %2298 = vmatpush.msra.mxu2 %v981_v60  ;;  %v1896_v3 = vadd.f32 %v1895_v1, %v1767_v58  ;;  %v1935_v4 = vpop.f32.mrf.mxu3  ;;  %v1002_v58 = vld [vmem:[%s3107_s0 + $0x518] sm:$0xff]  ;;  %v1771_v59 = vperm.slane %v3568_v33, 0  ;;  %v1015_v60 = vld [vmem:[%s3107_s0 + $0x580] sm:$0xff] }
 0x5af   : > { %2321 = vmatpush.msra.mxu0 %v994_v62  ;;  %2338 = vmatpush.msrb.mxu3 %v1013_v63  ;;  %v1936_v12 = vadd.f32 %v1935_v4, %v1769_v8  ;;  %v1995_v42 = vpop.f32.mrf.mxu0  ;;  %v1773_v63 = vperm.slane %v3568_v33, 2  ;;  %v969_v4 = vld [vmem:[%s3107_s0 + $0x410] sm:$0xff] }
 0x5b0   : > { %2361 = vmatpush.msrb.mxu1 %v1026_v0  ;;  %v2122_v10 = vmax.f32 %v1896_v3, 0.0  ;;  %2299 = vmatpush.msra.mxu2 %v980_v2  ;;  %v2035_v46 = vpop.f32.mrf.mxu1  ;;  %v1996_v53 = vadd.f32 %v1995_v42, %v1772_v39  ;;  %v1062_v0 = vld [vmem:[%s3107_s0 + $0x6f8] sm:$0xff] }
 0x5b1   : > { %v2124_v15 = vmax.f32 %v1936_v12, 0.0  ;;  %2322 = vmatpush.msra.mxu0 %v993_v5  ;;  %2339 = vmatpush.msrb.mxu3 %v1012_v6  ;;  %v2036_v55 = vadd.f32 %v2035_v46, %v1774_v43  ;;  %v1094_v3 = vld [vmem:[%s3107_s0 + $0x7f8] sm:$0xff]  ;;  %v1001_v5 = vld [vmem:[%s3107_s0 + $0x510] sm:$0xff] }
 0x5b2   : > { %2362 = vmatpush.msrb.mxu1 %v1025_v7  ;;  %2300 = vmatpush.msra.mxu2 %v979_v9  ;;  %v2127_v8 = vmax.f32 %v1996_v53, 0.0  ;;  %v1061_v6 = vld [vmem:[%s3107_s0 + $0x6f0] sm:$0xff]  ;;  %v968_v9 = vld [vmem:[%s3107_s0 + $0x408] sm:$0xff]  ;;  %v1074_v39 = vld [vmem:[%s3107_s0 + $0x758] sm:$0xff] }
 0x5b3   : > { %2323 = vmatpush.msra.mxu0 %v992_v11  ;;  %2340 = vmatpush.msrb.mxu3 %v1011_v13  ;;  %v2129_v1 = vmax.f32 %v2036_v55, 0.0  ;;  %v1093_v7 = vld [vmem:[%s3107_s0 + $0x7f0] sm:$0xff]  ;;  %v1000_v11 = vld [vmem:[%s3107_s0 + $0x508] sm:$0xff]  ;;  %v1054_v42 = vld [vmem:[%s3107_s0 + $0x6b8] sm:$0xff] }
 0x5b4   : > { %2363 = vmatpush.msrb.mxu1 %v1024_v16  ;;  %2233 = vmatmul.f32.vlgmr.msrb.gmra.mxu2 %v2122_v10  ;;  %v1060_v13 = vld [vmem:[%s3107_s0 + $0x6e8] sm:$0xff]  ;;  %v967_v16 = vld [vmem:[%s3107_s0 + $0x400] sm:$0xff]  ;;  %v1073_v43 = vld [vmem:[%s3107_s0 + $0x750] sm:$0xff] }
 0x5b5   : > { %2273 = vmatmul.f32.vlgmr.msra.gmra.mxu3 %v2124_v15  ;;  %2301 = vmatpush.msra.mxu2 %v978_v17  ;;  %v1975_v62 = vpop.f32.mrf.mxu2  ;;  %v1092_v15 = vld [vmem:[%s3107_s0 + $0x7e8] sm:$0xff]  ;;  %v999_v17 = vld [vmem:[%s3107_s0 + $0x500] sm:$0xff]  ;;  %v1053_v46 = vld [vmem:[%s3107_s0 + $0x6b0] sm:$0xff] }
 0x5b6   : > { %2324 = vmatpush.msra.mxu0 %v991_v18  ;;  %2341 = vmatpush.msrb.mxu3 %v1010_v20  ;;  %v2015_v2 = vpop.f32.mrf.mxu3  ;;  %v1976_v12 = vadd.f32 %v1975_v62, %v1771_v59  ;;  %v1046_v20 = vld [vmem:[%s3107_s0 + $0x678] sm:$0xff]  ;;  %v1071_v53 = vld [vmem:[%s3107_s0 + $0x740] sm:$0xff]  ;;  %v1778_v62 = vperm.slane %v3568_v33, 7 }
 0x5b7   : > { %2364 = vmatpush.msrb.mxu1 %v1023_v19  ;;  %2302 = vmatpush.msra.mxu2 %v977_v21  ;;  %v2016_v10 = vadd.f32 %v2015_v2, %v1773_v63  ;;  %v1059_v21 = vld [vmem:[%s3107_s0 + $0x6e0] sm:$0xff]  ;;  %v1050_v59 = vld [vmem:[%s3107_s0 + $0x698] sm:$0xff]  ;;  %v1049_v2 = vld [vmem:[%s3107_s0 + $0x690] sm:$0xff] }
 0x5b8   : > { %2325 = vmatpush.msra.mxu0 %v990_v22  ;;  %2342 = vmatpush.msrb.mxu3 %v1009_v23  ;;  %v2126_v18 = vmax.f32 %v1976_v12, 0.0  ;;  %v1078_v22 = vld [vmem:[%s3107_s0 + $0x778] sm:$0xff]  ;;  %v1091_v23 = vld [vmem:[%s3107_s0 + $0x7e0] sm:$0xff]  ;;  %v1048_v12 = vld [vmem:[%s3107_s0 + $0x688] sm:$0xff] }
 0x5b9   : > { %2365 = vmatpush.msrb.mxu1 %v1022_v24  ;;  %2303 = vmatpush.msra.mxu2 %v976_v26  ;;  %v2128_v19 = vmax.f32 %v2016_v10, 0.0  ;;  %v1045_v24 = vld [vmem:[%s3107_s0 + $0x670] sm:$0xff]  ;;  %v1058_v26 = vld [vmem:[%s3107_s0 + $0x6d8] sm:$0xff]  ;;  %v1051_v55 = vld [vmem:[%s3107_s0 + $0x6a0] sm:$0xff] }
 0x5ba   : > { %2326 = vmatpush.msra.mxu0 %v989_v27  ;;  %2343 = vmatpush.msrb.mxu3 %v1008_v28  ;;  %v1077_v27 = vld [vmem:[%s3107_s0 + $0x770] sm:$0xff]  ;;  %v1090_v28 = vld [vmem:[%s3107_s0 + $0x7d8] sm:$0xff]  ;;  %v1080_v10 = vld [vmem:[%s3107_s0 + $0x788] sm:$0xff] }
 0x5bb   : > { %2366 = vmatpush.msrb.mxu1 %v1021_v29  ;;  %2304 = vmatpush.msra.mxu2 %v975_v30  ;;  %v1044_v29 = vld [vmem:[%s3107_s0 + $0x668] sm:$0xff]  ;;  %v1057_v30 = vld [vmem:[%s3107_s0 + $0x6d0] sm:$0xff]  ;;  %v1082_v63 = vld [vmem:[%s3107_s0 + $0x798] sm:$0xff] }
 0x5bc   : > { %2327 = vmatpush.msra.mxu0 %v988_v14  ;;  %2344 = vmatpush.msrb.mxu3 %v1007_v31  ;;  %v1076_v14 = vld [vmem:[%s3107_s0 + $0x768] sm:$0xff]  ;;  %v1089_v31 = vld [vmem:[%s3107_s0 + $0x7d0] sm:$0xff] }
 0x5bd   : > { %2367 = vmatpush.msrb.mxu1 %v1020_v34  ;;  %2305 = vmatpush.msra.mxu2 %v974_v25  ;;  %v1043_v34 = vld [vmem:[%s3107_s0 + $0x660] sm:$0xff]  ;;  %v1056_v25 = vld [vmem:[%s3107_s0 + $0x6c8] sm:$0xff] }
 0x5be   : > { %2328 = vmatpush.msra.mxu0 %v987_v35  ;;  %2345 = vmatpush.msrb.mxu3 %v1006_v36  ;;  %v1075_v35 = vld [vmem:[%s3107_s0 + $0x760] sm:$0xff]  ;;  %v1088_v36 = vld [vmem:[%s3107_s0 + $0x7c8] sm:$0xff] }
 0x5bf   : > { %2368 = vmatpush.msrb.mxu1 %v1019_v37  ;;  %2306 = vmatpush.msra.mxu2 %v973_v38  ;;  %v1042_v37 = vld [vmem:[%s3107_s0 + $0x658] sm:$0xff]  ;;  %v1055_v38 = vld [vmem:[%s3107_s0 + $0x6c0] sm:$0xff] }
 0x5c0   : > { %2329 = vmatpush.msra.mxu0 %v986_v40  ;;  %2346 = vmatpush.msrb.mxu3 %v1005_v41  ;;  %v1087_v40 = vld [vmem:[%s3107_s0 + $0x7c0] sm:$0xff]  ;;  %v1041_v41 = vld [vmem:[%s3107_s0 + $0x650] sm:$0xff] }
 0x5c1   : > { %2369 = vmatpush.msrb.mxu1 %v1018_v44  ;;  %2307 = vmatpush.msra.mxu2 %v972_v45  ;;  %v1086_v44 = vld [vmem:[%s3107_s0 + $0x7b8] sm:$0xff]  ;;  %v1040_v45 = vld [vmem:[%s3107_s0 + $0x648] sm:$0xff] }
 0x5c2   : > { %2330 = vmatpush.msra.mxu0 %v985_v47  ;;  %2347 = vmatpush.msrb.mxu3 %v1004_v48  ;;  %v1072_v47 = vld [vmem:[%s3107_s0 + $0x748] sm:$0xff]  ;;  %v1085_v48 = vld [vmem:[%s3107_s0 + $0x7b0] sm:$0xff] }
 0x5c3   : > { %2370 = vmatpush.msrb.mxu1 %v1017_v49  ;;  %2308 = vmatpush.msra.mxu2 %v971_v52  ;;  %v1039_v49 = vld [vmem:[%s3107_s0 + $0x640] sm:$0xff]  ;;  %v1052_v52 = vld [vmem:[%s3107_s0 + $0x6a8] sm:$0xff] }
 0x5c4   : > { %2331 = vmatpush.msra.mxu0 %v984_v32  ;;  %2348 = vmatpush.msrb.mxu3 %v1003_v54  ;;  %v1084_v32 = vld [vmem:[%s3107_s0 + $0x7a8] sm:$0xff]  ;;  %v1038_v54 = vld [vmem:[%s3107_s0 + $0x638] sm:$0xff] }
 0x5c5   : > { %2371 = vmatpush.msrb.mxu1 %v1016_v50  ;;  %2309 = vmatpush.msra.mxu2 %v970_v56  ;;  %v1070_v50 = vld [vmem:[%s3107_s0 + $0x738] sm:$0xff]  ;;  %v1083_v56 = vld [vmem:[%s3107_s0 + $0x7a0] sm:$0xff] }
 0x5c6   : > { %2332 = vmatpush.msra.mxu0 %v983_v57  ;;  %2349 = vmatpush.msrb.mxu3 %v1002_v58  ;;  %v1037_v57 = vld [vmem:[%s3107_s0 + $0x630] sm:$0xff]  ;;  %v1776_v58 = vperm.slane %v3568_v33, 5 }
 0x5c7   : > { %2372 = vmatpush.msrb.mxu1 %v1015_v60  ;;  %2333 = vmatmul.f32.vlgmr.msra.gmra.mxu0 %v2127_v8  ;;  %v1069_v60 = vld [vmem:[%s3107_s0 + $0x730] sm:$0xff]  ;;  %v2075_v8 = vpop.f32.mrf.mxu0 }
 0x5c8   : > { %2373 = vmatmul.f32.vlgmr.msrb.gmra.mxu1 %v2129_v1  ;;  %2397 = vmatpush.msrb.mxu0 %v1062_v0  ;;  %v1036_v0 = vld [vmem:[%s3107_s0 + $0x628] sm:$0xff]  ;;  %v2115_v1 = vpop.f32.mrf.mxu1 }
 0x5c9   : > { %2437 = vmatpush.msra.mxu1 %v1094_v3  ;;  %2310 = vmatpush.msra.mxu2 %v969_v4  ;;  %v1068_v3 = vld [vmem:[%s3107_s0 + $0x728] sm:$0xff]  ;;  %v1081_v4 = vld [vmem:[%s3107_s0 + $0x790] sm:$0xff] }
 0x5ca   : > { %2350 = vmatpush.msrb.mxu3 %v1001_v5  ;;  %2398 = vmatpush.msrb.mxu0 %v1061_v6  ;;  %v1035_v5 = vld [vmem:[%s3107_s0 + $0x620] sm:$0xff]  ;;  %v2076_v6 = vadd.f32 %v2075_v8, %v1776_v58 }
 0x5cb   : > { %2438 = vmatpush.msra.mxu1 %v1093_v7  ;;  %2311 = vmatpush.msra.mxu2 %v968_v9  ;;  %v1067_v7 = vld [vmem:[%s3107_s0 + $0x720] sm:$0xff]  ;;  %v2116_v9 = vadd.f32 %v2115_v1, %v1778_v62 }
 0x5cc   : > { %2351 = vmatpush.msrb.mxu3 %v1000_v11  ;;  %2399 = vmatpush.msrb.mxu0 %v1060_v13  ;;  %v1034_v11 = vld [vmem:[%s3107_s0 + $0x618] sm:$0xff]  ;;  %v1775_v13 = vperm.slane %v3568_v33, 4 }
 0x5cd   : > { %2439 = vmatpush.msra.mxu1 %v1092_v15  ;;  %2312 = vmatpush.msra.mxu2 %v967_v16  ;;  %v1047_v15 = vld [vmem:[%s3107_s0 + $0x680] sm:$0xff]  ;;  %v1066_v16 = vld [vmem:[%s3107_s0 + $0x718] sm:$0xff] }
 0x5ce   : > { %2352 = vmatpush.msrb.mxu3 %v999_v17  ;;  %2313 = vmatmul.f32.vlgmr.msra.gmra.mxu2 %v2126_v18  ;;  %v2055_v17 = vpop.f32.mrf.mxu2  ;;  %v1777_v18 = vperm.slane %v3568_v33, 6  ;;  %v1032_v33 = vld [vmem:[%s3107_s0 + $0x608] sm:$0xff] }
 0x5cf   : > { %2353 = vmatmul.f32.vlgmr.msrb.gmra.mxu3 %v2128_v19  ;;  %2377 = vmatpush.msrb.mxu2 %v1046_v20  ;;  %v1079_v20 = vld [vmem:[%s3107_s0 + $0x780] sm:$0xff]  ;;  %v2131_v19 = vmax.f32 %v2076_v6, 0.0 }
 0x5d0   : > { %2400 = vmatpush.msrb.mxu0 %v1059_v21  ;;  %2417 = vmatpush.msra.mxu3 %v1078_v22  ;;  %v2095_v21 = vpop.f32.mrf.mxu3  ;;  %v1033_v22 = vld [vmem:[%s3107_s0 + $0x610] sm:$0xff] }
 0x5d1   : > { %2440 = vmatpush.msra.mxu1 %v1091_v23  ;;  %2378 = vmatpush.msrb.mxu2 %v1045_v24  ;;  %v2133_v23 = vmax.f32 %v2116_v9, 0.0  ;;  %v1065_v24 = vld [vmem:[%s3107_s0 + $0x710] sm:$0xff] }
 0x5d2   : > { %2401 = vmatpush.msrb.mxu0 %v1058_v26  ;;  %2418 = vmatpush.msra.mxu3 %v1077_v27  ;;  %v2056_v26 = vadd.f32 %v2055_v17, %v1775_v13  ;;  %v2096_v27 = vadd.f32 %v2095_v21, %v1777_v18 }
 0x5d3   : > { %2441 = vmatpush.msra.mxu1 %v1090_v28  ;;  %2379 = vmatpush.msrb.mxu2 %v1044_v29  ;;  %v1064_v28 = vld [vmem:[%s3107_s0 + $0x708] sm:$0xff]  ;;  %v1031_v29 = vld [vmem:[%s3107_s0 + $0x600] sm:$0xff] }
 0x5d4   : > { %2402 = vmatpush.msrb.mxu0 %v1057_v30  ;;  %2419 = vmatpush.msra.mxu3 %v1076_v14  ;;  %v1063_v30 = vld [vmem:[%s3107_s0 + $0x700] sm:$0xff]  ;;  %v2130_v14 = vmax.f32 %v2056_v26, 0.0 }
 0x5d5   : > { %2442 = vmatpush.msra.mxu1 %v1089_v31  ;;  %2380 = vmatpush.msrb.mxu2 %v1043_v34  ;;  %v2132_v31 = vmax.f32 %v2096_v27, 0.0  ;;  %v2845_v34 = vld [vmem:[%s740_s20] ss:$0 sm:$0xff] }
 0x5d6   : > { %2403 = vmatpush.msrb.mxu0 %v1056_v25  ;;  %2420 = vmatpush.msra.mxu3 %v1075_v35 }
 0x5d7   : > { %2443 = vmatpush.msra.mxu1 %v1088_v36  ;;  %2381 = vmatpush.msrb.mxu2 %v1042_v37 }
 0x5d8   : > { %2404 = vmatpush.msrb.mxu0 %v1055_v38  ;;  %2421 = vmatpush.msra.mxu3 %v1074_v39 }
 0x5d9   : > { %2444 = vmatpush.msra.mxu1 %v1087_v40  ;;  %2382 = vmatpush.msrb.mxu2 %v1041_v41 }
 0x5da   : > { %2405 = vmatpush.msrb.mxu0 %v1054_v42  ;;  %2422 = vmatpush.msra.mxu3 %v1073_v43 }
 0x5db   : > { %2445 = vmatpush.msra.mxu1 %v1086_v44  ;;  %2383 = vmatpush.msrb.mxu2 %v1040_v45 }
 0x5dc   : > { %2406 = vmatpush.msrb.mxu0 %v1053_v46  ;;  %2423 = vmatpush.msra.mxu3 %v1072_v47 }
 0x5dd   : > { %2446 = vmatpush.msra.mxu1 %v1085_v48  ;;  %2384 = vmatpush.msrb.mxu2 %v1039_v49 }
 0x5de   : > { %2407 = vmatpush.msrb.mxu0 %v1052_v52  ;;  %2424 = vmatpush.msra.mxu3 %v1071_v53 }
 0x5df   : > { %2447 = vmatpush.msra.mxu1 %v1084_v32  ;;  %2385 = vmatpush.msrb.mxu2 %v1038_v54 }
 0x5e0   : > { %2408 = vmatpush.msrb.mxu0 %v1051_v55  ;;  %2425 = vmatpush.msra.mxu3 %v1070_v50 }
 0x5e1   : > { %2448 = vmatpush.msra.mxu1 %v1083_v56  ;;  %2386 = vmatpush.msrb.mxu2 %v1037_v57 }
 0x5e2   : > { %2409 = vmatpush.msrb.mxu0 %v1050_v59  ;;  %2426 = vmatpush.msra.mxu3 %v1069_v60 }
 0x5e3   : > { %2449 = vmatpush.msra.mxu1 %v1082_v63  ;;  %2387 = vmatpush.msrb.mxu2 %v1036_v0 }
 0x5e4   : > { %2410 = vmatpush.msrb.mxu0 %v1049_v2  ;;  %2427 = vmatpush.msra.mxu3 %v1068_v3 }
 0x5e5   : > { %2450 = vmatpush.msra.mxu1 %v1081_v4  ;;  %2388 = vmatpush.msrb.mxu2 %v1035_v5 }
 0x5e6   : > { %2411 = vmatpush.msrb.mxu0 %v1048_v12  ;;  %2428 = vmatpush.msra.mxu3 %v1067_v7 }
 0x5e7   : > { %2451 = vmatpush.msra.mxu1 %v1080_v10  ;;  %2389 = vmatpush.msrb.mxu2 %v1034_v11 }
 0x5e8   : > { %2412 = vmatpush.msrb.mxu0 %v1047_v15  ;;  %2429 = vmatpush.msra.mxu3 %v1066_v16 }
 0x5e9   : > { %2452 = vmatpush.msra.mxu1 %v1079_v20  ;;  %2413 = vmatmul.f32.vlgmr.msrb.gmra.mxu0 %v2131_v19  ;;  %v2846_v20 = vld [vmem:[%s743_s3] ss:$0 sm:$0xff] }
 0x5ea   : > { %2453 = vmatmul.f32.vlgmr.msra.gmra.mxu1 %v2133_v23  ;;  %2390 = vmatpush.msrb.mxu2 %v1033_v22  ;;  %v2847_v22 = vld [vmem:[%s746_s16] ss:$0 sm:$0xff] }
 0x5eb   : > { %2430 = vmatpush.msra.mxu3 %v1065_v24 }
 0x5ec   : > { %2391 = vmatpush.msrb.mxu2 %v1032_v33 }
 0x5ed   : > { %2431 = vmatpush.msra.mxu3 %v1064_v28 }
 0x5ee   : > { %2392 = vmatpush.msrb.mxu2 %v1031_v29 }
 0x5ef   : > { %2432 = vmatpush.msra.mxu3 %v1063_v30  ;;  %2393 = vmatmul.f32.vlgmr.msrb.gmra.mxu2 %v2130_v14 }
 0x5f0   : > { %2433 = vmatmul.f32.vlgmr.msra.gmra.mxu3 %v2132_v31 }
 0x621   : > { %v2174_v36 = vpop.f32.mrf.mxu0 }
 0x622   : > { %v2214_v40 = vpop.f32.mrf.mxu1 }
 0x62a   : > { %v2254_v44 = vpop.f32.mrf.mxu0 }
 0x62b   : > { %v2294_v48 = vpop.f32.mrf.mxu1 }
 0x62d   : > { %v2154_v25 = vpop.f32.mrf.mxu2 }
 0x62e   : > { %v2155_v35 = vadd.f32 %v2845_v34, %v2154_v25  ;;  %v2194_v38 = vpop.f32.mrf.mxu3 }
 0x630   : > { %v2175_v37 = vadd.f32 %v2174_v36, %v2155_v35 }
 0x632   : > { %v2195_v39 = vadd.f32 %v2194_v38, %v2175_v37 }
 0x634   : > { %v2215_v41 = vadd.f32 %v2214_v40, %v2195_v39  ;;  %v2848_v40 = vld [vmem:[%s3775_s1] ss:$0 sm:$0xff] }
 0x637   : > { %v2234_v42 = vpop.f32.mrf.mxu2 }
 0x638   : > { %v2235_v43 = vadd.f32 %v2234_v42, %v2215_v41  ;;  %v2274_v46 = vpop.f32.mrf.mxu3  ;;  %v2522_v42 = vstv %s2521_s30 }
 0x639   : > { %vm2523_vm13 = vcmp.eq.s32.totalorder %v2522_v42, 1 }
 0x63a   : > { %v2255_v45 = vadd.f32 %v2254_v44, %v2235_v43 }
 0x63c   : > { %v2275_v47 = vadd.f32 %v2274_v46, %v2255_v45 }
 0x63e   : > { %v2295_v52 = vadd.f32 %v2294_v48, %v2275_v47 }
 0x644   : > { %v2334_v32 = vpop.f32.mrf.mxu0 }
 0x645   : > { %v2374_v56 = vpop.f32.mrf.mxu1 }
 0x651   : > { %v2314_v49 = vpop.f32.mrf.mxu2 }
 0x652   : > { %v2315_v53 = vadd.f32 %v2314_v49, %v2295_v52  ;;  %v2354_v55 = vpop.f32.mrf.mxu3 }
 0x654   : > { %v2335_v54 = vadd.f32 %v2334_v32, %v2315_v53 }
 0x656   : > { %v2355_v50 = vadd.f32 %v2354_v55, %v2335_v54 }
 0x658   : > { %v2375_v57 = vadd.f32 %v2374_v56, %v2355_v50 }
 0x666   : > { %v2414_v60 = vpop.f32.mrf.mxu0 }
 0x667   : > { %v2454_v0 = vpop.f32.mrf.mxu1 }
 0x672   : > { %v2394_v58 = vpop.f32.mrf.mxu2 }
 0x673   : > { %v2395_v59 = vadd.f32 %v2394_v58, %v2375_v57  ;;  %v2434_v62 = vpop.f32.mrf.mxu3 }
 0x675   : > { %v2415_v8 = vadd.f32 %v2414_v60, %v2395_v59 }
 0x677   : > { %v2435_v63 = vadd.f32 %v2434_v62, %v2415_v8 }
 0x679   : > { %v2455_v1 = vadd.f32 %v2454_v0, %v2435_v63 }
 0x67b   : > { %v2457_v2 = vadd.f32 %v2455_v1, %v3325_v51 }
 0x67d   : > { %v2458_v3 = vsel %vm1101_vm1, %v2457_v2, 0.0 }
 0x67e   : > { %2459 = vadd.xlane.f32.xlu0 %v2458_v3 }
 0x6f1   : > { %v2460_v4 = vpop.xlane.xlu0 %2459 }
 0x6f2   : > { %v2461_v5 = vmul.f32 %v2460_v4, %v3273_v61 }
 0x6f4   : > { %v2462_v6 = vsub.f32 %v2457_v2, %v2461_v5 }
 0x6f6   : > { %v2463_v12 = vmul.f32 %v2462_v6, %v2462_v6 }
 0x6f8   : > { %v2464_v7 = vsel %vm1101_vm1, %v2463_v12, 0.0 }
 0x6f9   : > { %2465 = vadd.xlane.f32.xlu2 %v2464_v7 }
 0x76c   : > { %v2466_v9 = vpop.xlane.xlu2 %2465 }
 0x76d   : > { %v2467_v10 = vmul.f32 %v2466_v9, %v3273_v61 }
 0x76f   : > { %v2468_v11 = vadd.f32 1e-05, %v2467_v10 }
 0x771   : > { %2886 = vrsqrt.f32 %v2468_v11  ;;  %vm2475_vm8 = vweird.f32 %v2468_v11 }
 0x777   : > { %v2887_v13 = vpop.eup %2886 }
 0x778   : > { %v2470_v51 = vmul.f32 %v2887_v13, %v2468_v11  ;;  %vm2476_vm7 = vweird.f32 %v2887_v13 }
 0x779   : > { %vm2477_vm9 = vmor %vm2475_vm8, %vm2476_vm7 }
 0x77a   : > { %v2471_v15 = vmul.f32 %v2887_v13, %v2470_v51 }
 0x77c   : > { %v2472_v16 = vmul.f32 0.5, %v2471_v15 }
 0x77e   : > { %v2473_v17 = vsub.f32 1.5, %v2472_v16 }
 0x780   : > { %v2474_v18 = vmul.f32 %v2887_v13, %v2473_v17 }
 0x782   : > { %v2478_v19 = vsel %vm2477_vm9, %v2887_v13, %v2474_v18 }
 0x783   : > { %v2479_v21 = vmul.f32 %v2478_v19, %v2462_v6 }
 0x785   : > { %v2483_v23 = vmul.f32 %v2846_v20, %v2479_v21 }
 0x787   : > { %v2487_v24 = vadd.f32 %v2847_v22, %v2483_v23 }
 0x789   : > { %v2491_v26 = vsel %vm1101_vm1, %v2487_v24, 0.0 }
 0x78a   : > { %2492 = vadd.xlane.f32.xlu0 %v2491_v26 }
 0x7fd   : > { %v2493_v33 = vpop.xlane.xlu0 %2492 }
 0x7fe   : > { %v2494_v27 = vmul.f32 %v2493_v33, %v3273_v61 }
 0x800   : > { %v2495_v28 = vsub.f32 %v2487_v24, %v2494_v27 }
 0x802   : > { %v2496_v29 = vmul.f32 %v2495_v28, %v2495_v28 }
 0x804   : > { %v2497_v30 = vsel %vm1101_vm1, %v2496_v29, 0.0 }
 0x805   : > { %2498 = vadd.xlane.f32.xlu0 %v2497_v30 }
 0x878   : > { %v2499_v14 = vpop.xlane.xlu0 %2498 }
 0x879   : > { %v2500_v31 = vmul.f32 %v2499_v14, %v3273_v61  ;;  %v2849_v61 = vld [vmem:[%s3776_s2] ss:$0 sm:$0xff] }
 0x87b   : > { %v2501_v34 = vadd.f32 1e-05, %v2500_v31 }
 0x87d   : > { %2888 = vrsqrt.f32 %v2501_v34  ;;  %vm2508_vm11 = vweird.f32 %v2501_v34 }
 0x883   : > { %v2889_v25 = vpop.eup %2888 }
 0x884   : > { %v2503_v35 = vmul.f32 %v2889_v25, %v2501_v34  ;;  %vm2509_vm10 = vweird.f32 %v2889_v25 }
 0x885   : > { %vm2510_vm12 = vmor %vm2508_vm11, %vm2509_vm10 }
 0x886   : > { %v2504_v36 = vmul.f32 %v2889_v25, %v2503_v35 }
 0x888   : > { %v2505_v37 = vmul.f32 0.5, %v2504_v36 }
 0x88a   : > { %v2506_v38 = vsub.f32 1.5, %v2505_v37 }
 0x88c   : > { %v2507_v39 = vmul.f32 %v2889_v25, %v2506_v38 }
 0x88e   : > { %v2511_v41 = vsel %vm2510_vm12, %v2889_v25, %v2507_v39 }
 0x88f   : > { %v2512_v43 = vmul.f32 %v2511_v41, %v2495_v28 }
 0x891   : > { %v2516_v44 = vmul.f32 %v2848_v40, %v2512_v43 }
 0x893   : > { %v2520_v45 = vadd.f32 %v2849_v61, %v2516_v44 }
 0x895   : > { %v2524_v46 = vsel %vm2523_vm13, %v2520_v45, %v2487_v24 }
 0x896   : > { %2525 = vst.msk [vmem:[%s3120_s24] sm:$0xff] %vm1101_vm1, %v2524_v46 }
 0x897 PF: > { %s3777_s27 = sld [smem:[#allocation5_spill]] }
 0x898   : > { %s3778_s24 = sld [smem:[#allocation3_spill]] }
 0x899   : > { %s3779_s25 = sld [smem:[#allocation4_spill]] }
 0x89a   : > { %s3780_s26 = sld [smem:[#allocation6_spill]] }
 0x89d   : > { %s27_s28 = sadd.s32 1, %s3777_s27   ;;  %s3781_s27 = sld [smem:[#allocation7_spill]] }
 0x89e   : > { %p24_p9 = scmp.ge.s32.totalorder %s27_s28, 14  }
 0x8a0   :  { %26 = sbr.rel (!%p24_p9) target bundleno = 12 (0xc), region = 158 }

// kernel: seq2seq_forward.4
= control target key start
LH: loop header
LB: loop body
LE: loop exit
PB: predicated region body
PF: predicated region fallthrough
CT: control target
= control target key end

     0   :  { %s4214_s26 = smov 0   ;;  %s4216_s27 = smov 0   ;;  %s5130_s0 = inlined_call_operand.vmem [shape: f32[2,6,32], index: 0, kind: input, shape index: {}]   ;;  %s5131_s1 = inlined_call_operand.vmem [shape: f32[2,8,32], index: 1, kind: input, shape index: {}]   ;;  %s5132_s2 = inlined_call_operand.vmem [shape: f32[6,6], index: 2, kind: input, shape index: {}]   ;;  %s5133_s3 = inlined_call_operand.vmem [shape: f32[8,32], index: 3, kind: input, shape index: {}]   ;;  %s5134_s4 = inlined_call_operand.vmem [shape: f32[6,32,96], index: 4, kind: input, shape index: {}]   ;;  %s5135_s5 = inlined_call_operand.vmem [shape: f32[6,1,96], index: 5, kind: input, shape index: {}]   ;;  %s5136_s6 = inlined_call_operand.vmem [shape: f32[6,32,32], index: 6, kind: input, shape index: {}]   ;;  %s5137_s7 = inlined_call_operand.vmem [shape: f32[6,1,32], index: 7, kind: input, shape index: {}]   ;;  %s5138_s8 = inlined_call_operand.vmem [shape: f32[6,1,32], index: 8, kind: input, shape index: {}]   ;;  %s5139_s9 = inlined_call_operand.vmem [shape: f32[6,1,32], index: 9, kind: input, shape index: {}]   ;;  %s5140_s10 = inlined_call_operand.vmem [shape: f32[6,32,32], index: 10, kind: input, shape index: {}]   ;;  %s5141_s11 = inlined_call_operand.vmem [shape: f32[6,1,32], index: 11, kind: input, shape index: {}]   ;;  %s5142_s12 = inlined_call_operand.vmem [shape: f32[6,32,64], index: 12, kind: input, shape index: {}]   ;;  %s5143_s13 = inlined_call_operand.vmem [shape: f32[6,1,64], index: 13, kind: input, shape index: {}]   ;;  %s5144_s14 = inlined_call_operand.vmem [shape: f32[6,32,32], index: 14, kind: input, shape index: {}]   ;;  %s5145_s15 = inlined_call_operand.vmem [shape: f32[6,1,32], index: 15, kind: input, shape index: {}]   ;;  %s5146_s16 = inlined_call_operand.vmem [shape: f32[6,1,32], index: 16, kind: input, shape index: {}]   ;;  %s5147_s17 = inlined_call_operand.vmem [shape: f32[6,1,32], index: 17, kind: input, shape index: {}]   ;;  %s5148_s18 = inlined_call_operand.vmem [shape: f32[6,32,2048], index: 18, kind: input, shape index: {}]   ;;  %s5149_s19 = inlined_call_operand.vmem [shape: f32[6,1,2048], index: 19, kind: input, shape index: {}]   ;;  %s5150_s20 = inlined_call_operand.vmem [shape: f32[6,2048,32], index: 20, kind: input, shape index: {}]   ;;  %s5151_s21 = inlined_call_operand.vmem [shape: f32[6,1,32], index: 21, kind: input, shape index: {}]   ;;  %s5152_s22 = inlined_call_operand.vmem [shape: f32[6,1,32], index: 22, kind: input, shape index: {}]   ;;  %s5153_s23 = inlined_call_operand.vmem [shape: f32[6,1,32], index: 23, kind: input, shape index: {}]   ;;  %s5154_s24 = inlined_call_operand.vmem [shape: f32[2,6,32], index: 24, kind: output, shape index: {}]  }
   0x1   :  { %5161 = sst [smem:[#allocation10_spill]] %s5130_s0  ;;  %s4218_s28 = smov 0  }
   0x2   :  { %5162 = sst [smem:[#allocation11_spill]] %s5131_s1 }
   0x3   :  { %5163 = sst [smem:[#allocation12_spill]] %s5132_s2 }
   0x4   :  { %5164 = sst [smem:[#allocation13_spill]] %s5133_s3 }
   0x5   :  { %5165 = sst [smem:[#allocation14_spill]] %s5134_s4 }
   0x6   :  { %5166 = sst [smem:[#allocation15_spill]] %s5135_s5  ;;  %s4212_s5 = smov 0  }
   0x7   :  { %5167 = sst [smem:[#allocation16_spill]] %s5136_s6  ;;  %s4220_s6 = smov 0  }
   0x8   :  { %5168 = sst [smem:[#allocation17_spill]] %s5137_s7 }
   0x9   :  { %5169 = sst [smem:[#allocation18_spill]] %s5138_s8 }
   0xa   :  { %5170 = sst [smem:[#allocation19_spill]] %s5140_s10 }
   0xb   :  { %5171 = sst [smem:[#allocation20_spill]] %s5141_s11 }
   0xc   :  { %5172 = sst [smem:[#allocation21_spill]] %s5142_s12 }
   0xd   :  { %5173 = sst [smem:[#allocation22_spill]] %s5144_s14 }
   0xe   :  { %5174 = sst [smem:[#allocation23_spill]] %s5145_s15 }
   0xf   :  { %5175 = sst [smem:[#allocation24_spill]] %s5146_s16 }
  0x10   :  { %5176 = sst [smem:[#allocation25_spill]] %s5147_s17 }
  0x11   :  { %5177 = sst [smem:[#allocation26_spill]] %s5148_s18 }
  0x12   :  { %5178 = sst [smem:[#allocation27_spill]] %s5149_s19 }
  0x13   :  { %5179 = sst [smem:[#allocation28_spill]] %s5150_s20 }
  0x14   :  { %5180 = sst [smem:[#allocation29_spill]] %s5151_s21 }
  0x15   :  { %5181 = sst [smem:[#allocation30_spill]] %s5152_s22 }
  0x16   :  { %5182 = sst [smem:[#allocation31_spill]] %s5153_s23 }
  0x17   :  { %5183 = sst [smem:[#allocation32_spill]] %s5154_s24 }
  0x18 LB: > { %5184 = sst [smem:[#allocation2_spill]] %s4065_s5  ;;  %s43_s2 = sadd.s32 1, %s4073_s27  ;;  %s4081_s6 = sphi %s4220_s6, %s34_s6   ;;  %s4077_s28 = sphi %s4218_s28, %s5243_s28   ;;  %s4073_s27 = sphi %s4216_s27, %s5242_s27   ;;  %s4069_s26 = sphi %s4214_s26, %s5241_s26   ;;  %s4065_s5 = sphi %s4212_s5, %s5240_s5  }
  0x19   : > { %5185 = sst [smem:[#allocation3_spill]] %s4073_s27  ;;  %s46_s29 = sadd.s32 1, %s4077_s28 }
  0x1a   : > { %5186 = sst [smem:[#allocation4_spill]] %s4077_s28  ;;  %p44_p0 = scmp.ge.s32.totalorder %s43_s2, 6 }
  0x1b   : > { %5187 = sst [smem:[#allocation5_spill]] %s4081_s6  ;;  %p3794_p1 = scmp.ge.s32.totalorder %s4081_s6, 1 }
  0x1c   : > { %p857_p2 = scmp.lt.s32.totalorder %s4081_s6, 13  ;;  %s5245_s2 = smov (%p44_p0, %s43_s2), 0 }
  0x1d   : > { %5188 = sst [smem:[#allocation6_spill]] %s5245_s2  ;;  %s5247_s29 = smov (!%p44_p0, %s46_s29), %s4077_s28 }
  0x1e   : > { %p858_p3 = pnand %p3794_p1, %p857_p2  ;;  %p48_p4 = scmp.ge.s32.totalorder %s5247_s29, 2 }
  0x20   : > { %s5249_s29 = smov (%p48_p4, %s5247_s29), 0  ;;  %861 = sbr.rel (%p858_p3) target bundleno = 3443 (0xd73), region = 116 }
  0x21   : > { %5189 = sst [smem:[#allocation7_spill]] %s5249_s29 }
  0x25   : > { %p1000_p5 = scmp.lt.s32.totalorder %s4069_s26, 1  ;;  %p1008_p6 = scmp.lt.s32.totalorder %s4065_s5, 5 }
  0x26   : > { %s5190_s25 = sld [smem:[#allocation10_spill]] }
  0x27   : > { %s5251_s26 = smov (!%p1000_p5, %s4069_s26), 1  ;;  %s5193_s22 = sld [smem:[#allocation14_spill]] }
  0x28   : > { %s4246_s0 = scalar_select %p1008_p6, %s4065_s5, 5 }
  0x29   : > { %s4248_s7 = sshll.u32 %s5251_s26, 3  ;;  %s5197_s10 = sld [smem:[#allocation19_spill]] }
  0x2a   : > { %s3893_s28 = sshll.u32 %s4246_s0, 5  ;;  %s5199_s12 = sld [smem:[#allocation21_spill]] }
  0x2b   : > { %s5200_s14 = sld [smem:[#allocation22_spill]] }
  0x2c   : > { %s1003_s8 = scalar_lea.vmem %s5190_s25, %s4248_s7  ;;  %s5194_s25 = sld [smem:[#allocation16_spill]] }
  0x2d   : > { %s4266_s21 = scalar_lea.vmem %s5193_s22, %s3893_s28  ;;  %s5204_s27 = sld [smem:[#allocation26_spill]] }
  0x2e   : > { %s3899_s22 = sshll.u32 %s4246_s0, 11  ;;  %s5212_s23 = sld [smem:[#allocation32_spill]] }
  0x2f   : > { %s4288_s30 = scalar_lea.vmem %s5197_s10, %s3893_s28  ;;  %s5209_s10 = sld [smem:[#allocation29_spill]] }
  0x30   : > { %s4297_s18 = scalar_lea.vmem %s5199_s12, %s3893_s28  ;;  %s3898_s12 = sshll.u32 %s4246_s0, 9 }
  0x31   : > { %s4306_s26 = scalar_lea.vmem %s5200_s14, %s3893_s28  ;;  %s5206_s14 = sld [smem:[#allocation27_spill]] }
  0x32   : > { %s4271_s20 = scalar_lea.vmem %s5194_s25, %s3893_s28  ;;  %s3809_s28 = sshll.u32 %s4246_s0, 4 }
  0x33   : > { %s4324_s11 = scalar_lea.vmem %s5204_s27, %s3898_s12  ;;  %s5208_s25 = sld [smem:[#allocation28_spill]] }
  0x34   : > { %5205 = sst [smem:[#allocation8_spill]] %s4324_s11 }
  0x35   : > { %s1076_s17 = scalar_lea.vmem %s5209_s10, %s4246_s0  ;;  %s5210_s12 = sld [smem:[#allocation30_spill]] }
  0x36   : > { %s5211_s11 = sld [smem:[#allocation31_spill]] }
  0x37   : > { %s4330_s5 = scalar_lea.vmem %s5206_s14, %s3809_s28  ;;  %s5213_s3 = sld [smem:[#allocation2_spill]] }
  0x38   : > { %5207 = sst [smem:[#allocation9_spill]] %s4330_s5  ;;  %s4354_s5 = scalar_lea.vmem %s5212_s23, %s4248_s7 }
  0x39   : > { %s4336_s1 = scalar_lea.vmem %s5208_s25, %s3899_s22 }
  0x3b   : > { %s1079_s27 = scalar_lea.vmem %s5210_s12, %s4246_s0 }
  0x3c   : > { %s1082_s6 = scalar_lea.vmem %s5211_s11, %s4246_s0 }
  0x3d   : > { %p3813_p7 = scmp.ne.s32.totalorder %s5213_s3, 0 }
  0x3f   : > { %1090 = sbr.rel (%p3813_p7) target bundleno = 70 (0x46), region = 120 }
  0x44   : > { %v1091_v0 = vld [vmem:[%s1003_s8] sm:$0x3f]  ;;  %vm1092_vm0 = vcmask 259072  }
  0x45   : > { %1093 = vst.msk [vmem:[%s4354_s5] sm:$0x3f] %vm1092_vm0, %v1091_v0 }
  0x46 PF: > { %v1101_v1 = vld [vmem:[%s4266_s21 + $0x18] sm:$0xff]  ;;  %v1100_v2 = vld [vmem:[%s4266_s21 + $0x10] sm:$0xff]  ;;  %s5214_s15 = sld [smem:[#allocation13_spill]]  ;;  %v1099_v5 = vld [vmem:[%s4266_s21 + $0x8] sm:$0xff]  ;;  %vm1106_vm1 = vcmask 261120   ;;  %s4083_s16 = smov 64  }
  0x47   : > { %1122 = vmatpush.msra.mxu0 %v1101_v1  ;;  %v1098_v6 = vld [vmem:[%s4266_s21] sm:$0xff]  ;;  %s5215_s22 = sld [smem:[#allocation15_spill]]  ;;  %s4084_s25 = smov 96   ;;  %vm1229_vm2 = vcmask 1045504   ;;  %vm1162_vm3 = vcmask 46080   ;;  %vm1225_vm4 = vcmask 48128  }
  0x48   : > { %s5217_s19 = sld [smem:[#allocation12_spill]]  ;;  %vm1746_vm5 = vcmask 259072   ;;  %s4086_s28 = smov 32   ;;  %vm1874_vm10 = vcmask 62464   ;;  %vm1934_vm11 = vcmask 64512  }
  0x49   : > { %1123 = vmatpush.msra.mxu0 %v1100_v2  ;;  %s5218_s24 = sld [smem:[#allocation17_spill]]  ;;  %s5224_s8 = scalar_lea.vmem %s5139_s9, %s4246_s0 }
  0x4a   : > { %s5220_s10 = sld [smem:[#allocation11_spill]]  ;;  %s5225_s2 = scalar_lea.vmem %s5143_s13, %s4246_s0 }
  0x4b   : > { %1124 = vmatpush.msra.mxu0 %v1099_v5 }
  0x4c   : > { %v1097_v3 = vld [vmem:[%s5214_s15] sm:$0xff] }
  0x4d   : > { %v4363_v4 = vperm.slane %v1097_v3, 0  ;;  %v4370_v7 = vld [vmem:[%s4354_s5] sm:$0x3f]  ;;  %v4372_v8 = vperm.slane %v1097_v3, 1  ;;  %1125 = vmatpush.msra.mxu0 %v1098_v6  ;;  %v4376_v9 = vperm.slane %v1097_v3, 2  ;;  %v4380_v10 = vperm.slane %v1097_v3, 6  ;;  %s5216_s4 = scalar_lea.vmem %s5215_s22, %s4246_s0 }
  0x4e   : > { %3814 = vmatmul.msk.f32.vlgmr.msra.gmra.mxu0 %vm1106_vm1, %v4370_v7  ;;  %v4386_v11 = vperm.slane %v1097_v3, 4  ;;  %v4390_v12 = vperm.slane %v1097_v3, 5  ;;  %v4394_v13 = vperm.slane %v1097_v3, 7  ;;  %v3959_v14 = vld [vmem:[%s5216_s4] ss:$0 sm:$0xff]  ;;  %v4409_v19 = vperm.slane %v1097_v3, 3 }
  0x4f   : > { %1175 = vrot.lane.b32.xlu1 %v4363_v4, %s4083_s16  ;;  %1218 = vrot.lane.b32.xlu2 %v4372_v8, %s4083_s16  ;;  %v1096_v36 = vld [vmem:[%s5217_s19] sm:$0x3f]  ;;  %s5219_s14 = scalar_lea.vmem %s5218_s24, %s4246_s0 }
  0x50   : > { %s5221_s11 = scalar_lea.vmem %s5220_s10, %s4248_s7  ;;  %s5231_s10 = sld [smem:[#allocation24_spill]] }
  0x57   : > { %1319 = vrot.lane.b32.xlu1 %v4376_v9, %s4083_s16  ;;  %1607 = vrot.lane.b32.xlu2 %v4380_v10, %s4083_s16 }
  0x5f   : > { %1463 = vrot.lane.b32.xlu1 %v4386_v11, %s4083_s16 }
  0x67   : > { %1535 = vrot.lane.b32.xlu1 %v4390_v12, %s4083_s16 }
  0x6f   : > { %1679 = vrot.lane.b32.xlu1 %v4394_v13, %s4083_s16 }
  0xa9   : > { %v1219_v17 = vpop.permute.xlu2 %1218 }
  0xb1   : > { %v4415_v22 = vpop.permute.xlu2 %1607 }
  0xc1   : > { %v1176_v20 = vpop.permute.xlu1 %1175 }
  0xc9   : > { %v1320_v61 = vpop.permute.xlu1 %1319 }
  0xcb   : > { %v1127_v15 = vpop.f32.mrf.mxu0 }
  0xcc   : > { %v4403_v16 = vadd.f32 %v3959_v14, %v1127_v15 }
  0xce   : > { %1133 = vrot.lane.b32.xlu0 %v4403_v16, %s4084_s25  ;;  %v1221_v18 = vmul.f32 %v1219_v17, %v4403_v16  ;;  %v1178_v21 = vmul.f32 %v1176_v20, %v4403_v16  ;;  %v1131_v25 = vmul.f32 %v4363_v4, %v4403_v16  ;;  %v1180_v26 = vmul.f32 %v4372_v8, %v4403_v16 }
  0xcf   : > { %v1353_v27 = vmul.f32 %v4409_v19, %v4403_v16  ;;  %v1281_v29 = vmul.f32 %v4376_v9, %v4403_v16  ;;  %v1497_v30 = vmul.f32 %v4390_v12, %v4403_v16  ;;  %v1425_v32 = vmul.f32 %v4386_v11, %v4403_v16 }
  0xd0   : > { %1223 = vrot.lane.b32.xlu2 %v1221_v18, %s4083_s16  ;;  %v1641_v33 = vmul.f32 %v4394_v13, %v4403_v16  ;;  %v1569_v34 = vmul.f32 %v4380_v10, %v4403_v16  ;;  %v1322_v5 = vmul.f32 %v1320_v61, %v4403_v16 }
  0xd1   : > { %v1464_v2 = vpop.permute.xlu1 %1463 }
  0xd2   : > { %v1466_v3 = vmul.f32 %v1464_v2, %v4403_v16 }
  0xd6   : > { %1391 = vrot.lane.b32.xlu0 %v4409_v19, %s4083_s16 }
  0xd9   : > { %v1536_v18 = vpop.permute.xlu1 %1535 }
  0xde   : > { %1253 = vrot.lane.b32.xlu0 %v1178_v21, %s4083_s16 }
  0xe1   : > { %v4471_v20 = vpop.permute.xlu1 %1679 }
 0x12a   : > { %v1224_v23 = vpop.permute.xlu2 %1223 }
 0x12b   : > { %3819 = vmatpush.msk.msra.mxu3 %vm1229_vm2, %v1224_v23 }
 0x140   : > { %v1134_v24 = vpop.permute.xlu0 %1133 }
 0x141   : > { %3815 = vmatpush.xpose.msk.msra.mxu1 %vm1106_vm1, %v1134_v24  ;;  %3817 = vmatpush.xpose.msk.msra.mxu2 %vm1106_vm1, %v1134_v24 }
 0x142   : > { %3827 = vmatpush.xpose.msk.msrb.mxu0 %vm1106_vm1, %v1134_v24 }
 0x144   : > { %3816 = vmatmul.msk.f32.vlgmr.msra.gmra.mxu1 %vm1106_vm1, %v1131_v25  ;;  %3818 = vmatmul.msk.f32.vlgmr.msra.gmra.mxu2 %vm1106_vm1, %v1180_v26 }
 0x145   : > { %3823 = vmatpush.xpose.msk.msrb.mxu1 %vm1106_vm1, %v1134_v24  ;;  %3828 = vmatmul.msk.f32.vlgmr.msrb.gmra.mxu0 %vm1106_vm1, %v1353_v27 }
 0x146   : > { %3835 = vmatpush.xpose.msk.msra.mxu0 %vm1106_vm1, %v1134_v24 }
 0x148   : > { %v1392_v28 = vpop.permute.xlu0 %1391 }
 0x149   : > { %3831 = vmatpush.xpose.msk.msra.mxu1 %vm1106_vm1, %v1134_v24  ;;  %v1394_v1 = vmul.f32 %v1392_v28, %v4403_v16 }
 0x14a   : > { %3843 = vmatpush.xpose.msk.msrb.mxu0 %vm1106_vm1, %v1134_v24 }
 0x14c   : > { %3824 = vmatmul.msk.f32.vlgmr.msrb.gmra.mxu1 %vm1106_vm1, %v1281_v29 }
 0x14d   : > { %3836 = vmatmul.msk.f32.vlgmr.msra.gmra.mxu0 %vm1106_vm1, %v1497_v30  ;;  %3839 = vmatpush.xpose.msk.msrb.mxu1 %vm1106_vm1, %v1134_v24 }
 0x150   : > { %v1254_v31 = vpop.permute.xlu0 %1253 }
 0x151   : > { %3821 = vmatpush.msk.msrb.mxu3 %vm1229_vm2, %v1254_v31 }
 0x154   : > { %3832 = vmatmul.msk.f32.vlgmr.msra.gmra.mxu1 %vm1106_vm1, %v1425_v32 }
 0x155   : > { %3844 = vmatmul.msk.f32.vlgmr.msrb.gmra.mxu0 %vm1106_vm1, %v1641_v33 }
 0x15c   : > { %3840 = vmatmul.msk.f32.vlgmr.msrb.gmra.mxu1 %vm1106_vm1, %v1569_v34 }
 0x1c1   : > { %v1157_v35 = vpop.f32.mrf.mxu1 }
 0x1c2   : > { %v1160_v37 = vmul.f32 0.5, %v1157_v35  ;;  %v1374_v38 = vpop.f32.mrf.mxu0 }
 0x1c3   : > { %v1377_v39 = vmul.f32 0.5, %v1374_v38 }
 0x1c4   : > { %v1161_v40 = vadd.f32 %v1160_v37, %v1096_v36 }
 0x1c5   : > { %v1378_v41 = vadd.f32 %v1377_v39, %v1096_v36 }
 0x1c6   : > { %v1163_v42 = vsel %vm1162_vm3, %v1161_v40, -inf }
 0x1c7   : > { %v1379_v43 = vsel %vm1162_vm3, %v1378_v41, -inf  ;;  %v1201_v44 = vpop.f32.mrf.mxu2  ;;  %1164 = vmax.xlane.f32.xlu1 %v1163_v42 }
 0x1c8   : > { %1380 = vmax.xlane.f32.xlu2 %v1379_v43  ;;  %v1204_v45 = vmul.f32 0.5, %v1201_v44 }
 0x1c9   : > { %v1302_v46 = vpop.f32.mrf.mxu1 }
 0x1ca   : > { %v1305_v47 = vmul.f32 0.5, %v1302_v46  ;;  %v1205_v48 = vadd.f32 %v1204_v45, %v1096_v36  ;;  %v1518_v49 = vpop.f32.mrf.mxu0 }
 0x1cb   : > { %v1521_v52 = vmul.f32 0.5, %v1518_v49 }
 0x1cc   : > { %v1206_v50 = vsel %vm1162_vm3, %v1205_v48, -inf  ;;  %v1306_v51 = vadd.f32 %v1305_v47, %v1096_v36 }
 0x1cd   : > { %1207 = vmax.xlane.f32.xlu0 %v1206_v50  ;;  %v1522_v55 = vadd.f32 %v1521_v52, %v1096_v36 }
 0x1ce   : > { %v1307_v53 = vsel %vm1162_vm3, %v1306_v51, -inf }
 0x1cf   : > { %1308 = vmax.xlane.f32.xlu1 %v1307_v53  ;;  %v1523_v57 = vsel %vm1162_vm3, %v1522_v55, -inf  ;;  %v1538_v53 = vmul.f32 %v1536_v18, %v4403_v16 }
 0x1d1   : > { %v1446_v54 = vpop.f32.mrf.mxu1 }
 0x1d2   : > { %v1449_v56 = vmul.f32 0.5, %v1446_v54  ;;  %v1662_v6 = vpop.f32.mrf.mxu0 }
 0x1d3   : > { %v1665_v14 = vmul.f32 0.5, %v1662_v6 }
 0x1d4   : > { %v1450_v60 = vadd.f32 %v1449_v56, %v1096_v36  ;;  %v1610_v56 = vmul.f32 %v4415_v22, %v4403_v16  ;;  %v1682_v22 = vmul.f32 %v4471_v20, %v4403_v16 }
 0x1d5   : > { %v1666_v15 = vadd.f32 %v1665_v14, %v1096_v36 }
 0x1d6   : > { %v1451_v0 = vsel %vm1162_vm3, %v1450_v60, -inf }
 0x1d7   : > { %1524 = vmax.xlane.f32.xlu1 %v1523_v57  ;;  %v1667_v17 = vsel %vm1162_vm3, %v1666_v15, -inf }
 0x1d9   : > { %v1590_v58 = vpop.f32.mrf.mxu1 }
 0x1da   : > { %v1593_v59 = vmul.f32 0.5, %v1590_v58 }
 0x1dc   : > { %v4459_v62 = vadd.f32 %v1593_v59, %v1096_v36 }
 0x1de   : > { %v1595_v63 = vsel %vm1162_vm3, %v4459_v62, -inf }
 0x1df   : > { %1596 = vmax.xlane.f32.xlu2 %v1595_v63  ;;  %1452 = vmax.xlane.f32.xlu1 %v1451_v0 }
 0x1e1   : > { %1396 = vrot.lane.b32.xlu0 %v1394_v1, %s4083_s16 }
 0x1e9   : > { %1468 = vrot.lane.b32.xlu0 %v1466_v3, %s4083_s16 }
 0x1f8   : > { %1324 = vrot.lane.b32.xlu1 %v1322_v5, %s4083_s16 }
 0x213   : > { %1668 = vmax.xlane.f32.xlu0 %v1667_v17 }
 0x23a   : > { %v1165_v21 = vpop.xlane.xlu1 %1164 }
 0x23b   : > { %v1381_v23 = vpop.xlane.xlu2 %1380  ;;  %v1166_v24 = vsub.f32 %v1161_v40, %v1165_v21 }
 0x23c   : > { %v1382_v25 = vsub.f32 %v1378_v41, %v1381_v23 }
 0x23d   : > { %v1167_v26 = vmul.f32 1.442695, %v1166_v24 }
 0x23e   : > { %v1383_v27 = vmul.f32 1.442695, %v1382_v25 }
 0x23f   : > { %3971 = vpow2.f32 %v1167_v26 }
 0x240   : > { %3973 = vpow2.f32 %v1383_v27  ;;  %v1208_v28 = vpop.xlane.xlu0 %1207 }
 0x241   : > { %v1209_v29 = vsub.f32 %v1205_v48, %v1208_v28 }
 0x242   : > { %v1309_v30 = vpop.xlane.xlu1 %1308 }
 0x243   : > { %v1210_v31 = vmul.f32 1.442695, %v1209_v29  ;;  %v1310_v32 = vsub.f32 %v1306_v51, %v1309_v30 }
 0x245   : > { %v4473_v33 = vpop.eup %3971  ;;  %v1311_v34 = vmul.f32 1.442695, %v1310_v32  ;;  %3975 = vpow2.f32 %v1210_v31 }
 0x246   : > { %v4475_v35 = vpop.eup %3973  ;;  %v1169_v36 = vsel %vm1162_vm3, %v4473_v33, 0.0 }
 0x247   : > { %3977 = vpow2.f32 %v1311_v34  ;;  %v1385_v37 = vsel %vm1162_vm3, %v4475_v35, 0.0  ;;  %1170 = vadd.xlane.f32.xlu1 %v1169_v36 }
 0x248   : > { %1386 = vadd.xlane.f32.xlu0 %v1385_v37 }
 0x24a   : > { %v1525_v38 = vpop.xlane.xlu1 %1524 }
 0x24b   : > { %v1526_v39 = vsub.f32 %v1522_v55, %v1525_v38  ;;  %v3976_v40 = vpop.eup %3975 }
 0x24c   : > { %v1212_v44 = vsel %vm1162_vm3, %v3976_v40, 0.0 }
 0x24d   : > { %v3978_v41 = vpop.eup %3977  ;;  %v1527_v42 = vmul.f32 1.442695, %v1526_v39 }
 0x24e   : > { %v1313_v43 = vsel %vm1162_vm3, %v3978_v41, 0.0 }
 0x24f   : > { %3979 = vpow2.f32 %v1527_v42  ;;  %1314 = vadd.xlane.f32.xlu2 %v1313_v43  ;;  %v1714_v42 = vld [vmem:[%s4271_s20 + $0x10] sm:$0xff]  ;;  %v1713_v43 = vld [vmem:[%s4271_s20 + $0x8] sm:$0xff] }
 0x250   : > { %1213 = vadd.xlane.f32.xlu0 %v1212_v44  ;;  %v1712_v44 = vld [vmem:[%s4271_s20] sm:$0xff] }
 0x252   : > { %v1453_v45 = vpop.xlane.xlu1 %1452  ;;  %v1597_v57 = vpop.xlane.xlu2 %1596 }
 0x253   : > { %v1454_v46 = vsub.f32 %v1450_v60, %v1453_v45  ;;  %v1397_v52 = vpop.permute.xlu0 %1396  ;;  %v1598_v60 = vsub.f32 %v4459_v62, %v1597_v57 }
 0x255   : > { %v4483_v47 = vpop.eup %3979  ;;  %v1455_v48 = vmul.f32 1.442695, %v1454_v46  ;;  %v1599_v63 = vmul.f32 1.442695, %v1598_v60 }
 0x256   : > { %v1529_v49 = vsel %vm1162_vm3, %v4483_v47, 0.0 }
 0x257   : > { %1530 = vadd.xlane.f32.xlu2 %v1529_v49  ;;  %3981 = vpow2.f32 %v1455_v48 }
 0x25b   : > { %v1469_v55 = vpop.permute.xlu0 %1468 }
 0x25d   : > { %v3982_v50 = vpop.eup %3981 }
 0x25e   : > { %v1457_v51 = vsel %vm1162_vm3, %v3982_v50, 0.0 }
 0x25f   : > { %1458 = vadd.xlane.f32.xlu1 %v1457_v51 }
 0x264   : > { %1540 = vrot.lane.b32.xlu0 %v1538_v53, %s4083_s16 }
 0x26a   : > { %v1325_v54 = vpop.permute.xlu1 %1324 }
 0x26b   : > { %3825 = vmatpush.msk.msrb.mxu2 %vm1229_vm2, %v1325_v54 }
 0x26d   : > { %3833 = vmatpush.msk.msra.mxu2 %vm1229_vm2, %v1469_v55 }
 0x278   : > { %1612 = vrot.lane.b32.xlu1 %v1610_v56, %s4083_s16 }
 0x286   : > { %v1669_v58 = vpop.xlane.xlu0 %1668 }
 0x287   : > { %v1670_v59 = vsub.f32 %v1666_v15, %v1669_v58 }
 0x289   : > { %v1671_v61 = vmul.f32 1.442695, %v1670_v59  ;;  %v3960_v59 = vld [vmem:[%s5219_s14] ss:$0 sm:$0xff]  ;;  %s5229_s14 = sld [smem:[#allocation23_spill]] }
 0x28b   : > { %3983 = vpow2.f32 %v1671_v61 }
 0x28c   : > { %3985 = vpow2.f32 %v1599_v63 }
 0x291   : > { %v3984_v0 = vpop.eup %3983 }
 0x292   : > { %v1673_v1 = vsel %vm1162_vm3, %v3984_v0, 0.0  ;;  %v3986_v2 = vpop.eup %3985 }
 0x293   : > { %1674 = vadd.xlane.f32.xlu2 %v1673_v1  ;;  %v1601_v3 = vsel %vm1162_vm3, %v3986_v2, 0.0  ;;  %v4085_v1 = vmov 32.0  }
 0x29b   : > { %1602 = vadd.xlane.f32.xlu2 %v1601_v3 }
 0x2b3   : > { %1684 = vrot.lane.b32.xlu2 %v1682_v22, %s4083_s16  ;;  %s5235_s16 = sld [smem:[#allocation9_spill]] }
 0x2ba   : > { %v1171_v14 = vpop.xlane.xlu1 %1170 }
 0x2bb   : > { %v1387_v5 = vpop.xlane.xlu0 %1386 }
 0x2c2   : > { %v1315_v6 = vpop.xlane.xlu2 %1314 }
 0x2c3   : > { %v1214_v62 = vpop.xlane.xlu0 %1213  ;;  %3987 = vrcp.f32 %v1315_v6 }
 0x2c4   : > { %3989 = vrcp.f32 %v1214_v62 }
 0x2c5   : > { %3991 = vrcp.f32 %v1171_v14 }
 0x2c6   : > { %3993 = vrcp.f32 %v1387_v5 }
 0x2c9   : > { %v3988_v15 = vpop.eup %3987 }
 0x2ca   : > { %v3990_v17 = vpop.eup %3989  ;;  %v1317_v18 = vmul.f32 %v3988_v15, %v3978_v41  ;;  %v1531_v25 = vpop.xlane.xlu2 %1530 }
 0x2cb   : > { %v1216_v21 = vmul.f32 %v3990_v17, %v3976_v40  ;;  %v3992_v16 = vpop.eup %3991  ;;  %v1715_v40 = vld [vmem:[%s4271_s20 + $0x18] sm:$0xff]  ;;  %s5226_s20 = sld [smem:[#allocation20_spill]] }
 0x2cc   : > { %3826 = vmatmul.msk.f32.vlgmr.msrb.gmra.mxu2 %vm1225_vm4, %v1317_v18  ;;  %v1173_v23 = vmul.f32 %v3992_v16, %v4473_v33  ;;  %v3994_v26 = vpop.eup %3993  ;;  %1735 = vmatpush.msra.mxu1 %v1715_v40  ;;  %v1786_v16 = vld [vmem:[%s4288_s30 + $0x10] sm:$0xff] }
 0x2cd   : > { %3820 = vmatmul.msk.f32.vlgmr.msra.gmra.mxu3 %vm1225_vm4, %v1216_v21  ;;  %v1389_v28 = vmul.f32 %v3994_v26, %v4475_v35  ;;  %v1787_v21 = vld [vmem:[%s4288_s30 + $0x18] sm:$0xff]  ;;  %v1816_v26 = vld [vmem:[%s4297_s18 + $0x8] sm:$0xff] }
 0x2ce   : > { %3829 = vmatpush.msk.msra.mxu3 %vm1229_vm2, %v1397_v52  ;;  %1736 = vmatpush.msra.mxu1 %v1714_v42 }
 0x2d0   : > { %1737 = vmatpush.msra.mxu1 %v1713_v43 }
 0x2d1   : > { %s5227_s12 = scalar_lea.vmem %s5226_s20, %s4246_s0 }
 0x2d2   : > { %v1459_v20 = vpop.xlane.xlu1 %1458  ;;  %1738 = vmatpush.msra.mxu1 %v1712_v44  ;;  %v3963_v44 = vld [vmem:[%s5225_s2] ss:$0 sm:$0xff] }
 0x2d3   : > { %3995 = vrcp.f32 %v1459_v20  ;;  %v1818_v20 = vld [vmem:[%s4297_s18 + $0x18] sm:$0xff] }
 0x2d4   : > { %3997 = vrcp.f32 %v1531_v25  ;;  %1838 = vmatpush.msra.mxu0 %v1818_v20  ;;  %v1784_v25 = vld [vmem:[%s4288_s30] sm:$0xff] }
 0x2d5   : > { %3822 = vmatmul.msk.f32.vlgmr.msrb.gmra.mxu3 %vm1225_vm4, %v1173_v23  ;;  %v1785_v23 = vld [vmem:[%s4288_s30 + $0x8] sm:$0xff] }
 0x2d6   : > { %v1541_v24 = vpop.permute.xlu0 %1540 }
 0x2d7   : > { %3837 = vmatpush.msk.msrb.mxu3 %vm1229_vm2, %v1541_v24  ;;  %v1817_v24 = vld [vmem:[%s4297_s18 + $0x10] sm:$0xff] }
 0x2d8   : > { %1839 = vmatpush.msra.mxu0 %v1817_v24 }
 0x2d9   : > { %v3996_v27 = vpop.eup %3995 }
 0x2da   : > { %v1461_v29 = vmul.f32 %v3996_v27, %v3982_v50  ;;  %v3998_v30 = vpop.eup %3997  ;;  %v1815_v27 = vld [vmem:[%s4297_s18] sm:$0xff]  ;;  %1840 = vmatpush.msra.mxu0 %v1816_v26  ;;  %s5222_s18 = sld [smem:[#allocation18_spill]] }
 0x2db   : > { %v1533_v31 = vmul.f32 %v3998_v30, %v4483_v47 }
 0x2dc   : > { %3834 = vmatmul.msk.f32.vlgmr.msra.gmra.mxu2 %vm1225_vm4, %v1461_v29  ;;  %1841 = vmatpush.msra.mxu0 %v1815_v27 }
 0x2dd   : > { %3830 = vmatmul.msk.f32.vlgmr.msra.gmra.mxu3 %vm1225_vm4, %v1389_v28  ;;  %v1095_v28 = vld [vmem:[%s5221_s11] sm:$0xff]  ;;  %s5232_s11 = scalar_lea.vmem %s5231_s10, %s4246_s0 }
 0x2de   : > { %3849 = vmatmul.msk.f32.vlgmr.msra.gmra.mxu0 %vm1106_vm1, %v1095_v28 }
 0x2e0   : > { %s5223_s15 = scalar_lea.vmem %s5222_s18, %s4246_s0  ;;  %s5233_s18 = sld [smem:[#allocation25_spill]] }
 0x2e5   : > { %3838 = vmatmul.msk.f32.vlgmr.msrb.gmra.mxu3 %vm1225_vm4, %v1533_v31 }
 0x2ea   : > { %v1613_v32 = vpop.permute.xlu1 %1612 }
 0x2eb   : > { %3841 = vmatpush.msk.msrb.mxu2 %vm1229_vm2, %v1613_v32 }
 0x2ed   : > { %1807 = vmatpush.msra.mxu2 %v1787_v21 }
 0x2ef   : > { %1808 = vmatpush.msra.mxu2 %v1786_v16 }
 0x2f1   : > { %1809 = vmatpush.msra.mxu2 %v1785_v23 }
 0x2f3   : > { %1810 = vmatpush.msra.mxu2 %v1784_v25 }
 0x306   : > { %v1675_v33 = vpop.xlane.xlu2 %1674 }
 0x307   : > { %3999 = vrcp.f32 %v1675_v33 }
 0x30d   : > { %v4000_v35 = vpop.eup %3999 }
 0x30e   : > { %v1603_v34 = vpop.xlane.xlu2 %1602  ;;  %v1677_v37 = vmul.f32 %v4000_v35, %v3984_v0 }
 0x30f   : > { %4001 = vrcp.f32 %v1603_v34 }
 0x310   : > { %4003 = vrcp.f32 %v4085_v1 }
 0x315   : > { %v4002_v36 = vpop.eup %4001 }
 0x316   : > { %v1605_v38 = vmul.f32 %v4002_v36, %v3986_v2  ;;  %v1685_v39 = vpop.permute.xlu2 %1684  ;;  %v4004_v2 = vpop.eup %4003 }
 0x317   : > { %3845 = vmatpush.msk.msra.mxu3 %vm1229_vm2, %v1685_v39  ;;  %v1751_v3 = vmul.f32 32.0, %v4004_v2  ;;  %vm1755_vm6 = vweird.f32 %v4004_v2 }
 0x318   : > { %3842 = vmatmul.msk.f32.vlgmr.msrb.gmra.mxu2 %vm1225_vm4, %v1605_v38  ;;  %3846 = vmatmul.msk.f32.vlgmr.msra.gmra.mxu3 %vm1225_vm4, %v1677_v37  ;;  %v3961_v38 = vld [vmem:[%s5223_s15] ss:$0 sm:$0xff]  ;;  %s5234_s15 = scalar_lea.vmem %s5233_s18, %s4246_s0 }
 0x319   : > { %v1752_v22 = vsub.f32 1.0, %v1751_v3 }
 0x31b   : > { %v1753_v5 = vmul.f32 %v4004_v2, %v1752_v22 }
 0x31d   : > { %v1754_v6 = vadd.f32 %v4004_v2, %v1753_v5 }
 0x31f   : > { %v4528_v62 = vsel %vm1755_vm6, %v4004_v2, %v1754_v6 }
 0x34f   : > { %v1348_v46 = vpop.f32.mrf.mxu2 }
 0x350   : > { %v1249_v41 = vpop.f32.mrf.mxu3 }
 0x358   : > { %v1277_v45 = vpop.f32.mrf.mxu3 }
 0x359   : > { %v1278_v48 = vadd.f32 %v1277_v45, %v1249_v41  ;;  %v3962_v41 = vld [vmem:[%s5224_s8] ss:$0 sm:$0xff] }
 0x35b   : > { %v1351_v49 = vadd.f32 %v1348_v46, %v1278_v48  ;;  %v1843_v45 = vpop.f32.mrf.mxu0 }
 0x35c   : > { %v4568_v46 = vadd.f32 %v3963_v44, %v1843_v45 }
 0x35e   : > { %3850 = vmatpush.xpose.msk.msrb.mxu3 %vm1106_vm1, %v4568_v46  ;;  %3852 = vmatpush.xpose.msk.msrb.mxu1 %vm1106_vm1, %v4568_v46 }
 0x35f   : > { %v1492_v50 = vpop.f32.mrf.mxu2 }
 0x360   : > { %v1420_v47 = vpop.f32.mrf.mxu3 }
 0x361   : > { %v1423_v51 = vadd.f32 %v1420_v47, %v1351_v49  ;;  %v3964_v47 = vld [vmem:[%s5227_s12] ss:$0 sm:$0xff] }
 0x362   : > { %3856 = vmatpush.xpose.msk.msra.mxu3 %vm1106_vm1, %v4568_v46 }
 0x363   : > { %v1495_v53 = vadd.f32 %v1492_v50, %v1423_v51 }
 0x368   : > { %v1564_v52 = vpop.f32.mrf.mxu3 }
 0x369   : > { %v1567_v54 = vadd.f32 %v1564_v52, %v1495_v53 }
 0x39b   : > { %v1636_v55 = vpop.f32.mrf.mxu2  ;;  %v1708_v57 = vpop.f32.mrf.mxu3 }
 0x39c   : > { %v1639_v56 = vadd.f32 %v1636_v55, %v1567_v54 }
 0x39e   : > { %v1711_v58 = vadd.f32 %v1708_v57, %v1639_v56 }
 0x3a0   : > { %3847 = vmatmul.msk.f32.vlgmr.msra.gmra.mxu1 %vm1106_vm1, %v1711_v58 }
 0x41d   : > { %v1740_v60 = vpop.f32.mrf.mxu1 }
 0x41e   : > { %v1741_v61 = vadd.f32 %v3960_v59, %v1740_v60 }
 0x420   : > { %v1743_v63 = vadd.f32 %v1741_v61, %v4370_v7 }
 0x422   : > { %v1747_v0 = vsel %vm1746_vm5, %v1743_v63, 0.0 }
 0x423   : > { %1748 = vadd.xlane.f32.xlu0 %v1747_v0 }
 0x437   : > { %1926 = vrot.lane.b32.xlu0 %v4372_v8, %s4086_s28 }
 0x496   : > { %v1749_v14 = vpop.xlane.xlu0 %1748 }
 0x497   : > { %v1757_v7 = vmul.f32 %v4528_v62, %v1749_v14 }
 0x499   : > { %v1758_v15 = vsub.f32 %v1743_v63, %v1757_v7 }
 0x49b   : > { %v1759_v17 = vmul.f32 %v1758_v15, %v1758_v15 }
 0x49d   : > { %v1760_v18 = vsel %vm1746_vm5, %v1759_v17, 0.0 }
 0x49e   : > { %1761 = vadd.xlane.f32.xlu1 %v1760_v18 }
 0x4a9   : > { %v1927_v18 = vpop.permute.xlu0 %1926 }
 0x4aa   : > { %v1929_v21 = vmul.f32 %v1927_v18, %v4568_v46 }
 0x511   : > { %v1762_v29 = vpop.xlane.xlu1 %1761 }
 0x512   : > { %v1763_v30 = vmul.f32 %v1762_v29, %v4528_v62 }
 0x514   : > { %v1764_v31 = vadd.f32 1e-05, %v1763_v30 }
 0x516   : > { %4005 = vrsqrt.f32 %v1764_v31  ;;  %vm1771_vm8 = vweird.f32 %v1764_v31 }
 0x51c   : > { %v4006_v32 = vpop.eup %4005 }
 0x51d   : > { %v1766_v33 = vmul.f32 %v4006_v32, %v1764_v31  ;;  %vm1772_vm7 = vweird.f32 %v4006_v32 }
 0x51e   : > { %vm1773_vm9 = vmor %vm1771_vm8, %vm1772_vm7 }
 0x51f   : > { %v1767_v34 = vmul.f32 %v4006_v32, %v1766_v33 }
 0x521   : > { %v1768_v35 = vmul.f32 0.5, %v1767_v34 }
 0x523   : > { %v1769_v36 = vsub.f32 1.5, %v1768_v35 }
 0x525   : > { %v1770_v37 = vmul.f32 %v4006_v32, %v1769_v36 }
 0x527   : > { %v1774_v39 = vsel %vm1773_vm9, %v4006_v32, %v1770_v37 }
 0x528   : > { %v1775_v40 = vmul.f32 %v1774_v39, %v1758_v15 }
 0x52a   : > { %v1779_v42 = vmul.f32 %v3961_v38, %v1775_v40 }
 0x52c   : > { %v4559_v43 = vadd.f32 %v3962_v41, %v1779_v42 }
 0x52e   : > { %3848 = vmatmul.msk.f32.vlgmr.msra.gmra.mxu2 %vm1106_vm1, %v4559_v43 }
 0x5b1   : > { %v1812_v48 = vpop.f32.mrf.mxu2 }
 0x5b2   : > { %v4581_v49 = vadd.f32 %v3964_v47, %v1812_v48 }
 0x5b4   : > { %v1846_v50 = vmul.f32 %v4581_v49, %v4363_v4  ;;  %v1890_v51 = vmul.f32 %v4581_v49, %v4372_v8  ;;  %v1985_v52 = vmul.f32 %v4581_v49, %v4376_v9  ;;  %v2121_v53 = vmul.f32 %v4581_v49, %v4386_v11 }
 0x5b5   : > { %v2257_v8 = vmul.f32 %v4581_v49, %v4380_v10  ;;  %v2053_v35 = vmul.f32 %v4581_v49, %v4409_v19  ;;  %v2189_v37 = vmul.f32 %v4581_v49, %v4390_v12  ;;  %v2325_v38 = vmul.f32 %v4581_v49, %v4394_v13 }
 0x5b6   : > { %3851 = vmatmul.msk.f32.vlgmr.msrb.gmra.mxu3 %vm1106_vm1, %v1846_v50  ;;  %3853 = vmatmul.msk.f32.vlgmr.msrb.gmra.mxu1 %vm1106_vm1, %v1890_v51 }
 0x5b7   : > { %3862 = vmatpush.xpose.msk.msrb.mxu3 %vm1106_vm1, %v4568_v46 }
 0x5be   : > { %3857 = vmatmul.msk.f32.vlgmr.msra.gmra.mxu3 %vm1106_vm1, %v1985_v52 }
 0x5bf   : > { %3868 = vmatpush.xpose.msk.msra.mxu3 %vm1106_vm1, %v4568_v46 }
 0x5c6   : > { %3863 = vmatmul.msk.f32.vlgmr.msrb.gmra.mxu3 %vm1106_vm1, %v2121_v53 }
 0x5ce   : > { %3869 = vmatmul.msk.f32.vlgmr.msra.gmra.mxu3 %vm1106_vm1, %v2257_v8 }
 0x633   : > { %v1911_v54 = vpop.f32.mrf.mxu1 }
 0x634   : > { %v1914_v55 = vmul.f32 0.5, %v1911_v54 }
 0x636   : > { %v1915_v56 = vsel %vm1874_vm10, %v1914_v55, -inf }
 0x637   : > { %1916 = vmax.xlane.f32.xlu2 %v1915_v56 }
 0x639   : > { %v1870_v57 = vpop.f32.mrf.mxu3 }
 0x63a   : > { %v1873_v58 = vmul.f32 0.5, %v1870_v57 }
 0x63c   : > { %v1875_v59 = vsel %vm1874_vm10, %v1873_v58, -inf }
 0x63d   : > { %1876 = vmax.xlane.f32.xlu0 %v1875_v59 }
 0x641   : > { %v2006_v60 = vpop.f32.mrf.mxu3 }
 0x642   : > { %v2009_v61 = vmul.f32 0.5, %v2006_v60 }
 0x644   : > { %v2010_v63 = vsel %vm1874_vm10, %v2009_v61, -inf }
 0x645   : > { %2011 = vmax.xlane.f32.xlu2 %v2010_v63 }
 0x649   : > { %v2142_v0 = vpop.f32.mrf.mxu3 }
 0x64a   : > { %v4623_v16 = vmul.f32 0.5, %v2142_v0 }
 0x64c   : > { %v2146_v20 = vsel %vm1874_vm10, %v4623_v16, -inf }
 0x651   : > { %v2278_v1 = vpop.f32.mrf.mxu3 }
 0x652   : > { %v2281_v2 = vmul.f32 0.5, %v2278_v1 }
 0x654   : > { %v2282_v3 = vsel %vm1874_vm10, %v2281_v2, -inf }
 0x655   : > { %2283 = vmax.xlane.f32.xlu0 %v2282_v3 }
 0x65d   : > { %1886 = vrot.lane.b32.xlu2 %v4363_v4, %s4086_s28 }
 0x669   : > { %2021 = vrot.lane.b32.xlu0 %v4376_v9, %s4086_s28 }
 0x671   : > { %2157 = vrot.lane.b32.xlu0 %v4386_v11, %s4086_s28 }
 0x679   : > { %2225 = vrot.lane.b32.xlu0 %v4390_v12, %s4086_s28 }
 0x681   : > { %2361 = vrot.lane.b32.xlu0 %v4394_v13, %s4086_s28 }
 0x6aa   : > { %v1917_v22 = vpop.xlane.xlu2 %1916 }
 0x6ab   : > { %v1918_v5 = vsub.f32 %v1914_v55, %v1917_v22 }
 0x6ad   : > { %v1919_v6 = vmul.f32 1.442695, %v1918_v5 }
 0x6af   : > { %4007 = vpow2.f32 %v1919_v6 }
 0x6b0   : > { %v1877_v23 = vpop.xlane.xlu0 %1876 }
 0x6b1   : > { %v1878_v24 = vsub.f32 %v1873_v58, %v1877_v23 }
 0x6b3   : > { %v1879_v26 = vmul.f32 1.442695, %v1878_v24 }
 0x6b5   : > { %v4008_v14 = vpop.eup %4007 }
 0x6b6   : > { %v1921_v7 = vsel %vm1874_vm10, %v4008_v14, 0.0 }
 0x6b7   : > { %1922 = vadd.xlane.f32.xlu1 %v1921_v7 }
 0x6b8   : > { %v2012_v4 = vpop.xlane.xlu2 %2011 }
 0x6b9   : > { %v2013_v15 = vsub.f32 %v2009_v61, %v2012_v4 }
 0x6bb   : > { %v2014_v9 = vmul.f32 1.442695, %v2013_v15 }
 0x6bd   : > { %4009 = vpow2.f32 %v2014_v9 }
 0x6c0   : > { %v1887_v54 = vpop.permute.xlu2 %1886 }
 0x6c1   : > { %v1889_v56 = vmul.f32 %v1887_v54, %v4568_v46  ;;  %v2396_v54 = vld [vmem:[%s4306_s26 + $0x18] sm:$0xff] }
 0x6c2   : > { %2416 = vmatpush.msrb.mxu3 %v2396_v54 }
 0x6c3   : > { %v4617_v17 = vpop.eup %4009 }
 0x6c4   : > { %v2016_v11 = vsel %vm1874_vm10, %v4617_v17, 0.0 }
 0x6c5   : > { %2017 = vadd.xlane.f32.xlu2 %v2016_v11 }
 0x6c8   : > { %v2284_v27 = vpop.xlane.xlu0 %2283 }
 0x6c9   : > { %v2285_v28 = vsub.f32 %v2281_v2, %v2284_v27 }
 0x6cb   : > { %v2286_v30 = vmul.f32 1.442695, %v2285_v28 }
 0x6d0   : > { %1931 = vrot.lane.b32.xlu1 %v1929_v21, %s4084_s25 }
 0x6fa   : > { %2147 = vmax.xlane.f32.xlu1 %v2146_v20 }
 0x713   : > { %2089 = vrot.lane.b32.xlu1 %v4409_v19, %s4086_s28  ;;  %v2022_v19 = vpop.permute.xlu0 %2021 }
 0x714   : > { %v2024_v55 = vmul.f32 %v2022_v19, %v4568_v46 }
 0x716   : > { %v3944_v57 = vpack.i.bf16 %v2024_v55, %v1889_v56  ;;  %v2395_v55 = vld [vmem:[%s4306_s26 + $0x10] sm:$0xff]  ;;  %v2394_v56 = vld [vmem:[%s4306_s26 + $0x8] sm:$0xff] }
 0x717   : > { %2417 = vmatpush.msrb.mxu3 %v2395_v55 }
 0x719   : > { %2418 = vmatpush.msrb.mxu3 %v2394_v56 }
 0x71b   : > { %2293 = vrot.lane.b32.xlu1 %v4380_v10, %s4086_s28  ;;  %v2158_v40 = vpop.permute.xlu0 %2157  ;;  %s5230_s28 = scalar_lea.vmem %s5229_s14, %s4246_s0 }
 0x71c   : > { %v2160_v42 = vmul.f32 %v2158_v40, %v4568_v46 }
 0x723   : > { %v2226_v3 = vpop.permute.xlu0 %2225 }
 0x72a   : > { %v1923_v25 = vpop.xlane.xlu1 %1922 }
 0x72b   : > { %4011 = vrcp.f32 %v1923_v25  ;;  %v2362_v9 = vpop.permute.xlu0 %2361 }
 0x72c   : > { %4013 = vpow2.f32 %v1879_v26 }
 0x72d   : > { %4015 = vpow2.f32 %v2286_v30 }
 0x731   : > { %v4012_v29 = vpop.eup %4011 }
 0x732   : > { %v4631_v31 = vpop.eup %4013  ;;  %v1925_v32 = vmul.f32 %v4012_v29, %v4008_v14 }
 0x733   : > { %v1881_v10 = vsel %vm1874_vm10, %v4631_v31, 0.0  ;;  %v4640_v34 = vpop.eup %4015 }
 0x734   : > { %v2288_v36 = vsel %vm1874_vm10, %v4640_v34, 0.0 }
 0x738   : > { %v2018_v63 = vpop.xlane.xlu2 %2017 }
 0x742   : > { %v1932_v33 = vpop.permute.xlu1 %1931 }
 0x743   : > { %1953 = vmatpush.msrb.mxu2 %v1932_v33 }
 0x744   : > { %3854 = vmatmul.msk.f32.vlgmr.msrb.gmra.mxu2 %vm1934_vm11, %v1925_v32 }
 0x745   : > { %3859 = vmatpush.xpose.msk.msra.mxu2 %vm1106_vm1, %v4568_v46  ;;  %1882 = vadd.xlane.f32.xlu1 %v1881_v10 }
 0x749   : > { %3865 = vmatpush.xpose.msk.msrb.mxu2 %vm1106_vm1, %v4568_v46 }
 0x74c   : > { %3860 = vmatmul.msk.f32.vlgmr.msra.gmra.mxu2 %vm1106_vm1, %v2053_v35 }
 0x74d   : > { %3871 = vmatpush.xpose.msk.msra.mxu2 %vm1106_vm1, %v4568_v46  ;;  %2289 = vadd.xlane.f32.xlu1 %v2288_v36 }
 0x754   : > { %3866 = vmatmul.msk.f32.vlgmr.msrb.gmra.mxu2 %vm1106_vm1, %v2189_v37  ;;  %v2364_v37 = vmul.f32 %v2362_v9, %v4568_v46 }
 0x75c   : > { %3872 = vmatmul.msk.f32.vlgmr.msra.gmra.mxu2 %vm1106_vm1, %v2325_v38 }
 0x76d   : > { %v2148_v39 = vpop.xlane.xlu1 %2147 }
 0x76e   : > { %v2149_v58 = vsub.f32 %v4623_v16, %v2148_v39 }
 0x770   : > { %v2150_v59 = vmul.f32 1.442695, %v2149_v58 }
 0x772   : > { %4017 = vpow2.f32 %v2150_v59 }
 0x778   : > { %v4018_v60 = vpop.eup %4017 }
 0x779   : > { %v2152_v61 = vsel %vm1874_vm10, %v4018_v60, 0.0 }
 0x785   : > { %v2090_v41 = vpop.permute.xlu1 %2089 }
 0x786   : > { %v2092_v44 = vmul.f32 %v2090_v41, %v4568_v46 }
 0x788   : > { %v3949_v45 = vpack.i.bf16 %v2160_v42, %v2092_v44 }
 0x78a   : > { %3950 = vrot.lane.b32.xlu0 %v3949_v45, %s4084_s25 }
 0x78d   : > { %v2294_v22 = vpop.permute.xlu1 %2293 }
 0x78e   : > { %v2296_v33 = vmul.f32 %v2294_v22, %v4568_v46 }
 0x7b8   : > { %v1883_v15 = vpop.xlane.xlu1 %1882 }
 0x7c0   : > { %v2290_v44 = vpop.xlane.xlu1 %2289 }
 0x7c7   : > { %v4658_v47 = vpop.f32.mrf.mxu2 }
 0x7cf   : > { %v2074_v12 = vpop.f32.mrf.mxu2 }
 0x7d0   : > { %v2077_v48 = vmul.f32 0.5, %v2074_v12 }
 0x7d2   : > { %v2078_v50 = vsel %vm1874_vm10, %v2077_v48, -inf }
 0x7d3   : > { %2079 = vmax.xlane.f32.xlu2 %v2078_v50 }
 0x7d7   : > { %v2210_v13 = vpop.f32.mrf.mxu2 }
 0x7d8   : > { %v2213_v49 = vmul.f32 0.5, %v2210_v13 }
 0x7da   : > { %v2214_v51 = vsel %vm1874_vm10, %v2213_v49, -inf }
 0x7db   : > { %2215 = vmax.xlane.f32.xlu2 %v2214_v51 }
 0x7df   : > { %v2346_v52 = vpop.f32.mrf.mxu2 }
 0x7e0   : > { %v2349_v53 = vmul.f32 0.5, %v2346_v52 }
 0x7e2   : > { %v2350_v8 = vsel %vm1874_vm10, %v2349_v53, -inf }
 0x7e3   : > { %2351 = vmax.xlane.f32.xlu2 %v2350_v8 }
 0x7fb   : > { %3945 = vrot.lane.b32.xlu2 %v3944_v57, %s4084_s25  ;;  %v2393_v57 = vld [vmem:[%s4306_s26] sm:$0xff] }
 0x7fc   : > { %v3951_v25 = vpop.permute.xlu0 %3950  ;;  %2419 = vmatpush.msrb.mxu3 %v2393_v57 }
 0x7fd   : > { %v3953_v10 = vunpack.i.h.bf16 %v3951_v25  ;;  %v3952_v35 = vunpack.i.l.bf16 %v3951_v25 }
 0x824   : > { %2153 = vadd.xlane.f32.xlu2 %v2152_v61 }
 0x846   : > { %v2080_v0 = vpop.xlane.xlu2 %2079 }
 0x847   : > { %v2081_v1 = vsub.f32 %v2077_v48, %v2080_v0 }
 0x849   : > { %v2082_v2 = vmul.f32 1.442695, %v2081_v1 }
 0x84b   : > { %4019 = vpow2.f32 %v2082_v2 }
 0x84e   : > { %v2216_v5 = vpop.xlane.xlu2 %2215 }
 0x84f   : > { %v2217_v6 = vsub.f32 %v2213_v49, %v2216_v5 }
 0x851   : > { %v4020_v14 = vpop.eup %4019  ;;  %v2218_v7 = vmul.f32 1.442695, %v2217_v6 }
 0x852   : > { %v2084_v4 = vsel %vm1874_vm10, %v4020_v14, 0.0 }
 0x853   : > { %4021 = vpow2.f32 %v2218_v7  ;;  %2085 = vadd.xlane.f32.xlu0 %v2084_v4 }
 0x854   : > { %4023 = vrcp.f32 %v2018_v63 }
 0x855   : > { %4025 = vrcp.f32 %v1883_v15 }
 0x856   : > { %v2352_v11 = vpop.xlane.xlu2 %2351 }
 0x857   : > { %v2353_v18 = vsub.f32 %v2349_v53, %v2352_v11 }
 0x859   : > { %v4022_v21 = vpop.eup %4021  ;;  %v2354_v16 = vmul.f32 1.442695, %v2353_v18 }
 0x85a   : > { %v2220_v20 = vsel %vm1874_vm10, %v4022_v21, 0.0  ;;  %v4024_v23 = vpop.eup %4023 }
 0x85b   : > { %4027 = vpow2.f32 %v2354_v16  ;;  %2221 = vadd.xlane.f32.xlu1 %v2220_v20  ;;  %v4026_v24 = vpop.eup %4025  ;;  %v2020_v29 = vmul.f32 %v4024_v23, %v4617_v17  ;;  %v3954_v17 = vpack.i.bf16 %v2364_v37, %v2296_v33 }
 0x85c   : > { %v1885_v30 = vmul.f32 %v4026_v24, %v4631_v31  ;;  %v2228_v31 = vmul.f32 %v2226_v3, %v4568_v46 }
 0x85e   : > { %v3946_v26 = vpop.permute.xlu2 %3945 }
 0x85f   : > { %v3948_v27 = vunpack.i.h.bf16 %v3946_v26  ;;  %v3947_v28 = vunpack.i.l.bf16 %v3946_v26 }
 0x861   : > { %v4028_v32 = vpop.eup %4027  ;;  %1980 = vmatpush.msrb.mxu0 %v3947_v28  ;;  %2047 = vmatpush.msra.mxu1 %v3948_v27 }
 0x862   : > { %3855 = vmatmul.msk.f32.vlgmr.msrb.gmra.mxu0 %vm1934_vm11, %v1885_v30  ;;  %3858 = vmatmul.msk.f32.vlgmr.msra.gmra.mxu1 %vm1934_vm11, %v2020_v29  ;;  %v2356_v36 = vsel %vm1874_vm10, %v4028_v32, 0.0 }
 0x863   : > { %2115 = vmatpush.msra.mxu0 %v3952_v35  ;;  %2183 = vmatpush.msrb.mxu1 %v3953_v10 }
 0x864   : > { %2357 = vadd.xlane.f32.xlu1 %v2356_v36 }
 0x867   : > { %3955 = vrot.lane.b32.xlu0 %v3954_v17, %s4084_s25 }
 0x87d   : > { %2230 = vrot.lane.b32.xlu1 %v2228_v31, %s4084_s25  ;;  %s5228_s25 = sld [smem:[#allocation8_spill]] }
 0x883   : > { %v2505_v24 = vld [vmem:[%s5228_s25 + $0x180] sm:$0xff]  ;;  %v2507_v25 = vld [vmem:[%s5228_s25 + $0x190] sm:$0xff]  ;;  %v2508_v26 = vld [vmem:[%s5228_s25 + $0x198] sm:$0xff] }
 0x884   : > { %2632 = vmatpush.msra.mxu3 %v2508_v26  ;;  %v2489_v27 = vld [vmem:[%s5228_s25 + $0x100] sm:$0xff]  ;;  %v2490_v28 = vld [vmem:[%s5228_s25 + $0x108] sm:$0xff]  ;;  %v2491_v29 = vld [vmem:[%s5228_s25 + $0x110] sm:$0xff] }
 0x885   : > { %v2492_v30 = vld [vmem:[%s5228_s25 + $0x118] sm:$0xff]  ;;  %v2474_v33 = vld [vmem:[%s5228_s25 + $0x88] sm:$0xff]  ;;  %v2475_v10 = vld [vmem:[%s5228_s25 + $0x90] sm:$0xff] }
 0x886   : > { %2633 = vmatpush.msra.mxu3 %v2492_v30  ;;  %v2476_v35 = vld [vmem:[%s5228_s25 + $0x98] sm:$0xff]  ;;  %v2457_v36 = vld [vmem:[%s5228_s25] sm:$0xff]  ;;  %v2458_v37 = vld [vmem:[%s5228_s25 + $0x8] sm:$0xff] }
 0x887   : > { %v2459_v17 = vld [vmem:[%s5228_s25 + $0x10] sm:$0xff]  ;;  %v2460_v31 = vld [vmem:[%s5228_s25 + $0x18] sm:$0xff] }
 0x888   : > { %2634 = vmatpush.msra.mxu3 %v2476_v35  ;;  %v2520_v26 = vld [vmem:[%s5228_s25 + $0x1f8] sm:$0xff] }
 0x889   : > { %v2504_v30 = vld [vmem:[%s5228_s25 + $0x178] sm:$0xff] }
 0x88a   : > { %2635 = vmatpush.msra.mxu3 %v2460_v31  ;;  %v2488_v35 = vld [vmem:[%s5228_s25 + $0xf8] sm:$0xff] }
 0x88b   : > { %v2472_v31 = vld [vmem:[%s5228_s25 + $0x78] sm:$0xff] }
 0x897   : > { %v2154_v38 = vpop.xlane.xlu2 %2153 }
 0x898   : > { %4029 = vrcp.f32 %v2154_v38  ;;  %v2509_v38 = vld [vmem:[%s5228_s25 + $0x1a0] sm:$0xff] }
 0x89e   : > { %v4030_v19 = vpop.eup %4029 }
 0x89f   : > { %v2156_v39 = vmul.f32 %v4030_v19, %v4018_v60  ;;  %v2510_v19 = vld [vmem:[%s5228_s25 + $0x1a8] sm:$0xff] }
 0x8a1   : > { %3864 = vmatmul.msk.f32.vlgmr.msrb.gmra.mxu1 %vm1934_vm11, %v2156_v39  ;;  %v2511_v39 = vld [vmem:[%s5228_s25 + $0x1b0] sm:$0xff] }
 0x8c6   : > { %v2086_v40 = vpop.xlane.xlu0 %2085 }
 0x8c7   : > { %4031 = vrcp.f32 %v2086_v40  ;;  %v2512_v40 = vld [vmem:[%s5228_s25 + $0x1b8] sm:$0xff] }
 0x8c8   : > { %4033 = vrcp.f32 %v2290_v44 }
 0x8cd   : > { %v4032_v41 = vpop.eup %4031 }
 0x8ce   : > { %v2088_v42 = vmul.f32 %v4032_v41, %v4020_v14  ;;  %v4034_v45 = vpop.eup %4033  ;;  %v2222_v50 = vpop.xlane.xlu1 %2221  ;;  %v2493_v41 = vld [vmem:[%s5228_s25 + $0x120] sm:$0xff] }
 0x8cf   : > { %v2292_v46 = vmul.f32 %v4034_v45, %v4640_v34  ;;  %4035 = vrcp.f32 %v2222_v50  ;;  %v2495_v45 = vld [vmem:[%s5228_s25 + $0x130] sm:$0xff]  ;;  %v2478_v50 = vld [vmem:[%s5228_s25 + $0xa8] sm:$0xff] }
 0x8d0   : > { %3861 = vmatmul.msk.f32.vlgmr.msra.gmra.mxu0 %vm1934_vm11, %v2088_v42  ;;  %v2494_v42 = vld [vmem:[%s5228_s25 + $0x128] sm:$0xff] }
 0x8d5   : > { %v4036_v49 = vpop.eup %4035 }
 0x8d6   : > { %v2224_v51 = vmul.f32 %v4036_v49, %v4022_v21  ;;  %v2480_v49 = vld [vmem:[%s5228_s25 + $0xb8] sm:$0xff] }
 0x8d7   : > { %v2358_v13 = vpop.xlane.xlu1 %2357 }
 0x8d8   : > { %4037 = vrcp.f32 %v2358_v13  ;;  %v2479_v13 = vld [vmem:[%s5228_s25 + $0xb0] sm:$0xff] }
 0x8d9   : > { %v3956_v12 = vpop.permute.xlu0 %3955 }
 0x8da   : > { %v3957_v48 = vunpack.i.l.bf16 %v3956_v12  ;;  %v3958_v53 = vunpack.i.h.bf16 %v3956_v12  ;;  %v2496_v12 = vld [vmem:[%s5228_s25 + $0x138] sm:$0xff] }
 0x8dc   : > { %2319 = vmatpush.msra.mxu1 %v3957_v48 }
 0x8dd   : > { %3870 = vmatmul.msk.f32.vlgmr.msra.gmra.mxu1 %vm1934_vm11, %v2292_v46  ;;  %v2477_v46 = vld [vmem:[%s5228_s25 + $0xa0] sm:$0xff] }
 0x8de   : > { %v4038_v34 = vpop.eup %4037  ;;  %2572 = vmatpush.msrb.mxu1 %v2505_v24  ;;  %v2517_v24 = vld [vmem:[%s5228_s25 + $0x1e0] sm:$0xff] }
 0x8df   : > { %v2360_v8 = vmul.f32 %v4038_v34, %v4028_v32  ;;  %v1982_v58 = vpop.f32.mrf.mxu0  ;;  %v2049_v59 = vpop.f32.mrf.mxu1  ;;  %v2473_v32 = vld [vmem:[%s5228_s25 + $0x80] sm:$0xff]  ;;  %v2463_v34 = vld [vmem:[%s5228_s25 + $0x30] sm:$0xff] }
 0x8e0   : > { %v1983_v60 = vadd.f32 %v1982_v58, %v4658_v47  ;;  %v3965_v47 = vld [vmem:[%s5230_s28] ss:$0 sm:$0xff]  ;;  %2573 = vmatpush.msrb.mxu1 %v2489_v27 }
 0x8e1   : > { %v2501_v27 = vld [vmem:[%s5228_s25 + $0x160] sm:$0xff] }
 0x8e2   : > { %v2052_v63 = vadd.f32 %v2049_v59, %v1983_v60  ;;  %2574 = vmatpush.msrb.mxu1 %v2473_v32  ;;  %v3966_v60 = vld [vmem:[%s5232_s11] ss:$0 sm:$0xff] }
 0x8e3   : > { %v2485_v32 = vld [vmem:[%s5228_s25 + $0xe0] sm:$0xff] }
 0x8e4   : > { %2575 = vmatpush.msrb.mxu1 %v2457_v36  ;;  %v2469_v36 = vld [vmem:[%s5228_s25 + $0x60] sm:$0xff] }
 0x8e6   : > { %2652 = vmatpush.msra.mxu1 %v2509_v38  ;;  %v2911_v38 = vld [vmem:[%s4336_s1 + $0x78] sm:$0xff] }
 0x8e8   : > { %2653 = vmatpush.msra.mxu1 %v2493_v41  ;;  %v2910_v41 = vld [vmem:[%s4336_s1 + $0x70] sm:$0xff] }
 0x8ea   : > { %2654 = vmatpush.msra.mxu1 %v2477_v46  ;;  %v2925_v46 = vld [vmem:[%s4336_s1 + $0xe8] sm:$0xff] }
 0x8ef   : > { %v2231_v52 = vpop.permute.xlu1 %2230 }
 0x8f0   : > { %2251 = vmatpush.msrb.mxu0 %v2231_v52  ;;  %v2461_v52 = vld [vmem:[%s5228_s25 + $0x20] sm:$0xff] }
 0x8f1   : > { %3867 = vmatmul.msk.f32.vlgmr.msrb.gmra.mxu0 %vm1934_vm11, %v2224_v51  ;;  %2655 = vmatpush.msra.mxu1 %v2461_v52  ;;  %v2956_v52 = vld [vmem:[%s4336_s1 + $0x1e0] sm:$0xff] }
 0x8f2   : > { %2387 = vmatpush.msra.mxu0 %v3958_v53  ;;  %v2462_v53 = vld [vmem:[%s5228_s25 + $0x28] sm:$0xff] }
 0x8f4   : > { %2612 = vmatpush.msrb.mxu0 %v2507_v25  ;;  %v2519_v25 = vld [vmem:[%s5228_s25 + $0x1f0] sm:$0xff] }
 0x8f6   : > { %2613 = vmatpush.msrb.mxu0 %v2491_v29  ;;  %v2503_v29 = vld [vmem:[%s5228_s25 + $0x170] sm:$0xff] }
 0x8f8   : > { %2614 = vmatpush.msrb.mxu0 %v2475_v10  ;;  %v2487_v10 = vld [vmem:[%s5228_s25 + $0xf0] sm:$0xff] }
 0x8f9   : > { %3873 = vmatmul.msk.f32.vlgmr.msra.gmra.mxu0 %vm1934_vm11, %v2360_v8  ;;  %v2464_v8 = vld [vmem:[%s5228_s25 + $0x38] sm:$0xff] }
 0x8fa   : > { %2615 = vmatpush.msrb.mxu0 %v2459_v17  ;;  %v2471_v17 = vld [vmem:[%s5228_s25 + $0x70] sm:$0xff] }
 0x8fc   : > { %2692 = vmatpush.msra.mxu0 %v2511_v39  ;;  %v2927_v39 = vld [vmem:[%s4336_s1 + $0xf8] sm:$0xff] }
 0x8fe   : > { %2693 = vmatpush.msra.mxu0 %v2495_v45  ;;  %v2958_v45 = vld [vmem:[%s4336_s1 + $0x1f0] sm:$0xff] }
 0x900   : > { %2694 = vmatpush.msra.mxu0 %v2479_v13  ;;  %v2908_v13 = vld [vmem:[%s4336_s1 + $0x60] sm:$0xff] }
 0x902   : > { %2695 = vmatpush.msra.mxu0 %v2463_v34  ;;  %v2939_v34 = vld [vmem:[%s4336_s1 + $0x158] sm:$0xff] }
 0x91e   : > { %v2185_v1 = vpop.f32.mrf.mxu1 }
 0x94d   : > { %v2117_v61 = vpop.f32.mrf.mxu0 }
 0x94e   : > { %v2120_v0 = vadd.f32 %v2117_v61, %v2052_v63  ;;  %v3967_v63 = vld [vmem:[%s5234_s15] ss:$0 sm:$0xff] }
 0x950   : > { %v2188_v3 = vadd.f32 %v2185_v1, %v2120_v0 }
 0x95a   : > { %v2321_v5 = vpop.f32.mrf.mxu1 }
 0x96e   : > { %v2253_v2 = vpop.f32.mrf.mxu0 }
 0x96f   : > { %v2256_v22 = vadd.f32 %v2253_v2, %v2188_v3  ;;  %v2513_v3 = vld [vmem:[%s5228_s25 + $0x1c0] sm:$0xff] }
 0x971   : > { %v2324_v6 = vadd.f32 %v2321_v5, %v2256_v22  ;;  %v2514_v22 = vld [vmem:[%s5228_s25 + $0x1c8] sm:$0xff]  ;;  %v2515_v5 = vld [vmem:[%s5228_s25 + $0x1d0] sm:$0xff] }
 0x976   : > { %v2389_v14 = vpop.f32.mrf.mxu0 }
 0x977   : > { %v2392_v7 = vadd.f32 %v2389_v14, %v2324_v6  ;;  %v2516_v6 = vld [vmem:[%s5228_s25 + $0x1d8] sm:$0xff]  ;;  %v2497_v14 = vld [vmem:[%s5228_s25 + $0x140] sm:$0xff] }
 0x979   : > { %3874 = vmatmul.msk.f32.vlgmr.msrb.gmra.mxu3 %vm1106_vm1, %v2392_v7  ;;  %v2498_v7 = vld [vmem:[%s5228_s25 + $0x148] sm:$0xff] }
 0x97a   : > { %2712 = vmatpush.msrb.mxu3 %v2512_v40  ;;  %v2959_v40 = vld [vmem:[%s4336_s1 + $0x1f8] sm:$0xff] }
 0x97c   : > { %2713 = vmatpush.msrb.mxu3 %v2496_v12  ;;  %v2909_v12 = vld [vmem:[%s4336_s1 + $0x68] sm:$0xff] }
 0x97e   : > { %2714 = vmatpush.msrb.mxu3 %v2480_v49  ;;  %v2940_v49 = vld [vmem:[%s4336_s1 + $0x160] sm:$0xff] }
 0x980   : > { %2715 = vmatpush.msrb.mxu3 %v2464_v8  ;;  %v2923_v8 = vld [vmem:[%s4336_s1 + $0xd8] sm:$0xff] }
 0x9fc   : > { %v2421_v4 = vpop.f32.mrf.mxu3 }
 0x9fd   : > { %v2422_v15 = vadd.f32 %v3965_v47, %v2421_v4  ;;  %v2499_v47 = vld [vmem:[%s5228_s25 + $0x150] sm:$0xff]  ;;  %v2500_v4 = vld [vmem:[%s5228_s25 + $0x158] sm:$0xff] }
 0x9ff   : > { %v2424_v9 = vadd.f32 %v2422_v15, %v4559_v43  ;;  %v2506_v43 = vld [vmem:[%s5228_s25 + $0x188] sm:$0xff]  ;;  %v2481_v15 = vld [vmem:[%s5228_s25 + $0xc0] sm:$0xff] }
 0xa00   : > { %2592 = vmatpush.msrb.mxu2 %v2506_v43  ;;  %v2518_v43 = vld [vmem:[%s5228_s25 + $0x1e8] sm:$0xff] }
 0xa01   : > { %v2427_v11 = vsel %vm1746_vm5, %v2424_v9, 0.0 }
 0xa02   : > { %2428 = vadd.xlane.f32.xlu2 %v2427_v11  ;;  %2593 = vmatpush.msrb.mxu2 %v2490_v28  ;;  %v2483_v11 = vld [vmem:[%s5228_s25 + $0xd0] sm:$0xff]  ;;  %v2502_v28 = vld [vmem:[%s5228_s25 + $0x168] sm:$0xff] }
 0xa04   : > { %2594 = vmatpush.msrb.mxu2 %v2474_v33  ;;  %v2486_v33 = vld [vmem:[%s5228_s25 + $0xe8] sm:$0xff] }
 0xa06   : > { %2595 = vmatpush.msrb.mxu2 %v2458_v37  ;;  %v2470_v37 = vld [vmem:[%s5228_s25 + $0x68] sm:$0xff] }
 0xa08   : > { %2672 = vmatpush.msra.mxu2 %v2510_v19  ;;  %v2943_v19 = vld [vmem:[%s4336_s1 + $0x178] sm:$0xff] }
 0xa0a   : > { %2673 = vmatpush.msra.mxu2 %v2494_v42  ;;  %v2942_v42 = vld [vmem:[%s4336_s1 + $0x170] sm:$0xff] }
 0xa0c   : > { %2674 = vmatpush.msra.mxu2 %v2478_v50  ;;  %v2957_v50 = vld [vmem:[%s4336_s1 + $0x1e8] sm:$0xff] }
 0xa0e   : > { %2675 = vmatpush.msra.mxu2 %v2462_v53  ;;  %v2907_v53 = vld [vmem:[%s4336_s1 + $0x58] sm:$0xff] }
 0xa75   : > { %v2429_v18 = vpop.xlane.xlu2 %2428 }
 0xa76   : > { %v2430_v21 = vmul.f32 %v2429_v18, %v4528_v62  ;;  %v2484_v18 = vld [vmem:[%s5228_s25 + $0xd8] sm:$0xff] }
 0xa78   : > { %v4700_v16 = vsub.f32 %v2424_v9, %v2430_v21  ;;  %v2482_v9 = vld [vmem:[%s5228_s25 + $0xc8] sm:$0xff]  ;;  %v2465_v21 = vld [vmem:[%s5228_s25 + $0x40] sm:$0xff] }
 0xa7a   : > { %v2432_v20 = vmul.f32 %v4700_v16, %v4700_v16 }
 0xa7c   : > { %v2433_v23 = vsel %vm1746_vm5, %v2432_v20, 0.0  ;;  %v2467_v20 = vld [vmem:[%s5228_s25 + $0x50] sm:$0xff] }
 0xa7d   : > { %2434 = vadd.xlane.f32.xlu0 %v2433_v23  ;;  %v2468_v23 = vld [vmem:[%s5228_s25 + $0x58] sm:$0xff] }
 0xaf0   : > { %v2435_v44 = vpop.xlane.xlu0 %2434 }
 0xaf1   : > { %v2436_v48 = vmul.f32 %v2435_v44, %v4528_v62  ;;  %v2926_v44 = vld [vmem:[%s4336_s1 + $0xf0] sm:$0xff] }
 0xaf3   : > { %v2437_v51 = vadd.f32 1e-05, %v2436_v48  ;;  %v2941_v48 = vld [vmem:[%s4336_s1 + $0x168] sm:$0xff] }
 0xaf5   : > { %4039 = vrsqrt.f32 %v2437_v51  ;;  %vm2444_vm13 = vweird.f32 %v2437_v51 }
 0xafb   : > { %v4040_v54 = vpop.eup %4039 }
 0xafc   : > { %v2439_v55 = vmul.f32 %v4040_v54, %v2437_v51  ;;  %vm2445_vm12 = vweird.f32 %v4040_v54  ;;  %v2924_v51 = vld [vmem:[%s4336_s1 + $0xe0] sm:$0xff] }
 0xafd   : > { %vm2446_vm14 = vmor %vm2444_vm13, %vm2445_vm12 }
 0xafe   : > { %v2440_v56 = vmul.f32 %v4040_v54, %v2439_v55  ;;  %v2906_v55 = vld [vmem:[%s4336_s1 + $0x50] sm:$0xff] }
 0xb00   : > { %v2441_v57 = vmul.f32 0.5, %v2440_v56  ;;  %v2938_v56 = vld [vmem:[%s4336_s1 + $0x150] sm:$0xff] }
 0xb02   : > { %v2442_v58 = vsub.f32 1.5, %v2441_v57  ;;  %v2922_v57 = vld [vmem:[%s4336_s1 + $0xd0] sm:$0xff] }
 0xb04   : > { %v2443_v59 = vmul.f32 %v4040_v54, %v2442_v58  ;;  %v2954_v58 = vld [vmem:[%s4336_s1 + $0x1d0] sm:$0xff] }
 0xb06   : > { %v2447_v61 = vsel %vm2446_vm14, %v4040_v54, %v2443_v59  ;;  %v2955_v54 = vld [vmem:[%s4336_s1 + $0x1d8] sm:$0xff]  ;;  %v2905_v59 = vld [vmem:[%s4336_s1 + $0x48] sm:$0xff] }
 0xb07   : > { %v2448_v0 = vmul.f32 %v2447_v61, %v4700_v16  ;;  %v2466_v16 = vld [vmem:[%s5228_s25 + $0x48] sm:$0xff] }
 0xb08   : > { %v2921_v61 = vld [vmem:[%s4336_s1 + $0xc8] sm:$0xff] }
 0xb09   : > { %v2452_v1 = vmul.f32 %v3966_v60, %v2448_v0  ;;  %v2937_v60 = vld [vmem:[%s4336_s1 + $0x148] sm:$0xff]  ;;  %v2904_v0 = vld [vmem:[%s4336_s1 + $0x40] sm:$0xff] }
 0xb0b   : > { %v4749_v2 = vadd.f32 %v3967_v63, %v2452_v1  ;;  %v2953_v63 = vld [vmem:[%s4336_s1 + $0x1c8] sm:$0xff]  ;;  %v2936_v1 = vld [vmem:[%s4336_s1 + $0x140] sm:$0xff] }
 0xb0d   : > { %3875 = vmatmul.msk.f32.vlgmr.msrb.gmra.mxu1 %vm1106_vm1, %v4749_v2  ;;  %3876 = vmatmul.msk.f32.vlgmr.msrb.gmra.mxu2 %vm1106_vm1, %v4749_v2 }
 0xb0e   : > { %3877 = vmatmul.msk.f32.vlgmr.msrb.gmra.mxu0 %vm1106_vm1, %v4749_v2  ;;  %3878 = vmatmul.msk.f32.vlgmr.msra.gmra.mxu3 %vm1106_vm1, %v4749_v2 }
 0xb0f   : > { %2732 = vmatpush.msrb.mxu1 %v2513_v3  ;;  %2752 = vmatpush.msrb.mxu2 %v2514_v22  ;;  %v2920_v3 = vld [vmem:[%s4336_s1 + $0xc0] sm:$0xff] }
 0xb10   : > { %2772 = vmatpush.msrb.mxu0 %v2515_v5  ;;  %2792 = vmatpush.msra.mxu3 %v2516_v6  ;;  %v2952_v22 = vld [vmem:[%s4336_s1 + $0x1c0] sm:$0xff]  ;;  %v2903_v5 = vld [vmem:[%s4336_s1 + $0x38] sm:$0xff] }
 0xb11   : > { %2733 = vmatpush.msrb.mxu1 %v2497_v14  ;;  %2753 = vmatpush.msrb.mxu2 %v2498_v7  ;;  %v2935_v6 = vld [vmem:[%s4336_s1 + $0x138] sm:$0xff] }
 0xb12   : > { %2773 = vmatpush.msrb.mxu0 %v2499_v47  ;;  %2793 = vmatpush.msra.mxu3 %v2500_v4  ;;  %v2919_v14 = vld [vmem:[%s4336_s1 + $0xb8] sm:$0xff]  ;;  %v2902_v47 = vld [vmem:[%s4336_s1 + $0x30] sm:$0xff] }
 0xb13   : > { %2734 = vmatpush.msrb.mxu1 %v2481_v15  ;;  %2754 = vmatpush.msrb.mxu2 %v2482_v9  ;;  %v2951_v7 = vld [vmem:[%s4336_s1 + $0x1b8] sm:$0xff]  ;;  %v2934_v4 = vld [vmem:[%s4336_s1 + $0x130] sm:$0xff] }
 0xb14   : > { %2774 = vmatpush.msrb.mxu0 %v2483_v11  ;;  %2794 = vmatpush.msra.mxu3 %v2484_v18  ;;  %v2918_v15 = vld [vmem:[%s4336_s1 + $0xb0] sm:$0xff]  ;;  %v2901_v11 = vld [vmem:[%s4336_s1 + $0x28] sm:$0xff] }
 0xb15   : > { %3879 = vmatmul.msk.f32.vlgmr.msra.gmra.mxu1 %vm1106_vm1, %v4749_v2  ;;  %3880 = vmatmul.msk.f32.vlgmr.msra.gmra.mxu2 %vm1106_vm1, %v4749_v2  ;;  %v2950_v9 = vld [vmem:[%s4336_s1 + $0x1b0] sm:$0xff]  ;;  %v2933_v18 = vld [vmem:[%s4336_s1 + $0x128] sm:$0xff] }
 0xb16   : > { %3881 = vmatmul.msk.f32.vlgmr.msra.gmra.mxu0 %vm1106_vm1, %v4749_v2  ;;  %3882 = vmatmul.msk.f32.vlgmr.msrb.gmra.mxu3 %vm1106_vm1, %v4749_v2 }
 0xb17   : > { %2735 = vmatpush.msrb.mxu1 %v2465_v21  ;;  %2755 = vmatpush.msrb.mxu2 %v2466_v16  ;;  %v2917_v21 = vld [vmem:[%s4336_s1 + $0xa8] sm:$0xff] }
 0xb18   : > { %2775 = vmatpush.msrb.mxu0 %v2467_v20  ;;  %2795 = vmatpush.msra.mxu3 %v2468_v23  ;;  %v2949_v16 = vld [vmem:[%s4336_s1 + $0x1a8] sm:$0xff]  ;;  %v2900_v20 = vld [vmem:[%s4336_s1 + $0x20] sm:$0xff] }
 0xb19   : > { %2812 = vmatpush.msra.mxu1 %v2517_v24  ;;  %2832 = vmatpush.msra.mxu2 %v2518_v43  ;;  %v2932_v23 = vld [vmem:[%s4336_s1 + $0x120] sm:$0xff] }
 0xb1a   : > { %2852 = vmatpush.msra.mxu0 %v2519_v25  ;;  %2872 = vmatpush.msrb.mxu3 %v2520_v26  ;;  %v2916_v24 = vld [vmem:[%s4336_s1 + $0xa0] sm:$0xff]  ;;  %v2899_v25 = vld [vmem:[%s4336_s1 + $0x18] sm:$0xff] }
 0xb1b   : > { %2813 = vmatpush.msra.mxu1 %v2501_v27  ;;  %2833 = vmatpush.msra.mxu2 %v2502_v28  ;;  %v2948_v43 = vld [vmem:[%s4336_s1 + $0x1a0] sm:$0xff]  ;;  %v2931_v26 = vld [vmem:[%s4336_s1 + $0x118] sm:$0xff] }
 0xb1c   : > { %2853 = vmatpush.msra.mxu0 %v2503_v29  ;;  %2873 = vmatpush.msrb.mxu3 %v2504_v30  ;;  %v2915_v27 = vld [vmem:[%s4336_s1 + $0x98] sm:$0xff]  ;;  %v2898_v29 = vld [vmem:[%s4336_s1 + $0x10] sm:$0xff] }
 0xb1d   : > { %3883 = vmatmul.msk.f32.vlgmr.msrb.gmra.mxu1 %vm1106_vm1, %v4749_v2  ;;  %3884 = vmatmul.msk.f32.vlgmr.msrb.gmra.mxu2 %vm1106_vm1, %v4749_v2  ;;  %v2947_v28 = vld [vmem:[%s4336_s1 + $0x198] sm:$0xff]  ;;  %v2930_v30 = vld [vmem:[%s4336_s1 + $0x110] sm:$0xff] }
 0xb1e   : > { %3885 = vmatmul.msk.f32.vlgmr.msrb.gmra.mxu0 %vm1106_vm1, %v4749_v2  ;;  %3886 = vmatmul.msk.f32.vlgmr.msra.gmra.mxu3 %vm1106_vm1, %v4749_v2 }
 0xb1f   : > { %2814 = vmatpush.msra.mxu1 %v2485_v32  ;;  %2834 = vmatpush.msra.mxu2 %v2486_v33  ;;  %v2914_v32 = vld [vmem:[%s4336_s1 + $0x90] sm:$0xff] }
 0xb20   : > { %2854 = vmatpush.msra.mxu0 %v2487_v10  ;;  %2874 = vmatpush.msrb.mxu3 %v2488_v35  ;;  %v2946_v33 = vld [vmem:[%s4336_s1 + $0x190] sm:$0xff]  ;;  %v2897_v10 = vld [vmem:[%s4336_s1 + $0x8] sm:$0xff] }
 0xb21   : > { %2815 = vmatpush.msra.mxu1 %v2469_v36  ;;  %2835 = vmatpush.msra.mxu2 %v2470_v37  ;;  %v2929_v35 = vld [vmem:[%s4336_s1 + $0x108] sm:$0xff] }
 0xb22   : > { %2855 = vmatpush.msra.mxu0 %v2471_v17  ;;  %2875 = vmatpush.msrb.mxu3 %v2472_v31  ;;  %v2913_v36 = vld [vmem:[%s4336_s1 + $0x88] sm:$0xff]  ;;  %v2896_v17 = vld [vmem:[%s4336_s1] sm:$0xff] }
 0xb23   : > { %3156 = vmatpush.msrb.mxu1 %v2911_v38  ;;  %3176 = vmatpush.msrb.mxu2 %v2927_v39  ;;  %v2945_v37 = vld [vmem:[%s4336_s1 + $0x188] sm:$0xff]  ;;  %v2928_v31 = vld [vmem:[%s4336_s1 + $0x100] sm:$0xff]  ;;  %v2975_v38 = vld [vmem:[%s4336_s1 + $0x278] sm:$0xff] }
 0xb24   : > { %3196 = vmatpush.msrb.mxu0 %v2943_v19  ;;  %3216 = vmatpush.msra.mxu3 %v2959_v40  ;;  %v3007_v19 = vld [vmem:[%s4336_s1 + $0x378] sm:$0xff]  ;;  %v2912_v39 = vld [vmem:[%s4336_s1 + $0x80] sm:$0xff] }
 0xb25   : > { %3887 = vmatmul.msk.f32.vlgmr.msra.gmra.mxu1 %vm1106_vm1, %v4749_v2  ;;  %3888 = vmatmul.msk.f32.vlgmr.msra.gmra.mxu2 %vm1106_vm1, %v4749_v2  ;;  %v2944_v40 = vld [vmem:[%s4336_s1 + $0x180] sm:$0xff] }
 0xb26   : > { %3889 = vmatmul.msk.f32.vlgmr.msra.gmra.mxu0 %vm1106_vm1, %v4749_v2  ;;  %3890 = vmatmul.msk.f32.vlgmr.msrb.gmra.mxu3 %vm1106_vm1, %v4749_v2 }
 0xb27   : > { %3157 = vmatpush.msrb.mxu1 %v2910_v41  ;;  %3197 = vmatpush.msrb.mxu0 %v2942_v42  ;;  %v2974_v41 = vld [vmem:[%s4336_s1 + $0x270] sm:$0xff] }
 0xb28   : > { %3177 = vmatpush.msrb.mxu2 %v2926_v44  ;;  %3217 = vmatpush.msra.mxu3 %v2958_v45  ;;  %v3006_v42 = vld [vmem:[%s4336_s1 + $0x370] sm:$0xff]  ;;  %v2991_v44 = vld [vmem:[%s4336_s1 + $0x2f8] sm:$0xff] }
 0xb29   : > { %3158 = vmatpush.msrb.mxu1 %v2909_v12  ;;  %3198 = vmatpush.msrb.mxu0 %v2941_v48  ;;  %v3023_v45 = vld [vmem:[%s4336_s1 + $0x3f8] sm:$0xff]  ;;  %v2973_v12 = vld [vmem:[%s4336_s1 + $0x268] sm:$0xff] }
 0xb2a   : > { %3178 = vmatpush.msrb.mxu2 %v2925_v46  ;;  %3218 = vmatpush.msra.mxu3 %v2957_v50  ;;  %v3005_v48 = vld [vmem:[%s4336_s1 + $0x368] sm:$0xff]  ;;  %v2990_v46 = vld [vmem:[%s4336_s1 + $0x2f0] sm:$0xff] }
 0xb2b   : > { %3159 = vmatpush.msrb.mxu1 %v2908_v13  ;;  %3199 = vmatpush.msrb.mxu0 %v2940_v49  ;;  %v3022_v50 = vld [vmem:[%s4336_s1 + $0x3f0] sm:$0xff]  ;;  %v2972_v13 = vld [vmem:[%s4336_s1 + $0x260] sm:$0xff] }
 0xb2c   : > { %3179 = vmatpush.msrb.mxu2 %v2924_v51  ;;  %3219 = vmatpush.msra.mxu3 %v2956_v52  ;;  %v3004_v49 = vld [vmem:[%s4336_s1 + $0x360] sm:$0xff]  ;;  %v2989_v51 = vld [vmem:[%s4336_s1 + $0x2e8] sm:$0xff] }
 0xb2d   : > { %3160 = vmatpush.msrb.mxu1 %v2907_v53  ;;  %3200 = vmatpush.msrb.mxu0 %v2939_v34  ;;  %v3021_v52 = vld [vmem:[%s4336_s1 + $0x3e8] sm:$0xff]  ;;  %v2971_v53 = vld [vmem:[%s4336_s1 + $0x258] sm:$0xff] }
 0xb2e   : > { %3180 = vmatpush.msrb.mxu2 %v2923_v8  ;;  %3220 = vmatpush.msra.mxu3 %v2955_v54  ;;  %v3003_v34 = vld [vmem:[%s4336_s1 + $0x358] sm:$0xff]  ;;  %v2988_v8 = vld [vmem:[%s4336_s1 + $0x2e0] sm:$0xff] }
 0xb2f   : > { %3161 = vmatpush.msrb.mxu1 %v2906_v55  ;;  %3201 = vmatpush.msrb.mxu0 %v2938_v56  ;;  %v3020_v54 = vld [vmem:[%s4336_s1 + $0x3e0] sm:$0xff]  ;;  %v2970_v55 = vld [vmem:[%s4336_s1 + $0x250] sm:$0xff] }
 0xb30   : > { %3181 = vmatpush.msrb.mxu2 %v2922_v57  ;;  %3221 = vmatpush.msra.mxu3 %v2954_v58  ;;  %v3002_v56 = vld [vmem:[%s4336_s1 + $0x350] sm:$0xff]  ;;  %v2987_v57 = vld [vmem:[%s4336_s1 + $0x2d8] sm:$0xff] }
 0xb31   : > { %3162 = vmatpush.msrb.mxu1 %v2905_v59  ;;  %3202 = vmatpush.msrb.mxu0 %v2937_v60  ;;  %v3019_v58 = vld [vmem:[%s4336_s1 + $0x3d8] sm:$0xff]  ;;  %v2969_v59 = vld [vmem:[%s4336_s1 + $0x248] sm:$0xff] }
 0xb32   : > { %3182 = vmatpush.msrb.mxu2 %v2921_v61  ;;  %3222 = vmatpush.msra.mxu3 %v2953_v63  ;;  %v3001_v60 = vld [vmem:[%s4336_s1 + $0x348] sm:$0xff]  ;;  %v2986_v61 = vld [vmem:[%s4336_s1 + $0x2d0] sm:$0xff] }
 0xb33   : > { %3163 = vmatpush.msrb.mxu1 %v2904_v0  ;;  %3203 = vmatpush.msrb.mxu0 %v2936_v1  ;;  %v3018_v63 = vld [vmem:[%s4336_s1 + $0x3d0] sm:$0xff]  ;;  %v2968_v0 = vld [vmem:[%s4336_s1 + $0x240] sm:$0xff] }
 0xb34   : > { %3183 = vmatpush.msrb.mxu2 %v2920_v3  ;;  %3223 = vmatpush.msra.mxu3 %v2952_v22  ;;  %v3000_v1 = vld [vmem:[%s4336_s1 + $0x340] sm:$0xff]  ;;  %v2985_v3 = vld [vmem:[%s4336_s1 + $0x2c8] sm:$0xff] }
 0xb35   : > { %3164 = vmatpush.msrb.mxu1 %v2903_v5  ;;  %3204 = vmatpush.msrb.mxu0 %v2935_v6  ;;  %v3017_v22 = vld [vmem:[%s4336_s1 + $0x3c8] sm:$0xff]  ;;  %v2967_v5 = vld [vmem:[%s4336_s1 + $0x238] sm:$0xff] }
 0xb36   : > { %3184 = vmatpush.msrb.mxu2 %v2919_v14  ;;  %3224 = vmatpush.msra.mxu3 %v2951_v7  ;;  %v2999_v6 = vld [vmem:[%s4336_s1 + $0x338] sm:$0xff]  ;;  %v2984_v14 = vld [vmem:[%s4336_s1 + $0x2c0] sm:$0xff] }
 0xb37   : > { %3165 = vmatpush.msrb.mxu1 %v2902_v47  ;;  %3205 = vmatpush.msrb.mxu0 %v2934_v4  ;;  %v3016_v7 = vld [vmem:[%s4336_s1 + $0x3c0] sm:$0xff]  ;;  %v2966_v47 = vld [vmem:[%s4336_s1 + $0x230] sm:$0xff] }
 0xb38   : > { %3185 = vmatpush.msrb.mxu2 %v2918_v15  ;;  %3225 = vmatpush.msra.mxu3 %v2950_v9  ;;  %v2998_v4 = vld [vmem:[%s4336_s1 + $0x330] sm:$0xff]  ;;  %v2983_v15 = vld [vmem:[%s4336_s1 + $0x2b8] sm:$0xff] }
 0xb39   : > { %3166 = vmatpush.msrb.mxu1 %v2901_v11  ;;  %3206 = vmatpush.msrb.mxu0 %v2933_v18  ;;  %v3015_v9 = vld [vmem:[%s4336_s1 + $0x3b8] sm:$0xff]  ;;  %v2965_v11 = vld [vmem:[%s4336_s1 + $0x228] sm:$0xff] }
 0xb3a   : > { %3186 = vmatpush.msrb.mxu2 %v2917_v21  ;;  %3226 = vmatpush.msra.mxu3 %v2949_v16  ;;  %v2997_v18 = vld [vmem:[%s4336_s1 + $0x328] sm:$0xff]  ;;  %v2982_v21 = vld [vmem:[%s4336_s1 + $0x2b0] sm:$0xff] }
 0xb3b   : > { %3167 = vmatpush.msrb.mxu1 %v2900_v20  ;;  %3207 = vmatpush.msrb.mxu0 %v2932_v23  ;;  %v3014_v16 = vld [vmem:[%s4336_s1 + $0x3b0] sm:$0xff]  ;;  %v2964_v20 = vld [vmem:[%s4336_s1 + $0x220] sm:$0xff] }
 0xb3c   : > { %3187 = vmatpush.msrb.mxu2 %v2916_v24  ;;  %3227 = vmatpush.msra.mxu3 %v2948_v43  ;;  %v2996_v23 = vld [vmem:[%s4336_s1 + $0x320] sm:$0xff]  ;;  %v2963_v24 = vld [vmem:[%s4336_s1 + $0x218] sm:$0xff] }
 0xb3d   : > { %3168 = vmatpush.msrb.mxu1 %v2899_v25  ;;  %3208 = vmatpush.msrb.mxu0 %v2931_v26  ;;  %v2995_v43 = vld [vmem:[%s4336_s1 + $0x318] sm:$0xff]  ;;  %v2962_v25 = vld [vmem:[%s4336_s1 + $0x210] sm:$0xff]  ;;  %v2981_v26 = vld [vmem:[%s4336_s1 + $0x2a8] sm:$0xff] }
 0xb3e   : > { %3188 = vmatpush.msrb.mxu2 %v2915_v27  ;;  %3228 = vmatpush.msra.mxu3 %v2947_v28  ;;  %v2994_v27 = vld [vmem:[%s4336_s1 + $0x310] sm:$0xff]  ;;  %v3013_v28 = vld [vmem:[%s4336_s1 + $0x3a8] sm:$0xff] }
 0xb3f   : > { %3169 = vmatpush.msrb.mxu1 %v2898_v29  ;;  %3209 = vmatpush.msrb.mxu0 %v2930_v30  ;;  %v2961_v29 = vld [vmem:[%s4336_s1 + $0x208] sm:$0xff]  ;;  %v2980_v30 = vld [vmem:[%s4336_s1 + $0x2a0] sm:$0xff] }
 0xb40   : > { %3189 = vmatpush.msrb.mxu2 %v2914_v32  ;;  %3229 = vmatpush.msra.mxu3 %v2946_v33  ;;  %v2993_v32 = vld [vmem:[%s4336_s1 + $0x308] sm:$0xff]  ;;  %v3012_v33 = vld [vmem:[%s4336_s1 + $0x3a0] sm:$0xff] }
 0xb41   : > { %3170 = vmatpush.msrb.mxu1 %v2897_v10  ;;  %3210 = vmatpush.msrb.mxu0 %v2929_v35  ;;  %v2960_v10 = vld [vmem:[%s4336_s1 + $0x200] sm:$0xff]  ;;  %v2979_v35 = vld [vmem:[%s4336_s1 + $0x298] sm:$0xff] }
 0xb42   : > { %3190 = vmatpush.msrb.mxu2 %v2913_v36  ;;  %3230 = vmatpush.msra.mxu3 %v2945_v37  ;;  %v2992_v36 = vld [vmem:[%s4336_s1 + $0x300] sm:$0xff]  ;;  %v3011_v37 = vld [vmem:[%s4336_s1 + $0x398] sm:$0xff] }
 0xb43   : > { %3171 = vmatpush.msrb.mxu1 %v2896_v17  ;;  %3211 = vmatpush.msrb.mxu0 %v2928_v31  ;;  %v2978_v17 = vld [vmem:[%s4336_s1 + $0x290] sm:$0xff] }
 0xb44   : > { %3191 = vmatpush.msrb.mxu2 %v2912_v39  ;;  %3231 = vmatpush.msra.mxu3 %v2944_v40  ;;  %v3010_v31 = vld [vmem:[%s4336_s1 + $0x390] sm:$0xff]  ;;  %v2976_v39 = vld [vmem:[%s4336_s1 + $0x280] sm:$0xff] }
 0xb45   : > { %3236 = vmatpush.msra.mxu1 %v2975_v38  ;;  %3276 = vmatpush.msra.mxu0 %v3007_v19  ;;  %v2977_v38 = vld [vmem:[%s4336_s1 + $0x288] sm:$0xff]  ;;  %v3008_v40 = vld [vmem:[%s4336_s1 + $0x380] sm:$0xff] }
 0xb46   : > { %3256 = vmatpush.msra.mxu2 %v2991_v44  ;;  %3296 = vmatpush.msrb.mxu3 %v3023_v45  ;;  %v3009_v19 = vld [vmem:[%s4336_s1 + $0x388] sm:$0xff] }
 0xb47   : > { %3237 = vmatpush.msra.mxu1 %v2974_v41  ;;  %3277 = vmatpush.msra.mxu0 %v3006_v42  ;;  %v4944_v41 = vld [vmem:[%s5235_s16] sm:$0xff] }
 0xb48   : > { %3257 = vmatpush.msra.mxu2 %v2990_v46  ;;  %3297 = vmatpush.msrb.mxu3 %v3022_v50  ;;  %v2525_v42 = vperm.slane %v4944_v41, 0  ;;  %v2527_v44 = vperm.slane %v4944_v41, 2 }
 0xb49   : > { %3238 = vmatpush.msra.mxu1 %v2973_v12  ;;  %3278 = vmatpush.msra.mxu0 %v3005_v48 }
 0xb4a   : > { %3258 = vmatpush.msra.mxu2 %v2989_v51  ;;  %3298 = vmatpush.msrb.mxu3 %v3021_v52  ;;  %v3071_v52 = vld [vmem:[%s4336_s1 + $0x578] sm:$0xff] }
 0xb4b   : > { %3239 = vmatpush.msra.mxu1 %v2972_v13  ;;  %3279 = vmatpush.msra.mxu0 %v3004_v49  ;;  %v3039_v13 = vld [vmem:[%s4336_s1 + $0x478] sm:$0xff]  ;;  %v2526_v49 = vperm.slane %v4944_v41, 1 }
 0xb4c   : > { %3259 = vmatpush.msra.mxu2 %v2988_v8  ;;  %3299 = vmatpush.msrb.mxu3 %v3020_v54  ;;  %v2529_v8 = vperm.slane %v4944_v41, 4 }
 0xb4d   : > { %3240 = vmatpush.msra.mxu1 %v2971_v53  ;;  %3280 = vmatpush.msra.mxu0 %v3003_v34  ;;  %v2528_v53 = vperm.slane %v4944_v41, 3  ;;  %v3038_v34 = vld [vmem:[%s4336_s1 + $0x470] sm:$0xff] }
 0xb4e   : > { %3260 = vmatpush.msra.mxu2 %v2987_v57  ;;  %3300 = vmatpush.msrb.mxu3 %v3019_v58 }
 0xb4f   : > { %3241 = vmatpush.msra.mxu1 %v2970_v55  ;;  %3281 = vmatpush.msra.mxu0 %v3002_v56  ;;  %v3070_v55 = vld [vmem:[%s4336_s1 + $0x570] sm:$0xff]  ;;  %v2531_v56 = vperm.slane %v4944_v41, 6 }
 0xb50   : > { %3261 = vmatpush.msra.mxu2 %v2986_v61  ;;  %3301 = vmatpush.msrb.mxu3 %v3018_v63  ;;  %v3069_v63 = vld [vmem:[%s4336_s1 + $0x568] sm:$0xff] }
 0xb51   : > { %3242 = vmatpush.msra.mxu1 %v2969_v59  ;;  %3282 = vmatpush.msra.mxu0 %v3001_v60  ;;  %v3037_v59 = vld [vmem:[%s4336_s1 + $0x468] sm:$0xff] }
 0xb52   : > { %3262 = vmatpush.msra.mxu2 %v2985_v3  ;;  %3302 = vmatpush.msrb.mxu3 %v3017_v22  ;;  %v3036_v22 = vld [vmem:[%s4336_s1 + $0x460] sm:$0xff] }
 0xb53   : > { %3243 = vmatpush.msra.mxu1 %v2968_v0  ;;  %3283 = vmatpush.msra.mxu0 %v3000_v1 }
 0xb54   : > { %3263 = vmatpush.msra.mxu2 %v2984_v14  ;;  %3303 = vmatpush.msrb.mxu3 %v3016_v7  ;;  %v3055_v14 = vld [vmem:[%s4336_s1 + $0x4f8] sm:$0xff]  ;;  %v3068_v7 = vld [vmem:[%s4336_s1 + $0x560] sm:$0xff] }
 0xb55   : > { %3244 = vmatpush.msra.mxu1 %v2967_v5  ;;  %3284 = vmatpush.msra.mxu0 %v2999_v6 }
 0xb56   : > { %3264 = vmatpush.msra.mxu2 %v2983_v15  ;;  %3304 = vmatpush.msrb.mxu3 %v3015_v9  ;;  %v2530_v15 = vperm.slane %v4944_v41, 5 }
 0xb57   : > { %3245 = vmatpush.msra.mxu1 %v2966_v47  ;;  %3285 = vmatpush.msra.mxu0 %v2998_v4  ;;  %v3087_v4 = vld [vmem:[%s4336_s1 + $0x5f8] sm:$0xff] }
 0xb58   : > { %3265 = vmatpush.msra.mxu2 %v2982_v21  ;;  %3305 = vmatpush.msrb.mxu3 %v3014_v16  ;;  %v3054_v21 = vld [vmem:[%s4336_s1 + $0x4f0] sm:$0xff]  ;;  %v3067_v16 = vld [vmem:[%s4336_s1 + $0x558] sm:$0xff] }
 0xb59   : > { %3246 = vmatpush.msra.mxu1 %v2965_v11  ;;  %3286 = vmatpush.msra.mxu0 %v2997_v18  ;;  %v3035_v11 = vld [vmem:[%s4336_s1 + $0x458] sm:$0xff]  ;;  %v2532_v18 = vperm.slane %v4944_v41, 7  ;;  %v3082_v41 = vld [vmem:[%s4336_s1 + $0x5d0] sm:$0xff] }
 0xb5a   : > { %3266 = vmatpush.msra.mxu2 %v2981_v26  ;;  %3306 = vmatpush.msrb.mxu3 %v3013_v28  ;;  %v3053_v26 = vld [vmem:[%s4336_s1 + $0x4e8] sm:$0xff] }
 0xb5b   : > { %3247 = vmatpush.msra.mxu1 %v2964_v20  ;;  %3287 = vmatpush.msra.mxu0 %v2996_v23  ;;  %v3086_v20 = vld [vmem:[%s4336_s1 + $0x5f0] sm:$0xff] }
 0xb5c   : > { %3267 = vmatpush.msra.mxu2 %v2980_v30  ;;  %3307 = vmatpush.msrb.mxu3 %v3012_v33  ;;  %v3033_v30 = vld [vmem:[%s4336_s1 + $0x448] sm:$0xff]  ;;  %v3052_v33 = vld [vmem:[%s4336_s1 + $0x4e0] sm:$0xff] }
 0xb5d   : > { %3248 = vmatpush.msra.mxu1 %v2963_v24  ;;  %3288 = vmatpush.msra.mxu0 %v2995_v43  ;;  %v3034_v24 = vld [vmem:[%s4336_s1 + $0x450] sm:$0xff] }
 0xb5e   : > { %3268 = vmatpush.msra.mxu2 %v2979_v35  ;;  %3308 = vmatpush.msrb.mxu3 %v3011_v37  ;;  %v3032_v37 = vld [vmem:[%s4336_s1 + $0x440] sm:$0xff] }
 0xb5f   : > { %3249 = vmatpush.msra.mxu1 %v2962_v25  ;;  %3289 = vmatpush.msra.mxu0 %v2994_v27  ;;  %v3066_v27 = vld [vmem:[%s4336_s1 + $0x550] sm:$0xff] }
 0xb60   : > { %3269 = vmatpush.msra.mxu2 %v2978_v17  ;;  %3309 = vmatpush.msrb.mxu3 %v3010_v31  ;;  %v3051_v17 = vld [vmem:[%s4336_s1 + $0x4d8] sm:$0xff]  ;;  %v3064_v31 = vld [vmem:[%s4336_s1 + $0x540] sm:$0xff] }
 0xb61   : > { %3250 = vmatpush.msra.mxu1 %v2961_v29  ;;  %3290 = vmatpush.msra.mxu0 %v2993_v32  ;;  %v3085_v29 = vld [vmem:[%s4336_s1 + $0x5e8] sm:$0xff] }
 0xb62   : > { %3270 = vmatpush.msra.mxu2 %v2977_v38  ;;  %3310 = vmatpush.msrb.mxu3 %v3009_v19  ;;  %v3083_v38 = vld [vmem:[%s4336_s1 + $0x5d8] sm:$0xff] }
 0xb63   : > { %3251 = vmatpush.msra.mxu1 %v2960_v10  ;;  %3291 = vmatpush.msra.mxu0 %v2992_v36  ;;  %v3065_v10 = vld [vmem:[%s4336_s1 + $0x548] sm:$0xff]  ;;  %v3084_v36 = vld [vmem:[%s4336_s1 + $0x5e0] sm:$0xff]  ;;  %v3031_v19 = vld [vmem:[%s4336_s1 + $0x438] sm:$0xff] }
 0xb64   : > { %3271 = vmatpush.msra.mxu2 %v2976_v39  ;;  %3311 = vmatpush.msrb.mxu3 %v3008_v40  ;;  %v3050_v39 = vld [vmem:[%s4336_s1 + $0x4d0] sm:$0xff]  ;;  %v3063_v40 = vld [vmem:[%s4336_s1 + $0x538] sm:$0xff] }
 0xb8a   : > { %v2577_v45 = vpop.f32.mrf.mxu1 }
 0xb8b   : > { %v2578_v12 = vadd.f32 %v2577_v45, %v2525_v42  ;;  %v2617_v48 = vpop.f32.mrf.mxu0  ;;  %v3030_v42 = vld [vmem:[%s4336_s1 + $0x430] sm:$0xff] }
 0xb8c   : > { %v2618_v46 = vadd.f32 %v2617_v48, %v2527_v44  ;;  %v3049_v44 = vld [vmem:[%s4336_s1 + $0x4c8] sm:$0xff]  ;;  %v3062_v45 = vld [vmem:[%s4336_s1 + $0x530] sm:$0xff] }
 0xb8d   : > { %v2880_v50 = vmax.f32 %v2578_v12, 0.0  ;;  %v3081_v12 = vld [vmem:[%s4336_s1 + $0x5c8] sm:$0xff] }
 0xb8e   : > { %v2882_v51 = vmax.f32 %v2618_v46, 0.0  ;;  %v3029_v48 = vld [vmem:[%s4336_s1 + $0x428] sm:$0xff]  ;;  %v3048_v46 = vld [vmem:[%s4336_s1 + $0x4c0] sm:$0xff] }
 0xb8f   : > { %3172 = vmatmul.f32.vlgmr.msrb.gmra.mxu1 %v2880_v50  ;;  %v3061_v50 = vld [vmem:[%s4336_s1 + $0x528] sm:$0xff] }
 0xb90   : > { %3212 = vmatmul.f32.vlgmr.msrb.gmra.mxu0 %v2882_v51  ;;  %3316 = vmatpush.msrb.mxu1 %v3039_v13  ;;  %v2597_v54 = vpop.f32.mrf.mxu2  ;;  %v4992_v13 = vld [vmem:[%s5235_s16 + $0x8] sm:$0xff]  ;;  %v3028_v51 = vld [vmem:[%s4336_s1 + $0x420] sm:$0xff] }
 0xb91   : > { %3356 = vmatpush.msrb.mxu0 %v3071_v52  ;;  %v2598_v57 = vadd.f32 %v2597_v54, %v2526_v49  ;;  %v2637_v58 = vpop.f32.mrf.mxu3  ;;  %v3080_v49 = vld [vmem:[%s4336_s1 + $0x5c0] sm:$0xff]  ;;  %v3047_v52 = vld [vmem:[%s4336_s1 + $0x4b8] sm:$0xff]  ;;  %v2533_v54 = vperm.slane %v4992_v13, 0 }
 0xb92   : > { %v2638_v60 = vadd.f32 %v2637_v58, %v2528_v53  ;;  %3317 = vmatpush.msrb.mxu1 %v3038_v34  ;;  %v2657_v61 = vpop.f32.mrf.mxu1  ;;  %v3060_v53 = vld [vmem:[%s4336_s1 + $0x520] sm:$0xff]  ;;  %v3079_v34 = vld [vmem:[%s4336_s1 + $0x5b8] sm:$0xff]  ;;  %v2535_v58 = vperm.slane %v4992_v13, 2 }
 0xb93   : > { %v2881_v0 = vmax.f32 %v2598_v57, 0.0  ;;  %3357 = vmatpush.msrb.mxu0 %v3070_v55  ;;  %v2658_v1 = vadd.f32 %v2657_v61, %v2529_v8  ;;  %v2697_v3 = vpop.f32.mrf.mxu0  ;;  %v3027_v8 = vld [vmem:[%s4336_s1 + $0x418] sm:$0xff]  ;;  %v3046_v55 = vld [vmem:[%s4336_s1 + $0x4b0] sm:$0xff] }
 0xb94   : > { %v2883_v5 = vmax.f32 %v2638_v60, 0.0  ;;  %v2698_v6 = vadd.f32 %v2697_v3, %v2531_v56  ;;  %3318 = vmatpush.msrb.mxu1 %v3037_v59  ;;  %v3059_v56 = vld [vmem:[%s4336_s1 + $0x518] sm:$0xff]  ;;  %v3078_v59 = vld [vmem:[%s4336_s1 + $0x5b0] sm:$0xff]  ;;  %v3025_v3 = vld [vmem:[%s4336_s1 + $0x408] sm:$0xff] }
 0xb95   : > { %v2884_v47 = vmax.f32 %v2658_v1, 0.0  ;;  %3358 = vmatpush.msrb.mxu0 %v3069_v63  ;;  %3192 = vmatmul.f32.vlgmr.msrb.gmra.mxu2 %v2881_v0  ;;  %v3026_v60 = vld [vmem:[%s4336_s1 + $0x410] sm:$0xff]  ;;  %v3045_v63 = vld [vmem:[%s4336_s1 + $0x4a8] sm:$0xff] }
 0xb96   : > { %v2886_v9 = vmax.f32 %v2698_v6, 0.0  ;;  %3232 = vmatmul.f32.vlgmr.msra.gmra.mxu3 %v2883_v5  ;;  %3319 = vmatpush.msrb.mxu1 %v3036_v22  ;;  %v3058_v0 = vld [vmem:[%s4336_s1 + $0x510] sm:$0xff]  ;;  %v3077_v1 = vld [vmem:[%s4336_s1 + $0x5a8] sm:$0xff]  ;;  %v3044_v5 = vld [vmem:[%s4336_s1 + $0x4a0] sm:$0xff] }
 0xb97   : > { %3336 = vmatpush.msrb.mxu2 %v3055_v14  ;;  %3359 = vmatpush.msrb.mxu0 %v3068_v7  ;;  %v3057_v6 = vld [vmem:[%s4336_s1 + $0x508] sm:$0xff]  ;;  %v3076_v7 = vld [vmem:[%s4336_s1 + $0x5a0] sm:$0xff] }
 0xb98   : > { %3376 = vmatpush.msra.mxu3 %v3087_v4  ;;  %3252 = vmatmul.f32.vlgmr.msra.gmra.mxu1 %v2884_v47  ;;  %v2677_v23 = vpop.f32.mrf.mxu2  ;;  %v3024_v47 = vld [vmem:[%s4336_s1 + $0x400] sm:$0xff]  ;;  %v3043_v4 = vld [vmem:[%s4336_s1 + $0x498] sm:$0xff] }
 0xb99   : > { %3292 = vmatmul.f32.vlgmr.msra.gmra.mxu0 %v2886_v9  ;;  %3320 = vmatpush.msrb.mxu1 %v3035_v11  ;;  %v2678_v43 = vadd.f32 %v2677_v23, %v2530_v15  ;;  %v2717_v25 = vpop.f32.mrf.mxu3  ;;  %v3056_v15 = vld [vmem:[%s4336_s1 + $0x500] sm:$0xff]  ;;  %v2534_v9 = vperm.slane %v4992_v13, 1  ;;  %v3075_v11 = vld [vmem:[%s4336_s1 + $0x598] sm:$0xff] }
 0xb9a   : > { %3337 = vmatpush.msrb.mxu2 %v3054_v21  ;;  %3360 = vmatpush.msrb.mxu0 %v3067_v16  ;;  %v2718_v28 = vadd.f32 %v2717_v25, %v2532_v18  ;;  %v2737_v57 = vpop.f32.mrf.mxu1  ;;  %v2536_v16 = vperm.slane %v4992_v13, 3  ;;  %v3042_v25 = vld [vmem:[%s4336_s1 + $0x490] sm:$0xff] }
 0xb9b   : > { %3377 = vmatpush.msra.mxu3 %v3086_v20  ;;  %v2885_v32 = vmax.f32 %v2678_v43, 0.0  ;;  %3321 = vmatpush.msrb.mxu1 %v3034_v24  ;;  %v2777_v61 = vpop.f32.mrf.mxu0  ;;  %v2738_v22 = vadd.f32 %v2737_v57, %v2533_v54  ;;  %v3103_v20 = vld [vmem:[%s4336_s1 + $0x678] sm:$0xff]  ;;  %v3128_v54 = vld [vmem:[%s4336_s1 + $0x740] sm:$0xff]  ;;  %v3114_v57 = vld [vmem:[%s4336_s1 + $0x6d0] sm:$0xff] }
 0xb9c   : > { %v2887_v35 = vmax.f32 %v2718_v28, 0.0  ;;  %3338 = vmatpush.msrb.mxu2 %v3053_v26  ;;  %3361 = vmatpush.msrb.mxu0 %v3066_v27  ;;  %v2778_v14 = vadd.f32 %v2777_v61, %v2535_v58  ;;  %v3135_v43 = vld [vmem:[%s4336_s1 + $0x778] sm:$0xff]  ;;  %v3074_v26 = vld [vmem:[%s4336_s1 + $0x590] sm:$0xff]  ;;  %v3113_v61 = vld [vmem:[%s4336_s1 + $0x6c8] sm:$0xff] }
 0xb9d   : > { %3378 = vmatpush.msra.mxu3 %v3085_v29  ;;  %3322 = vmatpush.msrb.mxu1 %v3033_v30  ;;  %v2888_v18 = vmax.f32 %v2738_v22, 0.0  ;;  %v3102_v27 = vld [vmem:[%s4336_s1 + $0x670] sm:$0xff]  ;;  %v3041_v30 = vld [vmem:[%s4336_s1 + $0x488] sm:$0xff]  ;;  %v3127_v58 = vld [vmem:[%s4336_s1 + $0x738] sm:$0xff] }
 0xb9e   : > { %3339 = vmatpush.msrb.mxu2 %v3052_v33  ;;  %3362 = vmatpush.msrb.mxu0 %v3065_v10  ;;  %v2890_v23 = vmax.f32 %v2778_v14, 0.0  ;;  %v3134_v29 = vld [vmem:[%s4336_s1 + $0x770] sm:$0xff]  ;;  %v3073_v33 = vld [vmem:[%s4336_s1 + $0x588] sm:$0xff]  ;;  %v3111_v14 = vld [vmem:[%s4336_s1 + $0x6b8] sm:$0xff] }
 0xb9f   : > { %3379 = vmatpush.msra.mxu3 %v3084_v36  ;;  %3272 = vmatmul.f32.vlgmr.msra.gmra.mxu2 %v2885_v32  ;;  %v3101_v10 = vld [vmem:[%s4336_s1 + $0x668] sm:$0xff]  ;;  %v3040_v36 = vld [vmem:[%s4336_s1 + $0x480] sm:$0xff] }
 0xba0   : > { %3312 = vmatmul.f32.vlgmr.msrb.gmra.mxu3 %v2887_v35  ;;  %3323 = vmatpush.msrb.mxu1 %v3032_v37  ;;  %v2757_v21 = vpop.f32.mrf.mxu2  ;;  %v3133_v35 = vld [vmem:[%s4336_s1 + $0x768] sm:$0xff]  ;;  %v3072_v37 = vld [vmem:[%s4336_s1 + $0x580] sm:$0xff] }
 0xba1   : > { %3340 = vmatpush.msrb.mxu2 %v3051_v17  ;;  %3363 = vmatpush.msrb.mxu0 %v3064_v31  ;;  %v2797_v24 = vpop.f32.mrf.mxu3  ;;  %v2758_v28 = vadd.f32 %v2757_v21, %v2534_v9  ;;  %v3100_v31 = vld [vmem:[%s4336_s1 + $0x660] sm:$0xff]  ;;  %v3125_v22 = vld [vmem:[%s4336_s1 + $0x728] sm:$0xff]  ;;  %v3110_v9 = vld [vmem:[%s4336_s1 + $0x6b0] sm:$0xff]  ;;  %v2539_v21 = vperm.slane %v4992_v13, 6 }
 0xba2   : > { %3380 = vmatpush.msra.mxu3 %v3083_v38  ;;  %3324 = vmatpush.msrb.mxu1 %v3031_v19  ;;  %v2798_v32 = vadd.f32 %v2797_v24, %v2536_v16  ;;  %v3119_v19 = vld [vmem:[%s4336_s1 + $0x6f8] sm:$0xff]  ;;  %v3142_v16 = vld [vmem:[%s4336_s1 + $0x7b0] sm:$0xff]  ;;  %v3109_v24 = vld [vmem:[%s4336_s1 + $0x6a8] sm:$0xff] }
 0xba3   : > { %3341 = vmatpush.msrb.mxu2 %v3050_v39  ;;  %3364 = vmatpush.msrb.mxu0 %v3063_v40  ;;  %v2889_v17 = vmax.f32 %v2758_v28, 0.0  ;;  %v3132_v39 = vld [vmem:[%s4336_s1 + $0x760] sm:$0xff]  ;;  %v3151_v40 = vld [vmem:[%s4336_s1 + $0x7f8] sm:$0xff] }
 0xba4   : > { %3381 = vmatpush.msra.mxu3 %v3082_v41  ;;  %3325 = vmatpush.msrb.mxu1 %v3030_v42  ;;  %v2891_v38 = vmax.f32 %v2798_v32, 0.0  ;;  %v3099_v41 = vld [vmem:[%s4336_s1 + $0x658] sm:$0xff]  ;;  %v3118_v42 = vld [vmem:[%s4336_s1 + $0x6f0] sm:$0xff]  ;;  %v3108_v28 = vld [vmem:[%s4336_s1 + $0x6a0] sm:$0xff] }
 0xba5   : > { %3342 = vmatpush.msrb.mxu2 %v3049_v44  ;;  %3365 = vmatpush.msrb.mxu0 %v3062_v45  ;;  %v3131_v44 = vld [vmem:[%s4336_s1 + $0x758] sm:$0xff]  ;;  %v3150_v45 = vld [vmem:[%s4336_s1 + $0x7f0] sm:$0xff]  ;;  %v3140_v32 = vld [vmem:[%s4336_s1 + $0x7a0] sm:$0xff] }
 0xba6   : > { %3382 = vmatpush.msra.mxu3 %v3081_v12  ;;  %3326 = vmatpush.msrb.mxu1 %v3029_v48  ;;  %v3098_v12 = vld [vmem:[%s4336_s1 + $0x650] sm:$0xff]  ;;  %v3117_v48 = vld [vmem:[%s4336_s1 + $0x6e8] sm:$0xff] }
 0xba7   : > { %3343 = vmatpush.msrb.mxu2 %v3048_v46  ;;  %3366 = vmatpush.msrb.mxu0 %v3061_v50  ;;  %v3130_v46 = vld [vmem:[%s4336_s1 + $0x750] sm:$0xff]  ;;  %v3149_v50 = vld [vmem:[%s4336_s1 + $0x7e8] sm:$0xff] }
 0xba8   : > { %3383 = vmatpush.msra.mxu3 %v3080_v49  ;;  %3327 = vmatpush.msrb.mxu1 %v3028_v51  ;;  %v3097_v49 = vld [vmem:[%s4336_s1 + $0x648] sm:$0xff]  ;;  %v3116_v51 = vld [vmem:[%s4336_s1 + $0x6e0] sm:$0xff] }
 0xba9   : > { %3344 = vmatpush.msrb.mxu2 %v3047_v52  ;;  %3367 = vmatpush.msrb.mxu0 %v3060_v53  ;;  %v3129_v52 = vld [vmem:[%s4336_s1 + $0x748] sm:$0xff]  ;;  %v3148_v53 = vld [vmem:[%s4336_s1 + $0x7e0] sm:$0xff] }
 0xbaa   : > { %3384 = vmatpush.msra.mxu3 %v3079_v34  ;;  %3328 = vmatpush.msrb.mxu1 %v3027_v8  ;;  %v3096_v34 = vld [vmem:[%s4336_s1 + $0x640] sm:$0xff]  ;;  %v3115_v8 = vld [vmem:[%s4336_s1 + $0x6d8] sm:$0xff] }
 0xbab   : > { %3345 = vmatpush.msrb.mxu2 %v3046_v55  ;;  %3368 = vmatpush.msrb.mxu0 %v3059_v56  ;;  %v3147_v55 = vld [vmem:[%s4336_s1 + $0x7d8] sm:$0xff] }
 0xbac   : > { %3385 = vmatpush.msra.mxu3 %v3078_v59  ;;  %3329 = vmatpush.msrb.mxu1 %v3026_v60  ;;  %v3095_v56 = vld [vmem:[%s4336_s1 + $0x638] sm:$0xff]  ;;  %v3146_v59 = vld [vmem:[%s4336_s1 + $0x7d0] sm:$0xff] }
 0xbad   : > { %3346 = vmatpush.msrb.mxu2 %v3045_v63  ;;  %3369 = vmatpush.msrb.mxu0 %v3058_v0  ;;  %v3094_v60 = vld [vmem:[%s4336_s1 + $0x630] sm:$0xff]  ;;  %v3145_v0 = vld [vmem:[%s4336_s1 + $0x7c8] sm:$0xff] }
 0xbae   : > { %3386 = vmatpush.msra.mxu3 %v3077_v1  ;;  %3330 = vmatpush.msrb.mxu1 %v3025_v3  ;;  %v3126_v63 = vld [vmem:[%s4336_s1 + $0x730] sm:$0xff]  ;;  %v3093_v1 = vld [vmem:[%s4336_s1 + $0x628] sm:$0xff]  ;;  %v3112_v3 = vld [vmem:[%s4336_s1 + $0x6c0] sm:$0xff] }
 0xbaf   : > { %3347 = vmatpush.msrb.mxu2 %v3044_v5  ;;  %3370 = vmatpush.msrb.mxu0 %v3057_v6  ;;  %v3144_v5 = vld [vmem:[%s4336_s1 + $0x7c0] sm:$0xff] }
 0xbb0   : > { %3387 = vmatpush.msra.mxu3 %v3076_v7  ;;  %3331 = vmatpush.msrb.mxu1 %v3024_v47  ;;  %v3092_v6 = vld [vmem:[%s4336_s1 + $0x620] sm:$0xff]  ;;  %v3143_v47 = vld [vmem:[%s4336_s1 + $0x7b8] sm:$0xff] }
 0xbb1   : > { %3348 = vmatpush.msrb.mxu2 %v3043_v4  ;;  %3371 = vmatpush.msrb.mxu0 %v3056_v15  ;;  %v3124_v7 = vld [vmem:[%s4336_s1 + $0x720] sm:$0xff]  ;;  %v3091_v4 = vld [vmem:[%s4336_s1 + $0x618] sm:$0xff]  ;;  %v2537_v15 = vperm.slane %v4992_v13, 4 }
 0xbb2   : > { %3388 = vmatpush.msra.mxu3 %v3075_v11  ;;  %3332 = vmatmul.f32.vlgmr.msrb.gmra.mxu1 %v2888_v18  ;;  %v3123_v11 = vld [vmem:[%s4336_s1 + $0x718] sm:$0xff]  ;;  %v2817_v18 = vpop.f32.mrf.mxu1 }
 0xbb3   : > { %3372 = vmatmul.f32.vlgmr.msrb.gmra.mxu0 %v2890_v23  ;;  %3396 = vmatpush.msra.mxu1 %v3103_v20  ;;  %v3090_v20 = vld [vmem:[%s4336_s1 + $0x610] sm:$0xff]  ;;  %v2857_v23 = vpop.f32.mrf.mxu0 }
 0xbb4   : > { %3436 = vmatpush.msra.mxu0 %v3135_v43  ;;  %3349 = vmatpush.msrb.mxu2 %v3042_v25  ;;  %v3122_v43 = vld [vmem:[%s4336_s1 + $0x710] sm:$0xff]  ;;  %v3141_v25 = vld [vmem:[%s4336_s1 + $0x7a8] sm:$0xff] }
 0xbb5   : > { %3389 = vmatpush.msra.mxu3 %v3074_v26  ;;  %3397 = vmatpush.msra.mxu1 %v3102_v27  ;;  %v3089_v26 = vld [vmem:[%s4336_s1 + $0x608] sm:$0xff]  ;;  %v2818_v27 = vadd.f32 %v2817_v18, %v2537_v15 }
 0xbb6   : > { %3437 = vmatpush.msra.mxu0 %v3134_v29  ;;  %3350 = vmatpush.msrb.mxu2 %v3041_v30  ;;  %v3121_v29 = vld [vmem:[%s4336_s1 + $0x708] sm:$0xff]  ;;  %v2858_v30 = vadd.f32 %v2857_v23, %v2539_v21 }
 0xbb7   : > { %3390 = vmatpush.msra.mxu3 %v3073_v33  ;;  %3398 = vmatpush.msra.mxu1 %v3101_v10  ;;  %v3088_v33 = vld [vmem:[%s4336_s1 + $0x600] sm:$0xff]  ;;  %v2538_v10 = vperm.slane %v4992_v13, 5 }
 0xbb8   : > { %3438 = vmatpush.msra.mxu0 %v3133_v35  ;;  %3351 = vmatpush.msrb.mxu2 %v3040_v36  ;;  %v3107_v35 = vld [vmem:[%s4336_s1 + $0x698] sm:$0xff]  ;;  %v3120_v36 = vld [vmem:[%s4336_s1 + $0x700] sm:$0xff] }
 0xbb9   : > { %3391 = vmatpush.msra.mxu3 %v3072_v37  ;;  %3352 = vmatmul.f32.vlgmr.msrb.gmra.mxu2 %v2889_v17  ;;  %v2837_v37 = vpop.f32.mrf.mxu2  ;;  %v2540_v17 = vperm.slane %v4992_v13, 7  ;;  %v3105_v13 = vld [vmem:[%s4336_s1 + $0x688] sm:$0xff] }
 0xbba   : > { %3392 = vmatmul.f32.vlgmr.msra.gmra.mxu3 %v2891_v38  ;;  %3399 = vmatpush.msra.mxu1 %v3100_v31  ;;  %v3139_v31 = vld [vmem:[%s4336_s1 + $0x798] sm:$0xff]  ;;  %v2892_v38 = vmax.f32 %v2818_v27, 0.0 }
 0xbbb   : > { %3416 = vmatpush.msra.mxu2 %v3119_v19  ;;  %3439 = vmatpush.msra.mxu0 %v3132_v39  ;;  %v2877_v19 = vpop.f32.mrf.mxu3  ;;  %v3106_v39 = vld [vmem:[%s4336_s1 + $0x690] sm:$0xff] }
 0xbbc   : > { %3456 = vmatpush.msrb.mxu3 %v3151_v40  ;;  %3400 = vmatpush.msra.mxu1 %v3099_v41  ;;  %v2894_v40 = vmax.f32 %v2858_v30, 0.0  ;;  %v3138_v41 = vld [vmem:[%s4336_s1 + $0x790] sm:$0xff] }
 0xbbd   : > { %3417 = vmatpush.msra.mxu2 %v3118_v42  ;;  %3440 = vmatpush.msra.mxu0 %v3131_v44  ;;  %v2838_v42 = vadd.f32 %v2837_v37, %v2538_v10  ;;  %v2878_v44 = vadd.f32 %v2877_v19, %v2540_v17 }
 0xbbe   : > { %3457 = vmatpush.msrb.mxu3 %v3150_v45  ;;  %3401 = vmatpush.msra.mxu1 %v3098_v12  ;;  %v3137_v45 = vld [vmem:[%s4336_s1 + $0x788] sm:$0xff]  ;;  %v3104_v12 = vld [vmem:[%s4336_s1 + $0x680] sm:$0xff] }
 0xbbf   : > { %3418 = vmatpush.msra.mxu2 %v3117_v48  ;;  %3441 = vmatpush.msra.mxu0 %v3130_v46  ;;  %v3136_v48 = vld [vmem:[%s4336_s1 + $0x780] sm:$0xff]  ;;  %v2893_v46 = vmax.f32 %v2838_v42, 0.0 }
 0xbc0   : > { %3458 = vmatpush.msrb.mxu3 %v3149_v50  ;;  %3402 = vmatpush.msra.mxu1 %v3097_v49  ;;  %v2895_v50 = vmax.f32 %v2878_v44, 0.0  ;;  %v3968_v49 = vld [vmem:[%s1076_s17] ss:$0 sm:$0xff] }
 0xbc1   : > { %3419 = vmatpush.msra.mxu2 %v3116_v51  ;;  %3442 = vmatpush.msra.mxu0 %v3129_v52 }
 0xbc2   : > { %3459 = vmatpush.msrb.mxu3 %v3148_v53  ;;  %3403 = vmatpush.msra.mxu1 %v3096_v34 }
 0xbc3   : > { %3420 = vmatpush.msra.mxu2 %v3115_v8  ;;  %3443 = vmatpush.msra.mxu0 %v3128_v54 }
 0xbc4   : > { %3460 = vmatpush.msrb.mxu3 %v3147_v55  ;;  %3404 = vmatpush.msra.mxu1 %v3095_v56 }
 0xbc5   : > { %3421 = vmatpush.msra.mxu2 %v3114_v57  ;;  %3444 = vmatpush.msra.mxu0 %v3127_v58 }
 0xbc6   : > { %3461 = vmatpush.msrb.mxu3 %v3146_v59  ;;  %3405 = vmatpush.msra.mxu1 %v3094_v60 }
 0xbc7   : > { %3422 = vmatpush.msra.mxu2 %v3113_v61  ;;  %3445 = vmatpush.msra.mxu0 %v3126_v63 }
 0xbc8   : > { %3462 = vmatpush.msrb.mxu3 %v3145_v0  ;;  %3406 = vmatpush.msra.mxu1 %v3093_v1 }
 0xbc9   : > { %3423 = vmatpush.msra.mxu2 %v3112_v3  ;;  %3446 = vmatpush.msra.mxu0 %v3125_v22 }
 0xbca   : > { %3463 = vmatpush.msrb.mxu3 %v3144_v5  ;;  %3407 = vmatpush.msra.mxu1 %v3092_v6 }
 0xbcb   : > { %3424 = vmatpush.msra.mxu2 %v3111_v14  ;;  %3447 = vmatpush.msra.mxu0 %v3124_v7 }
 0xbcc   : > { %3464 = vmatpush.msrb.mxu3 %v3143_v47  ;;  %3408 = vmatpush.msra.mxu1 %v3091_v4 }
 0xbcd   : > { %3425 = vmatpush.msra.mxu2 %v3110_v9  ;;  %3448 = vmatpush.msra.mxu0 %v3123_v11 }
 0xbce   : > { %3465 = vmatpush.msrb.mxu3 %v3142_v16  ;;  %3409 = vmatpush.msra.mxu1 %v3090_v20 }
 0xbcf   : > { %3426 = vmatpush.msra.mxu2 %v3109_v24  ;;  %3449 = vmatpush.msra.mxu0 %v3122_v43 }
 0xbd0   : > { %3466 = vmatpush.msrb.mxu3 %v3141_v25  ;;  %3410 = vmatpush.msra.mxu1 %v3089_v26 }
 0xbd1   : > { %3427 = vmatpush.msra.mxu2 %v3108_v28  ;;  %3450 = vmatpush.msra.mxu0 %v3121_v29 }
 0xbd2   : > { %3467 = vmatpush.msrb.mxu3 %v3140_v32  ;;  %3411 = vmatpush.msra.mxu1 %v3088_v33 }
 0xbd3   : > { %3428 = vmatpush.msra.mxu2 %v3107_v35  ;;  %3451 = vmatpush.msra.mxu0 %v3120_v36 }
 0xbd4   : > { %3468 = vmatpush.msrb.mxu3 %v3139_v31  ;;  %3412 = vmatmul.f32.vlgmr.msra.gmra.mxu1 %v2892_v38  ;;  %v3969_v31 = vld [vmem:[%s1079_s27] ss:$0 sm:$0xff] }
 0xbd5   : > { %3452 = vmatmul.f32.vlgmr.msra.gmra.mxu0 %v2894_v40  ;;  %3429 = vmatpush.msra.mxu2 %v3106_v39 }
 0xbd6   : > { %3469 = vmatpush.msrb.mxu3 %v3138_v41 }
 0xbd7   : > { %3430 = vmatpush.msra.mxu2 %v3105_v13 }
 0xbd8   : > { %3470 = vmatpush.msrb.mxu3 %v3137_v45 }
 0xbd9   : > { %3431 = vmatpush.msra.mxu2 %v3104_v12 }
 0xbda   : > { %3471 = vmatpush.msrb.mxu3 %v3136_v48  ;;  %3432 = vmatmul.f32.vlgmr.msra.gmra.mxu2 %v2893_v46 }
 0xbdb   : > { %3472 = vmatmul.f32.vlgmr.msrb.gmra.mxu3 %v2895_v50 }
 0xc0c   : > { %v3173_v51 = vpop.f32.mrf.mxu1 }
 0xc0d   : > { %v3174_v53 = vadd.f32 %v3968_v49, %v3173_v51  ;;  %v3213_v8 = vpop.f32.mrf.mxu0 }
 0xc15   : > { %v3253_v57 = vpop.f32.mrf.mxu1 }
 0xc16   : > { %v3293_v61 = vpop.f32.mrf.mxu0 }
 0xc18   : > { %v3193_v52 = vpop.f32.mrf.mxu2 }
 0xc19   : > { %v3194_v34 = vadd.f32 %v3193_v52, %v3174_v53  ;;  %v3233_v55 = vpop.f32.mrf.mxu3 }
 0xc1b   : > { %v3214_v54 = vadd.f32 %v3213_v8, %v3194_v34 }
 0xc1d   : > { %v3234_v56 = vadd.f32 %v3233_v55, %v3214_v54 }
 0xc1f   : > { %v3254_v58 = vadd.f32 %v3253_v57, %v3234_v56 }
 0xc22   : > { %v3273_v59 = vpop.f32.mrf.mxu2 }
 0xc23   : > { %v3274_v60 = vadd.f32 %v3273_v59, %v3254_v58  ;;  %v3313_v0 = vpop.f32.mrf.mxu3 }
 0xc25   : > { %v3294_v63 = vadd.f32 %v3293_v61, %v3274_v60 }
 0xc27   : > { %v3314_v3 = vadd.f32 %v3313_v0, %v3294_v63 }
 0xc2f   : > { %v3333_v1 = vpop.f32.mrf.mxu1 }
 0xc30   : > { %v3334_v5 = vadd.f32 %v3333_v1, %v3314_v3  ;;  %v3373_v14 = vpop.f32.mrf.mxu0 }
 0xc3c   : > { %v3353_v22 = vpop.f32.mrf.mxu2 }
 0xc3d   : > { %v3354_v6 = vadd.f32 %v3353_v22, %v3334_v5  ;;  %v3393_v47 = vpop.f32.mrf.mxu3 }
 0xc3f   : > { %v3374_v7 = vadd.f32 %v3373_v14, %v3354_v6 }
 0xc41   : > { %v3394_v15 = vadd.f32 %v3393_v47, %v3374_v7 }
 0xc51   : > { %v3413_v4 = vpop.f32.mrf.mxu1 }
 0xc52   : > { %v3414_v9 = vadd.f32 %v3413_v4, %v3394_v15  ;;  %v3453_v21 = vpop.f32.mrf.mxu0 }
 0xc5d   : > { %v3433_v11 = vpop.f32.mrf.mxu2 }
 0xc5e   : > { %v3434_v18 = vadd.f32 %v3433_v11, %v3414_v9  ;;  %v3473_v20 = vpop.f32.mrf.mxu3 }
 0xc60   : > { %v3454_v16 = vadd.f32 %v3453_v21, %v3434_v18 }
 0xc62   : > { %v3474_v23 = vadd.f32 %v3473_v20, %v3454_v16 }
 0xc64   : > { %v3476_v24 = vadd.f32 %v3474_v23, %v4749_v2 }
 0xc66   : > { %v3479_v43 = vsel %vm1746_vm5, %v3476_v24, 0.0 }
 0xc67   : > { %3480 = vadd.xlane.f32.xlu2 %v3479_v43 }
 0xcda   : > { %v3481_v25 = vpop.xlane.xlu2 %3480 }
 0xcdb   : > { %v3482_v26 = vmul.f32 %v3481_v25, %v4528_v62 }
 0xcdd   : > { %v3483_v27 = vsub.f32 %v3476_v24, %v3482_v26 }
 0xcdf   : > { %v3484_v28 = vmul.f32 %v3483_v27, %v3483_v27 }
 0xce1   : > { %v3485_v29 = vsel %vm1746_vm5, %v3484_v28, 0.0 }
 0xce2   : > { %3486 = vadd.xlane.f32.xlu1 %v3485_v29 }
 0xd55   : > { %v3487_v30 = vpop.xlane.xlu1 %3486 }
 0xd56   : > { %v3488_v32 = vmul.f32 %v3487_v30, %v4528_v62  ;;  %v3970_v62 = vld [vmem:[%s1082_s6] ss:$0 sm:$0xff] }
 0xd58   : > { %v3489_v33 = vadd.f32 1e-05, %v3488_v32 }
 0xd5a   : > { %4041 = vrsqrt.f32 %v3489_v33  ;;  %vm3496_vm0 = vweird.f32 %v3489_v33 }
 0xd60   : > { %v4042_v2 = vpop.eup %4041 }
 0xd61   : > { %v3491_v10 = vmul.f32 %v4042_v2, %v3489_v33  ;;  %vm3497_vm15 = vweird.f32 %v4042_v2 }
 0xd62   : > { %vm3498_vm1 = vmor %vm3496_vm0, %vm3497_vm15 }
 0xd63   : > { %v3492_v35 = vmul.f32 %v4042_v2, %v3491_v10 }
 0xd65   : > { %v3493_v36 = vmul.f32 0.5, %v3492_v35 }
 0xd67   : > { %v3494_v37 = vsub.f32 1.5, %v3493_v36 }
 0xd69   : > { %v3495_v17 = vmul.f32 %v4042_v2, %v3494_v37 }
 0xd6b   : > { %v3499_v38 = vsel %vm3498_vm1, %v4042_v2, %v3495_v17 }
 0xd6c   : > { %v3500_v19 = vmul.f32 %v3499_v38, %v3483_v27 }
 0xd6e   : > { %v3504_v39 = vmul.f32 %v3969_v31, %v3500_v19 }
 0xd70   : > { %v3508_v40 = vadd.f32 %v3970_v62, %v3504_v39 }
 0xd72   : > { %3509 = vst.msk [vmem:[%s4354_s5] sm:$0x3f] %vm1746_vm5, %v3508_v40 }
 0xd73 PF: > { %s5239_s20 = sld [smem:[#allocation5_spill]] }
 0xd74   : > { %s5240_s5 = sld [smem:[#allocation3_spill]] }
 0xd75   : > { %s5241_s26 = sld [smem:[#allocation4_spill]] }
 0xd76   : > { %s5242_s27 = sld [smem:[#allocation6_spill]] }
 0xd77   : > { %s5243_s28 = sld [smem:[#allocation7_spill]] }
 0xd79   : > { %s34_s6 = sadd.s32 1, %s5239_s20  }
 0xd7a   : > { %p31_p8 = scmp.ge.s32.totalorder %s34_s6, 14  }
 0xd7c   :  { %33 = sbr.rel (!%p31_p8) target bundleno = 24 (0x18), region = 213 }

// kernel: seq2seq_forward.5
= control target key start
LH: loop header
LB: loop body
LE: loop exit
PB: predicated region body
PF: predicated region fallthrough
CT: control target
= control target key end

     0   :  { %vm24_vm0 = vcmask 261120   ;;  %vm28_vm1 = vcmask 257024   ;;  %v146_v4 = vmov 32.0   ;;  %s216_s0 = inlined_call_operand.vmem [shape: f32[12,32], index: 0, kind: input, shape index: {}]   ;;  %s217_s1 = inlined_call_operand.vmem [shape: f32[1,32], index: 1, kind: input, shape index: {}]   ;;  %s218_s2 = inlined_call_operand.vmem [shape: f32[1,32], index: 2, kind: input, shape index: {}]   ;;  %s219_s4 = inlined_call_operand.vmem [shape: f32[1,128], index: 4, kind: input, shape index: {}]   ;;  %s220_s3 = inlined_call_operand.vmem [shape: f32[32,128], index: 3, kind: input, shape index: {}]   ;;  %s221_s5 = inlined_call_operand.vmem [shape: f32[12,128], index: 5, kind: output, shape index: {}]  }
   0x1   :  { %v20_v0 = vld [vmem:[%s216_s0] sm:$0xff]  ;;  %v21_v2 = vld [vmem:[%s216_s0 + $0x8] sm:$0xf]  ;;  %140 = vrcp.f32 %v146_v4  ;;  %v90_v21 = vld [vmem:[%s220_s3 + $0x18] sm:$0xff] }
   0x2   :  { %v25_v1 = vsel %vm24_vm0, %v20_v0, 0.0  ;;  %v29_v3 = vsel %vm28_vm1, %v21_v2, 0.0  ;;  %113 = vmatpush.msra.mxu0 %v90_v21  ;;  %132 = vmatpush.msra.mxu1 %v90_v21  ;;  %v89_v22 = vld [vmem:[%s220_s3 + $0x10] sm:$0xff]  ;;  %v88_v23 = vld [vmem:[%s220_s3 + $0x8] sm:$0xff]  ;;  %v87_v24 = vld [vmem:[%s220_s3] sm:$0xff] }
   0x3   :  { %26 = vadd.xlane.f32.xlu0 %v25_v1  ;;  %v137_v39 = vld [vmem:[%s217_s1] ss:$0 sm:$0xff] }
   0x4   :  { %114 = vmatpush.msra.mxu0 %v89_v22  ;;  %133 = vmatpush.msra.mxu1 %v89_v22  ;;  %v138_v43 = vld [vmem:[%s218_s2] ss:$0 sm:$0xff] }
   0x5   :  { %v139_v53 = vld [vmem:[%s219_s4] ss:$0 sm:$0xff] }
   0x6   :  { %115 = vmatpush.msra.mxu0 %v88_v23  ;;  %134 = vmatpush.msra.mxu1 %v88_v23 }
   0x7   :  { %v141_v5 = vpop.eup %140 }
   0x8   :  { %v33_v6 = vmul.f32 32.0, %v141_v5  ;;  %vm37_vm2 = vweird.f32 %v141_v5  ;;  %116 = vmatpush.msra.mxu0 %v87_v24  ;;  %135 = vmatpush.msra.mxu1 %v87_v24 }
   0xa   :  { %v34_v7 = vsub.f32 1.0, %v33_v6 }
   0xb   :  { %30 = vadd.xlane.f32.xlu0 %v29_v3 }
   0xc   :  { %v35_v8 = vmul.f32 %v141_v5, %v34_v7 }
   0xe   :  { %v36_v9 = vadd.f32 %v141_v5, %v35_v8 }
  0x10   :  { %v38_v10 = vsel %vm37_vm2, %v141_v5, %v36_v9 }
  0x76   :  { %v27_v11 = vpop.xlane.xlu0 %26 }
  0x77   :  { %v39_v12 = vmul.f32 %v38_v10, %v27_v11 }
  0x79   :  { %v41_v13 = vsub.f32 %v20_v0, %v39_v12 }
  0x7b   :  { %v43_v14 = vmul.f32 %v41_v13, %v41_v13 }
  0x7d   :  { %v45_v15 = vsel %vm24_vm0, %v43_v14, 0.0 }
  0x7e   :  { %46 = vadd.xlane.f32.xlu1 %v45_v15  ;;  %v31_v16 = vpop.xlane.xlu0 %30 }
  0x7f   :  { %v40_v17 = vmul.f32 %v38_v10, %v31_v16 }
  0x81   :  { %v42_v18 = vsub.f32 %v21_v2, %v40_v17 }
  0x83   :  { %v44_v19 = vmul.f32 %v42_v18, %v42_v18 }
  0x85   :  { %v48_v20 = vsel %vm28_vm1, %v44_v19, 0.0 }
  0x86   :  { %49 = vadd.xlane.f32.xlu1 %v48_v20 }
  0xf1   :  { %v47_v25 = vpop.xlane.xlu1 %46 }
  0xf2   :  { %v51_v26 = vmul.f32 %v47_v25, %v38_v10 }
  0xf4   :  { %v53_v27 = vadd.f32 1e-05, %v51_v26 }
  0xf6   :  { %142 = vrsqrt.f32 %v53_v27  ;;  %vm61_vm4 = vweird.f32 %v53_v27 }
  0xf9   :  { %v50_v28 = vpop.xlane.xlu1 %49 }
  0xfa   :  { %v52_v29 = vmul.f32 %v50_v28, %v38_v10 }
  0xfc   :  { %v143_v30 = vpop.eup %142  ;;  %v54_v31 = vadd.f32 1e-05, %v52_v29 }
  0xfd   :  { %v56_v32 = vmul.f32 %v143_v30, %v53_v27  ;;  %vm62_vm3 = vweird.f32 %v143_v30 }
  0xfe   :  { %144 = vrsqrt.f32 %v54_v31  ;;  %vm63_vm5 = vmor %vm61_vm4, %vm62_vm3  ;;  %vm71_vm7 = vweird.f32 %v54_v31 }
  0xff   :  { %v57_v33 = vmul.f32 %v143_v30, %v56_v32 }
 0x101   :  { %v58_v34 = vmul.f32 0.5, %v57_v33 }
 0x103   :  { %v59_v35 = vsub.f32 1.5, %v58_v34 }
 0x104   :  { %v145_v36 = vpop.eup %144 }
 0x105   :  { %v60_v37 = vmul.f32 %v143_v30, %v59_v35  ;;  %v66_v38 = vmul.f32 %v145_v36, %v54_v31  ;;  %vm72_vm6 = vweird.f32 %v145_v36 }
 0x106   :  { %vm73_vm8 = vmor %vm71_vm7, %vm72_vm6 }
 0x107   :  { %v64_v40 = vsel %vm63_vm5, %v143_v30, %v60_v37  ;;  %v67_v41 = vmul.f32 %v145_v36, %v66_v38 }
 0x108   :  { %v75_v42 = vmul.f32 %v64_v40, %v41_v13 }
 0x109   :  { %v68_v44 = vmul.f32 0.5, %v67_v41 }
 0x10a   :  { %v80_v45 = vmul.f32 %v137_v39, %v75_v42 }
 0x10b   :  { %v69_v46 = vsub.f32 1.5, %v68_v44 }
 0x10c   :  { %v85_v47 = vadd.f32 %v138_v43, %v80_v45 }
 0x10d   :  { %v70_v48 = vmul.f32 %v145_v36, %v69_v46 }
 0x10e   :  { %130 = vmatmul.msk.f32.vlgmr.msra.gmra.mxu0 %vm24_vm0, %v85_v47 }
 0x10f   :  { %v74_v49 = vsel %vm73_vm8, %v145_v36, %v70_v48 }
 0x110   :  { %v76_v50 = vmul.f32 %v74_v49, %v42_v18 }
 0x112   :  { %v81_v51 = vmul.f32 %v137_v39, %v76_v50 }
 0x114   :  { %v86_v52 = vadd.f32 %v138_v43, %v81_v51 }
 0x116   :  { %131 = vmatmul.msk.f32.vlgmr.msra.gmra.mxu1 %vm24_vm0, %v86_v52 }
 0x18b   :  { %v118_v54 = vpop.f32.mrf.mxu0 }
 0x18c   :  { %v119_v55 = vadd.f32 %v139_v53, %v118_v54 }
 0x18e   :  { %124 = vst [vmem:[%s221_s5] sm:$0xff] %v119_v55 }
 0x193   :  { %v121_v56 = vpop.f32.mrf.mxu1 }
 0x194   :  { %v122_v57 = vadd.f32 %v139_v53, %v121_v56 }
 0x196   :  { %125 = vst [vmem:[%s221_s5 + $0x8] sm:$0xf] %v122_v57 }

</bundles_post_ra>
